<compile_context>
chip_gen: v5e
topology: v5e:2x2
jax: 0.10.0
libtpu: 0.0.40
codegen_flags: <defaults>
</compile_context>

<pallas_src>
import jax
import jax.numpy as jnp
from jax.experimental import pallas as pl
from jax.experimental.pallas import tpu as pltpu

# ----------------------------- configuration (small) -----------------------------
NODE_N_IN = 28    # raw node feature dim (module default)
EDGE_N_IN = 15    # raw edge feature dim (module default)
ATOM_IN   = 7     # atom_emb_in (module default)
A_ATOMS   = 5     # atoms per node
H         = 32    # node_n_hidden = edge_n_hidden = atom_emb_h (small)
N_LAYERS  = 4     # message passing layers: [noLSTM, LSTM, LSTM, noLSTM(last)]
N_OUTPUT  = 37    # distCB bins (module default)
N_OUT_PAD = 128   # lane-dense padded output width

N_NODES   = 16
K_DEG     = 4     # fixed in-degree
N_EDGES   = N_NODES * K_DEG
BATCH     = 8     # graphs per call (shared topology)

EPS = 1e-5        # nn.InstanceNorm1d default eps


# ----------------------------- in-kernel math helpers -----------------------------
def _instnorm(x):
    """InstanceNorm1d semantics: per-row normalisation over the last axis (biased var)."""
    mu = jnp.mean(x, axis=-1, keepdims=True)
    var = jnp.mean(jnp.square(x - mu), axis=-1, keepdims=True)
    return (x - mu) * jax.lax.rsqrt(var + EPS)


def _leaky(x):
    return jnp.where(x > 0, x, 0.01 * x)   # nn.LeakyReLU(0.01)


def _lstm_cell(x, h, c, w_ih, w_hh):
    """torch.nn.LSTMCell(bias=False); gate order i,f,g,o. Split dots (no lane concat)."""
    hd = h.shape[-1]
    g = (jnp.dot(x, w_ih, preferred_element_type=jnp.float32)
         + jnp.dot(h, w_hh, preferred_element_type=jnp.float32))
    i = jax.nn.sigmoid(g[:, 0 * hd:1 * hd])
    f = jax.nn.sigmoid(g[:, 1 * hd:2 * hd])
    gg = jnp.tanh(g[:, 2 * hd:3 * hd])
    o = jax.nn.sigmoid(g[:, 3 * hd:4 * hd])
    c2 = f * c + i * gg
    return o * jnp.tanh(c2), c2


def _norm_linear(slabs, weights, b):
    """Linear(InstanceNorm(cat(slabs))) without materializing the concat:
    the norm statistics are accumulated over the slabs and the weight is split."""
    tot = sum(s.shape[-1] for s in slabs)
    mu = sum(jnp.sum(s, axis=-1, keepdims=True) for s in slabs) / tot
    var = sum(jnp.sum(jnp.square(s - mu), axis=-1, keepdims=True) for s in slabs) / tot
    inv = jax.lax.rsqrt(var + EPS)
    y = b
    for s, w in zip(slabs, weights):
        y = y + jnp.dot((s - mu) * inv, w, preferred_element_type=jnp.float32)
    return y


# ----------------------------- parameter packing -----------------------------
def _pad8(r):
    return (r + 7) & ~7


class _Slab:
    """Row-packs 2-D params of one fixed lane width into a single slab.
    Offsets are 8-aligned so in-kernel static ref slices land on sublane boundaries."""

    def __init__(self, width):
        self.width = width
        self.parts = []
        self.layout = {}   # name -> (row_offset, rows)
        self.rows = 0

    def add(self, name, arr):
        arr = jnp.asarray(arr, jnp.float32)
        r, c = arr.shape
        assert c == self.width, (name, arr.shape, self.width)
        self.layout[name] = (self.rows, r)
        pr = _pad8(r)
        if pr != r:
            arr = jnp.pad(arr, ((0, pr - r), (0, 0)))
        self.parts.append(arr)
        self.rows += pr

    def pack(self):
        return jnp.concatenate(self.parts, axis=0)


def pack_params(params):
    """Pack all weights into two contiguous slabs (one per lane width) -> 2 input DMAs."""
    lstm_flags = tuple(lp["lstm"] for lp in params["mp"])
    n_layers = len(lstm_flags)
    ws = _Slab(H)        # lane-width-H slab: feature-space weights / biases / attn rows
    ls = _Slab(4 * H)    # lane-width-4H slab: LSTM gate stacks + padded output head

    ws.add("atom_w1", params["atom_w1"])
    ws.add("atom_w2", params["atom_w2"])

    def add_split(name, arr, widths):
        off = 0
        for p, wd in enumerate(widths):
            ws.add(f"{name}{p}", arr[off:off + wd])
            off += wd

    for li, lp in enumerate(params["mp"]):
        last = li == n_layers - 1
        node_widths = (NODE_N_IN, H) if li == 0 else (H,)
        add_split(f"l{li}_e_w_src", lp["e_w_src"], node_widths)
        ws.add(f"l{li}_e_w_e", lp["e_w_e"])
        add_split(f"l{li}_e_w_dst", lp["e_w_dst"], node_widths)
        ws.add(f"l{li}_e_b", lp["e_b"])
        if not last:
            # last layer's attn / node update is dead work for the distCB head (QA=False).
            ws.add(f"l{li}_e_wat", lp["e_wat"].T)            # stored as a (1, H) row
            add_split(f"l{li}_n_wn", lp["n_wn"], node_widths)
            ws.add(f"l{li}_n_wa", lp["n_wa"])
            ws.add(f"l{li}_n_b", lp["n_b"])
        if lp["lstm"]:
            ws_e, ws_n = lp["e_wl"], lp["n_wl"]              # (2H, 4H) = [w_ih^T ; w_hh^T]
            ls.add(f"l{li}_e_wl_ih", ws_e[:H])
            ls.add(f"l{li}_e_wl_hh", ws_e[H:])
            ls.add(f"l{li}_n_wl_ih", ws_n[:H])
            ls.add(f"l{li}_n_wl_hh", ws_n[H:])

    # lane-dense output head: pad 37 -> 128 (sliced back in the wrapper)
    ls.add("out_w", jnp.pad(params["out_w"], ((0, 0), (0, N_OUT_PAD - N_OUTPUT))))
    ls.add("out_b", jnp.pad(params["out_b"], ((0, 0), (0, N_OUT_PAD - N_OUTPUT))))

    return {
        "w_slab": ws.pack(), "l_slab": ls.pack(),
        "w_layout": ws.layout, "l_layout": ls.layout,
        "lstm_flags": lstm_flags,
    }


def make_graph_constants(src_idx):
    """Per-topology constants (built once, reused across calls / batch)."""
    n, k = src_idx.shape
    e = n * k
    nodes = jnp.arange(n, dtype=jnp.int32)
    src_flat = src_idx.reshape(-1).astype(jnp.int32)
    dst_flat = jnp.arange(e, dtype=jnp.int32) // k
    oh_src = (src_flat[:, None] == nodes[None, :]).astype(jnp.float32)   # (E, N)
    oh_dst = (dst_flat[:, None] == nodes[None, :]).astype(jnp.float32)   # (E, N)
    oh = jnp.concatenate([oh_src, oh_dst], axis=0)                       # (2E, N)
    mask_dst = jnp.transpose(oh_dst)                                     # (N, E)
    return oh, mask_dst


# ----------------------------- fused GNN kernel -----------------------------
def build_gnn_kernel(w_layout, l_layout, lstm_flags, n_edges):
    n_layers = len(lstm_flags)

    def kernel(w_ref, l_ref, oh_ref, mask_ref, nf_ref, atom_ref, ef_ref, o_ref):
        def W(name):
            off, r = w_layout[name]
            return w_ref[off:off + r, :]

        def L(name):
            off, r = l_layout[name]
            return l_ref[off:off + r, :]

        oh_src = oh_ref[0:n_edges, :]            # (E, N)
        oh_dst = oh_ref[n_edges:2 * n_edges, :]  # (E, N)
        mask_d = mask_ref[...]                   # (N, E) per-node mailbox mask

        nf_raw = nf_ref[0]                       # (N, NODE_N_IN)
        ef = ef_ref[0]                           # (E, EDGE_N_IN)

        # ---- AtomEmbLayer: norm -> Linear(7,H,no bias) -> mean(atoms) -> ReLU
        #      -> norm -> Linear(H,H,no bias) -> ReLU.
        # mean BEFORE the bias-free Linear == mean after it (linearity); atoms are on a
        # leading axis, so the reduce is plain cross-vreg adds (no middle-axis slices).
        a3 = _instnorm(atom_ref[0])                         # (A, N, ATOM_IN)
        am = jnp.sum(a3, axis=0) * (1.0 / a3.shape[0])      # (N, ATOM_IN)
        h = jnp.maximum(jnp.dot(am, W("atom_w1"), preferred_element_type=jnp.float32), 0.0)
        h = _instnorm(h)
        h = jnp.maximum(jnp.dot(h, W("atom_w2"), preferred_element_type=jnp.float32), 0.0)

        # node feature carried as separate slabs -> no lane concat anywhere
        nf_slabs = [nf_raw, h]
        ef_c = None
        nf_c = None
        for li, lstm in enumerate(lstm_flags):
            last = li == n_layers - 1
            nparts = len(nf_slabs)
            w_src = [W(f"l{li}_e_w_src{p}") for p in range(nparts)]
            w_dst = [W(f"l{li}_e_w_dst{p}") for p in range(nparts)]

            # per-edge endpoint features via one-hot MXU matmuls (exact gather, VMEM only)
            src_sl = [jnp.dot(oh_src, s, preferred_element_type=jnp.float32) for s in nf_slabs]
            dst_sl = [jnp.dot(oh_dst, s, preferred_element_type=jnp.float32) for s in nf_slabs]

            # EdgeApplyModule: LeakyReLU(Linear(InstanceNorm(cat([src, efeat, dst]))))
            y = _leaky(_norm_linear(src_sl + [ef] + dst_sl,
                                    w_src + [W(f"l{li}_e_w_e")] + w_dst,
                                    W(f"l{li}_e_b")))
            if lstm:
                if ef_c is None:
                    ef_c = jnp.zeros_like(ef)               # zeros_like(efeat) at first LSTM
                new_ef, ef_c = _lstm_cell(y, ef, ef_c,
                                          L(f"l{li}_e_wl_ih"), L(f"l{li}_e_wl_hh"))
            else:
                new_ef = y

            if not last:
                # mailbox softmax + attention-weighted sum via mask matmuls.
                wat = W(f"l{li}_e_wat")                                   # (1, H)
                attn = jnp.sum(new_ef * wat, axis=-1, keepdims=True)      # (E, 1)
                # subtracting the GLOBAL max is mathematically identical per-node softmax
                # and keeps exp() overflow-safe.
                mx = jnp.max(attn, axis=0, keepdims=True)
                ex = jnp.exp(attn - mx)                                   # (E, 1)
                denom = jnp.dot(mask_d, ex, preferred_element_type=jnp.float32)           # (N, 1)
                num = jnp.dot(mask_d, ex * new_ef, preferred_element_type=jnp.float32)    # (N, H)
                attn_feat = num / denom                                   # exact reciprocal

                # NodeApplyModule: ReLU(Linear(InstanceNorm(cat([nfeat_old, attn_feat]))))
                n_wn = [W(f"l{li}_n_wn{p}") for p in range(nparts)]
                ny = jnp.maximum(_norm_linear(nf_slabs + [attn_feat],
                                              n_wn + [W(f"l{li}_n_wa")],
                                              W(f"l{li}_n_b")), 0.0)
                if lstm:
                    if nf_c is None:
                        nf_c = jnp.zeros_like(nf_slabs[0])  # zeros_like(nfeat) at first LSTM
                    new_nf, nf_c = _lstm_cell(ny, nf_slabs[0], nf_c,
                                              L(f"l{li}_n_wl_ih"), L(f"l{li}_n_wl_hh"))
                else:
                    new_nf = ny
                nf_slabs = [new_nf]
            # Last layer: its node update (and the duplicated G.apply_nodes) feeds nothing
            # the distCB head reads (QA disabled) -> skipped as dead work.

            ef = new_ef

        # output_layer = nn.Sequential(nn.Linear(edge_n_hidden, n_output)), lane-padded to 128
        o_ref[0] = (jnp.dot(ef, L("out_w"), preferred_element_type=jnp.float32)
                    + L("out_b"))

    return kernel


# ----------------------------- wrapper -----------------------------
def gnn_forward(packed, graph_consts, nfeat, atom_emb, efeat):
    """nfeat: (B,N,28)  atom_emb: (B,N,A,7)  efeat: (B,E,15); B graphs share one topology."""
    oh, mask_d = graph_consts
    b, n, nf_dim = nfeat.shape
    e, ef_dim = efeat.shape[1], efeat.shape[2]
    a, at_dim = atom_emb.shape[2], atom_emb.shape[3]

    # Layout plumbing in the wrapper: atoms onto a leading axis (lane-major (N, 7) tiles).
    atom_t = jnp.transpose(atom_emb, (0, 2, 1, 3))          # (B, A, N, ATOM_IN)

    w_slab, l_slab = packed["w_slab"], packed["l_slab"]
    kernel = build_gnn_kernel(packed["w_layout"], packed["l_layout"],
                              packed["lstm_flags"], e)

    def const_spec(arr):
        # full-array block, constant index map -> fetched once, VMEM-resident across the grid
        return pl.BlockSpec(arr.shape, lambda bb: (0, 0))

    out_pad = pl.pallas_call(
        kernel,
        grid=(b,),
        out_shape=jax.ShapeDtypeStruct((b, e, N_OUT_PAD), jnp.float32),
        in_specs=[
            const_spec(w_slab),                                   # packed lane-H weight slab
            const_spec(l_slab),                                   # packed lane-4H weight slab
            const_spec(oh),                                       # (2E, N) src/dst one-hots
            const_spec(mask_d),                                   # (N, E) mailbox mask
            pl.BlockSpec((1, n, nf_dim), lambda bb: (bb, 0, 0)),
            pl.BlockSpec((1, a, n, at_dim), lambda bb: (bb, 0, 0, 0)),
            pl.BlockSpec((1, e, ef_dim), lambda bb: (bb, 0, 0)),
        ],
        out_specs=pl.BlockSpec((1, e, N_OUT_PAD), lambda bb: (bb, 0, 0)),
        compiler_params=pltpu.CompilerParams(
            dimension_semantics=("parallel",)),                   # batch axis -> both TCs on v7x
    )(w_slab, l_slab, oh, mask_d, nfeat, atom_t, efeat)

    return {"distCB": out_pad[:, :, :N_OUTPUT]}


# ----------------------------- deterministic parameter init -----------------------------
def make_params(key):
    keys = iter(jax.random.split(key, 80))

    def w(shape):
        fan_in = shape[0]
        return (jax.random.normal(next(keys), shape, jnp.float32)
                * (1.0 / jnp.sqrt(jnp.float32(fan_in)))).astype(jnp.float32)

    params = {
        "atom_w1": w((ATOM_IN, H)),        # Linear(7, H, bias=False)   (stored transposed)
        "atom_w2": w((H, H)),              # Linear(H, H, bias=False)
        "mp": [],
        "out_w": w((H, N_OUTPUT)),         # Linear(H, n_output)
        "out_b": w((1, N_OUTPUT)),
    }

    for li in range(N_LAYERS):
        node_in = (NODE_N_IN + H) if li == 0 else H
        edge_in = EDGE_N_IN if li == 0 else H
        lstm = (0 < li < N_LAYERS - 1)
        lp = {
            "lstm": lstm,
            # EdgeApplyModule: Linear(edge_in + 2*node_in, H) split into [src | efeat | dst]
            "e_w_src": w((node_in, H)),
            "e_w_e":   w((edge_in, H)),
            "e_w_dst": w((node_in, H)),
            "e_b": w((1, H)),
            "e_wat": w((H, 1)),            # attn Linear(H, 1, bias=False)
            # NodeApplyModule: Linear(node_in + H, H) split into [node_in | H]
            "n_wn": w((node_in, H)),
            "n_wa": w((H, H)),
            "n_b": w((1, H)),
        }
        if lstm:
            lp["e_wl"] = w((2 * H, 4 * H))  # LSTMCell(H, H, bias=False): [w_ih^T ; w_hh^T]
            lp["n_wl"] = w((2 * H, 4 * H))
        params["mp"].append(lp)
    return params


# ----------------------------- main -----------------------------
if __name__ == "__main__":
    key = jax.random.PRNGKey(0)
    kp, kn, ka, ke = jax.random.split(key, 4)

    params = make_params(kp)
    packed = pack_params(params)                      # once per checkpoint

    nfeat = jax.random.normal(kn, (BATCH, N_NODES, NODE_N_IN), jnp.float32)
    atom_emb = jax.random.normal(ka, (BATCH, N_NODES, A_ATOMS, ATOM_IN), jnp.float32)
    efeat = jax.random.normal(ke, (BATCH, N_EDGES, EDGE_N_IN), jnp.float32)
    # fixed-degree graph: node n receives from nodes (n+1 .. n+K) mod N
    src_idx = (jnp.arange(N_NODES)[:, None] + jnp.arange(1, K_DEG + 1)[None, :]) % N_NODES
    gconst = make_graph_constants(src_idx)            # once per topology

    out = gnn_forward(packed, gconst, nfeat, atom_emb, efeat)
    jax.block_until_ready(out)
    assert out["distCB"].shape == (BATCH, N_EDGES, N_OUTPUT)
    assert bool(jnp.all(jnp.isfinite(out["distCB"])))
    print("KERNEL_OK")
</pallas_src>

<mosaic_0001>
module attributes {stable_mosaic.version = 11 : i64} {
  func.func @kernel(%arg0: i32, %arg1: memref<776x32xf32, #tpu.memory_space<vmem>>, %arg2: memref<296x128xf32, #tpu.memory_space<vmem>>, %arg3: memref<128x16xf32, #tpu.memory_space<vmem>>, %arg4: memref<16x64xf32, #tpu.memory_space<vmem>>, %arg5: memref<1x16x28xf32, #tpu.memory_space<vmem>>, %arg6: memref<1x5x16x7xf32, #tpu.memory_space<vmem>>, %arg7: memref<1x64x15xf32, #tpu.memory_space<vmem>>, %arg8: memref<1x64x128xf32, #tpu.memory_space<vmem>>) attributes {dimension_semantics = [#tpu.dimension_semantics<parallel>], iteration_bounds = array<i64: 8>, scalar_prefetch = 0 : i64, scratch_operands = 0 : i64, tpu.core_type = #tpu.core_type<tc>, window_params = [{pipeline_mode = #tpu.pipeline_mode<synchronous>, transform_indices = @transform_0, window_bounds = array<i64: 776, 32>}, {pipeline_mode = #tpu.pipeline_mode<synchronous>, transform_indices = @transform_1, window_bounds = array<i64: 296, 128>}, {pipeline_mode = #tpu.pipeline_mode<synchronous>, transform_indices = @transform_2, window_bounds = array<i64: 128, 16>}, {pipeline_mode = #tpu.pipeline_mode<synchronous>, transform_indices = @transform_3, window_bounds = array<i64: 16, 64>}, {transform_indices = @transform_4, window_bounds = array<i64: 1, 16, 28>}, {transform_indices = @transform_5, window_bounds = array<i64: 1, 5, 16, 7>}, {transform_indices = @transform_6, window_bounds = array<i64: 1, 64, 15>}, {transform_indices = @transform_7, window_bounds = array<i64: 1, 64, 128>}]} {
    %c0 = arith.constant 0 : index
    %c0_0 = arith.constant 0 : index
    %0 = vector.load %arg3[%c0, %c0_0] : memref<128x16xf32, #tpu.memory_space<vmem>>, vector<64x16xf32>
    %c64 = arith.constant 64 : index
    %c0_1 = arith.constant 0 : index
    %1 = vector.load %arg3[%c64, %c0_1] : memref<128x16xf32, #tpu.memory_space<vmem>>, vector<64x16xf32>
    %c0_2 = arith.constant 0 : index
    %c0_3 = arith.constant 0 : index
    %2 = vector.load %arg4[%c0_2, %c0_3] : memref<16x64xf32, #tpu.memory_space<vmem>>, vector<16x64xf32>
    %c0_4 = arith.constant 0 : index
    %c0_5 = arith.constant 0 : index
    %c0_6 = arith.constant 0 : index
    %3 = vector.load %arg5[%c0_4, %c0_5, %c0_6] : memref<1x16x28xf32, #tpu.memory_space<vmem>>, vector<1x16x28xf32>
    %4 = vector.shape_cast %3 : vector<1x16x28xf32> to vector<16x28xf32>
    %c0_7 = arith.constant 0 : index
    %c0_8 = arith.constant 0 : index
    %c0_9 = arith.constant 0 : index
    %5 = vector.load %arg7[%c0_7, %c0_8, %c0_9] : memref<1x64x15xf32, #tpu.memory_space<vmem>>, vector<1x64x15xf32>
    %6 = vector.shape_cast %5 : vector<1x64x15xf32> to vector<64x15xf32>
    %c0_10 = arith.constant 0 : index
    %c0_11 = arith.constant 0 : index
    %c0_12 = arith.constant 0 : index
    %c0_13 = arith.constant 0 : index
    %7 = vector.load %arg6[%c0_10, %c0_11, %c0_12, %c0_13] : memref<1x5x16x7xf32, #tpu.memory_space<vmem>>, vector<1x5x16x7xf32>
    %8 = vector.shape_cast %7 : vector<1x5x16x7xf32> to vector<5x16x7xf32>
    %cst = arith.constant dense<0.000000e+00> : vector<5x16xf32>
    %9 = vector.multi_reduction <add>, %8, %cst [2] : vector<5x16x7xf32> to vector<5x16xf32>
    %10 = vector.shape_cast %9 : vector<5x16xf32> to vector<5x16x1xf32>
    %cst_14 = arith.constant 7.000000e+00 : f32
    %11 = vector.broadcast %cst_14 : f32 to vector<5x16x1xf32>
    %12 = arith.divf %10, %11 : vector<5x16x1xf32>
    %13 = vector.broadcast %12 : vector<5x16x1xf32> to vector<5x16x7xf32>
    %14 = arith.subf %8, %13 : vector<5x16x7xf32>
    %15 = arith.mulf %14, %14 : vector<5x16x7xf32>
    %cst_15 = arith.constant dense<0.000000e+00> : vector<5x16xf32>
    %16 = vector.multi_reduction <add>, %15, %cst_15 [2] : vector<5x16x7xf32> to vector<5x16xf32>
    %17 = vector.shape_cast %16 : vector<5x16xf32> to vector<5x16x1xf32>
    %cst_16 = arith.constant 7.000000e+00 : f32
    %18 = vector.broadcast %cst_16 : f32 to vector<5x16x1xf32>
    %19 = arith.divf %17, %18 : vector<5x16x1xf32>
    %20 = vector.broadcast %12 : vector<5x16x1xf32> to vector<5x16x7xf32>
    %21 = arith.subf %8, %20 : vector<5x16x7xf32>
    %cst_17 = arith.constant 9.99999974E-6 : f32
    %22 = vector.broadcast %cst_17 : f32 to vector<5x16x1xf32>
    %23 = arith.addf %19, %22 : vector<5x16x1xf32>
    %24 = math.rsqrt %23 : vector<5x16x1xf32>
    %25 = vector.broadcast %24 : vector<5x16x1xf32> to vector<5x16x7xf32>
    %26 = arith.mulf %21, %25 : vector<5x16x7xf32>
    %cst_18 = arith.constant dense<0.000000e+00> : vector<16x7xf32>
    %27 = vector.multi_reduction <add>, %26, %cst_18 [0] : vector<5x16x7xf32> to vector<16x7xf32>
    %cst_19 = arith.constant 2.000000e-01 : f32
    %28 = vector.broadcast %cst_19 : f32 to vector<16x7xf32>
    %29 = arith.mulf %27, %28 : vector<16x7xf32>
    %c0_20 = arith.constant 0 : index
    %c0_21 = arith.constant 0 : index
    %30 = vector.load %arg1[%c0_20, %c0_21] : memref<776x32xf32, #tpu.memory_space<vmem>>, vector<7x32xf32>
    %cst_22 = arith.constant dense<0.000000e+00> : vector<16x32xf32>
    %31 = tpu.matmul %29, %30, %cst_22 {dimension_numbers = #tpu.dot_dimension_numbers<[1], [0], [0], [1], [0, 0, 1, 1], [], []>} : vector<16x7xf32>, vector<7x32xf32>, vector<16x32xf32> -> vector<16x32xf32>
    %cst_23 = arith.constant 0.000000e+00 : f32
    %32 = vector.broadcast %cst_23 : f32 to vector<16x32xf32>
    %33 = arith.maximumf %31, %32 : vector<16x32xf32>
    %cst_24 = arith.constant dense<0.000000e+00> : vector<16xf32>
    %34 = vector.multi_reduction <add>, %33, %cst_24 [1] : vector<16x32xf32> to vector<16xf32>
    %35 = vector.shape_cast %34 : vector<16xf32> to vector<16x1xf32>
    %cst_25 = arith.constant 3.200000e+01 : f32
    %36 = vector.broadcast %cst_25 : f32 to vector<16x1xf32>
    %37 = arith.divf %35, %36 : vector<16x1xf32>
    %38 = vector.broadcast %37 : vector<16x1xf32> to vector<16x32xf32>
    %39 = arith.subf %33, %38 : vector<16x32xf32>
    %40 = arith.mulf %39, %39 : vector<16x32xf32>
    %cst_26 = arith.constant dense<0.000000e+00> : vector<16xf32>
    %41 = vector.multi_reduction <add>, %40, %cst_26 [1] : vector<16x32xf32> to vector<16xf32>
    %42 = vector.shape_cast %41 : vector<16xf32> to vector<16x1xf32>
    %cst_27 = arith.constant 3.200000e+01 : f32
    %43 = vector.broadcast %cst_27 : f32 to vector<16x1xf32>
    %44 = arith.divf %42, %43 : vector<16x1xf32>
    %45 = vector.broadcast %37 : vector<16x1xf32> to vector<16x32xf32>
    %46 = arith.subf %33, %45 : vector<16x32xf32>
    %cst_28 = arith.constant 9.99999974E-6 : f32
    %47 = vector.broadcast %cst_28 : f32 to vector<16x1xf32>
    %48 = arith.addf %44, %47 : vector<16x1xf32>
    %49 = math.rsqrt %48 : vector<16x1xf32>
    %50 = vector.broadcast %49 : vector<16x1xf32> to vector<16x32xf32>
    %51 = arith.mulf %46, %50 : vector<16x32xf32>
    %c8 = arith.constant 8 : index
    %c0_29 = arith.constant 0 : index
    %52 = vector.load %arg1[%c8, %c0_29] : memref<776x32xf32, #tpu.memory_space<vmem>>, vector<32x32xf32>
    %cst_30 = arith.constant dense<0.000000e+00> : vector<16x32xf32>
    %53 = tpu.matmul %51, %52, %cst_30 {dimension_numbers = #tpu.dot_dimension_numbers<[1], [0], [0], [1], [0, 0, 1, 1], [], []>} : vector<16x32xf32>, vector<32x32xf32>, vector<16x32xf32> -> vector<16x32xf32>
    %cst_31 = arith.constant 0.000000e+00 : f32
    %54 = vector.broadcast %cst_31 : f32 to vector<16x32xf32>
    %55 = arith.maximumf %53, %54 : vector<16x32xf32>
    %c40 = arith.constant 40 : index
    %c0_32 = arith.constant 0 : index
    %56 = vector.load %arg1[%c40, %c0_32] : memref<776x32xf32, #tpu.memory_space<vmem>>, vector<28x32xf32>
    %c72 = arith.constant 72 : index
    %c0_33 = arith.constant 0 : index
    %57 = vector.load %arg1[%c72, %c0_33] : memref<776x32xf32, #tpu.memory_space<vmem>>, vector<32x32xf32>
    %c120 = arith.constant 120 : index
    %c0_34 = arith.constant 0 : index
    %58 = vector.load %arg1[%c120, %c0_34] : memref<776x32xf32, #tpu.memory_space<vmem>>, vector<28x32xf32>
    %c152 = arith.constant 152 : index
    %c0_35 = arith.constant 0 : index
    %59 = vector.load %arg1[%c152, %c0_35] : memref<776x32xf32, #tpu.memory_space<vmem>>, vector<32x32xf32>
    %cst_36 = arith.constant dense<0.000000e+00> : vector<64x28xf32>
    %60 = tpu.matmul %0, %4, %cst_36 {dimension_numbers = #tpu.dot_dimension_numbers<[1], [0], [0], [1], [0, 0, 1, 1], [], []>} : vector<64x16xf32>, vector<16x28xf32>, vector<64x28xf32> -> vector<64x28xf32>
    %cst_37 = arith.constant dense<0.000000e+00> : vector<64x32xf32>
    %61 = tpu.matmul %0, %55, %cst_37 {dimension_numbers = #tpu.dot_dimension_numbers<[1], [0], [0], [1], [0, 0, 1, 1], [], []>} : vector<64x16xf32>, vector<16x32xf32>, vector<64x32xf32> -> vector<64x32xf32>
    %cst_38 = arith.constant dense<0.000000e+00> : vector<64x28xf32>
    %62 = tpu.matmul %1, %4, %cst_38 {dimension_numbers = #tpu.dot_dimension_numbers<[1], [0], [0], [1], [0, 0, 1, 1], [], []>} : vector<64x16xf32>, vector<16x28xf32>, vector<64x28xf32> -> vector<64x28xf32>
    %cst_39 = arith.constant dense<0.000000e+00> : vector<64x32xf32>
    %63 = tpu.matmul %1, %55, %cst_39 {dimension_numbers = #tpu.dot_dimension_numbers<[1], [0], [0], [1], [0, 0, 1, 1], [], []>} : vector<64x16xf32>, vector<16x32xf32>, vector<64x32xf32> -> vector<64x32xf32>
    %c104 = arith.constant 104 : index
    %c0_40 = arith.constant 0 : index
    %64 = vector.load %arg1[%c104, %c0_40] : memref<776x32xf32, #tpu.memory_space<vmem>>, vector<15x32xf32>
    %c184 = arith.constant 184 : index
    %c0_41 = arith.constant 0 : index
    %65 = vector.load %arg1[%c184, %c0_41] : memref<776x32xf32, #tpu.memory_space<vmem>>, vector<1x32xf32>
    %cst_42 = arith.constant dense<0.000000e+00> : vector<64xf32>
    %66 = vector.multi_reduction <add>, %60, %cst_42 [1] : vector<64x28xf32> to vector<64xf32>
    %67 = vector.shape_cast %66 : vector<64xf32> to vector<64x1xf32>
    %cst_43 = arith.constant 0.000000e+00 : f32
    %68 = vector.broadcast %cst_43 : f32 to vector<64x1xf32>
    %69 = arith.addf %68, %67 : vector<64x1xf32>
    %cst_44 = arith.constant dense<0.000000e+00> : vector<64xf32>
    %70 = vector.multi_reduction <add>, %61, %cst_44 [1] : vector<64x32xf32> to vector<64xf32>
    %71 = vector.shape_cast %70 : vector<64xf32> to vector<64x1xf32>
    %72 = arith.addf %69, %71 : vector<64x1xf32>
    %cst_45 = arith.constant dense<0.000000e+00> : vector<64xf32>
    %73 = vector.multi_reduction <add>, %6, %cst_45 [1] : vector<64x15xf32> to vector<64xf32>
    %74 = vector.shape_cast %73 : vector<64xf32> to vector<64x1xf32>
    %75 = arith.addf %72, %74 : vector<64x1xf32>
    %cst_46 = arith.constant dense<0.000000e+00> : vector<64xf32>
    %76 = vector.multi_reduction <add>, %62, %cst_46 [1] : vector<64x28xf32> to vector<64xf32>
    %77 = vector.shape_cast %76 : vector<64xf32> to vector<64x1xf32>
    %78 = arith.addf %75, %77 : vector<64x1xf32>
    %cst_47 = arith.constant dense<0.000000e+00> : vector<64xf32>
    %79 = vector.multi_reduction <add>, %63, %cst_47 [1] : vector<64x32xf32> to vector<64xf32>
    %80 = vector.shape_cast %79 : vector<64xf32> to vector<64x1xf32>
    %81 = arith.addf %78, %80 : vector<64x1xf32>
    %cst_48 = arith.constant 1.350000e+02 : f32
    %82 = vector.broadcast %cst_48 : f32 to vector<64x1xf32>
    %83 = arith.divf %81, %82 : vector<64x1xf32>
    %84 = vector.broadcast %83 : vector<64x1xf32> to vector<64x28xf32>
    %85 = arith.subf %60, %84 : vector<64x28xf32>
    %86 = arith.mulf %85, %85 : vector<64x28xf32>
    %cst_49 = arith.constant dense<0.000000e+00> : vector<64xf32>
    %87 = vector.multi_reduction <add>, %86, %cst_49 [1] : vector<64x28xf32> to vector<64xf32>
    %88 = vector.shape_cast %87 : vector<64xf32> to vector<64x1xf32>
    %cst_50 = arith.constant 0.000000e+00 : f32
    %89 = vector.broadcast %cst_50 : f32 to vector<64x1xf32>
    %90 = arith.addf %89, %88 : vector<64x1xf32>
    %91 = vector.broadcast %83 : vector<64x1xf32> to vector<64x32xf32>
    %92 = arith.subf %61, %91 : vector<64x32xf32>
    %93 = arith.mulf %92, %92 : vector<64x32xf32>
    %cst_51 = arith.constant dense<0.000000e+00> : vector<64xf32>
    %94 = vector.multi_reduction <add>, %93, %cst_51 [1] : vector<64x32xf32> to vector<64xf32>
    %95 = vector.shape_cast %94 : vector<64xf32> to vector<64x1xf32>
    %96 = arith.addf %90, %95 : vector<64x1xf32>
    %97 = vector.broadcast %83 : vector<64x1xf32> to vector<64x15xf32>
    %98 = arith.subf %6, %97 : vector<64x15xf32>
    %99 = arith.mulf %98, %98 : vector<64x15xf32>
    %cst_52 = arith.constant dense<0.000000e+00> : vector<64xf32>
    %100 = vector.multi_reduction <add>, %99, %cst_52 [1] : vector<64x15xf32> to vector<64xf32>
    %101 = vector.shape_cast %100 : vector<64xf32> to vector<64x1xf32>
    %102 = arith.addf %96, %101 : vector<64x1xf32>
    %103 = vector.broadcast %83 : vector<64x1xf32> to vector<64x28xf32>
    %104 = arith.subf %62, %103 : vector<64x28xf32>
    %105 = arith.mulf %104, %104 : vector<64x28xf32>
    %cst_53 = arith.constant dense<0.000000e+00> : vector<64xf32>
    %106 = vector.multi_reduction <add>, %105, %cst_53 [1] : vector<64x28xf32> to vector<64xf32>
    %107 = vector.shape_cast %106 : vector<64xf32> to vector<64x1xf32>
    %108 = arith.addf %102, %107 : vector<64x1xf32>
    %109 = vector.broadcast %83 : vector<64x1xf32> to vector<64x32xf32>
    %110 = arith.subf %63, %109 : vector<64x32xf32>
    %111 = arith.mulf %110, %110 : vector<64x32xf32>
    %cst_54 = arith.constant dense<0.000000e+00> : vector<64xf32>
    %112 = vector.multi_reduction <add>, %111, %cst_54 [1] : vector<64x32xf32> to vector<64xf32>
    %113 = vector.shape_cast %112 : vector<64xf32> to vector<64x1xf32>
    %114 = arith.addf %108, %113 : vector<64x1xf32>
    %cst_55 = arith.constant 1.350000e+02 : f32
    %115 = vector.broadcast %cst_55 : f32 to vector<64x1xf32>
    %116 = arith.divf %114, %115 : vector<64x1xf32>
    %cst_56 = arith.constant 9.99999974E-6 : f32
    %117 = vector.broadcast %cst_56 : f32 to vector<64x1xf32>
    %118 = arith.addf %116, %117 : vector<64x1xf32>
    %119 = math.rsqrt %118 : vector<64x1xf32>
    %120 = vector.broadcast %83 : vector<64x1xf32> to vector<64x28xf32>
    %121 = arith.subf %60, %120 : vector<64x28xf32>
    %122 = vector.broadcast %119 : vector<64x1xf32> to vector<64x28xf32>
    %123 = arith.mulf %121, %122 : vector<64x28xf32>
    %cst_57 = arith.constant dense<0.000000e+00> : vector<64x32xf32>
    %124 = tpu.matmul %123, %56, %cst_57 {dimension_numbers = #tpu.dot_dimension_numbers<[1], [0], [0], [1], [0, 0, 1, 1], [], []>} : vector<64x28xf32>, vector<28x32xf32>, vector<64x32xf32> -> vector<64x32xf32>
    %125 = vector.broadcast %65 : vector<1x32xf32> to vector<64x32xf32>
    %126 = arith.addf %125, %124 : vector<64x32xf32>
    %127 = vector.broadcast %83 : vector<64x1xf32> to vector<64x32xf32>
    %128 = arith.subf %61, %127 : vector<64x32xf32>
    %129 = vector.broadcast %119 : vector<64x1xf32> to vector<64x32xf32>
    %130 = arith.mulf %128, %129 : vector<64x32xf32>
    %cst_58 = arith.constant dense<0.000000e+00> : vector<64x32xf32>
    %131 = tpu.matmul %130, %57, %cst_58 {dimension_numbers = #tpu.dot_dimension_numbers<[1], [0], [0], [1], [0, 0, 1, 1], [], []>} : vector<64x32xf32>, vector<32x32xf32>, vector<64x32xf32> -> vector<64x32xf32>
    %132 = arith.addf %126, %131 : vector<64x32xf32>
    %133 = vector.broadcast %83 : vector<64x1xf32> to vector<64x15xf32>
    %134 = arith.subf %6, %133 : vector<64x15xf32>
    %135 = vector.broadcast %119 : vector<64x1xf32> to vector<64x15xf32>
    %136 = arith.mulf %134, %135 : vector<64x15xf32>
    %cst_59 = arith.constant dense<0.000000e+00> : vector<64x32xf32>
    %137 = tpu.matmul %136, %64, %cst_59 {dimension_numbers = #tpu.dot_dimension_numbers<[1], [0], [0], [1], [0, 0, 1, 1], [], []>} : vector<64x15xf32>, vector<15x32xf32>, vector<64x32xf32> -> vector<64x32xf32>
    %138 = arith.addf %132, %137 : vector<64x32xf32>
    %139 = vector.broadcast %83 : vector<64x1xf32> to vector<64x28xf32>
    %140 = arith.subf %62, %139 : vector<64x28xf32>
    %141 = vector.broadcast %119 : vector<64x1xf32> to vector<64x28xf32>
    %142 = arith.mulf %140, %141 : vector<64x28xf32>
    %cst_60 = arith.constant dense<0.000000e+00> : vector<64x32xf32>
    %143 = tpu.matmul %142, %58, %cst_60 {dimension_numbers = #tpu.dot_dimension_numbers<[1], [0], [0], [1], [0, 0, 1, 1], [], []>} : vector<64x28xf32>, vector<28x32xf32>, vector<64x32xf32> -> vector<64x32xf32>
    %144 = arith.addf %138, %143 : vector<64x32xf32>
    %145 = vector.broadcast %83 : vector<64x1xf32> to vector<64x32xf32>
    %146 = arith.subf %63, %145 : vector<64x32xf32>
    %147 = vector.broadcast %119 : vector<64x1xf32> to vector<64x32xf32>
    %148 = arith.mulf %146, %147 : vector<64x32xf32>
    %cst_61 = arith.constant dense<0.000000e+00> : vector<64x32xf32>
    %149 = tpu.matmul %148, %59, %cst_61 {dimension_numbers = #tpu.dot_dimension_numbers<[1], [0], [0], [1], [0, 0, 1, 1], [], []>} : vector<64x32xf32>, vector<32x32xf32>, vector<64x32xf32> -> vector<64x32xf32>
    %150 = arith.addf %144, %149 : vector<64x32xf32>
    %cst_62 = arith.constant 0.000000e+00 : f32
    %151 = vector.broadcast %cst_62 : f32 to vector<64x32xf32>
    %152 = arith.cmpf ogt, %150, %151 : vector<64x32xf32>
    %cst_63 = arith.constant 0.00999999977 : f32
    %153 = vector.broadcast %cst_63 : f32 to vector<64x32xf32>
    %154 = arith.mulf %153, %150 : vector<64x32xf32>
    %155 = arith.select %152, %150, %154 : vector<64x32xi1>, vector<64x32xf32>
    %c192 = arith.constant 192 : index
    %c0_64 = arith.constant 0 : index
    %156 = vector.load %arg1[%c192, %c0_64] : memref<776x32xf32, #tpu.memory_space<vmem>>, vector<1x32xf32>
    %157 = vector.broadcast %156 : vector<1x32xf32> to vector<64x32xf32>
    %158 = arith.mulf %155, %157 : vector<64x32xf32>
    %cst_65 = arith.constant dense<0.000000e+00> : vector<64xf32>
    %159 = vector.multi_reduction <add>, %158, %cst_65 [1] : vector<64x32xf32> to vector<64xf32>
    %160 = vector.shape_cast %159 : vector<64xf32> to vector<64x1xf32>
    %cst_66 = arith.constant dense<0xFF800000> : vector<1xf32>
    %161 = vector.multi_reduction <maximumf>, %160, %cst_66 [0] : vector<64x1xf32> to vector<1xf32>
    %162 = vector.shape_cast %161 : vector<1xf32> to vector<1x1xf32>
    %163 = vector.broadcast %162 : vector<1x1xf32> to vector<64x1xf32>
    %164 = arith.subf %160, %163 : vector<64x1xf32>
    %165 = math.exp %164 : vector<64x1xf32>
    %cst_67 = arith.constant dense<0.000000e+00> : vector<16x1xf32>
    %166 = tpu.matmul %2, %165, %cst_67 {dimension_numbers = #tpu.dot_dimension_numbers<[1], [0], [0], [1], [0, 0, 1, 1], [], []>} : vector<16x64xf32>, vector<64x1xf32>, vector<16x1xf32> -> vector<16x1xf32>
    %167 = vector.broadcast %165 : vector<64x1xf32> to vector<64x32xf32>
    %168 = arith.mulf %167, %155 : vector<64x32xf32>
    %cst_68 = arith.constant dense<0.000000e+00> : vector<16x32xf32>
    %169 = tpu.matmul %2, %168, %cst_68 {dimension_numbers = #tpu.dot_dimension_numbers<[1], [0], [0], [1], [0, 0, 1, 1], [], []>} : vector<16x64xf32>, vector<64x32xf32>, vector<16x32xf32> -> vector<16x32xf32>
    %170 = vector.broadcast %166 : vector<16x1xf32> to vector<16x32xf32>
    %171 = arith.divf %169, %170 : vector<16x32xf32>
    %c200 = arith.constant 200 : index
    %c0_69 = arith.constant 0 : index
    %172 = vector.load %arg1[%c200, %c0_69] : memref<776x32xf32, #tpu.memory_space<vmem>>, vector<28x32xf32>
    %c232 = arith.constant 232 : index
    %c0_70 = arith.constant 0 : index
    %173 = vector.load %arg1[%c232, %c0_70] : memref<776x32xf32, #tpu.memory_space<vmem>>, vector<32x32xf32>
    %c264 = arith.constant 264 : index
    %c0_71 = arith.constant 0 : index
    %174 = vector.load %arg1[%c264, %c0_71] : memref<776x32xf32, #tpu.memory_space<vmem>>, vector<32x32xf32>
    %c296 = arith.constant 296 : index
    %c0_72 = arith.constant 0 : index
    %175 = vector.load %arg1[%c296, %c0_72] : memref<776x32xf32, #tpu.memory_space<vmem>>, vector<1x32xf32>
    %cst_73 = arith.constant dense<0.000000e+00> : vector<16xf32>
    %176 = vector.multi_reduction <add>, %4, %cst_73 [1] : vector<16x28xf32> to vector<16xf32>
    %177 = vector.shape_cast %176 : vector<16xf32> to vector<16x1xf32>
    %cst_74 = arith.constant 0.000000e+00 : f32
    %178 = vector.broadcast %cst_74 : f32 to vector<16x1xf32>
    %179 = arith.addf %178, %177 : vector<16x1xf32>
    %cst_75 = arith.constant dense<0.000000e+00> : vector<16xf32>
    %180 = vector.multi_reduction <add>, %55, %cst_75 [1] : vector<16x32xf32> to vector<16xf32>
    %181 = vector.shape_cast %180 : vector<16xf32> to vector<16x1xf32>
    %182 = arith.addf %179, %181 : vector<16x1xf32>
    %cst_76 = arith.constant dense<0.000000e+00> : vector<16xf32>
    %183 = vector.multi_reduction <add>, %171, %cst_76 [1] : vector<16x32xf32> to vector<16xf32>
    %184 = vector.shape_cast %183 : vector<16xf32> to vector<16x1xf32>
    %185 = arith.addf %182, %184 : vector<16x1xf32>
    %cst_77 = arith.constant 9.200000e+01 : f32
    %186 = vector.broadcast %cst_77 : f32 to vector<16x1xf32>
    %187 = arith.divf %185, %186 : vector<16x1xf32>
    %188 = vector.broadcast %187 : vector<16x1xf32> to vector<16x28xf32>
    %189 = arith.subf %4, %188 : vector<16x28xf32>
    %190 = arith.mulf %189, %189 : vector<16x28xf32>
    %cst_78 = arith.constant dense<0.000000e+00> : vector<16xf32>
    %191 = vector.multi_reduction <add>, %190, %cst_78 [1] : vector<16x28xf32> to vector<16xf32>
    %192 = vector.shape_cast %191 : vector<16xf32> to vector<16x1xf32>
    %cst_79 = arith.constant 0.000000e+00 : f32
    %193 = vector.broadcast %cst_79 : f32 to vector<16x1xf32>
    %194 = arith.addf %193, %192 : vector<16x1xf32>
    %195 = vector.broadcast %187 : vector<16x1xf32> to vector<16x32xf32>
    %196 = arith.subf %55, %195 : vector<16x32xf32>
    %197 = arith.mulf %196, %196 : vector<16x32xf32>
    %cst_80 = arith.constant dense<0.000000e+00> : vector<16xf32>
    %198 = vector.multi_reduction <add>, %197, %cst_80 [1] : vector<16x32xf32> to vector<16xf32>
    %199 = vector.shape_cast %198 : vector<16xf32> to vector<16x1xf32>
    %200 = arith.addf %194, %199 : vector<16x1xf32>
    %201 = vector.broadcast %187 : vector<16x1xf32> to vector<16x32xf32>
    %202 = arith.subf %171, %201 : vector<16x32xf32>
    %203 = arith.mulf %202, %202 : vector<16x32xf32>
    %cst_81 = arith.constant dense<0.000000e+00> : vector<16xf32>
    %204 = vector.multi_reduction <add>, %203, %cst_81 [1] : vector<16x32xf32> to vector<16xf32>
    %205 = vector.shape_cast %204 : vector<16xf32> to vector<16x1xf32>
    %206 = arith.addf %200, %205 : vector<16x1xf32>
    %cst_82 = arith.constant 9.200000e+01 : f32
    %207 = vector.broadcast %cst_82 : f32 to vector<16x1xf32>
    %208 = arith.divf %206, %207 : vector<16x1xf32>
    %cst_83 = arith.constant 9.99999974E-6 : f32
    %209 = vector.broadcast %cst_83 : f32 to vector<16x1xf32>
    %210 = arith.addf %208, %209 : vector<16x1xf32>
    %211 = math.rsqrt %210 : vector<16x1xf32>
    %212 = vector.broadcast %187 : vector<16x1xf32> to vector<16x28xf32>
    %213 = arith.subf %4, %212 : vector<16x28xf32>
    %214 = vector.broadcast %211 : vector<16x1xf32> to vector<16x28xf32>
    %215 = arith.mulf %213, %214 : vector<16x28xf32>
    %cst_84 = arith.constant dense<0.000000e+00> : vector<16x32xf32>
    %216 = tpu.matmul %215, %172, %cst_84 {dimension_numbers = #tpu.dot_dimension_numbers<[1], [0], [0], [1], [0, 0, 1, 1], [], []>} : vector<16x28xf32>, vector<28x32xf32>, vector<16x32xf32> -> vector<16x32xf32>
    %217 = vector.broadcast %175 : vector<1x32xf32> to vector<16x32xf32>
    %218 = arith.addf %217, %216 : vector<16x32xf32>
    %219 = vector.broadcast %187 : vector<16x1xf32> to vector<16x32xf32>
    %220 = arith.subf %55, %219 : vector<16x32xf32>
    %221 = vector.broadcast %211 : vector<16x1xf32> to vector<16x32xf32>
    %222 = arith.mulf %220, %221 : vector<16x32xf32>
    %cst_85 = arith.constant dense<0.000000e+00> : vector<16x32xf32>
    %223 = tpu.matmul %222, %173, %cst_85 {dimension_numbers = #tpu.dot_dimension_numbers<[1], [0], [0], [1], [0, 0, 1, 1], [], []>} : vector<16x32xf32>, vector<32x32xf32>, vector<16x32xf32> -> vector<16x32xf32>
    %224 = arith.addf %218, %223 : vector<16x32xf32>
    %225 = vector.broadcast %187 : vector<16x1xf32> to vector<16x32xf32>
    %226 = arith.subf %171, %225 : vector<16x32xf32>
    %227 = vector.broadcast %211 : vector<16x1xf32> to vector<16x32xf32>
    %228 = arith.mulf %226, %227 : vector<16x32xf32>
    %cst_86 = arith.constant dense<0.000000e+00> : vector<16x32xf32>
    %229 = tpu.matmul %228, %174, %cst_86 {dimension_numbers = #tpu.dot_dimension_numbers<[1], [0], [0], [1], [0, 0, 1, 1], [], []>} : vector<16x32xf32>, vector<32x32xf32>, vector<16x32xf32> -> vector<16x32xf32>
    %230 = arith.addf %224, %229 : vector<16x32xf32>
    %cst_87 = arith.constant 0.000000e+00 : f32
    %231 = vector.broadcast %cst_87 : f32 to vector<16x32xf32>
    %232 = arith.maximumf %230, %231 : vector<16x32xf32>
    %c304 = arith.constant 304 : index
    %c0_88 = arith.constant 0 : index
    %233 = vector.load %arg1[%c304, %c0_88] : memref<776x32xf32, #tpu.memory_space<vmem>>, vector<32x32xf32>
    %c368 = arith.constant 368 : index
    %c0_89 = arith.constant 0 : index
    %234 = vector.load %arg1[%c368, %c0_89] : memref<776x32xf32, #tpu.memory_space<vmem>>, vector<32x32xf32>
    %cst_90 = arith.constant dense<0.000000e+00> : vector<64x32xf32>
    %235 = tpu.matmul %0, %232, %cst_90 {dimension_numbers = #tpu.dot_dimension_numbers<[1], [0], [0], [1], [0, 0, 1, 1], [], []>} : vector<64x16xf32>, vector<16x32xf32>, vector<64x32xf32> -> vector<64x32xf32>
    %cst_91 = arith.constant dense<0.000000e+00> : vector<64x32xf32>
    %236 = tpu.matmul %1, %232, %cst_91 {dimension_numbers = #tpu.dot_dimension_numbers<[1], [0], [0], [1], [0, 0, 1, 1], [], []>} : vector<64x16xf32>, vector<16x32xf32>, vector<64x32xf32> -> vector<64x32xf32>
    %c336 = arith.constant 336 : index
    %c0_92 = arith.constant 0 : index
    %237 = vector.load %arg1[%c336, %c0_92] : memref<776x32xf32, #tpu.memory_space<vmem>>, vector<32x32xf32>
    %c400 = arith.constant 400 : index
    %c0_93 = arith.constant 0 : index
    %238 = vector.load %arg1[%c400, %c0_93] : memref<776x32xf32, #tpu.memory_space<vmem>>, vector<1x32xf32>
    %cst_94 = arith.constant dense<0.000000e+00> : vector<64xf32>
    %239 = vector.multi_reduction <add>, %235, %cst_94 [1] : vector<64x32xf32> to vector<64xf32>
    %240 = vector.shape_cast %239 : vector<64xf32> to vector<64x1xf32>
    %cst_95 = arith.constant 0.000000e+00 : f32
    %241 = vector.broadcast %cst_95 : f32 to vector<64x1xf32>
    %242 = arith.addf %241, %240 : vector<64x1xf32>
    %cst_96 = arith.constant dense<0.000000e+00> : vector<64xf32>
    %243 = vector.multi_reduction <add>, %155, %cst_96 [1] : vector<64x32xf32> to vector<64xf32>
    %244 = vector.shape_cast %243 : vector<64xf32> to vector<64x1xf32>
    %245 = arith.addf %242, %244 : vector<64x1xf32>
    %cst_97 = arith.constant dense<0.000000e+00> : vector<64xf32>
    %246 = vector.multi_reduction <add>, %236, %cst_97 [1] : vector<64x32xf32> to vector<64xf32>
    %247 = vector.shape_cast %246 : vector<64xf32> to vector<64x1xf32>
    %248 = arith.addf %245, %247 : vector<64x1xf32>
    %cst_98 = arith.constant 9.600000e+01 : f32
    %249 = vector.broadcast %cst_98 : f32 to vector<64x1xf32>
    %250 = arith.divf %248, %249 : vector<64x1xf32>
    %251 = vector.broadcast %250 : vector<64x1xf32> to vector<64x32xf32>
    %252 = arith.subf %235, %251 : vector<64x32xf32>
    %253 = arith.mulf %252, %252 : vector<64x32xf32>
    %cst_99 = arith.constant dense<0.000000e+00> : vector<64xf32>
    %254 = vector.multi_reduction <add>, %253, %cst_99 [1] : vector<64x32xf32> to vector<64xf32>
    %255 = vector.shape_cast %254 : vector<64xf32> to vector<64x1xf32>
    %cst_100 = arith.constant 0.000000e+00 : f32
    %256 = vector.broadcast %cst_100 : f32 to vector<64x1xf32>
    %257 = arith.addf %256, %255 : vector<64x1xf32>
    %258 = vector.broadcast %250 : vector<64x1xf32> to vector<64x32xf32>
    %259 = arith.subf %155, %258 : vector<64x32xf32>
    %260 = arith.mulf %259, %259 : vector<64x32xf32>
    %cst_101 = arith.constant dense<0.000000e+00> : vector<64xf32>
    %261 = vector.multi_reduction <add>, %260, %cst_101 [1] : vector<64x32xf32> to vector<64xf32>
    %262 = vector.shape_cast %261 : vector<64xf32> to vector<64x1xf32>
    %263 = arith.addf %257, %262 : vector<64x1xf32>
    %264 = vector.broadcast %250 : vector<64x1xf32> to vector<64x32xf32>
    %265 = arith.subf %236, %264 : vector<64x32xf32>
    %266 = arith.mulf %265, %265 : vector<64x32xf32>
    %cst_102 = arith.constant dense<0.000000e+00> : vector<64xf32>
    %267 = vector.multi_reduction <add>, %266, %cst_102 [1] : vector<64x32xf32> to vector<64xf32>
    %268 = vector.shape_cast %267 : vector<64xf32> to vector<64x1xf32>
    %269 = arith.addf %263, %268 : vector<64x1xf32>
    %cst_103 = arith.constant 9.600000e+01 : f32
    %270 = vector.broadcast %cst_103 : f32 to vector<64x1xf32>
    %271 = arith.divf %269, %270 : vector<64x1xf32>
    %cst_104 = arith.constant 9.99999974E-6 : f32
    %272 = vector.broadcast %cst_104 : f32 to vector<64x1xf32>
    %273 = arith.addf %271, %272 : vector<64x1xf32>
    %274 = math.rsqrt %273 : vector<64x1xf32>
    %275 = vector.broadcast %250 : vector<64x1xf32> to vector<64x32xf32>
    %276 = arith.subf %235, %275 : vector<64x32xf32>
    %277 = vector.broadcast %274 : vector<64x1xf32> to vector<64x32xf32>
    %278 = arith.mulf %276, %277 : vector<64x32xf32>
    %cst_105 = arith.constant dense<0.000000e+00> : vector<64x32xf32>
    %279 = tpu.matmul %278, %233, %cst_105 {dimension_numbers = #tpu.dot_dimension_numbers<[1], [0], [0], [1], [0, 0, 1, 1], [], []>} : vector<64x32xf32>, vector<32x32xf32>, vector<64x32xf32> -> vector<64x32xf32>
    %280 = vector.broadcast %238 : vector<1x32xf32> to vector<64x32xf32>
    %281 = arith.addf %280, %279 : vector<64x32xf32>
    %282 = vector.broadcast %250 : vector<64x1xf32> to vector<64x32xf32>
    %283 = arith.subf %155, %282 : vector<64x32xf32>
    %284 = vector.broadcast %274 : vector<64x1xf32> to vector<64x32xf32>
    %285 = arith.mulf %283, %284 : vector<64x32xf32>
    %cst_106 = arith.constant dense<0.000000e+00> : vector<64x32xf32>
    %286 = tpu.matmul %285, %237, %cst_106 {dimension_numbers = #tpu.dot_dimension_numbers<[1], [0], [0], [1], [0, 0, 1, 1], [], []>} : vector<64x32xf32>, vector<32x32xf32>, vector<64x32xf32> -> vector<64x32xf32>
    %287 = arith.addf %281, %286 : vector<64x32xf32>
    %288 = vector.broadcast %250 : vector<64x1xf32> to vector<64x32xf32>
    %289 = arith.subf %236, %288 : vector<64x32xf32>
    %290 = vector.broadcast %274 : vector<64x1xf32> to vector<64x32xf32>
    %291 = arith.mulf %289, %290 : vector<64x32xf32>
    %cst_107 = arith.constant dense<0.000000e+00> : vector<64x32xf32>
    %292 = tpu.matmul %291, %234, %cst_107 {dimension_numbers = #tpu.dot_dimension_numbers<[1], [0], [0], [1], [0, 0, 1, 1], [], []>} : vector<64x32xf32>, vector<32x32xf32>, vector<64x32xf32> -> vector<64x32xf32>
    %293 = arith.addf %287, %292 : vector<64x32xf32>
    %cst_108 = arith.constant 0.000000e+00 : f32
    %294 = vector.broadcast %cst_108 : f32 to vector<64x32xf32>
    %295 = arith.cmpf ogt, %293, %294 : vector<64x32xf32>
    %cst_109 = arith.constant 0.00999999977 : f32
    %296 = vector.broadcast %cst_109 : f32 to vector<64x32xf32>
    %297 = arith.mulf %296, %293 : vector<64x32xf32>
    %298 = arith.select %295, %293, %297 : vector<64x32xi1>, vector<64x32xf32>
    %cst_110 = arith.constant 0.000000e+00 : f32
    %299 = vector.broadcast %cst_110 : f32 to vector<64x32xf32>
    %c0_111 = arith.constant 0 : index
    %c0_112 = arith.constant 0 : index
    %300 = vector.load %arg2[%c0_111, %c0_112] : memref<296x128xf32, #tpu.memory_space<vmem>>, vector<32x128xf32>
    %c32 = arith.constant 32 : index
    %c0_113 = arith.constant 0 : index
    %301 = vector.load %arg2[%c32, %c0_113] : memref<296x128xf32, #tpu.memory_space<vmem>>, vector<32x128xf32>
    %cst_114 = arith.constant dense<0.000000e+00> : vector<64x128xf32>
    %302 = tpu.matmul %298, %300, %cst_114 {dimension_numbers = #tpu.dot_dimension_numbers<[1], [0], [0], [1], [0, 0, 1, 1], [], []>} : vector<64x32xf32>, vector<32x128xf32>, vector<64x128xf32> -> vector<64x128xf32>
    %cst_115 = arith.constant dense<0.000000e+00> : vector<64x128xf32>
    %303 = tpu.matmul %155, %301, %cst_115 {dimension_numbers = #tpu.dot_dimension_numbers<[1], [0], [0], [1], [0, 0, 1, 1], [], []>} : vector<64x32xf32>, vector<32x128xf32>, vector<64x128xf32> -> vector<64x128xf32>
    %304 = arith.addf %302, %303 : vector<64x128xf32>
    %305 = vector.extract_strided_slice %304 {offsets = [0, 0], sizes = [64, 32], strides = [1, 1]} : vector<64x128xf32> to vector<64x32xf32>
    %306 = arith.negf %305 : vector<64x32xf32>
    %307 = math.exp %306 : vector<64x32xf32>
    %cst_116 = arith.constant 1.000000e+00 : f32
    %308 = vector.broadcast %cst_116 : f32 to vector<64x32xf32>
    %309 = arith.addf %308, %307 : vector<64x32xf32>
    %310 = arith.divf %308, %309 : vector<64x32xf32>
    %311 = vector.extract_strided_slice %304 {offsets = [0, 32], sizes = [64, 32], strides = [1, 1]} : vector<64x128xf32> to vector<64x32xf32>
    %312 = arith.negf %311 : vector<64x32xf32>
    %313 = math.exp %312 : vector<64x32xf32>
    %cst_117 = arith.constant 1.000000e+00 : f32
    %314 = vector.broadcast %cst_117 : f32 to vector<64x32xf32>
    %315 = arith.addf %314, %313 : vector<64x32xf32>
    %316 = arith.divf %314, %315 : vector<64x32xf32>
    %317 = vector.extract_strided_slice %304 {offsets = [0, 64], sizes = [64, 32], strides = [1, 1]} : vector<64x128xf32> to vector<64x32xf32>
    %318 = math.tanh %317 : vector<64x32xf32>
    %319 = vector.extract_strided_slice %304 {offsets = [0, 96], sizes = [64, 32], strides = [1, 1]} : vector<64x128xf32> to vector<64x32xf32>
    %320 = arith.negf %319 : vector<64x32xf32>
    %321 = math.exp %320 : vector<64x32xf32>
    %cst_118 = arith.constant 1.000000e+00 : f32
    %322 = vector.broadcast %cst_118 : f32 to vector<64x32xf32>
    %323 = arith.addf %322, %321 : vector<64x32xf32>
    %324 = arith.divf %322, %323 : vector<64x32xf32>
    %325 = arith.mulf %316, %299 : vector<64x32xf32>
    %326 = arith.mulf %310, %318 : vector<64x32xf32>
    %327 = arith.addf %325, %326 : vector<64x32xf32>
    %328 = math.tanh %327 : vector<64x32xf32>
    %329 = arith.mulf %324, %328 : vector<64x32xf32>
    %c408 = arith.constant 408 : index
    %c0_119 = arith.constant 0 : index
    %330 = vector.load %arg1[%c408, %c0_119] : memref<776x32xf32, #tpu.memory_space<vmem>>, vector<1x32xf32>
    %331 = vector.broadcast %330 : vector<1x32xf32> to vector<64x32xf32>
    %332 = arith.mulf %329, %331 : vector<64x32xf32>
    %cst_120 = arith.constant dense<0.000000e+00> : vector<64xf32>
    %333 = vector.multi_reduction <add>, %332, %cst_120 [1] : vector<64x32xf32> to vector<64xf32>
    %334 = vector.shape_cast %333 : vector<64xf32> to vector<64x1xf32>
    %cst_121 = arith.constant dense<0xFF800000> : vector<1xf32>
    %335 = vector.multi_reduction <maximumf>, %334, %cst_121 [0] : vector<64x1xf32> to vector<1xf32>
    %336 = vector.shape_cast %335 : vector<1xf32> to vector<1x1xf32>
    %337 = vector.broadcast %336 : vector<1x1xf32> to vector<64x1xf32>
    %338 = arith.subf %334, %337 : vector<64x1xf32>
    %339 = math.exp %338 : vector<64x1xf32>
    %cst_122 = arith.constant dense<0.000000e+00> : vector<16x1xf32>
    %340 = tpu.matmul %2, %339, %cst_122 {dimension_numbers = #tpu.dot_dimension_numbers<[1], [0], [0], [1], [0, 0, 1, 1], [], []>} : vector<16x64xf32>, vector<64x1xf32>, vector<16x1xf32> -> vector<16x1xf32>
    %341 = vector.broadcast %339 : vector<64x1xf32> to vector<64x32xf32>
    %342 = arith.mulf %341, %329 : vector<64x32xf32>
    %cst_123 = arith.constant dense<0.000000e+00> : vector<16x32xf32>
    %343 = tpu.matmul %2, %342, %cst_123 {dimension_numbers = #tpu.dot_dimension_numbers<[1], [0], [0], [1], [0, 0, 1, 1], [], []>} : vector<16x64xf32>, vector<64x32xf32>, vector<16x32xf32> -> vector<16x32xf32>
    %344 = vector.broadcast %340 : vector<16x1xf32> to vector<16x32xf32>
    %345 = arith.divf %343, %344 : vector<16x32xf32>
    %c416 = arith.constant 416 : index
    %c0_124 = arith.constant 0 : index
    %346 = vector.load %arg1[%c416, %c0_124] : memref<776x32xf32, #tpu.memory_space<vmem>>, vector<32x32xf32>
    %c448 = arith.constant 448 : index
    %c0_125 = arith.constant 0 : index
    %347 = vector.load %arg1[%c448, %c0_125] : memref<776x32xf32, #tpu.memory_space<vmem>>, vector<32x32xf32>
    %c480 = arith.constant 480 : index
    %c0_126 = arith.constant 0 : index
    %348 = vector.load %arg1[%c480, %c0_126] : memref<776x32xf32, #tpu.memory_space<vmem>>, vector<1x32xf32>
    %cst_127 = arith.constant dense<0.000000e+00> : vector<16xf32>
    %349 = vector.multi_reduction <add>, %232, %cst_127 [1] : vector<16x32xf32> to vector<16xf32>
    %350 = vector.shape_cast %349 : vector<16xf32> to vector<16x1xf32>
    %cst_128 = arith.constant 0.000000e+00 : f32
    %351 = vector.broadcast %cst_128 : f32 to vector<16x1xf32>
    %352 = arith.addf %351, %350 : vector<16x1xf32>
    %cst_129 = arith.constant dense<0.000000e+00> : vector<16xf32>
    %353 = vector.multi_reduction <add>, %345, %cst_129 [1] : vector<16x32xf32> to vector<16xf32>
    %354 = vector.shape_cast %353 : vector<16xf32> to vector<16x1xf32>
    %355 = arith.addf %352, %354 : vector<16x1xf32>
    %cst_130 = arith.constant 6.400000e+01 : f32
    %356 = vector.broadcast %cst_130 : f32 to vector<16x1xf32>
    %357 = arith.divf %355, %356 : vector<16x1xf32>
    %358 = vector.broadcast %357 : vector<16x1xf32> to vector<16x32xf32>
    %359 = arith.subf %232, %358 : vector<16x32xf32>
    %360 = arith.mulf %359, %359 : vector<16x32xf32>
    %cst_131 = arith.constant dense<0.000000e+00> : vector<16xf32>
    %361 = vector.multi_reduction <add>, %360, %cst_131 [1] : vector<16x32xf32> to vector<16xf32>
    %362 = vector.shape_cast %361 : vector<16xf32> to vector<16x1xf32>
    %cst_132 = arith.constant 0.000000e+00 : f32
    %363 = vector.broadcast %cst_132 : f32 to vector<16x1xf32>
    %364 = arith.addf %363, %362 : vector<16x1xf32>
    %365 = vector.broadcast %357 : vector<16x1xf32> to vector<16x32xf32>
    %366 = arith.subf %345, %365 : vector<16x32xf32>
    %367 = arith.mulf %366, %366 : vector<16x32xf32>
    %cst_133 = arith.constant dense<0.000000e+00> : vector<16xf32>
    %368 = vector.multi_reduction <add>, %367, %cst_133 [1] : vector<16x32xf32> to vector<16xf32>
    %369 = vector.shape_cast %368 : vector<16xf32> to vector<16x1xf32>
    %370 = arith.addf %364, %369 : vector<16x1xf32>
    %cst_134 = arith.constant 6.400000e+01 : f32
    %371 = vector.broadcast %cst_134 : f32 to vector<16x1xf32>
    %372 = arith.divf %370, %371 : vector<16x1xf32>
    %cst_135 = arith.constant 9.99999974E-6 : f32
    %373 = vector.broadcast %cst_135 : f32 to vector<16x1xf32>
    %374 = arith.addf %372, %373 : vector<16x1xf32>
    %375 = math.rsqrt %374 : vector<16x1xf32>
    %376 = vector.broadcast %357 : vector<16x1xf32> to vector<16x32xf32>
    %377 = arith.subf %232, %376 : vector<16x32xf32>
    %378 = vector.broadcast %375 : vector<16x1xf32> to vector<16x32xf32>
    %379 = arith.mulf %377, %378 : vector<16x32xf32>
    %cst_136 = arith.constant dense<0.000000e+00> : vector<16x32xf32>
    %380 = tpu.matmul %379, %346, %cst_136 {dimension_numbers = #tpu.dot_dimension_numbers<[1], [0], [0], [1], [0, 0, 1, 1], [], []>} : vector<16x32xf32>, vector<32x32xf32>, vector<16x32xf32> -> vector<16x32xf32>
    %381 = vector.broadcast %348 : vector<1x32xf32> to vector<16x32xf32>
    %382 = arith.addf %381, %380 : vector<16x32xf32>
    %383 = vector.broadcast %357 : vector<16x1xf32> to vector<16x32xf32>
    %384 = arith.subf %345, %383 : vector<16x32xf32>
    %385 = vector.broadcast %375 : vector<16x1xf32> to vector<16x32xf32>
    %386 = arith.mulf %384, %385 : vector<16x32xf32>
    %cst_137 = arith.constant dense<0.000000e+00> : vector<16x32xf32>
    %387 = tpu.matmul %386, %347, %cst_137 {dimension_numbers = #tpu.dot_dimension_numbers<[1], [0], [0], [1], [0, 0, 1, 1], [], []>} : vector<16x32xf32>, vector<32x32xf32>, vector<16x32xf32> -> vector<16x32xf32>
    %388 = arith.addf %382, %387 : vector<16x32xf32>
    %cst_138 = arith.constant 0.000000e+00 : f32
    %389 = vector.broadcast %cst_138 : f32 to vector<16x32xf32>
    %390 = arith.maximumf %388, %389 : vector<16x32xf32>
    %cst_139 = arith.constant 0.000000e+00 : f32
    %391 = vector.broadcast %cst_139 : f32 to vector<16x32xf32>
    %c64_140 = arith.constant 64 : index
    %c0_141 = arith.constant 0 : index
    %392 = vector.load %arg2[%c64_140, %c0_141] : memref<296x128xf32, #tpu.memory_space<vmem>>, vector<32x128xf32>
    %c96 = arith.constant 96 : index
    %c0_142 = arith.constant 0 : index
    %393 = vector.load %arg2[%c96, %c0_142] : memref<296x128xf32, #tpu.memory_space<vmem>>, vector<32x128xf32>
    %cst_143 = arith.constant dense<0.000000e+00> : vector<16x128xf32>
    %394 = tpu.matmul %390, %392, %cst_143 {dimension_numbers = #tpu.dot_dimension_numbers<[1], [0], [0], [1], [0, 0, 1, 1], [], []>} : vector<16x32xf32>, vector<32x128xf32>, vector<16x128xf32> -> vector<16x128xf32>
    %cst_144 = arith.constant dense<0.000000e+00> : vector<16x128xf32>
    %395 = tpu.matmul %232, %393, %cst_144 {dimension_numbers = #tpu.dot_dimension_numbers<[1], [0], [0], [1], [0, 0, 1, 1], [], []>} : vector<16x32xf32>, vector<32x128xf32>, vector<16x128xf32> -> vector<16x128xf32>
    %396 = arith.addf %394, %395 : vector<16x128xf32>
    %397 = vector.extract_strided_slice %396 {offsets = [0, 0], sizes = [16, 32], strides = [1, 1]} : vector<16x128xf32> to vector<16x32xf32>
    %398 = arith.negf %397 : vector<16x32xf32>
    %399 = math.exp %398 : vector<16x32xf32>
    %cst_145 = arith.constant 1.000000e+00 : f32
    %400 = vector.broadcast %cst_145 : f32 to vector<16x32xf32>
    %401 = arith.addf %400, %399 : vector<16x32xf32>
    %402 = arith.divf %400, %401 : vector<16x32xf32>
    %403 = vector.extract_strided_slice %396 {offsets = [0, 32], sizes = [16, 32], strides = [1, 1]} : vector<16x128xf32> to vector<16x32xf32>
    %404 = arith.negf %403 : vector<16x32xf32>
    %405 = math.exp %404 : vector<16x32xf32>
    %cst_146 = arith.constant 1.000000e+00 : f32
    %406 = vector.broadcast %cst_146 : f32 to vector<16x32xf32>
    %407 = arith.addf %406, %405 : vector<16x32xf32>
    %408 = arith.divf %406, %407 : vector<16x32xf32>
    %409 = vector.extract_strided_slice %396 {offsets = [0, 64], sizes = [16, 32], strides = [1, 1]} : vector<16x128xf32> to vector<16x32xf32>
    %410 = math.tanh %409 : vector<16x32xf32>
    %411 = vector.extract_strided_slice %396 {offsets = [0, 96], sizes = [16, 32], strides = [1, 1]} : vector<16x128xf32> to vector<16x32xf32>
    %412 = arith.negf %411 : vector<16x32xf32>
    %413 = math.exp %412 : vector<16x32xf32>
    %cst_147 = arith.constant 1.000000e+00 : f32
    %414 = vector.broadcast %cst_147 : f32 to vector<16x32xf32>
    %415 = arith.addf %414, %413 : vector<16x32xf32>
    %416 = arith.divf %414, %415 : vector<16x32xf32>
    %417 = arith.mulf %408, %391 : vector<16x32xf32>
    %418 = arith.mulf %402, %410 : vector<16x32xf32>
    %419 = arith.addf %417, %418 : vector<16x32xf32>
    %420 = math.tanh %419 : vector<16x32xf32>
    %421 = arith.mulf %416, %420 : vector<16x32xf32>
    %c488 = arith.constant 488 : index
    %c0_148 = arith.constant 0 : index
    %422 = vector.load %arg1[%c488, %c0_148] : memref<776x32xf32, #tpu.memory_space<vmem>>, vector<32x32xf32>
    %c552 = arith.constant 552 : index
    %c0_149 = arith.constant 0 : index
    %423 = vector.load %arg1[%c552, %c0_149] : memref<776x32xf32, #tpu.memory_space<vmem>>, vector<32x32xf32>
    %cst_150 = arith.constant dense<0.000000e+00> : vector<64x32xf32>
    %424 = tpu.matmul %0, %421, %cst_150 {dimension_numbers = #tpu.dot_dimension_numbers<[1], [0], [0], [1], [0, 0, 1, 1], [], []>} : vector<64x16xf32>, vector<16x32xf32>, vector<64x32xf32> -> vector<64x32xf32>
    %cst_151 = arith.constant dense<0.000000e+00> : vector<64x32xf32>
    %425 = tpu.matmul %1, %421, %cst_151 {dimension_numbers = #tpu.dot_dimension_numbers<[1], [0], [0], [1], [0, 0, 1, 1], [], []>} : vector<64x16xf32>, vector<16x32xf32>, vector<64x32xf32> -> vector<64x32xf32>
    %c520 = arith.constant 520 : index
    %c0_152 = arith.constant 0 : index
    %426 = vector.load %arg1[%c520, %c0_152] : memref<776x32xf32, #tpu.memory_space<vmem>>, vector<32x32xf32>
    %c584 = arith.constant 584 : index
    %c0_153 = arith.constant 0 : index
    %427 = vector.load %arg1[%c584, %c0_153] : memref<776x32xf32, #tpu.memory_space<vmem>>, vector<1x32xf32>
    %cst_154 = arith.constant dense<0.000000e+00> : vector<64xf32>
    %428 = vector.multi_reduction <add>, %424, %cst_154 [1] : vector<64x32xf32> to vector<64xf32>
    %429 = vector.shape_cast %428 : vector<64xf32> to vector<64x1xf32>
    %cst_155 = arith.constant 0.000000e+00 : f32
    %430 = vector.broadcast %cst_155 : f32 to vector<64x1xf32>
    %431 = arith.addf %430, %429 : vector<64x1xf32>
    %cst_156 = arith.constant dense<0.000000e+00> : vector<64xf32>
    %432 = vector.multi_reduction <add>, %329, %cst_156 [1] : vector<64x32xf32> to vector<64xf32>
    %433 = vector.shape_cast %432 : vector<64xf32> to vector<64x1xf32>
    %434 = arith.addf %431, %433 : vector<64x1xf32>
    %cst_157 = arith.constant dense<0.000000e+00> : vector<64xf32>
    %435 = vector.multi_reduction <add>, %425, %cst_157 [1] : vector<64x32xf32> to vector<64xf32>
    %436 = vector.shape_cast %435 : vector<64xf32> to vector<64x1xf32>
    %437 = arith.addf %434, %436 : vector<64x1xf32>
    %cst_158 = arith.constant 9.600000e+01 : f32
    %438 = vector.broadcast %cst_158 : f32 to vector<64x1xf32>
    %439 = arith.divf %437, %438 : vector<64x1xf32>
    %440 = vector.broadcast %439 : vector<64x1xf32> to vector<64x32xf32>
    %441 = arith.subf %424, %440 : vector<64x32xf32>
    %442 = arith.mulf %441, %441 : vector<64x32xf32>
    %cst_159 = arith.constant dense<0.000000e+00> : vector<64xf32>
    %443 = vector.multi_reduction <add>, %442, %cst_159 [1] : vector<64x32xf32> to vector<64xf32>
    %444 = vector.shape_cast %443 : vector<64xf32> to vector<64x1xf32>
    %cst_160 = arith.constant 0.000000e+00 : f32
    %445 = vector.broadcast %cst_160 : f32 to vector<64x1xf32>
    %446 = arith.addf %445, %444 : vector<64x1xf32>
    %447 = vector.broadcast %439 : vector<64x1xf32> to vector<64x32xf32>
    %448 = arith.subf %329, %447 : vector<64x32xf32>
    %449 = arith.mulf %448, %448 : vector<64x32xf32>
    %cst_161 = arith.constant dense<0.000000e+00> : vector<64xf32>
    %450 = vector.multi_reduction <add>, %449, %cst_161 [1] : vector<64x32xf32> to vector<64xf32>
    %451 = vector.shape_cast %450 : vector<64xf32> to vector<64x1xf32>
    %452 = arith.addf %446, %451 : vector<64x1xf32>
    %453 = vector.broadcast %439 : vector<64x1xf32> to vector<64x32xf32>
    %454 = arith.subf %425, %453 : vector<64x32xf32>
    %455 = arith.mulf %454, %454 : vector<64x32xf32>
    %cst_162 = arith.constant dense<0.000000e+00> : vector<64xf32>
    %456 = vector.multi_reduction <add>, %455, %cst_162 [1] : vector<64x32xf32> to vector<64xf32>
    %457 = vector.shape_cast %456 : vector<64xf32> to vector<64x1xf32>
    %458 = arith.addf %452, %457 : vector<64x1xf32>
    %cst_163 = arith.constant 9.600000e+01 : f32
    %459 = vector.broadcast %cst_163 : f32 to vector<64x1xf32>
    %460 = arith.divf %458, %459 : vector<64x1xf32>
    %cst_164 = arith.constant 9.99999974E-6 : f32
    %461 = vector.broadcast %cst_164 : f32 to vector<64x1xf32>
    %462 = arith.addf %460, %461 : vector<64x1xf32>
    %463 = math.rsqrt %462 : vector<64x1xf32>
    %464 = vector.broadcast %439 : vector<64x1xf32> to vector<64x32xf32>
    %465 = arith.subf %424, %464 : vector<64x32xf32>
    %466 = vector.broadcast %463 : vector<64x1xf32> to vector<64x32xf32>
    %467 = arith.mulf %465, %466 : vector<64x32xf32>
    %cst_165 = arith.constant dense<0.000000e+00> : vector<64x32xf32>
    %468 = tpu.matmul %467, %422, %cst_165 {dimension_numbers = #tpu.dot_dimension_numbers<[1], [0], [0], [1], [0, 0, 1, 1], [], []>} : vector<64x32xf32>, vector<32x32xf32>, vector<64x32xf32> -> vector<64x32xf32>
    %469 = vector.broadcast %427 : vector<1x32xf32> to vector<64x32xf32>
    %470 = arith.addf %469, %468 : vector<64x32xf32>
    %471 = vector.broadcast %439 : vector<64x1xf32> to vector<64x32xf32>
    %472 = arith.subf %329, %471 : vector<64x32xf32>
    %473 = vector.broadcast %463 : vector<64x1xf32> to vector<64x32xf32>
    %474 = arith.mulf %472, %473 : vector<64x32xf32>
    %cst_166 = arith.constant dense<0.000000e+00> : vector<64x32xf32>
    %475 = tpu.matmul %474, %426, %cst_166 {dimension_numbers = #tpu.dot_dimension_numbers<[1], [0], [0], [1], [0, 0, 1, 1], [], []>} : vector<64x32xf32>, vector<32x32xf32>, vector<64x32xf32> -> vector<64x32xf32>
    %476 = arith.addf %470, %475 : vector<64x32xf32>
    %477 = vector.broadcast %439 : vector<64x1xf32> to vector<64x32xf32>
    %478 = arith.subf %425, %477 : vector<64x32xf32>
    %479 = vector.broadcast %463 : vector<64x1xf32> to vector<64x32xf32>
    %480 = arith.mulf %478, %479 : vector<64x32xf32>
    %cst_167 = arith.constant dense<0.000000e+00> : vector<64x32xf32>
    %481 = tpu.matmul %480, %423, %cst_167 {dimension_numbers = #tpu.dot_dimension_numbers<[1], [0], [0], [1], [0, 0, 1, 1], [], []>} : vector<64x32xf32>, vector<32x32xf32>, vector<64x32xf32> -> vector<64x32xf32>
    %482 = arith.addf %476, %481 : vector<64x32xf32>
    %cst_168 = arith.constant 0.000000e+00 : f32
    %483 = vector.broadcast %cst_168 : f32 to vector<64x32xf32>
    %484 = arith.cmpf ogt, %482, %483 : vector<64x32xf32>
    %cst_169 = arith.constant 0.00999999977 : f32
    %485 = vector.broadcast %cst_169 : f32 to vector<64x32xf32>
    %486 = arith.mulf %485, %482 : vector<64x32xf32>
    %487 = arith.select %484, %482, %486 : vector<64x32xi1>, vector<64x32xf32>
    %c128 = arith.constant 128 : index
    %c0_170 = arith.constant 0 : index
    %488 = vector.load %arg2[%c128, %c0_170] : memref<296x128xf32, #tpu.memory_space<vmem>>, vector<32x128xf32>
    %c160 = arith.constant 160 : index
    %c0_171 = arith.constant 0 : index
    %489 = vector.load %arg2[%c160, %c0_171] : memref<296x128xf32, #tpu.memory_space<vmem>>, vector<32x128xf32>
    %cst_172 = arith.constant dense<0.000000e+00> : vector<64x128xf32>
    %490 = tpu.matmul %487, %488, %cst_172 {dimension_numbers = #tpu.dot_dimension_numbers<[1], [0], [0], [1], [0, 0, 1, 1], [], []>} : vector<64x32xf32>, vector<32x128xf32>, vector<64x128xf32> -> vector<64x128xf32>
    %cst_173 = arith.constant dense<0.000000e+00> : vector<64x128xf32>
    %491 = tpu.matmul %329, %489, %cst_173 {dimension_numbers = #tpu.dot_dimension_numbers<[1], [0], [0], [1], [0, 0, 1, 1], [], []>} : vector<64x32xf32>, vector<32x128xf32>, vector<64x128xf32> -> vector<64x128xf32>
    %492 = arith.addf %490, %491 : vector<64x128xf32>
    %493 = vector.extract_strided_slice %492 {offsets = [0, 0], sizes = [64, 32], strides = [1, 1]} : vector<64x128xf32> to vector<64x32xf32>
    %494 = arith.negf %493 : vector<64x32xf32>
    %495 = math.exp %494 : vector<64x32xf32>
    %cst_174 = arith.constant 1.000000e+00 : f32
    %496 = vector.broadcast %cst_174 : f32 to vector<64x32xf32>
    %497 = arith.addf %496, %495 : vector<64x32xf32>
    %498 = arith.divf %496, %497 : vector<64x32xf32>
    %499 = vector.extract_strided_slice %492 {offsets = [0, 32], sizes = [64, 32], strides = [1, 1]} : vector<64x128xf32> to vector<64x32xf32>
    %500 = arith.negf %499 : vector<64x32xf32>
    %501 = math.exp %500 : vector<64x32xf32>
    %cst_175 = arith.constant 1.000000e+00 : f32
    %502 = vector.broadcast %cst_175 : f32 to vector<64x32xf32>
    %503 = arith.addf %502, %501 : vector<64x32xf32>
    %504 = arith.divf %502, %503 : vector<64x32xf32>
    %505 = vector.extract_strided_slice %492 {offsets = [0, 64], sizes = [64, 32], strides = [1, 1]} : vector<64x128xf32> to vector<64x32xf32>
    %506 = math.tanh %505 : vector<64x32xf32>
    %507 = vector.extract_strided_slice %492 {offsets = [0, 96], sizes = [64, 32], strides = [1, 1]} : vector<64x128xf32> to vector<64x32xf32>
    %508 = arith.negf %507 : vector<64x32xf32>
    %509 = math.exp %508 : vector<64x32xf32>
    %cst_176 = arith.constant 1.000000e+00 : f32
    %510 = vector.broadcast %cst_176 : f32 to vector<64x32xf32>
    %511 = arith.addf %510, %509 : vector<64x32xf32>
    %512 = arith.divf %510, %511 : vector<64x32xf32>
    %513 = arith.mulf %504, %327 : vector<64x32xf32>
    %514 = arith.mulf %498, %506 : vector<64x32xf32>
    %515 = arith.addf %513, %514 : vector<64x32xf32>
    %516 = math.tanh %515 : vector<64x32xf32>
    %517 = arith.mulf %512, %516 : vector<64x32xf32>
    %c592 = arith.constant 592 : index
    %c0_177 = arith.constant 0 : index
    %518 = vector.load %arg1[%c592, %c0_177] : memref<776x32xf32, #tpu.memory_space<vmem>>, vector<1x32xf32>
    %519 = vector.broadcast %518 : vector<1x32xf32> to vector<64x32xf32>
    %520 = arith.mulf %517, %519 : vector<64x32xf32>
    %cst_178 = arith.constant dense<0.000000e+00> : vector<64xf32>
    %521 = vector.multi_reduction <add>, %520, %cst_178 [1] : vector<64x32xf32> to vector<64xf32>
    %522 = vector.shape_cast %521 : vector<64xf32> to vector<64x1xf32>
    %cst_179 = arith.constant dense<0xFF800000> : vector<1xf32>
    %523 = vector.multi_reduction <maximumf>, %522, %cst_179 [0] : vector<64x1xf32> to vector<1xf32>
    %524 = vector.shape_cast %523 : vector<1xf32> to vector<1x1xf32>
    %525 = vector.broadcast %524 : vector<1x1xf32> to vector<64x1xf32>
    %526 = arith.subf %522, %525 : vector<64x1xf32>
    %527 = math.exp %526 : vector<64x1xf32>
    %cst_180 = arith.constant dense<0.000000e+00> : vector<16x1xf32>
    %528 = tpu.matmul %2, %527, %cst_180 {dimension_numbers = #tpu.dot_dimension_numbers<[1], [0], [0], [1], [0, 0, 1, 1], [], []>} : vector<16x64xf32>, vector<64x1xf32>, vector<16x1xf32> -> vector<16x1xf32>
    %529 = vector.broadcast %527 : vector<64x1xf32> to vector<64x32xf32>
    %530 = arith.mulf %529, %517 : vector<64x32xf32>
    %cst_181 = arith.constant dense<0.000000e+00> : vector<16x32xf32>
    %531 = tpu.matmul %2, %530, %cst_181 {dimension_numbers = #tpu.dot_dimension_numbers<[1], [0], [0], [1], [0, 0, 1, 1], [], []>} : vector<16x64xf32>, vector<64x32xf32>, vector<16x32xf32> -> vector<16x32xf32>
    %532 = vector.broadcast %528 : vector<16x1xf32> to vector<16x32xf32>
    %533 = arith.divf %531, %532 : vector<16x32xf32>
    %c600 = arith.constant 600 : index
    %c0_182 = arith.constant 0 : index
    %534 = vector.load %arg1[%c600, %c0_182] : memref<776x32xf32, #tpu.memory_space<vmem>>, vector<32x32xf32>
    %c632 = arith.constant 632 : index
    %c0_183 = arith.constant 0 : index
    %535 = vector.load %arg1[%c632, %c0_183] : memref<776x32xf32, #tpu.memory_space<vmem>>, vector<32x32xf32>
    %c664 = arith.constant 664 : index
    %c0_184 = arith.constant 0 : index
    %536 = vector.load %arg1[%c664, %c0_184] : memref<776x32xf32, #tpu.memory_space<vmem>>, vector<1x32xf32>
    %cst_185 = arith.constant dense<0.000000e+00> : vector<16xf32>
    %537 = vector.multi_reduction <add>, %421, %cst_185 [1] : vector<16x32xf32> to vector<16xf32>
    %538 = vector.shape_cast %537 : vector<16xf32> to vector<16x1xf32>
    %cst_186 = arith.constant 0.000000e+00 : f32
    %539 = vector.broadcast %cst_186 : f32 to vector<16x1xf32>
    %540 = arith.addf %539, %538 : vector<16x1xf32>
    %cst_187 = arith.constant dense<0.000000e+00> : vector<16xf32>
    %541 = vector.multi_reduction <add>, %533, %cst_187 [1] : vector<16x32xf32> to vector<16xf32>
    %542 = vector.shape_cast %541 : vector<16xf32> to vector<16x1xf32>
    %543 = arith.addf %540, %542 : vector<16x1xf32>
    %cst_188 = arith.constant 6.400000e+01 : f32
    %544 = vector.broadcast %cst_188 : f32 to vector<16x1xf32>
    %545 = arith.divf %543, %544 : vector<16x1xf32>
    %546 = vector.broadcast %545 : vector<16x1xf32> to vector<16x32xf32>
    %547 = arith.subf %421, %546 : vector<16x32xf32>
    %548 = arith.mulf %547, %547 : vector<16x32xf32>
    %cst_189 = arith.constant dense<0.000000e+00> : vector<16xf32>
    %549 = vector.multi_reduction <add>, %548, %cst_189 [1] : vector<16x32xf32> to vector<16xf32>
    %550 = vector.shape_cast %549 : vector<16xf32> to vector<16x1xf32>
    %cst_190 = arith.constant 0.000000e+00 : f32
    %551 = vector.broadcast %cst_190 : f32 to vector<16x1xf32>
    %552 = arith.addf %551, %550 : vector<16x1xf32>
    %553 = vector.broadcast %545 : vector<16x1xf32> to vector<16x32xf32>
    %554 = arith.subf %533, %553 : vector<16x32xf32>
    %555 = arith.mulf %554, %554 : vector<16x32xf32>
    %cst_191 = arith.constant dense<0.000000e+00> : vector<16xf32>
    %556 = vector.multi_reduction <add>, %555, %cst_191 [1] : vector<16x32xf32> to vector<16xf32>
    %557 = vector.shape_cast %556 : vector<16xf32> to vector<16x1xf32>
    %558 = arith.addf %552, %557 : vector<16x1xf32>
    %cst_192 = arith.constant 6.400000e+01 : f32
    %559 = vector.broadcast %cst_192 : f32 to vector<16x1xf32>
    %560 = arith.divf %558, %559 : vector<16x1xf32>
    %cst_193 = arith.constant 9.99999974E-6 : f32
    %561 = vector.broadcast %cst_193 : f32 to vector<16x1xf32>
    %562 = arith.addf %560, %561 : vector<16x1xf32>
    %563 = math.rsqrt %562 : vector<16x1xf32>
    %564 = vector.broadcast %545 : vector<16x1xf32> to vector<16x32xf32>
    %565 = arith.subf %421, %564 : vector<16x32xf32>
    %566 = vector.broadcast %563 : vector<16x1xf32> to vector<16x32xf32>
    %567 = arith.mulf %565, %566 : vector<16x32xf32>
    %cst_194 = arith.constant dense<0.000000e+00> : vector<16x32xf32>
    %568 = tpu.matmul %567, %534, %cst_194 {dimension_numbers = #tpu.dot_dimension_numbers<[1], [0], [0], [1], [0, 0, 1, 1], [], []>} : vector<16x32xf32>, vector<32x32xf32>, vector<16x32xf32> -> vector<16x32xf32>
    %569 = vector.broadcast %536 : vector<1x32xf32> to vector<16x32xf32>
    %570 = arith.addf %569, %568 : vector<16x32xf32>
    %571 = vector.broadcast %545 : vector<16x1xf32> to vector<16x32xf32>
    %572 = arith.subf %533, %571 : vector<16x32xf32>
    %573 = vector.broadcast %563 : vector<16x1xf32> to vector<16x32xf32>
    %574 = arith.mulf %572, %573 : vector<16x32xf32>
    %cst_195 = arith.constant dense<0.000000e+00> : vector<16x32xf32>
    %575 = tpu.matmul %574, %535, %cst_195 {dimension_numbers = #tpu.dot_dimension_numbers<[1], [0], [0], [1], [0, 0, 1, 1], [], []>} : vector<16x32xf32>, vector<32x32xf32>, vector<16x32xf32> -> vector<16x32xf32>
    %576 = arith.addf %570, %575 : vector<16x32xf32>
    %cst_196 = arith.constant 0.000000e+00 : f32
    %577 = vector.broadcast %cst_196 : f32 to vector<16x32xf32>
    %578 = arith.maximumf %576, %577 : vector<16x32xf32>
    %c192_197 = arith.constant 192 : index
    %c0_198 = arith.constant 0 : index
    %579 = vector.load %arg2[%c192_197, %c0_198] : memref<296x128xf32, #tpu.memory_space<vmem>>, vector<32x128xf32>
    %c224 = arith.constant 224 : index
    %c0_199 = arith.constant 0 : index
    %580 = vector.load %arg2[%c224, %c0_199] : memref<296x128xf32, #tpu.memory_space<vmem>>, vector<32x128xf32>
    %cst_200 = arith.constant dense<0.000000e+00> : vector<16x128xf32>
    %581 = tpu.matmul %578, %579, %cst_200 {dimension_numbers = #tpu.dot_dimension_numbers<[1], [0], [0], [1], [0, 0, 1, 1], [], []>} : vector<16x32xf32>, vector<32x128xf32>, vector<16x128xf32> -> vector<16x128xf32>
    %cst_201 = arith.constant dense<0.000000e+00> : vector<16x128xf32>
    %582 = tpu.matmul %421, %580, %cst_201 {dimension_numbers = #tpu.dot_dimension_numbers<[1], [0], [0], [1], [0, 0, 1, 1], [], []>} : vector<16x32xf32>, vector<32x128xf32>, vector<16x128xf32> -> vector<16x128xf32>
    %583 = arith.addf %581, %582 : vector<16x128xf32>
    %584 = vector.extract_strided_slice %583 {offsets = [0, 0], sizes = [16, 32], strides = [1, 1]} : vector<16x128xf32> to vector<16x32xf32>
    %585 = arith.negf %584 : vector<16x32xf32>
    %586 = math.exp %585 : vector<16x32xf32>
    %cst_202 = arith.constant 1.000000e+00 : f32
    %587 = vector.broadcast %cst_202 : f32 to vector<16x32xf32>
    %588 = arith.addf %587, %586 : vector<16x32xf32>
    %589 = arith.divf %587, %588 : vector<16x32xf32>
    %590 = vector.extract_strided_slice %583 {offsets = [0, 32], sizes = [16, 32], strides = [1, 1]} : vector<16x128xf32> to vector<16x32xf32>
    %591 = arith.negf %590 : vector<16x32xf32>
    %592 = math.exp %591 : vector<16x32xf32>
    %cst_203 = arith.constant 1.000000e+00 : f32
    %593 = vector.broadcast %cst_203 : f32 to vector<16x32xf32>
    %594 = arith.addf %593, %592 : vector<16x32xf32>
    %595 = arith.divf %593, %594 : vector<16x32xf32>
    %596 = vector.extract_strided_slice %583 {offsets = [0, 64], sizes = [16, 32], strides = [1, 1]} : vector<16x128xf32> to vector<16x32xf32>
    %597 = math.tanh %596 : vector<16x32xf32>
    %598 = vector.extract_strided_slice %583 {offsets = [0, 96], sizes = [16, 32], strides = [1, 1]} : vector<16x128xf32> to vector<16x32xf32>
    %599 = arith.negf %598 : vector<16x32xf32>
    %600 = math.exp %599 : vector<16x32xf32>
    %cst_204 = arith.constant 1.000000e+00 : f32
    %601 = vector.broadcast %cst_204 : f32 to vector<16x32xf32>
    %602 = arith.addf %601, %600 : vector<16x32xf32>
    %603 = arith.divf %601, %602 : vector<16x32xf32>
    %604 = arith.mulf %595, %419 : vector<16x32xf32>
    %605 = arith.mulf %589, %597 : vector<16x32xf32>
    %606 = arith.addf %604, %605 : vector<16x32xf32>
    %607 = math.tanh %606 : vector<16x32xf32>
    %608 = arith.mulf %603, %607 : vector<16x32xf32>
    %c672 = arith.constant 672 : index
    %c0_205 = arith.constant 0 : index
    %609 = vector.load %arg1[%c672, %c0_205] : memref<776x32xf32, #tpu.memory_space<vmem>>, vector<32x32xf32>
    %c736 = arith.constant 736 : index
    %c0_206 = arith.constant 0 : index
    %610 = vector.load %arg1[%c736, %c0_206] : memref<776x32xf32, #tpu.memory_space<vmem>>, vector<32x32xf32>
    %cst_207 = arith.constant dense<0.000000e+00> : vector<64x32xf32>
    %611 = tpu.matmul %0, %608, %cst_207 {dimension_numbers = #tpu.dot_dimension_numbers<[1], [0], [0], [1], [0, 0, 1, 1], [], []>} : vector<64x16xf32>, vector<16x32xf32>, vector<64x32xf32> -> vector<64x32xf32>
    %cst_208 = arith.constant dense<0.000000e+00> : vector<64x32xf32>
    %612 = tpu.matmul %1, %608, %cst_208 {dimension_numbers = #tpu.dot_dimension_numbers<[1], [0], [0], [1], [0, 0, 1, 1], [], []>} : vector<64x16xf32>, vector<16x32xf32>, vector<64x32xf32> -> vector<64x32xf32>
    %c704 = arith.constant 704 : index
    %c0_209 = arith.constant 0 : index
    %613 = vector.load %arg1[%c704, %c0_209] : memref<776x32xf32, #tpu.memory_space<vmem>>, vector<32x32xf32>
    %c768 = arith.constant 768 : index
    %c0_210 = arith.constant 0 : index
    %614 = vector.load %arg1[%c768, %c0_210] : memref<776x32xf32, #tpu.memory_space<vmem>>, vector<1x32xf32>
    %cst_211 = arith.constant dense<0.000000e+00> : vector<64xf32>
    %615 = vector.multi_reduction <add>, %611, %cst_211 [1] : vector<64x32xf32> to vector<64xf32>
    %616 = vector.shape_cast %615 : vector<64xf32> to vector<64x1xf32>
    %cst_212 = arith.constant 0.000000e+00 : f32
    %617 = vector.broadcast %cst_212 : f32 to vector<64x1xf32>
    %618 = arith.addf %617, %616 : vector<64x1xf32>
    %cst_213 = arith.constant dense<0.000000e+00> : vector<64xf32>
    %619 = vector.multi_reduction <add>, %517, %cst_213 [1] : vector<64x32xf32> to vector<64xf32>
    %620 = vector.shape_cast %619 : vector<64xf32> to vector<64x1xf32>
    %621 = arith.addf %618, %620 : vector<64x1xf32>
    %cst_214 = arith.constant dense<0.000000e+00> : vector<64xf32>
    %622 = vector.multi_reduction <add>, %612, %cst_214 [1] : vector<64x32xf32> to vector<64xf32>
    %623 = vector.shape_cast %622 : vector<64xf32> to vector<64x1xf32>
    %624 = arith.addf %621, %623 : vector<64x1xf32>
    %cst_215 = arith.constant 9.600000e+01 : f32
    %625 = vector.broadcast %cst_215 : f32 to vector<64x1xf32>
    %626 = arith.divf %624, %625 : vector<64x1xf32>
    %627 = vector.broadcast %626 : vector<64x1xf32> to vector<64x32xf32>
    %628 = arith.subf %611, %627 : vector<64x32xf32>
    %629 = arith.mulf %628, %628 : vector<64x32xf32>
    %cst_216 = arith.constant dense<0.000000e+00> : vector<64xf32>
    %630 = vector.multi_reduction <add>, %629, %cst_216 [1] : vector<64x32xf32> to vector<64xf32>
    %631 = vector.shape_cast %630 : vector<64xf32> to vector<64x1xf32>
    %cst_217 = arith.constant 0.000000e+00 : f32
    %632 = vector.broadcast %cst_217 : f32 to vector<64x1xf32>
    %633 = arith.addf %632, %631 : vector<64x1xf32>
    %634 = vector.broadcast %626 : vector<64x1xf32> to vector<64x32xf32>
    %635 = arith.subf %517, %634 : vector<64x32xf32>
    %636 = arith.mulf %635, %635 : vector<64x32xf32>
    %cst_218 = arith.constant dense<0.000000e+00> : vector<64xf32>
    %637 = vector.multi_reduction <add>, %636, %cst_218 [1] : vector<64x32xf32> to vector<64xf32>
    %638 = vector.shape_cast %637 : vector<64xf32> to vector<64x1xf32>
    %639 = arith.addf %633, %638 : vector<64x1xf32>
    %640 = vector.broadcast %626 : vector<64x1xf32> to vector<64x32xf32>
    %641 = arith.subf %612, %640 : vector<64x32xf32>
    %642 = arith.mulf %641, %641 : vector<64x32xf32>
    %cst_219 = arith.constant dense<0.000000e+00> : vector<64xf32>
    %643 = vector.multi_reduction <add>, %642, %cst_219 [1] : vector<64x32xf32> to vector<64xf32>
    %644 = vector.shape_cast %643 : vector<64xf32> to vector<64x1xf32>
    %645 = arith.addf %639, %644 : vector<64x1xf32>
    %cst_220 = arith.constant 9.600000e+01 : f32
    %646 = vector.broadcast %cst_220 : f32 to vector<64x1xf32>
    %647 = arith.divf %645, %646 : vector<64x1xf32>
    %cst_221 = arith.constant 9.99999974E-6 : f32
    %648 = vector.broadcast %cst_221 : f32 to vector<64x1xf32>
    %649 = arith.addf %647, %648 : vector<64x1xf32>
    %650 = math.rsqrt %649 : vector<64x1xf32>
    %651 = vector.broadcast %626 : vector<64x1xf32> to vector<64x32xf32>
    %652 = arith.subf %611, %651 : vector<64x32xf32>
    %653 = vector.broadcast %650 : vector<64x1xf32> to vector<64x32xf32>
    %654 = arith.mulf %652, %653 : vector<64x32xf32>
    %cst_222 = arith.constant dense<0.000000e+00> : vector<64x32xf32>
    %655 = tpu.matmul %654, %609, %cst_222 {dimension_numbers = #tpu.dot_dimension_numbers<[1], [0], [0], [1], [0, 0, 1, 1], [], []>} : vector<64x32xf32>, vector<32x32xf32>, vector<64x32xf32> -> vector<64x32xf32>
    %656 = vector.broadcast %614 : vector<1x32xf32> to vector<64x32xf32>
    %657 = arith.addf %656, %655 : vector<64x32xf32>
    %658 = vector.broadcast %626 : vector<64x1xf32> to vector<64x32xf32>
    %659 = arith.subf %517, %658 : vector<64x32xf32>
    %660 = vector.broadcast %650 : vector<64x1xf32> to vector<64x32xf32>
    %661 = arith.mulf %659, %660 : vector<64x32xf32>
    %cst_223 = arith.constant dense<0.000000e+00> : vector<64x32xf32>
    %662 = tpu.matmul %661, %613, %cst_223 {dimension_numbers = #tpu.dot_dimension_numbers<[1], [0], [0], [1], [0, 0, 1, 1], [], []>} : vector<64x32xf32>, vector<32x32xf32>, vector<64x32xf32> -> vector<64x32xf32>
    %663 = arith.addf %657, %662 : vector<64x32xf32>
    %664 = vector.broadcast %626 : vector<64x1xf32> to vector<64x32xf32>
    %665 = arith.subf %612, %664 : vector<64x32xf32>
    %666 = vector.broadcast %650 : vector<64x1xf32> to vector<64x32xf32>
    %667 = arith.mulf %665, %666 : vector<64x32xf32>
    %cst_224 = arith.constant dense<0.000000e+00> : vector<64x32xf32>
    %668 = tpu.matmul %667, %610, %cst_224 {dimension_numbers = #tpu.dot_dimension_numbers<[1], [0], [0], [1], [0, 0, 1, 1], [], []>} : vector<64x32xf32>, vector<32x32xf32>, vector<64x32xf32> -> vector<64x32xf32>
    %669 = arith.addf %663, %668 : vector<64x32xf32>
    %cst_225 = arith.constant 0.000000e+00 : f32
    %670 = vector.broadcast %cst_225 : f32 to vector<64x32xf32>
    %671 = arith.cmpf ogt, %669, %670 : vector<64x32xf32>
    %cst_226 = arith.constant 0.00999999977 : f32
    %672 = vector.broadcast %cst_226 : f32 to vector<64x32xf32>
    %673 = arith.mulf %672, %669 : vector<64x32xf32>
    %674 = arith.select %671, %669, %673 : vector<64x32xi1>, vector<64x32xf32>
    %c256 = arith.constant 256 : index
    %c0_227 = arith.constant 0 : index
    %675 = vector.load %arg2[%c256, %c0_227] : memref<296x128xf32, #tpu.memory_space<vmem>>, vector<32x128xf32>
    %cst_228 = arith.constant dense<0.000000e+00> : vector<64x128xf32>
    %676 = tpu.matmul %674, %675, %cst_228 {dimension_numbers = #tpu.dot_dimension_numbers<[1], [0], [0], [1], [0, 0, 1, 1], [], []>} : vector<64x32xf32>, vector<32x128xf32>, vector<64x128xf32> -> vector<64x128xf32>
    %c288 = arith.constant 288 : index
    %c0_229 = arith.constant 0 : index
    %677 = vector.load %arg2[%c288, %c0_229] : memref<296x128xf32, #tpu.memory_space<vmem>>, vector<1x128xf32>
    %678 = vector.broadcast %677 : vector<1x128xf32> to vector<64x128xf32>
    %679 = arith.addf %676, %678 : vector<64x128xf32>
    %c0_230 = arith.constant 0 : index
    %c0_231 = arith.constant 0 : index
    %c0_232 = arith.constant 0 : index
    %680 = vector.load %arg8[%c0_230, %c0_231, %c0_232] : memref<1x64x128xf32, #tpu.memory_space<vmem>>, vector<1x64x128xf32>
    %681 = vector.shape_cast %680 : vector<1x64x128xf32> to vector<64x128xf32>
    %682 = vector.shape_cast %679 : vector<64x128xf32> to vector<1x64x128xf32>
    tpu.vector_store %arg8[%c0_230, %c0_231, %c0_232], %682 {strides = array<i32>} : memref<1x64x128xf32, #tpu.memory_space<vmem>>, vector<1x64x128xf32>,
    return
  }
  func.func @transform_0(%arg0: i32) -> (i32, i32) {
    %c0_i32 = arith.constant 0 : i32
    %c0_i32_0 = arith.constant 0 : i32
    %c0_i32_1 = arith.constant 0 : i32
    return %c0_i32, %c0_i32_0 : i32, i32
  }
  func.func @transform_1(%arg0: i32) -> (i32, i32) {
    %c0_i32 = arith.constant 0 : i32
    %c0_i32_0 = arith.constant 0 : i32
    %c0_i32_1 = arith.constant 0 : i32
    return %c0_i32, %c0_i32_0 : i32, i32
  }
  func.func @transform_2(%arg0: i32) -> (i32, i32) {
    %c0_i32 = arith.constant 0 : i32
    %c0_i32_0 = arith.constant 0 : i32
    %c0_i32_1 = arith.constant 0 : i32
    return %c0_i32, %c0_i32_0 : i32, i32
  }
  func.func @transform_3(%arg0: i32) -> (i32, i32) {
    %c0_i32 = arith.constant 0 : i32
    %c0_i32_0 = arith.constant 0 : i32
    %c0_i32_1 = arith.constant 0 : i32
    return %c0_i32, %c0_i32_0 : i32, i32
  }
  func.func @transform_4(%arg0: i32) -> (i32, i32, i32) {
    %c0_i32 = arith.constant 0 : i32
    %c0_i32_0 = arith.constant 0 : i32
    %c0_i32_1 = arith.constant 0 : i32
    return %arg0, %c0_i32, %c0_i32_0 : i32, i32, i32
  }
  func.func @transform_5(%arg0: i32) -> (i32, i32, i32, i32) {
    %c0_i32 = arith.constant 0 : i32
    %c0_i32_0 = arith.constant 0 : i32
    %c0_i32_1 = arith.constant 0 : i32
    %c0_i32_2 = arith.constant 0 : i32
    return %arg0, %c0_i32, %c0_i32_0, %c0_i32_1 : i32, i32, i32, i32
  }
  func.func @transform_6(%arg0: i32) -> (i32, i32, i32) {
    %c0_i32 = arith.constant 0 : i32
    %c0_i32_0 = arith.constant 0 : i32
    %c0_i32_1 = arith.constant 0 : i32
    return %arg0, %c0_i32, %c0_i32_0 : i32, i32, i32
  }
  func.func @transform_7(%arg0: i32) -> (i32, i32, i32) {
    %c0_i32 = arith.constant 0 : i32
    %c0_i32_0 = arith.constant 0 : i32
    %c0_i32_1 = arith.constant 0 : i32
    return %arg0, %c0_i32, %c0_i32_0 : i32, i32, i32
  }
}

</mosaic_0001>

<bundles_post_ra>
// kernel: tpu_custom_call.1
= control target key start
LH: loop header
LB: loop body
LE: loop exit
PB: predicated region body
PF: predicated region fallthrough
CT: control target
= control target key end

     0   :  { %12 = vsyncpa [#allocation3], 0  ;;  %s11015_s0 = inlined_call_operand.vmem [shape: f32[776,32], index: 0, kind: input, shape index: {}]   ;;  %s11016_s1 = inlined_call_operand.vmem [shape: f32[296,128], index: 1, kind: input, shape index: {}]   ;;  %s11017_s2 = inlined_call_operand.vmem [shape: f32[128,16], index: 2, kind: input, shape index: {}]   ;;  %s11018_s3 = inlined_call_operand.vmem [shape: f32[16,64], index: 3, kind: input, shape index: {}]   ;;  %s11019_s4 = inlined_call_operand.vmem [shape: f32[8,16,28], index: 4, kind: input, shape index: {}]   ;;  %s11020_s5 = inlined_call_operand.vmem [shape: f32[8,5,16,7], index: 5, kind: input, shape index: {}]   ;;  %s11021_s6 = inlined_call_operand.vmem [shape: f32[8,64,15], index: 6, kind: input, shape index: {}]   ;;  %s11022_s7 = inlined_call_operand.hbm [shape: f32[8,64,128], index: 7, kind: output, shape index: {}]  }
   0x1   :  { %14 = vsyncpa [#allocation3 + $0x1], 0  ;;  %s7620_s24 = smov 0   ;;  %s7622_s25 = smov 0  }
   0x2   :  { %s7624_s26 = smov 0   ;;  %s7626_s27 = smov 0  }
   0x3 LB: > { %s7641_s28 = sadd.s32 4294967295, %s7566_s27   ;;  %s6690_s29 = sadd.s32 4294967294, %s7566_s27   ;;  %s7566_s27 = sphi %s7626_s27, %s11097_s27   ;;  %s7562_s26 = sphi %s7624_s26, %s11096_s26   ;;  %s7558_s25 = sphi %s7622_s25, %s11095_s25   ;;  %s7554_s24 = sphi %s7620_s24, %s11094_s24  }
   0x4   : > { %s7645_s30 = sadd.s32 1, %s7566_s27   ;;  %s189_s8 = sadd.s32 1, %s7562_s26 }
   0x5   : > { %s186_s9 = ssub.s32 %s7566_s27, %s7645_s30  ;;  %p199_p0 = scmp.ne.s32.totalorder %s7562_s26, %s7558_s25 }
   0x6   : > { %p187_p1 = scmp.eq.s32.totalorder %s186_s9, 0  ;;  %p200_p2 = scmp.eq.s32.totalorder %s7641_s28, 7 }
   0x7   : > { %p205_p3 = scmp.ne.s32.totalorder %s7558_s25, %s7554_s24  ;;  %p206_p4 = scmp.eq.s32.totalorder %s6690_s29, 7 }
   0x8   : > { %s7656_s10 = scalar_select %p187_p1, %s7562_s26, %s189_s8  }
   0x9   : > { %p7658_p5 = por %p200_p2, %p199_p0  ;;  %p7662_p6 = por %p206_p4, %p205_p3 }
   0xa   : > { %p6693_p7 = scmp.ge.s32.totalorder %s7566_s27, 1  ;;  %p260_p8 = scmp.lt.s32.totalorder %s7566_s27, 9 }
   0xc   : > { %p261_p9 = pnand %p6693_p7, %p260_p8 }
   0xe   : > { %264 = sbr.rel (%p261_p9) target bundleno = 9248 (0x2420), region = 48 }
  0x13   : > { %p302_p10 = scmp.lt.s32.totalorder %s7641_s28, 7  ;;  %vm355_vm0 = vcmask 56320   ;;  %v7568_v20 = vmov 7.0   ;;  %vm610_vm2 = vcmask 1046528   ;;  %s7574_s19 = smov 64  }
  0x14   : > { %7118 = vrcp.f32 %v7568_v20  ;;  %s7575_s20 = smov 32   ;;  %s7002_s29 = sshll.u32 %s7641_s28, 6 }
  0x15   : > { %s7670_s13 = scalar_select %p302_p10, %s7641_s28, 7 }
  0x16   : > { %s7524_s22 = scalar_lea.hbm %s11022_s7, 512 }
  0x17   : > { %s7007_s14 = smul.u32 80, %s7670_s13  ;;  %s7000_s15 = sshll.u32 %s7670_s13, 4 }
  0x18   : > { %s7952_s18 = scalar_lea.vmem %s11019_s4, %s7000_s15 }
  0x19   : > { %s311_s17 = scalar_lea.vmem %s11020_s5, %s7007_s14  ;;  %s7001_s14 = sshll.u32 %s7670_s13, 6 }
  0x1a   : > { %v7676_v0 = vld [vmem:[%s311_s17 + $0x40] sm:$0xff]  ;;  %v351_v6 = vld [vmem:[%s311_s17 + $0x30] sm:$0xff]  ;;  %v346_v7 = vld [vmem:[%s311_s17 + $0x8] sm:$0xff]  ;;  %v7119_v21 = vpop.eup %7118 }
  0x1b   : > { %v349_v1 = vld [vmem:[%s311_s17 + $0x20] sm:$0xff]  ;;  %v380_v3 = vsel %vm355_vm0, %v7676_v0, 0.0  ;;  %v347_v8 = vld [vmem:[%s311_s17 + $0x10] sm:$0xff]  ;;  %v374_v9 = vsel %vm355_vm0, %v351_v6, 0.0  ;;  %v359_v10 = vsel %vm355_vm0, %v346_v7, 0.0  ;;  %v352_v12 = vld [vmem:[%s311_s17 + $0x38] sm:$0xff]  ;;  %vm391_vm1 = vweird.f32 %v7119_v21 }
  0x1c   : > { %v345_v2 = vld [vmem:[%s311_s17] sm:$0xff]  ;;  %v368_v4 = vsel %vm355_vm0, %v349_v1, 0.0  ;;  %381 = vadd.xlane.f32.xlu2 %v380_v3  ;;  %v362_v11 = vsel %vm355_vm0, %v347_v8, 0.0  ;;  %v7685_v13 = vld [vmem:[%s311_s17 + $0x28] sm:$0xff]  ;;  %v348_v14 = vld [vmem:[%s311_s17 + $0x18] sm:$0xff]  ;;  %v377_v15 = vsel %vm355_vm0, %v352_v12, 0.0 }
  0x1d   : > { %v356_v5 = vsel %vm355_vm0, %v345_v2, 0.0  ;;  %369 = vadd.xlane.f32.xlu1 %v368_v4  ;;  %v371_v16 = vsel %vm355_vm0, %v7685_v13, 0.0  ;;  %v365_v17 = vsel %vm355_vm0, %v348_v14, 0.0  ;;  %v7691_v18 = vld [vmem:[%s311_s17 + $0x48] sm:$0xff]  ;;  %v387_v22 = vmul.f32 7.0, %v7119_v21  ;;  %s8081_s17 = scalar_lea.vmem %s11021_s6, %s7001_s14 }
  0x1e   : > { %357 = vadd.xlane.f32.xlu0 %v356_v5  ;;  %v383_v19 = vsel %vm355_vm0, %v7691_v18, 0.0 }
  0x1f   : > { %v388_v23 = vsub.f32 1.0, %v387_v22 }
  0x21   : > { %v389_v24 = vmul.f32 %v7119_v21, %v388_v23 }
  0x23   : > { %v390_v25 = vadd.f32 %v7119_v21, %v389_v24 }
  0x24   : > { %360 = vadd.xlane.f32.xlu2 %v359_v10 }
  0x25   : > { %375 = vadd.xlane.f32.xlu1 %v374_v9  ;;  %v7695_v26 = vsel %vm391_vm1, %v7119_v21, %v390_v25 }
  0x26   : > { %363 = vadd.xlane.f32.xlu0 %v362_v11 }
  0x2c   : > { %378 = vadd.xlane.f32.xlu2 %v377_v15 }
  0x2d   : > { %372 = vadd.xlane.f32.xlu1 %v371_v16 }
  0x2e   : > { %366 = vadd.xlane.f32.xlu0 %v365_v17 }
  0x36   : > { %384 = vadd.xlane.f32.xlu0 %v383_v19 }
  0x8f   : > { %v382_v27 = vpop.xlane.xlu2 %381 }
  0x90   : > { %v370_v28 = vpop.xlane.xlu1 %369  ;;  %v401_v46 = vmul.f32 %v7695_v26, %v382_v27 }
  0x91   : > { %v397_v29 = vmul.f32 %v7695_v26, %v370_v28  ;;  %v358_v30 = vpop.xlane.xlu0 %357 }
  0x92   : > { %v393_v31 = vmul.f32 %v7695_v26, %v358_v30  ;;  %v7728_v53 = vsub.f32 %v7676_v0, %v401_v46 }
  0x93   : > { %v7699_v32 = vsub.f32 %v349_v1, %v397_v29 }
  0x94   : > { %v7701_v33 = vsub.f32 %v345_v2, %v393_v31  ;;  %v421_v63 = vmul.f32 %v7728_v53, %v7728_v53 }
  0x95   : > { %v417_v34 = vmul.f32 %v7699_v32, %v7699_v32 }
  0x96   : > { %v413_v35 = vmul.f32 %v7701_v33, %v7701_v33  ;;  %v447_v4 = vsel %vm355_vm0, %v421_v63, 0.0 }
  0x97   : > { %v435_v36 = vsel %vm355_vm0, %v417_v34, 0.0  ;;  %v361_v38 = vpop.xlane.xlu2 %360 }
  0x98   : > { %v376_v37 = vpop.xlane.xlu1 %375  ;;  %436 = vadd.xlane.f32.xlu0 %v435_v36  ;;  %v423_v39 = vsel %vm355_vm0, %v413_v35, 0.0  ;;  %v394_v41 = vmul.f32 %v7695_v26, %v361_v38 }
  0x99   : > { %v399_v40 = vmul.f32 %v7695_v26, %v376_v37  ;;  %424 = vadd.xlane.f32.xlu1 %v423_v39  ;;  %v364_v42 = vpop.xlane.xlu0 %363 }
  0x9a   : > { %v395_v43 = vmul.f32 %v7695_v26, %v364_v42  ;;  %v7714_v45 = vsub.f32 %v346_v7, %v394_v41  ;;  %v603_v41 = vld [vmem:[%s11015_s0] sm:$0x7f] }
  0x9b   : > { %v7712_v44 = vsub.f32 %v351_v6, %v399_v40  ;;  %6700 = vmatpush.msk.msra.mxu0 %vm610_vm2, %v603_v41 }
  0x9c   : > { %v7717_v47 = vsub.f32 %v347_v8, %v395_v43  ;;  %v414_v48 = vmul.f32 %v7714_v45, %v7714_v45 }
  0x9d   : > { %v419_v49 = vmul.f32 %v7712_v44, %v7712_v44 }
  0x9e   : > { %v415_v50 = vmul.f32 %v7717_v47, %v7717_v47  ;;  %v426_v51 = vsel %vm355_vm0, %v414_v48, 0.0 }
  0x9f   : > { %v441_v52 = vsel %vm355_vm0, %v419_v49, 0.0  ;;  %v379_v54 = vpop.xlane.xlu2 %378 }
  0xa0   : > { %427 = vadd.xlane.f32.xlu0 %v426_v51  ;;  %v429_v55 = vsel %vm355_vm0, %v415_v50, 0.0  ;;  %v373_v56 = vpop.xlane.xlu1 %372  ;;  %v400_v57 = vmul.f32 %v7695_v26, %v379_v54 }
  0xa1   : > { %442 = vadd.xlane.f32.xlu1 %v441_v52  ;;  %430 = vadd.xlane.f32.xlu2 %v429_v55  ;;  %v367_v58 = vpop.xlane.xlu0 %366  ;;  %v398_v60 = vmul.f32 %v7695_v26, %v373_v56 }
  0xa2   : > { %v396_v59 = vmul.f32 %v7695_v26, %v367_v58  ;;  %v7734_v61 = vsub.f32 %v352_v12, %v400_v57 }
  0xa3   : > { %v7743_v1 = vsub.f32 %v7685_v13, %v398_v60 }
  0xa4   : > { %v7736_v62 = vsub.f32 %v348_v14, %v396_v59  ;;  %v420_v0 = vmul.f32 %v7734_v61, %v7734_v61 }
  0xa5   : > { %v418_v8 = vmul.f32 %v7743_v1, %v7743_v1 }
  0xa6   : > { %v416_v2 = vmul.f32 %v7736_v62, %v7736_v62  ;;  %v444_v3 = vsel %vm355_vm0, %v420_v0, 0.0 }
  0xa7   : > { %v438_v10 = vsel %vm355_vm0, %v418_v8, 0.0 }
  0xa8   : > { %445 = vadd.xlane.f32.xlu0 %v444_v3  ;;  %v432_v5 = vsel %vm355_vm0, %v416_v2, 0.0 }
  0xa9   : > { %448 = vadd.xlane.f32.xlu2 %v447_v4  ;;  %433 = vadd.xlane.f32.xlu1 %v432_v5  ;;  %v385_v6 = vpop.xlane.xlu0 %384 }
  0xaa   : > { %v402_v7 = vmul.f32 %v7695_v26, %v385_v6 }
  0xac   : > { %v7754_v9 = vsub.f32 %v7691_v18, %v402_v7 }
  0xae   : > { %v422_v11 = vmul.f32 %v7754_v9, %v7754_v9 }
  0xb0   : > { %v450_v12 = vsel %vm355_vm0, %v422_v11, 0.0 }
  0xb1   : > { %439 = vadd.xlane.f32.xlu2 %v438_v10  ;;  %451 = vadd.xlane.f32.xlu1 %v450_v12 }
 0x10b   : > { %v437_v13 = vpop.xlane.xlu0 %436 }
 0x10c   : > { %v425_v14 = vpop.xlane.xlu1 %424  ;;  %v457_v15 = vmul.f32 %v437_v13, %v7695_v26 }
 0x10d   : > { %v453_v16 = vmul.f32 %v425_v14, %v7695_v26 }
 0x10e   : > { %v7762_v17 = vadd.f32 1e-05, %v457_v15 }
 0x10f   : > { %v463_v19 = vadd.f32 1e-05, %v453_v16 }
 0x110   : > { %7120 = vrsqrt.f32 %v7762_v17  ;;  %vm519_vm7 = vweird.f32 %v7762_v17 }
 0x111   : > { %7122 = vrsqrt.f32 %v463_v19  ;;  %vm479_vm4 = vweird.f32 %v463_v19 }
 0x113   : > { %v428_v18 = vpop.xlane.xlu0 %427 }
 0x114   : > { %v443_v20 = vpop.xlane.xlu1 %442  ;;  %v431_v21 = vpop.xlane.xlu2 %430  ;;  %v454_v22 = vmul.f32 %v428_v18, %v7695_v26 }
 0x115   : > { %v459_v23 = vmul.f32 %v443_v20, %v7695_v26  ;;  %v455_v24 = vmul.f32 %v431_v21, %v7695_v26 }
 0x116   : > { %v7768_v25 = vpop.eup %7120  ;;  %v7770_v27 = vadd.f32 1e-05, %v454_v22 }
 0x117   : > { %v7772_v28 = vpop.eup %7122  ;;  %v514_v29 = vmul.f32 %v7768_v25, %v7762_v17  ;;  %v7776_v30 = vadd.f32 1e-05, %v459_v23  ;;  %v7778_v31 = vadd.f32 1e-05, %v455_v24  ;;  %vm520_vm5 = vweird.f32 %v7768_v25 }
 0x118   : > { %v474_v34 = vmul.f32 %v7772_v28, %v463_v19  ;;  %7124 = vrsqrt.f32 %v7770_v27  ;;  %vm480_vm3 = vweird.f32 %v7772_v28  ;;  %vm7833_vm9 = vmor %vm519_vm7, %vm520_vm5  ;;  %vm489_vm14 = vweird.f32 %v7770_v27 }
 0x119   : > { %v515_v35 = vmul.f32 %v7768_v25, %v514_v29  ;;  %7126 = vrsqrt.f32 %v7776_v30  ;;  %vm7818_vm6 = vmor %vm479_vm4, %vm480_vm3  ;;  %vm499_vm11 = vweird.f32 %v7778_v31  ;;  %vm539_vm12 = vweird.f32 %v7776_v30 }
 0x11a   : > { %v475_v36 = vmul.f32 %v7772_v28, %v474_v34  ;;  %7128 = vrsqrt.f32 %v7778_v31 }
 0x11b   : > { %v446_v37 = vpop.xlane.xlu0 %445  ;;  %v516_v42 = vmul.f32 0.5, %v515_v35 }
 0x11c   : > { %v476_v38 = vmul.f32 0.5, %v475_v36  ;;  %v449_v39 = vpop.xlane.xlu2 %448  ;;  %v434_v40 = vpop.xlane.xlu1 %433  ;;  %v460_v48 = vmul.f32 %v446_v37, %v7695_v26 }
 0x11d   : > { %v461_v43 = vmul.f32 %v449_v39, %v7695_v26  ;;  %v456_v46 = vmul.f32 %v434_v40, %v7695_v26  ;;  %v517_v58 = vsub.f32 1.5, %v516_v42 }
 0x11e   : > { %v7793_v49 = vpop.eup %7124  ;;  %v477_v51 = vsub.f32 1.5, %v476_v38  ;;  %v7806_v60 = vadd.f32 1e-05, %v460_v48 }
 0x11f   : > { %v7795_v50 = vpop.eup %7126  ;;  %v484_v52 = vmul.f32 %v7793_v49, %v7770_v27  ;;  %v7799_v54 = vadd.f32 1e-05, %v461_v43  ;;  %v7803_v57 = vadd.f32 1e-05, %v456_v46  ;;  %v518_v7 = vmul.f32 %v7768_v25, %v517_v58 }
 0x120   : > { %v7129_v55 = vpop.eup %7128  ;;  %v534_v56 = vmul.f32 %v7795_v50, %v7776_v30  ;;  %v478_v0 = vmul.f32 %v7772_v28, %v477_v51  ;;  %vm540_vm10 = vweird.f32 %v7795_v50  ;;  %vm490_vm1 = vweird.f32 %v7793_v49 }
 0x121   : > { %v494_v59 = vmul.f32 %v7129_v55, %v7778_v31  ;;  %7130 = vrsqrt.f32 %v7799_v54  ;;  %v485_v3 = vmul.f32 %v7793_v49, %v484_v52  ;;  %vm500_vm8 = vweird.f32 %v7129_v55  ;;  %vm7859_vm15 = vmor %vm539_vm12, %vm540_vm10 }
 0x122   : > { %v535_v63 = vmul.f32 %v7795_v50, %v534_v56  ;;  %7132 = vrsqrt.f32 %v7803_v57  ;;  %v482_v14 = vsel %vm7818_vm6, %v7772_v28, %v478_v0  ;;  %v522_v17 = vsel %vm7833_vm9, %v7768_v25, %v518_v7  ;;  %vm501_vm13 = vmor %vm499_vm11, %vm500_vm8 }
 0x123   : > { %v495_v2 = vmul.f32 %v7129_v55, %v494_v59  ;;  %7134 = vrsqrt.f32 %v7806_v60  ;;  %v486_v16 = vmul.f32 0.5, %v485_v3  ;;  %v573_v28 = vmul.f32 %v482_v14, %v7701_v33  ;;  %vm7885_vm6 = vmor %vm489_vm14, %vm490_vm1 }
 0x124   : > { %v536_v4 = vmul.f32 0.5, %v535_v63  ;;  %v440_v5 = vpop.xlane.xlu2 %439  ;;  %v452_v6 = vpop.xlane.xlu1 %451  ;;  %v577_v36 = vmul.f32 %v522_v17, %v7699_v32  ;;  %vm559_vm3 = vweird.f32 %v7799_v54  ;;  %vm509_vm7 = vweird.f32 %v7803_v57 }
 0x125   : > { %v496_v8 = vmul.f32 0.5, %v495_v2  ;;  %v458_v10 = vmul.f32 %v440_v5, %v7695_v26  ;;  %v462_v13 = vmul.f32 %v452_v6, %v7695_v26  ;;  %v487_v31 = vsub.f32 1.5, %v486_v16 }
 0x126   : > { %v537_v12 = vsub.f32 1.5, %v536_v4  ;;  %v583_v41 = vsel %vm355_vm0, %v573_v28, 0.0  ;;  %vm549_vm8 = vweird.f32 %v7806_v60 }
 0x127   : > { %v497_v15 = vsub.f32 1.5, %v496_v8  ;;  %v7827_v19 = vadd.f32 1e-05, %v458_v10  ;;  %v7829_v18 = vpop.eup %7130  ;;  %v7839_v26 = vadd.f32 1e-05, %v462_v13  ;;  %v488_v42 = vmul.f32 %v7793_v49, %v487_v31 }
 0x128   : > { %v538_v21 = vmul.f32 %v7795_v50, %v537_v12  ;;  %v554_v23 = vmul.f32 %v7829_v18, %v7799_v54  ;;  %v7133_v24 = vpop.eup %7132  ;;  %vm560_vm4 = vweird.f32 %v7829_v18 }
 0x129   : > { %v498_v22 = vmul.f32 %v7129_v55, %v497_v15  ;;  %7136 = vrsqrt.f32 %v7827_v19  ;;  %v7852_v29 = vpop.eup %7134  ;;  %v504_v35 = vmul.f32 %v7133_v24, %v7803_v57  ;;  %vm510_vm5 = vweird.f32 %v7133_v24  ;;  %vm561_vm9 = vmor %vm559_vm3, %vm560_vm4 }
 0x12a   : > { %v555_v34 = vmul.f32 %v7829_v18, %v554_v23  ;;  %v544_v37 = vmul.f32 %v7852_v29, %v7806_v60  ;;  %7138 = vrsqrt.f32 %v7839_v26  ;;  %v542_v38 = vsel %vm7859_vm15, %v7795_v50, %v538_v21  ;;  %vm511_vm10 = vmor %vm509_vm7, %vm510_vm5 }
 0x12b   : > { %v502_v25 = vsel %vm501_vm13, %v7129_v55, %v498_v22  ;;  %v505_v39 = vmul.f32 %v7133_v24, %v504_v35  ;;  %v579_v52 = vmul.f32 %v542_v38, %v7712_v44  ;;  %v586_v55 = vsel %vm355_vm0, %v577_v36, 0.0 }
 0x12c   : > { %v575_v30 = vmul.f32 %v502_v25, %v7717_v47  ;;  %v556_v32 = vmul.f32 0.5, %v555_v34  ;;  %v545_v40 = vmul.f32 %v7852_v29, %v544_v37  ;;  %v492_v3 = vsel %vm7885_vm6, %v7793_v49, %v488_v42 }
 0x12d   : > { %v506_v46 = vmul.f32 0.5, %v505_v39  ;;  %vm550_vm11 = vweird.f32 %v7852_v29  ;;  %v588_v7 = vsel %vm355_vm0, %v579_v52, 0.0  ;;  %v574_v16 = vmul.f32 %v492_v3, %v7714_v45  ;;  %v692_v3 = vld [vmem:[%s11015_s0 + $0x10] sm:$0xff] }
 0x12e   : > { %v584_v47 = vsel %vm355_vm0, %v575_v30, 0.0  ;;  %v557_v43 = vsub.f32 1.5, %v556_v32  ;;  %v546_v50 = vmul.f32 0.5, %v545_v40  ;;  %vm7909_vm13 = vmor %vm549_vm8, %vm550_vm11  ;;  %vm529_vm14 = vweird.f32 %v7827_v19 }
 0x12f   : > { %v585_v48 = vadd.f32 %v584_v47, %v583_v41  ;;  %v7137_v51 = vpop.eup %7136  ;;  %v507_v58 = vsub.f32 1.5, %v506_v46  ;;  %vm569_vm3 = vweird.f32 %v7839_v26  ;;  %vm639_vm5 = vcmask 261120  }
 0x130   : > { %v558_v56 = vmul.f32 %v7829_v18, %v557_v43  ;;  %v524_v59 = vmul.f32 %v7137_v51, %v7827_v19  ;;  %v7139_v63 = vpop.eup %7138  ;;  %v547_v44 = vsub.f32 1.5, %v546_v50  ;;  %vm530_vm12 = vweird.f32 %v7137_v51 }
 0x131   : > { %v587_v2 = vadd.f32 %v586_v55, %v585_v48  ;;  %v508_v27 = vmul.f32 %v7133_v24, %v507_v58  ;;  %v564_v5 = vmul.f32 %v7139_v63, %v7839_v26  ;;  %vm570_vm15 = vweird.f32 %v7139_v63  ;;  %vm531_vm1 = vmor %vm529_vm14, %vm530_vm12 }
 0x132   : > { %v525_v4 = vmul.f32 %v7137_v51, %v524_v59  ;;  %v548_v57 = vmul.f32 %v7852_v29, %v547_v44  ;;  %v562_v6 = vsel %vm561_vm9, %v7829_v18, %v558_v56  ;;  %vm571_vm4 = vmor %vm569_vm3, %vm570_vm15  ;;  %v7569_v39 = vmov 32.0   ;;  %v694_v44 = vld [vmem:[%s11015_s0 + $0x20] sm:$0xff]  ;;  %v7980_v18 = vld [vmem:[%s11017_s2 + $0x48] sm:$0xff] }
 0x133   : > { %v512_v8 = vsel %vm511_vm10, %v7133_v24, %v508_v27  ;;  %v565_v10 = vmul.f32 %v7139_v63, %v564_v5  ;;  %v581_v11 = vmul.f32 %v562_v6, %v7728_v53  ;;  %v589_v12 = vadd.f32 %v588_v7, %v587_v2  ;;  %713 = vmatpush.msra.mxu1 %v694_v44  ;;  %v693_v2 = vld [vmem:[%s11015_s0 + $0x18] sm:$0xff]  ;;  %v691_v27 = vld [vmem:[%s11015_s0 + $0x8] sm:$0xff]  ;;  %v335_v7 = vld [vmem:[%s7952_s18] sm:$0xff] }
 0x134   : > { %v526_v49 = vmul.f32 0.5, %v525_v4  ;;  %v576_v54 = vmul.f32 %v512_v8, %v7736_v62  ;;  %v552_v53 = vsel %vm7909_vm13, %v7852_v29, %v548_v57  ;;  %v592_v24 = vsel %vm355_vm0, %v574_v16, 0.0  ;;  %v336_v6 = vld [vmem:[%s7952_s18 + $0x8] sm:$0xff]  ;;  %v7959_v8 = vld [vmem:[%s11017_s2] sm:$0xff] }
 0x135   : > { %v566_v14 = vmul.f32 0.5, %v565_v10  ;;  %v590_v15 = vsel %vm355_vm0, %v581_v11, 0.0  ;;  %v580_v19 = vmul.f32 %v552_v53, %v7734_v61  ;;  %7140 = vrcp.f32 %v7569_v39  ;;  %714 = vmatpush.msra.mxu1 %v693_v2  ;;  %781 = vmatpush.msra.mxu2 %v336_v6 }
 0x136   : > { %v527_v13 = vsub.f32 1.5, %v526_v49  ;;  %v591_v20 = vadd.f32 %v590_v15, %v589_v12  ;;  %v593_v45 = vsel %vm355_vm0, %v576_v54, 0.0  ;;  %887 = vmatpush.msrb.mxu0 %v336_v6  ;;  %v7966_v49 = vld [vmem:[%s11017_s2 + $0x40] sm:$0xff]  ;;  %vm1023_vm13 = vcmask 121856  }
 0x137   : > { %v567_v17 = vsub.f32 1.5, %v566_v14  ;;  %v594_v29 = vadd.f32 %v593_v45, %v592_v24  ;;  %v597_v35 = vsel %vm355_vm0, %v580_v19, 0.0  ;;  %715 = vmatpush.msra.mxu1 %v692_v3  ;;  %782 = vmatpush.msra.mxu2 %v335_v7  ;;  %vm958_vm14 = vcmask 228352  }
 0x138   : > { %v528_v62 = vmul.f32 %v7137_v51, %v527_v13  ;;  %v601_v21 = vmul.f32 0.2, %v591_v20  ;;  %888 = vmatpush.msrb.mxu0 %v335_v7  ;;  %v7973_v13 = vld [vmem:[%s11017_s2 + $0x8] sm:$0xff] }
 0x139   : > { %v568_v60 = vmul.f32 %v7139_v63, %v567_v17  ;;  %716 = vmatpush.msra.mxu1 %v691_v27  ;;  %7003 = vmatpush.msrb.mxu2 %v336_v6 }
 0x13a   : > { %v532_v22 = vsel %vm531_vm1, %v7137_v51, %v528_v62  ;;  %6701 = vmatmul.msk.f32.vlgmr.msra.gmra.mxu0 %vm355_vm0, %v601_v21  ;;  %v7987_v62 = vld [vmem:[%s11017_s2 + $0x10] sm:$0xff]  ;;  %vm1503_vm1 = vcmask 1043456  }
 0x13b   : > { %v578_v23 = vmul.f32 %v532_v22, %v7743_v1  ;;  %v572_v28 = vsel %vm571_vm4, %v7139_v63, %v568_v60  ;;  %v7141_v40 = vpop.eup %7140  ;;  %7004 = vmatpush.msrb.mxu2 %v335_v7  ;;  %v7994_v60 = vld [vmem:[%s11017_s2 + $0x50] sm:$0xff] }
 0x13c   : > { %v582_v25 = vmul.f32 %v572_v28, %v7754_v9  ;;  %v647_v41 = vmul.f32 32.0, %v7141_v40  ;;  %vm651_vm6 = vweird.f32 %v7141_v40  ;;  %v8002_v28 = vld [vmem:[%s11017_s2 + $0x18] sm:$0xff] }
 0x13d   : > { %v595_v31 = vsel %vm355_vm0, %v578_v23, 0.0 }
 0x13e   : > { %v596_v34 = vadd.f32 %v595_v31, %v594_v29  ;;  %v599_v26 = vsel %vm355_vm0, %v582_v25, 0.0  ;;  %v648_v47 = vsub.f32 1.0, %v647_v41  ;;  %v8009_v25 = vld [vmem:[%s11017_s2 + $0x58] sm:$0xff] }
 0x140   : > { %v598_v36 = vadd.f32 %v597_v35, %v596_v34  ;;  %v649_v42 = vmul.f32 %v7141_v40, %v648_v47  ;;  %v8018_v35 = vld [vmem:[%s11017_s2 + $0x20] sm:$0xff] }
 0x142   : > { %v600_v1 = vadd.f32 %v599_v26, %v598_v36  ;;  %v650_v43 = vadd.f32 %v7141_v40, %v649_v42  ;;  %v8025_v36 = vld [vmem:[%s11017_s2 + $0x28] sm:$0xff]  ;;  %v8032_v26 = vld [vmem:[%s11017_s2 + $0x30] sm:$0xff] }
 0x144   : > { %v602_v33 = vmul.f32 0.2, %v600_v1  ;;  %v652_v46 = vsel %vm651_vm6, %v7141_v40, %v650_v43  ;;  %v8039_v1 = vld [vmem:[%s11017_s2 + $0x38] sm:$0xff]  ;;  %v8084_v40 = vld [vmem:[%s8081_s17] sm:$0xff] }
 0x145   : > { %v1024_v41 = vsel %vm1023_vm13, %v8084_v40, 0.0 }
 0x146   : > { %6702 = vmatmul.msk.f32.gmra.mxu0 %vm355_vm0, %v602_v33  ;;  %vm742_vm0 = vcmask 130048   ;;  %v8046_v33 = vld [vmem:[%s11017_s2 + $0x60] sm:$0xff] }
 0x147   : > { %6705 = vmatmul.msk.f32.vlgmr.msra.gmra.mxu2 %vm742_vm0, %v7959_v8 }
 0x14e   : > { %6721 = vmatmul.msk.f32.vlgmr.msrb.gmra.mxu0 %vm742_vm0, %v7966_v49 }
 0x14f   : > { %6706 = vmatmul.msk.f32.gmra.mxu2 %vm742_vm0, %v7973_v13 }
 0x156   : > { %6722 = vmatmul.msk.f32.gmra.mxu0 %vm742_vm0, %v7980_v18 }
 0x157   : > { %6707 = vmatmul.msk.f32.gmra.mxu2 %vm742_vm0, %v7987_v62 }
 0x15e   : > { %6723 = vmatmul.msk.f32.gmra.mxu0 %vm742_vm0, %v7994_v60 }
 0x15f   : > { %6708 = vmatmul.msk.f32.gmra.mxu2 %vm742_vm0, %v8002_v28 }
 0x166   : > { %6724 = vmatmul.msk.f32.gmra.mxu0 %vm742_vm0, %v8009_v25 }
 0x167   : > { %6709 = vmatmul.msk.f32.gmra.mxu2 %vm742_vm0, %v8018_v35 }
 0x16f   : > { %6710 = vmatmul.msk.f32.gmra.mxu2 %vm742_vm0, %v8025_v36 }
 0x177   : > { %6711 = vmatmul.msk.f32.gmra.mxu2 %vm742_vm0, %v8032_v26 }
 0x17f   : > { %6712 = vmatmul.msk.f32.gmra.mxu2 %vm742_vm0, %v8039_v1 }
 0x187   : > { %6725 = vmatmul.msk.f32.vlgmr.msrb.gmra.mxu2 %vm742_vm0, %v8046_v33 }
 0x1b7   : > { %v631_v30 = vpop.f32.mrf.mxu0 }
 0x1b8   : > { %v637_v61 = vmax.f32 %v631_v30, 0.0  ;;  %v8053_v30 = vld [vmem:[%s11017_s2 + $0x68] sm:$0xff] }
 0x1b9   : > { %6726 = vmatmul.msk.f32.gmra.mxu2 %vm742_vm0, %v8053_v30 }
 0x1ba   : > { %v640_v37 = vsel %vm639_vm5, %v637_v61, 0.0 }
 0x1bb   : > { %641 = vadd.xlane.f32.xlu2 %v640_v37  ;;  %v8067_v37 = vld [vmem:[%s11017_s2 + $0x78] sm:$0xff] }
 0x1c3   : > { %v634_v38 = vpop.f32.mrf.mxu0 }
 0x1c4   : > { %v638_v9 = vmax.f32 %v634_v38, 0.0 }
 0x1c6   : > { %v643_v32 = vsel %vm639_vm5, %v638_v9, 0.0 }
 0x1c7   : > { %644 = vadd.xlane.f32.xlu0 %v643_v32 }
 0x1ca   : > { %v8071_v38 = vpop.f32.mrf.mxu2 }
 0x1cb   : > { %v959_v47 = vsel %vm958_vm14, %v8071_v38, 0.0 }
 0x1cf   : > { %960 = vadd.xlane.f32.xlu0 %v959_v47 }
 0x22e   : > { %v642_v48 = vpop.xlane.xlu2 %641 }
 0x22f   : > { %v653_v51 = vmul.f32 %v652_v46, %v642_v48 }
 0x231   : > { %v655_v50 = vsub.f32 %v637_v61, %v653_v51  ;;  %v8060_v61 = vld [vmem:[%s11017_s2 + $0x70] sm:$0xff]  ;;  %v8104_v51 = vpop.f32.mrf.mxu0 }
 0x232   : > { %6727 = vmatmul.msk.f32.gmra.mxu2 %vm742_vm0, %v8060_v61 }
 0x233   : > { %v657_v52 = vmul.f32 %v655_v50, %v655_v50 }
 0x235   : > { %v659_v55 = vsel %vm639_vm5, %v657_v52, 0.0 }
 0x236   : > { %660 = vadd.xlane.f32.xlu1 %v659_v55 }
 0x23a   : > { %v645_v56 = vpop.xlane.xlu0 %644  ;;  %6728 = vmatmul.msk.f32.gmra.mxu2 %vm742_vm0, %v8067_v37 }
 0x23b   : > { %v654_v58 = vmul.f32 %v652_v46, %v645_v56  ;;  %v1056_v56 = vsel %vm958_vm14, %v8104_v51, 0.0 }
 0x23c   : > { %1057 = vadd.xlane.f32.xlu0 %v1056_v56 }
 0x23d   : > { %v7931_v59 = vsub.f32 %v638_v9, %v654_v58  ;;  %v8073_v9 = vpop.f32.mrf.mxu2 }
 0x23e   : > { %v962_v52 = vsel %vm958_vm14, %v8073_v9, 0.0 }
 0x23f   : > { %v658_v63 = vmul.f32 %v7931_v59, %v7931_v59 }
 0x241   : > { %v662_v0 = vsel %vm639_vm5, %v658_v63, 0.0  ;;  %v8126_v63 = vld [vmem:[%s8081_s17 + $0x10] sm:$0xff] }
 0x242   : > { %663 = vadd.xlane.f32.xlu2 %v662_v0  ;;  %v1030_v44 = vsel %vm1023_vm13, %v8126_v63, 0.0  ;;  %v961_v56 = vpop.xlane.xlu0 %960 }
 0x244   : > { %1031 = vadd.xlane.f32.xlu0 %v1030_v44 }
 0x245   : > { %v8076_v39 = vpop.f32.mrf.mxu2 }
 0x246   : > { %v965_v0 = vsel %vm958_vm14, %v8076_v39, 0.0 }
 0x24a   : > { %1025 = vadd.xlane.f32.xlu2 %v1024_v41 }
 0x252   : > { %963 = vadd.xlane.f32.xlu2 %v962_v52 }
 0x2a9   : > { %v661_v4 = vpop.xlane.xlu1 %660 }
 0x2aa   : > { %v665_v5 = vmul.f32 %v661_v4, %v652_v46  ;;  %v8143_v4 = vld [vmem:[%s8081_s17 + $0x18] sm:$0xff] }
 0x2ac   : > { %v667_v57 = vadd.f32 1e-05, %v665_v5 }
 0x2ae   : > { %7142 = vrsqrt.f32 %v667_v57  ;;  %vm675_vm8 = vweird.f32 %v667_v57 }
 0x2b4   : > { %v7143_v10 = vpop.eup %7142 }
 0x2b5   : > { %v664_v11 = vpop.xlane.xlu2 %663  ;;  %v670_v54 = vmul.f32 %v7143_v10, %v667_v57  ;;  %vm676_vm7 = vweird.f32 %v7143_v10  ;;  %v1033_v57 = vsel %vm1023_vm13, %v8143_v4, 0.0 }
 0x2b6   : > { %v666_v12 = vmul.f32 %v664_v11, %v652_v46  ;;  %vm677_vm9 = vmor %vm675_vm8, %vm676_vm7  ;;  %v8092_v46 = vpop.f32.mrf.mxu2 }
 0x2b7   : > { %v671_v14 = vmul.f32 %v7143_v10, %v670_v54  ;;  %v968_v5 = vsel %vm958_vm14, %v8092_v46, 0.0 }
 0x2b8   : > { %v668_v15 = vadd.f32 1e-05, %v666_v12  ;;  %969 = vadd.xlane.f32.xlu0 %v968_v5 }
 0x2b9   : > { %v672_v16 = vmul.f32 0.5, %v671_v14 }
 0x2ba   : > { %7144 = vrsqrt.f32 %v668_v15  ;;  %vm685_vm11 = vweird.f32 %v668_v15 }
 0x2bb   : > { %v673_v20 = vsub.f32 1.5, %v672_v16 }
 0x2bd   : > { %v674_v53 = vmul.f32 %v7143_v10, %v673_v20 }
 0x2be   : > { %v8117_v58 = vpop.f32.mrf.mxu2 }
 0x2bf   : > { %v678_v21 = vsel %vm677_vm9, %v7143_v10, %v674_v53  ;;  %v971_v10 = vsel %vm958_vm14, %v8117_v58, 0.0 }
 0x2c0   : > { %v7145_v17 = vpop.eup %7144  ;;  %v689_v22 = vmul.f32 %v678_v21, %v655_v50  ;;  %v8107_v50 = vld [vmem:[%s8081_s17 + $0x8] sm:$0xff]  ;;  %v8200_v21 = vld [vmem:[%s8081_s17 + $0x38] sm:$0xff] }
 0x2c1   : > { %v680_v45 = vmul.f32 %v7145_v17, %v668_v15  ;;  %vm686_vm10 = vweird.f32 %v7145_v17  ;;  %v1027_v55 = vsel %vm1023_vm13, %v8107_v50, 0.0  ;;  %11061 = vst [vmem:[#allocation12_spill] sm:$0xff] %v8200_v21 }
 0x2c2   : > { %6703 = vmatmul.msk.f32.vlgmr.msra.gmra.mxu1 %vm639_vm5, %v689_v22  ;;  %vm687_vm12 = vmor %vm685_vm11, %vm686_vm10  ;;  %1028 = vadd.xlane.f32.xlu1 %v1027_v55 }
 0x2c3   : > { %v681_v23 = vmul.f32 %v7145_v17, %v680_v45  ;;  %v1045_v45 = vsel %vm1023_vm13, %v8200_v21, 0.0 }
 0x2c5   : > { %v682_v19 = vmul.f32 0.5, %v681_v23 }
 0x2c6   : > { %v8134_v3 = vpop.f32.mrf.mxu2 }
 0x2c7   : > { %v683_v24 = vsub.f32 1.5, %v682_v19  ;;  %v974_v14 = vsel %vm958_vm14, %v8134_v3, 0.0 }
 0x2c9   : > { %v684_v29 = vmul.f32 %v7145_v17, %v683_v24  ;;  %v8219_v24 = vld [vmem:[%s8081_s17 + $0x30] sm:$0xff] }
 0x2ca   : > { %966 = vadd.xlane.f32.xlu1 %v965_v0  ;;  %11064 = vst [vmem:[#allocation15_spill] sm:$0xff] %v8219_v24 }
 0x2cb   : > { %v688_v31 = vsel %vm687_vm12, %v7145_v17, %v684_v29 }
 0x2cc   : > { %v690_v34 = vmul.f32 %v688_v31, %v7931_v59  ;;  %v8123_v59 = vpop.f32.mrf.mxu0 }
 0x2cd   : > { %v1059_v2 = vsel %vm958_vm14, %v8123_v59, 0.0 }
 0x2ce   : > { %6704 = vmatmul.msk.f32.gmra.mxu1 %vm639_vm5, %v690_v34  ;;  %1060 = vadd.xlane.f32.xlu2 %v1059_v2  ;;  %v8151_v7 = vpop.f32.mrf.mxu2 }
 0x2cf   : > { %11056 = vst [vmem:[#allocation7_spill] sm:$0xff] %v8151_v7 }
 0x2d4   : > { %v8140_v27 = vpop.f32.mrf.mxu0 }
 0x2d5   : > { %v1062_v6 = vsel %vm958_vm14, %v8140_v27, 0.0 }
 0x2d6   : > { %1063 = vadd.xlane.f32.xlu1 %v1062_v6  ;;  %1034 = vadd.xlane.f32.xlu2 %v1033_v57  ;;  %v8168_v12 = vpop.f32.mrf.mxu2  ;;  %v1058_v57 = vpop.xlane.xlu0 %1057 }
 0x2d7   : > { %11057 = vst [vmem:[#allocation8_spill] sm:$0xff] %v8168_v12  ;;  %v980_v17 = vsel %vm958_vm14, %v8168_v12, 0.0 }
 0x2de   : > { %972 = vadd.xlane.f32.xlu2 %v971_v10  ;;  %v8181_v16 = vpop.f32.mrf.mxu2 }
 0x2df   : > { %11059 = vst [vmem:[#allocation10_spill] sm:$0xff] %v8181_v16 }
 0x2e6   : > { %v8187_v20 = vpop.f32.mrf.mxu2 }
 0x2e7   : > { %11060 = vst [vmem:[#allocation11_spill] sm:$0xff] %v8187_v20  ;;  %v1071_v53 = vsel %vm958_vm14, %v8187_v20, 0.0 }
 0x2ee   : > { %v8210_v22 = vpop.f32.mrf.mxu2 }
 0x2ef   : > { %11062 = vst [vmem:[#allocation13_spill] sm:$0xff] %v8210_v22 }
 0x2f6   : > { %v8214_v23 = vpop.f32.mrf.mxu2 }
 0x2f7   : > { %11063 = vst [vmem:[#allocation14_spill] sm:$0xff] %v8214_v23  ;;  %v1077_v19 = vsel %vm958_vm14, %v8214_v23, 0.0 }
 0x335   : > { %v8261_v44 = vpop.xlane.xlu1 %1028 }
 0x33d   : > { %v8269_v10 = vpop.xlane.xlu1 %966 }
 0x33f   : > { %v718_v32 = vpop.f32.mrf.mxu1 }
 0x340   : > { %v8094_v48 = vmax.f32 %v718_v32, 0.0 }
 0x342   : > { %11055 = vst [vmem:[#allocation6_spill] sm:$0xff] %v8094_v48 }
 0x34b   : > { %v721_v42 = vpop.f32.mrf.mxu1 }
 0x34c   : > { %v8090_v43 = vmax.f32 %v721_v42, 0.0 }
 0x34e   : > { %11054 = vst [vmem:[#allocation5_spill] sm:$0xff] %v8090_v43  ;;  %822 = vmatpush.msra.mxu3 %v8090_v43  ;;  %928 = vmatpush.msrb.mxu1 %v8090_v43 }
 0x350   : > { %823 = vmatpush.msra.mxu3 %v8094_v48  ;;  %929 = vmatpush.msrb.mxu1 %v8094_v48 }
 0x351   : > { %6713 = vmatmul.msk.f32.vlgmr.msra.gmra.mxu3 %vm742_vm0, %v7959_v8  ;;  %6729 = vmatmul.msk.f32.vlgmr.msrb.gmra.mxu1 %vm742_vm0, %v7966_v49  ;;  %v8157_v8 = vpop.f32.mrf.mxu0  ;;  %v8160_v49 = vld [vmem:[%s8081_s17 + $0x20] sm:$0xff] }
 0x352   : > { %7005 = vmatpush.msrb.mxu3 %v8090_v43  ;;  %v1036_v11 = vsel %vm1023_vm13, %v8160_v49, 0.0  ;;  %v1065_v54 = vsel %vm958_vm14, %v8157_v8, 0.0 }
 0x353   : > { %1037 = vadd.xlane.f32.xlu1 %v1036_v11  ;;  %1066 = vadd.xlane.f32.xlu0 %v1065_v54 }
 0x354   : > { %7006 = vmatpush.msrb.mxu3 %v8094_v48 }
 0x359   : > { %6714 = vmatmul.msk.f32.gmra.mxu3 %vm742_vm0, %v7973_v13  ;;  %6730 = vmatmul.msk.f32.gmra.mxu1 %vm742_vm0, %v7980_v18  ;;  %v8175_v13 = vld [vmem:[%s8081_s17 + $0x28] sm:$0xff]  ;;  %v977_v18 = vsel %vm958_vm14, %v8151_v7, 0.0 }
 0x35a   : > { %11058 = vst [vmem:[#allocation9_spill] sm:$0xff] %v8175_v13  ;;  %v1039_v15 = vsel %vm1023_vm13, %v8175_v13, 0.0 }
 0x35b   : > { %1040 = vadd.xlane.f32.xlu0 %v1039_v15  ;;  %975 = vadd.xlane.f32.xlu1 %v974_v14  ;;  %v8275_v14 = vpop.xlane.xlu0 %1031  ;;  %v8277_v15 = vpop.xlane.xlu1 %1063 }
 0x361   : > { %6715 = vmatmul.msk.f32.gmra.mxu3 %vm742_vm0, %v7987_v62  ;;  %6731 = vmatmul.msk.f32.gmra.mxu1 %vm742_vm0, %v7994_v60  ;;  %v1068_v62 = vsel %vm958_vm14, %v8181_v16, 0.0  ;;  %v1074_v60 = vsel %vm958_vm14, %v8210_v22, 0.0 }
 0x362   : > { %1069 = vadd.xlane.f32.xlu2 %v1068_v62  ;;  %v1026_v62 = vpop.xlane.xlu2 %1025 }
 0x363   : > { %978 = vadd.xlane.f32.xlu0 %v977_v18  ;;  %1072 = vadd.xlane.f32.xlu1 %v1071_v53 }
 0x369   : > { %6716 = vmatmul.msk.f32.gmra.mxu3 %vm742_vm0, %v8002_v28  ;;  %6732 = vmatmul.msk.f32.gmra.mxu1 %vm742_vm0, %v8009_v25  ;;  %v1042_v28 = vsel %vm1023_vm13, %v8219_v24, 0.0 }
 0x36a   : > { %1043 = vadd.xlane.f32.xlu2 %v1042_v28  ;;  %v964_v28 = vpop.xlane.xlu2 %963 }
 0x36b   : > { %981 = vadd.xlane.f32.xlu1 %v980_v17  ;;  %1075 = vadd.xlane.f32.xlu0 %v1074_v60  ;;  %v8283_v17 = vpop.xlane.xlu0 %969 }
 0x371   : > { %6717 = vmatmul.msk.f32.gmra.mxu3 %vm742_vm0, %v8018_v35  ;;  %6733 = vmatmul.msk.f32.gmra.mxu1 %vm742_vm0, %v8046_v33 }
 0x373   : > { %1046 = vadd.xlane.f32.xlu1 %v1045_v45  ;;  %1078 = vadd.xlane.f32.xlu0 %v1077_v19 }
 0x379   : > { %6718 = vmatmul.msk.f32.gmra.mxu3 %vm742_vm0, %v8025_v36 }
 0x381   : > { %6719 = vmatmul.msk.f32.gmra.mxu3 %vm742_vm0, %v8032_v26 }
 0x389   : > { %6720 = vmatmul.msk.f32.gmra.mxu3 %vm742_vm0, %v8039_v1 }
 0x391   : > { %6734 = vmatmul.msk.f32.vlgmr.msrb.gmra.mxu3 %vm742_vm0, %v8053_v30 }
 0x399   : > { %6735 = vmatmul.msk.f32.gmra.mxu3 %vm742_vm0, %v8060_v61 }
 0x3a1   : > { %6736 = vmatmul.msk.f32.gmra.mxu3 %vm742_vm0, %v8067_v37 }
 0x3c6   : > { %v8285_v45 = vpop.xlane.xlu1 %1037 }
 0x3ce   : > { %v8223_v29 = vpop.f32.mrf.mxu1 }
 0x3cf   : > { %v1088_v25 = vsel %vm639_vm5, %v8223_v29, 0.0 }
 0x3d0   : > { %1089 = vadd.xlane.f32.xlu1 %v1088_v25  ;;  %v8291_v25 = vpop.xlane.xlu0 %1066 }
 0x3d4   : > { %v8227_v31 = vpop.f32.mrf.mxu3 }
 0x3d5   : > { %v991_v34 = vsel %vm639_vm5, %v8227_v31, 0.0 }
 0x3d6   : > { %v8231_v35 = vpop.f32.mrf.mxu1 }
 0x3d7   : > { %v1091_v36 = vsel %vm639_vm5, %v8231_v35, 0.0 }
 0x3d8   : > { %992 = vadd.xlane.f32.xlu1 %v991_v34  ;;  %1092 = vadd.xlane.f32.xlu0 %v1091_v36  ;;  %v8295_v36 = vpop.xlane.xlu1 %975 }
 0x3dc   : > { %v8235_v26 = vpop.f32.mrf.mxu3 }
 0x3dd   : > { %v994_v1 = vsel %vm639_vm5, %v8235_v26, 0.0 }
 0x3de   : > { %v8239_v33 = vpop.f32.mrf.mxu1 }
 0x3df   : > { %v1094_v30 = vsel %vm639_vm5, %v8239_v33, 0.0 }
 0x3e0   : > { %1095 = vadd.xlane.f32.xlu2 %v1094_v30  ;;  %995 = vadd.xlane.f32.xlu0 %v994_v1 }
 0x3e4   : > { %v8243_v61 = vpop.f32.mrf.mxu3 }
 0x3e5   : > { %v997_v37 = vsel %vm639_vm5, %v8243_v61, 0.0 }
 0x3e6   : > { %v8247_v32 = vpop.f32.mrf.mxu1 }
 0x3e7   : > { %v1097_v41 = vsel %vm639_vm5, %v8247_v32, 0.0 }
 0x3e8   : > { %998 = vadd.xlane.f32.xlu2 %v997_v37  ;;  %1098 = vadd.xlane.f32.xlu1 %v1097_v41  ;;  %v1061_v37 = vpop.xlane.xlu2 %1060  ;;  %v8301_v41 = vpop.xlane.xlu0 %1040 }
 0x3ec   : > { %v8251_v47 = vpop.f32.mrf.mxu3 }
 0x3ed   : > { %v1000_v42 = vsel %vm639_vm5, %v8251_v47, 0.0 }
 0x3ee   : > { %v8255_v52 = vpop.f32.mrf.mxu1 }
 0x3ef   : > { %v1100_v55 = vsel %vm639_vm5, %v8255_v52, 0.0 }
 0x3f0   : > { %1001 = vadd.xlane.f32.xlu1 %v1000_v42  ;;  %1101 = vadd.xlane.f32.xlu0 %v1100_v55  ;;  %v8305_v55 = vpop.xlane.xlu1 %1072 }
 0x3f4   : > { %v8259_v0 = vpop.f32.mrf.mxu3 }
 0x3f5   : > { %v1003_v2 = vsel %vm639_vm5, %v8259_v0, 0.0 }
 0x3f8   : > { %1004 = vadd.xlane.f32.xlu0 %v1003_v2  ;;  %v8307_v2 = vpop.xlane.xlu2 %1034 }
 0x3fc   : > { %v8265_v5 = vpop.f32.mrf.mxu3 }
 0x3fd   : > { %11065 = vst [vmem:[#allocation16_spill] sm:$0xff] %v8265_v5  ;;  %v1006_v6 = vsel %vm639_vm5, %v8265_v5, 0.0 }
 0x3fe   : > { %1007 = vadd.xlane.f32.xlu2 %v1006_v6  ;;  %v8309_v6 = vpop.xlane.xlu0 %978 }
 0x404   : > { %v8271_v11 = vpop.f32.mrf.mxu3 }
 0x405   : > { %11066 = vst [vmem:[#allocation17_spill] sm:$0xff] %v8271_v11  ;;  %v1009_v54 = vsel %vm639_vm5, %v8271_v11, 0.0 }
 0x406   : > { %1010 = vadd.xlane.f32.xlu1 %v1009_v54  ;;  %v8311_v54 = vpop.xlane.xlu1 %981 }
 0x407   : > { %11071 = vst [vmem:[#allocation22_spill] sm:$0xff] %v8311_v54 }
 0x40c   : > { %v8279_v18 = vpop.f32.mrf.mxu3 }
 0x40d   : > { %11067 = vst [vmem:[#allocation18_spill] sm:$0xff] %v8279_v18  ;;  %v1012_v53 = vsel %vm639_vm5, %v8279_v18, 0.0 }
 0x40e   : > { %1013 = vadd.xlane.f32.xlu2 %v1012_v53  ;;  %v8313_v53 = vpop.xlane.xlu0 %1075  ;;  %v8317_v43 = vpop.xlane.xlu1 %1046 }
 0x40f   : > { %11072 = vst [vmem:[#allocation23_spill] sm:$0xff] %v8317_v43 }
 0x414   : > { %v8287_v60 = vpop.f32.mrf.mxu3 }
 0x415   : > { %11068 = vst [vmem:[#allocation19_spill] sm:$0xff] %v8287_v60  ;;  %v1103_v19 = vsel %vm639_vm5, %v8287_v60, 0.0 }
 0x416   : > { %1104 = vadd.xlane.f32.xlu2 %v1103_v19  ;;  %v7570_v19 = vmov 135.0  }
 0x417   : > { %7146 = vrcp.f32 %v7570_v19 }
 0x41c   : > { %v8293_v34 = vpop.f32.mrf.mxu3 }
 0x41d   : > { %11069 = vst [vmem:[#allocation20_spill] sm:$0xff] %v8293_v34  ;;  %v1106_v1 = vsel %vm639_vm5, %v8293_v34, 0.0  ;;  %v7147_v48 = vpop.eup %7146 }
 0x41e   : > { %1107 = vadd.xlane.f32.xlu1 %v1106_v1  ;;  %v8315_v1 = vpop.xlane.xlu2 %972  ;;  %v1121_v12 = vmul.f32 135.0, %v7147_v48  ;;  %vm1125_vm15 = vweird.f32 %v7147_v48 }
 0x420   : > { %v1122_v21 = vsub.f32 1.0, %v1121_v12 }
 0x422   : > { %v1123_v18 = vmul.f32 %v7147_v48, %v1122_v21 }
 0x424   : > { %v8299_v30 = vpop.f32.mrf.mxu3  ;;  %v1124_v11 = vadd.f32 %v7147_v48, %v1123_v18 }
 0x425   : > { %11070 = vst [vmem:[#allocation21_spill] sm:$0xff] %v8299_v30  ;;  %v1109_v42 = vsel %vm639_vm5, %v8299_v30, 0.0 }
 0x426   : > { %1110 = vadd.xlane.f32.xlu2 %v1109_v42  ;;  %v8319_v23 = vpop.xlane.xlu2 %1069  ;;  %v8321_v42 = vpop.xlane.xlu0 %1078  ;;  %v8325_v7 = vsel %vm1125_vm15, %v7147_v48, %v1124_v11 }
 0x427   : > { %11073 = vst [vmem:[#allocation24_spill] sm:$0xff] %v8321_v42 }
 0x42e   : > { %v8323_v24 = vpop.xlane.xlu2 %1043 }
 0x443   : > { %v1090_v30 = vpop.xlane.xlu1 %1089 }
 0x44b   : > { %v993_v34 = vpop.xlane.xlu1 %992  ;;  %v1093_v60 = vpop.xlane.xlu0 %1092 }
 0x44c   : > { %v1015_v22 = vadd.f32 %v993_v34, %v961_v56 }
 0x44e   : > { %v1048_v19 = vadd.f32 %v1026_v62, %v1015_v22 }
 0x450   : > { %v1080_v5 = vadd.f32 %v1058_v57, %v1048_v19 }
 0x452   : > { %v1112_v43 = vadd.f32 %v1090_v30, %v1080_v5 }
 0x453   : > { %v1096_v20 = vpop.xlane.xlu2 %1095  ;;  %v996_v54 = vpop.xlane.xlu0 %995 }
 0x454   : > { %v1127_v42 = vmul.f32 %v8325_v7, %v1112_v43  ;;  %v1016_v16 = vadd.f32 %v996_v54, %v964_v28 }
 0x456   : > { %v1049_v12 = vadd.f32 %v8261_v44, %v1016_v16  ;;  %v8330_v13 = vsub.f32 %v8223_v29, %v1127_v42  ;;  %v8333_v21 = vsub.f32 %v8071_v38, %v1127_v42  ;;  %v8336_v56 = vsub.f32 %v8227_v31, %v1127_v42 }
 0x457   : > { %v8345_v16 = vsub.f32 %v8104_v51, %v1127_v42  ;;  %v8351_v18 = vsub.f32 %v8084_v40, %v1127_v42 }
 0x458   : > { %v1081_v22 = vadd.f32 %v1061_v37, %v1049_v12  ;;  %v1335_v48 = vmul.f32 %v8330_v13, %v8330_v13  ;;  %v1143_v5 = vmul.f32 %v8333_v21, %v8333_v21  ;;  %v1191_v43 = vmul.f32 %v8336_v56, %v8336_v56 }
 0x459   : > { %v1239_v30 = vmul.f32 %v8351_v18, %v8351_v18 }
 0x45a   : > { %v1113_v29 = vadd.f32 %v1093_v60, %v1081_v22  ;;  %v1343_v38 = vsel %vm639_vm5, %v1335_v48, 0.0  ;;  %v1151_v44 = vsel %vm958_vm14, %v1143_v5, 0.0  ;;  %v1199_v31 = vsel %vm639_vm5, %v1191_v43, 0.0 }
 0x45b   : > { %v999_v57 = vpop.xlane.xlu2 %998  ;;  %1344 = vadd.xlane.f32.xlu1 %v1343_v38  ;;  %1152 = vadd.xlane.f32.xlu2 %v1151_v44  ;;  %v1099_v11 = vpop.xlane.xlu1 %1098  ;;  %v1287_v60 = vmul.f32 %v8345_v16, %v8345_v16  ;;  %v1247_v12 = vsel %vm1023_vm13, %v1239_v30, 0.0 }
 0x45c   : > { %v1128_v62 = vmul.f32 %v8325_v7, %v1113_v29  ;;  %v1017_v28 = vadd.f32 %v999_v57, %v8269_v10  ;;  %1200 = vadd.xlane.f32.xlu0 %v1199_v31 }
 0x45e   : > { %v1050_v51 = vadd.f32 %v8275_v14, %v1017_v28  ;;  %v8359_v34 = vsub.f32 %v8235_v26, %v1128_v62  ;;  %v8367_v54 = vsub.f32 %v8107_v50, %v1128_v62  ;;  %v1295_v14 = vsel %vm958_vm14, %v1287_v60, 0.0 }
 0x45f   : > { %v8372_v19 = vsub.f32 %v8231_v35, %v1128_v62  ;;  %v8376_v22 = vsub.f32 %v8073_v9, %v1128_v62  ;;  %v8398_v28 = vsub.f32 %v8123_v59, %v1128_v62 }
 0x460   : > { %v1082_v37 = vadd.f32 %v8277_v15, %v1050_v51  ;;  %v1192_v40 = vmul.f32 %v8359_v34, %v8359_v34 }
 0x461   : > { %v1336_v5 = vmul.f32 %v8372_v19, %v8372_v19  ;;  %v1144_v43 = vmul.f32 %v8376_v22, %v8376_v22  ;;  %v1288_v51 = vmul.f32 %v8398_v28, %v8398_v28 }
 0x462   : > { %v1114_v10 = vadd.f32 %v1096_v20, %v1082_v37  ;;  %v1202_v42 = vsel %vm639_vm5, %v1192_v40, 0.0  ;;  %v1240_v20 = vmul.f32 %v8367_v54, %v8367_v54 }
 0x463   : > { %1296 = vadd.xlane.f32.xlu2 %v1295_v14  ;;  %v1002_v26 = vpop.xlane.xlu1 %1001  ;;  %1203 = vadd.xlane.f32.xlu1 %v1202_v42  ;;  %v1102_v15 = vpop.xlane.xlu0 %1101  ;;  %v1298_v37 = vsel %vm958_vm14, %v1288_v51, 0.0 }
 0x464   : > { %v1018_v50 = vadd.f32 %v1002_v26, %v8283_v17  ;;  %1248 = vadd.xlane.f32.xlu0 %v1247_v12  ;;  %v1129_v48 = vmul.f32 %v8325_v7, %v1114_v10  ;;  %v1250_v9 = vsel %vm1023_vm13, %v1240_v20, 0.0  ;;  %v1346_v17 = vsel %vm639_vm5, %v1336_v5, 0.0 }
 0x466   : > { %v1051_v35 = vadd.f32 %v8307_v2, %v1018_v50  ;;  %v8391_v44 = vsub.f32 %v8076_v39, %v1129_v48  ;;  %v8394_v31 = vsub.f32 %v8126_v63, %v1129_v48  ;;  %v1154_v2 = vsel %vm958_vm14, %v1144_v43, 0.0 }
 0x467   : > { %v8409_v60 = vsub.f32 %v8140_v27, %v1129_v48  ;;  %v8419_v40 = vsub.f32 %v8243_v61, %v1129_v48  ;;  %v8438_v20 = vsub.f32 %v8239_v33, %v1129_v48 }
 0x468   : > { %v1083_v29 = vadd.f32 %v8291_v25, %v1051_v35  ;;  %v1145_v39 = vmul.f32 %v8391_v44, %v8391_v44  ;;  %v1241_v63 = vmul.f32 %v8394_v31, %v8394_v31 }
 0x469   : > { %v1289_v27 = vmul.f32 %v8409_v60, %v8409_v60 }
 0x46a   : > { %v1115_v38 = vadd.f32 %v1099_v11, %v1083_v29  ;;  %v1157_v62 = vsel %vm958_vm14, %v1145_v39, 0.0  ;;  %v1253_v30 = vsel %vm1023_vm13, %v1241_v63, 0.0 }
 0x46b   : > { %1251 = vadd.xlane.f32.xlu2 %v1250_v9  ;;  %1347 = vadd.xlane.f32.xlu1 %v1346_v17  ;;  %v1005_v57 = vpop.xlane.xlu0 %1004  ;;  %v1301_v42 = vsel %vm958_vm14, %v1289_v27, 0.0 }
 0x46c   : > { %1155 = vadd.xlane.f32.xlu0 %v1154_v2  ;;  %v1130_v25 = vmul.f32 %v8325_v7, %v1115_v38  ;;  %v1019_v11 = vadd.f32 %v1005_v57, %v8315_v1 }
 0x46e   : > { %v1052_v59 = vadd.f32 %v8285_v45, %v1019_v11  ;;  %v8415_v1 = vsub.f32 %v8092_v46, %v1130_v25  ;;  %v1193_v46 = vmul.f32 %v8419_v40, %v8419_v40  ;;  %v8431_v61 = vsub.f32 %v8251_v47, %v1130_v25 }
 0x46f   : > { %v8434_v50 = vsub.f32 %v8157_v8, %v1130_v25  ;;  %v1337_v8 = vmul.f32 %v8438_v20, %v8438_v20  ;;  %v8451_v48 = vsub.f32 %v8247_v32, %v1130_v25  ;;  %v8458_v17 = vsub.f32 %v8143_v4, %v1130_v25 }
 0x470   : > { %v1084_v45 = vadd.f32 %v8319_v23, %v1052_v59  ;;  %v1146_v10 = vmul.f32 %v8415_v1, %v8415_v1  ;;  %v1205_v23 = vsel %vm639_vm5, %v1193_v46, 0.0 }
 0x471   : > { %v1008_v14 = vpop.xlane.xlu2 %1007  ;;  %v1290_v47 = vmul.f32 %v8434_v50, %v8434_v50  ;;  %v1349_v38 = vsel %vm639_vm5, %v1337_v8, 0.0  ;;  %v1338_v57 = vmul.f32 %v8451_v48, %v8451_v48  ;;  %v11076_v8 = vld [vmem:[#allocation22_spill] sm:$0xff] }
 0x472   : > { %v1116_v26 = vadd.f32 %v1102_v15, %v1084_v45  ;;  %v1160_v12 = vsel %vm958_vm14, %v1146_v10, 0.0  ;;  %v1194_v15 = vmul.f32 %v8431_v61, %v8431_v61  ;;  %v1020_v5 = vadd.f32 %v1008_v14, %v8295_v36  ;;  %v11074_v14 = vld [vmem:[#allocation9_spill] sm:$0xff] }
 0x473   : > { %1158 = vadd.xlane.f32.xlu2 %v1157_v62  ;;  %1254 = vadd.xlane.f32.xlu1 %v1253_v30  ;;  %v1304_v33 = vsel %vm958_vm14, %v1290_v47, 0.0  ;;  %v1352_v25 = vsel %vm639_vm5, %v1338_v57, 0.0 }
 0x474   : > { %1299 = vadd.xlane.f32.xlu0 %v1298_v37  ;;  %v1131_v35 = vmul.f32 %v8325_v7, %v1116_v26  ;;  %v1208_v29 = vsel %vm639_vm5, %v1194_v15, 0.0  ;;  %v1053_v36 = vadd.f32 %v8301_v41, %v1020_v5 }
 0x476   : > { %v8454_v9 = vsub.f32 %v8259_v0, %v1131_v35  ;;  %v1242_v0 = vmul.f32 %v8458_v17, %v8458_v17  ;;  %v1085_v39 = vadd.f32 %v8305_v55, %v1053_v36  ;;  %v8470_v4 = vsub.f32 %v8160_v49, %v1131_v35  ;;  %v11078_v36 = vld [vmem:[#allocation7_spill] sm:$0xff] }
 0x477   : > { %v8475_v59 = vsub.f32 %v8255_v52, %v1131_v35 }
 0x478   : > { %v1195_v32 = vmul.f32 %v8454_v9, %v8454_v9  ;;  %v1256_v62 = vsel %vm1023_vm13, %v1242_v0, 0.0  ;;  %v1243_v49 = vmul.f32 %v8470_v4, %v8470_v4 }
 0x479   : > { %v1011_v2 = vpop.xlane.xlu1 %1010  ;;  %v1339_v37 = vmul.f32 %v8475_v59, %v8475_v59 }
 0x47a   : > { %v1021_v11 = vadd.f32 %v1011_v2, %v8309_v6  ;;  %v1211_v51 = vsel %vm639_vm5, %v1195_v32, 0.0  ;;  %v8479_v6 = vsub.f32 %v8117_v58, %v1131_v35  ;;  %v1259_v58 = vsel %vm1023_vm13, %v1243_v49, 0.0  ;;  %v11079_v32 = vld [vmem:[#allocation16_spill] sm:$0xff] }
 0x47b   : > { %1302 = vadd.xlane.f32.xlu2 %v1301_v42  ;;  %1161 = vadd.xlane.f32.xlu1 %v1160_v12  ;;  %v11075_v12 = vld [vmem:[#allocation10_spill] sm:$0xff] }
 0x47c   : > { %1206 = vadd.xlane.f32.xlu0 %v1205_v23  ;;  %v1054_v55 = vadd.f32 %v8323_v24, %v1021_v11  ;;  %v1147_v52 = vmul.f32 %v8479_v6, %v8479_v6  ;;  %v1355_v24 = vsel %vm639_vm5, %v1339_v37, 0.0  ;;  %v8500_v23 = vsub.f32 %v11075_v12, %v1131_v35  ;;  %v11080_v11 = vld [vmem:[#allocation23_spill] sm:$0xff] }
 0x47e   : > { %v1086_v27 = vadd.f32 %v8313_v53, %v1054_v55  ;;  %v1163_v26 = vsel %vm958_vm14, %v1147_v52, 0.0  ;;  %v1291_v47 = vmul.f32 %v8500_v23, %v8500_v23  ;;  %v11082_v52 = vld [vmem:[#allocation17_spill] sm:$0xff] }
 0x480   : > { %v1307_v57 = vsel %vm958_vm14, %v1291_v47, 0.0 }
 0x481   : > { %v1014_v43 = vpop.xlane.xlu2 %1013 }
 0x482   : > { %v1022_v5 = vadd.f32 %v1014_v43, %v11076_v8 }
 0x483   : > { %1209 = vadd.xlane.f32.xlu2 %v1208_v29  ;;  %1305 = vadd.xlane.f32.xlu1 %v1304_v33  ;;  %v11077_v29 = vld [vmem:[#allocation11_spill] sm:$0xff] }
 0x484   : > { %1350 = vadd.xlane.f32.xlu0 %v1349_v38 }
 0x489   : > { %v1105_v63 = vpop.xlane.xlu2 %1104 }
 0x48a   : > { %v1117_v41 = vadd.f32 %v1105_v63, %v1085_v39  ;;  %v1055_v39 = vadd.f32 %v11080_v11, %v1022_v5  ;;  %v11085_v5 = vld [vmem:[#allocation20_spill] sm:$0xff] }
 0x48b   : > { %1353 = vadd.xlane.f32.xlu2 %v1352_v25  ;;  %1212 = vadd.xlane.f32.xlu1 %v1211_v51  ;;  %v11081_v51 = vld [vmem:[#allocation24_spill] sm:$0xff] }
 0x48c   : > { %1257 = vadd.xlane.f32.xlu0 %v1256_v62  ;;  %v1132_v30 = vmul.f32 %v8325_v7, %v1117_v41  ;;  %v1087_v62 = vadd.f32 %v11081_v51, %v1055_v39  ;;  %v11089_v51 = vld [vmem:[#allocation21_spill] sm:$0xff] }
 0x48e   : > { %v8493_v46 = vsub.f32 %v8134_v3, %v1132_v30  ;;  %v8496_v42 = vsub.f32 %v11074_v14, %v1132_v30  ;;  %v8511_v33 = vsub.f32 %v11077_v29, %v1132_v30  ;;  %v8520_v0 = vsub.f32 %v11079_v32, %v1132_v30 }
 0x490   : > { %v1148_v15 = vmul.f32 %v8493_v46, %v8493_v46  ;;  %v1244_v3 = vmul.f32 %v8496_v42, %v8496_v42  ;;  %v1292_v43 = vmul.f32 %v8511_v33, %v8511_v33  ;;  %v1196_v25 = vmul.f32 %v8520_v0, %v8520_v0 }
 0x491   : > { %v1108_v45 = vpop.xlane.xlu1 %1107 }
 0x492   : > { %v1118_v10 = vadd.f32 %v1108_v45, %v1086_v27  ;;  %v1166_v35 = vsel %vm958_vm14, %v1148_v15, 0.0  ;;  %v1262_v38 = vsel %vm1023_vm13, %v1244_v3, 0.0  ;;  %v1310_v55 = vsel %vm958_vm14, %v1292_v43, 0.0  ;;  %v11083_v45 = vld [vmem:[#allocation13_spill] sm:$0xff] }
 0x493   : > { %1260 = vadd.xlane.f32.xlu2 %v1259_v58  ;;  %1356 = vadd.xlane.f32.xlu1 %v1355_v24  ;;  %v11084_v24 = vld [vmem:[#allocation19_spill] sm:$0xff] }
 0x494   : > { %1164 = vadd.xlane.f32.xlu0 %v1163_v26  ;;  %v1133_v53 = vmul.f32 %v8325_v7, %v1118_v10  ;;  %v1214_v10 = vsel %vm639_vm5, %v1196_v25, 0.0  ;;  %v8540_v14 = vsub.f32 %v11084_v24, %v1132_v30  ;;  %v11086_v30 = vld [vmem:[#allocation18_spill] sm:$0xff] }
 0x496   : > { %v8516_v2 = vsub.f32 %v11078_v36, %v1133_v53  ;;  %v8533_v27 = vsub.f32 %v11082_v52, %v1133_v53  ;;  %v8536_v58 = vsub.f32 %v11083_v45, %v1133_v53  ;;  %v1340_v3 = vmul.f32 %v8540_v14, %v8540_v14  ;;  %v11087_v36 = vld [vmem:[#allocation15_spill] sm:$0xff] }
 0x497   : > { %v8552_v29 = vsub.f32 %v11085_v5, %v1133_v53 }
 0x498   : > { %v1149_v63 = vmul.f32 %v8516_v2, %v8516_v2  ;;  %v1197_v12 = vmul.f32 %v8533_v27, %v8533_v27  ;;  %v1293_v15 = vmul.f32 %v8536_v58, %v8536_v58 }
 0x499   : > { %v1111_v41 = vpop.xlane.xlu2 %1110  ;;  %v1341_v32 = vmul.f32 %v8552_v29, %v8552_v29 }
 0x49a   : > { %v1119_v49 = vadd.f32 %v1111_v41, %v1087_v62  ;;  %v1169_v37 = vsel %vm958_vm14, %v1149_v63, 0.0  ;;  %v1217_v47 = vsel %vm639_vm5, %v1197_v12, 0.0  ;;  %v1313_v8 = vsel %vm958_vm14, %v1293_v15, 0.0  ;;  %v11088_v41 = vld [vmem:[#allocation12_spill] sm:$0xff]  ;;  %v11091_v15 = vld [vmem:[#allocation14_spill] sm:$0xff] }
 0x49b   : > { %1167 = vadd.xlane.f32.xlu2 %v1166_v35  ;;  %1263 = vadd.xlane.f32.xlu1 %v1262_v38  ;;  %v1358_v38 = vsel %vm639_vm5, %v1340_v3, 0.0  ;;  %v1361_v43 = vsel %vm639_vm5, %v1341_v32, 0.0  ;;  %v737_v32 = vld [vmem:[%s11015_s0 + $0x90] sm:$0xf] }
 0x49c   : > { %1308 = vadd.xlane.f32.xlu0 %v1307_v57  ;;  %v1134_v26 = vmul.f32 %v8325_v7, %v1119_v49  ;;  %v8559_v57 = vsub.f32 %v11087_v36, %v1133_v53  ;;  %v729_v36 = vld [vmem:[%s11015_s0 + $0x40] sm:$0xf]  ;;  %6763 = vmatpush.msk.msra.mxu1 %vm1503_vm1, %v737_v32 }
 0x49d   : > { %6737 = vmatpush.msk.msra.mxu2 %vm1503_vm1, %v729_v36 }
 0x49e   : > { %v8555_v35 = vsub.f32 %v11086_v30, %v1134_v26  ;;  %v1245_v39 = vmul.f32 %v8559_v57, %v8559_v57  ;;  %v8570_v25 = vsub.f32 %v11088_v41, %v1134_v26  ;;  %v8573_v53 = vsub.f32 %v11089_v51, %v1134_v26  ;;  %v731_v41 = vld [vmem:[%s11015_s0 + $0x50] sm:$0xff] }
 0x49f   : > { %v8589_v3 = vsub.f32 %v11091_v15, %v1134_v26  ;;  %v956_v51 = vld [vmem:[%s11015_s0 + $0x70] sm:$0x7f]  ;;  %v734_v15 = vld [vmem:[%s11015_s0 + $0x78] sm:$0xff] }
 0x4a0   : > { %v1198_v11 = vmul.f32 %v8555_v35, %v8555_v35  ;;  %v1265_v62 = vsel %vm1023_vm13, %v1245_v39, 0.0  ;;  %v1342_v52 = vmul.f32 %v8573_v53, %v8573_v53  ;;  %v732_v39 = vld [vmem:[%s11015_s0 + $0x58] sm:$0xff]  ;;  %6754 = vmatpush.msk.msra.mxu0 %vm610_vm2, %v956_v51 }
 0x4a2   : > { %v1220_v63 = vsel %vm639_vm5, %v1198_v11, 0.0  ;;  %v1364_v24 = vsel %vm639_vm5, %v1342_v52, 0.0  ;;  %v728_v11 = vld [vmem:[%s11015_s0 + $0x38] sm:$0xff] }
 0x4a3   : > { %1311 = vadd.xlane.f32.xlu2 %v1310_v55  ;;  %1170 = vadd.xlane.f32.xlu1 %v1169_v37  ;;  %v11090_v55 = vld [vmem:[#allocation8_spill] sm:$0xff]  ;;  %v1246_v37 = vmul.f32 %v8570_v25, %v8570_v25 }
 0x4a4   : > { %1215 = vadd.xlane.f32.xlu0 %v1214_v10  ;;  %v8577_v49 = vsub.f32 %v11090_v55, %v1134_v26  ;;  %v733_v26 = vld [vmem:[%s11015_s0 + $0x60] sm:$0xff]  ;;  %1520 = vmatpush.msra.mxu2 %v728_v11 }
 0x4a5   : > { %v1268_v10 = vsel %vm1023_vm13, %v1246_v37, 0.0  ;;  %1601 = vmatpush.msra.mxu3 %v733_v26 }
 0x4a6   : > { %v1150_v45 = vmul.f32 %v8577_v49, %v8577_v49 }
 0x4a7   : > { %1602 = vmatpush.msra.mxu3 %v732_v39 }
 0x4a8   : > { %v1172_v12 = vsel %vm958_vm14, %v1150_v45, 0.0  ;;  %v726_v45 = vld [vmem:[%s11015_s0 + $0x28] sm:$0xff] }
 0x4a9   : > { %1603 = vmatpush.msra.mxu3 %v731_v41 }
 0x4ab   : > { %1218 = vadd.xlane.f32.xlu2 %v1217_v47  ;;  %1314 = vadd.xlane.f32.xlu1 %v1313_v8  ;;  %v1294_v47 = vmul.f32 %v8589_v3, %v8589_v3 }
 0x4ac   : > { %1359 = vadd.xlane.f32.xlu0 %v1358_v38 }
 0x4ad   : > { %v1316_v8 = vsel %vm958_vm14, %v1294_v47, 0.0 }
 0x4b3   : > { %1362 = vadd.xlane.f32.xlu2 %v1361_v43  ;;  %1221 = vadd.xlane.f32.xlu1 %v1220_v63  ;;  %v736_v43 = vld [vmem:[%s11015_s0 + $0x88] sm:$0xff]  ;;  %v727_v63 = vld [vmem:[%s11015_s0 + $0x30] sm:$0xff] }
 0x4b4   : > { %1266 = vadd.xlane.f32.xlu0 %v1265_v62  ;;  %1770 = vmatpush.msra.mxu1 %v736_v43  ;;  %v735_v62 = vld [vmem:[%s11015_s0 + $0x80] sm:$0xff] }
 0x4b5   : > { %1521 = vmatpush.msra.mxu2 %v727_v63 }
 0x4b6   : > { %1771 = vmatpush.msra.mxu1 %v735_v62 }
 0x4b7   : > { %1522 = vmatpush.msra.mxu2 %v726_v45 }
 0x4b8   : > { %1772 = vmatpush.msra.mxu1 %v734_v15 }
 0x4bb   : > { %1269 = vadd.xlane.f32.xlu2 %v1268_v10  ;;  %1365 = vadd.xlane.f32.xlu1 %v1364_v24  ;;  %v730_v10 = vld [vmem:[%s11015_s0 + $0x48] sm:$0xff] }
 0x4bc   : > { %1173 = vadd.xlane.f32.xlu0 %v1172_v12  ;;  %v955_v24 = vld [vmem:[%s11015_s0 + $0x68] sm:$0xff]  ;;  %1604 = vmatpush.msra.mxu3 %v730_v10 }
 0x4bd   : > { %1688 = vmatpush.msra.mxu0 %v955_v24 }
 0x4c4   : > { %1317 = vadd.xlane.f32.xlu0 %v1316_v8 }
 0x4ce   : > { %v1153_v5 = vpop.xlane.xlu2 %1152  ;;  %v1345_v30 = vpop.xlane.xlu1 %1344 }
 0x4cf   : > { %v1201_v38 = vpop.xlane.xlu0 %1200 }
 0x4d0   : > { %v1223_v55 = vadd.f32 %v1201_v38, %v1153_v5 }
 0x4d6   : > { %v1297_v37 = vpop.xlane.xlu2 %1296  ;;  %v1204_v52 = vpop.xlane.xlu1 %1203 }
 0x4d7   : > { %v1249_v12 = vpop.xlane.xlu0 %1248 }
 0x4d8   : > { %v1271_v47 = vadd.f32 %v1249_v12, %v1223_v55 }
 0x4da   : > { %v1319_v8 = vadd.f32 %v1297_v37, %v1271_v47 }
 0x4dc   : > { %v1367_v5 = vadd.f32 %v1345_v30, %v1319_v8 }
 0x4de   : > { %v1375_v38 = vmul.f32 %v1367_v5, %v8325_v7  ;;  %v1252_v36 = vpop.xlane.xlu2 %1251  ;;  %v1348_v26 = vpop.xlane.xlu1 %1347 }
 0x4df   : > { %v1156_v32 = vpop.xlane.xlu0 %1155 }
 0x4e0   : > { %v1383_v11 = vadd.f32 1e-05, %v1375_v38  ;;  %v1224_v39 = vadd.f32 %v1204_v52, %v1156_v32 }
 0x4e2   : > { %7148 = vrsqrt.f32 %v1383_v11  ;;  %v1272_v41 = vadd.f32 %v1252_v36, %v1224_v39  ;;  %vm1397_vm3 = vweird.f32 %v1383_v11 }
 0x4e6   : > { %v1159_v43 = vpop.xlane.xlu2 %1158  ;;  %v1255_v63 = vpop.xlane.xlu1 %1254 }
 0x4e7   : > { %v1300_v51 = vpop.xlane.xlu0 %1299 }
 0x4e8   : > { %v7149_v62 = vpop.eup %7148  ;;  %v1320_v45 = vadd.f32 %v1300_v51, %v1272_v41 }
 0x4e9   : > { %v1392_v10 = vmul.f32 %v7149_v62, %v1383_v11  ;;  %vm1398_vm2 = vweird.f32 %v7149_v62 }
 0x4ea   : > { %v1368_v55 = vadd.f32 %v1348_v26, %v1320_v45  ;;  %vm1399_vm4 = vmor %vm1397_vm3, %vm1398_vm2 }
 0x4eb   : > { %v1393_v24 = vmul.f32 %v7149_v62, %v1392_v10 }
 0x4ec   : > { %v1376_v37 = vmul.f32 %v1368_v55, %v8325_v7 }
 0x4ed   : > { %v1394_v30 = vmul.f32 0.5, %v1393_v24 }
 0x4ee   : > { %v1384_v12 = vadd.f32 1e-05, %v1376_v37  ;;  %v1303_v15 = vpop.xlane.xlu2 %1302  ;;  %v1162_v47 = vpop.xlane.xlu1 %1161 }
 0x4ef   : > { %v1395_v8 = vsub.f32 1.5, %v1394_v30  ;;  %v1207_v5 = vpop.xlane.xlu0 %1206 }
 0x4f0   : > { %7150 = vrsqrt.f32 %v1384_v12  ;;  %v1225_v52 = vadd.f32 %v1207_v5, %v1159_v43  ;;  %vm1407_vm7 = vweird.f32 %v1384_v12 }
 0x4f1   : > { %v1396_v38 = vmul.f32 %v7149_v62, %v1395_v8 }
 0x4f2   : > { %v1273_v36 = vadd.f32 %v1255_v63, %v1225_v52 }
 0x4f3   : > { %v8641_v32 = vsel %vm1399_vm4, %v7149_v62, %v1396_v38 }
 0x4f4   : > { %v1471_v26 = vmul.f32 %v8641_v32, %v8333_v21  ;;  %v1557_v39 = vmul.f32 %v8641_v32, %v8336_v56  ;;  %v1638_v41 = vmul.f32 %v8641_v32, %v8351_v18  ;;  %v1722_v51 = vmul.f32 %v8641_v32, %v8345_v16 }
 0x4f5   : > { %v1321_v63 = vadd.f32 %v1303_v15, %v1273_v36 }
 0x4f6   : > { %v7151_v45 = vpop.eup %7150  ;;  %6738 = vmatmul.msk.f32.vlgmr.msra.gmra.mxu2 %vm958_vm14, %v1471_v26  ;;  %6746 = vmatmul.msk.f32.vlgmr.msra.gmra.mxu3 %vm639_vm5, %v1557_v39  ;;  %v1210_v11 = vpop.xlane.xlu2 %1209 }
 0x4f7   : > { %v1306_v43 = vpop.xlane.xlu1 %1305  ;;  %v1402_v62 = vmul.f32 %v7151_v45, %v1384_v12  ;;  %6755 = vmatmul.msk.f32.vlgmr.msra.gmra.mxu0 %vm1023_vm13, %v1638_v41  ;;  %6764 = vmatmul.msk.f32.vlgmr.msra.gmra.mxu1 %vm958_vm14, %v1722_v51  ;;  %v1351_v21 = vpop.xlane.xlu0 %1350  ;;  %vm1408_vm6 = vweird.f32 %v7151_v45  ;;  %v1226_v37 = vadd.f32 %v1210_v11, %v1162_v47 }
 0x4f8   : > { %v1369_v56 = vadd.f32 %v1351_v21, %v1321_v63  ;;  %vm1409_vm8 = vmor %vm1407_vm7, %vm1408_vm6 }
 0x4f9   : > { %v1403_v10 = vmul.f32 %v7151_v45, %v1402_v62 }
 0x4fa   : > { %v1377_v18 = vmul.f32 %v1369_v56, %v8325_v7 }
 0x4fb   : > { %v1404_v55 = vmul.f32 0.5, %v1403_v10 }
 0x4fc   : > { %v1385_v16 = vadd.f32 1e-05, %v1377_v18 }
 0x4fd   : > { %v1405_v24 = vsub.f32 1.5, %v1404_v55 }
 0x4fe   : > { %7152 = vrsqrt.f32 %v1385_v16  ;;  %v1354_v30 = vpop.xlane.xlu2 %1353  ;;  %vm1417_vm10 = vweird.f32 %v1385_v16 }
 0x4ff   : > { %v1213_v8 = vpop.xlane.xlu1 %1212  ;;  %v1258_v15 = vpop.xlane.xlu0 %1257  ;;  %v1406_v5 = vmul.f32 %v7151_v45, %v1405_v24 }
 0x500   : > { %v1274_v52 = vadd.f32 %v1258_v15, %v1226_v37 }
 0x501   : > { %v8656_v38 = vsel %vm1409_vm8, %v7151_v45, %v1406_v5 }
 0x502   : > { %v1322_v36 = vadd.f32 %v1306_v43, %v1274_v52  ;;  %v1472_v26 = vmul.f32 %v8656_v38, %v8376_v22  ;;  %v1558_v39 = vmul.f32 %v8656_v38, %v8359_v34  ;;  %v1639_v47 = vmul.f32 %v8656_v38, %v8367_v54 }
 0x503   : > { %v1723_v41 = vmul.f32 %v8656_v38, %v8398_v28 }
 0x504   : > { %v7153_v12 = vpop.eup %7152  ;;  %v1370_v51 = vadd.f32 %v1354_v30, %v1322_v36  ;;  %6739 = vmatmul.msk.f32.gmra.mxu2 %vm958_vm14, %v1472_v26  ;;  %6747 = vmatmul.msk.f32.gmra.mxu3 %vm639_vm5, %v1558_v39 }
 0x505   : > { %v1412_v45 = vmul.f32 %v7153_v12, %v1385_v16  ;;  %6756 = vmatmul.msk.f32.gmra.mxu0 %vm1023_vm13, %v1639_v47  ;;  %6765 = vmatmul.msk.f32.gmra.mxu1 %vm958_vm14, %v1723_v41  ;;  %vm1418_vm9 = vweird.f32 %v7153_v12 }
 0x506   : > { %v1378_v22 = vmul.f32 %v1370_v51, %v8325_v7  ;;  %v1261_v34 = vpop.xlane.xlu2 %1260  ;;  %vm1419_vm11 = vmor %vm1417_vm10, %vm1418_vm9 }
 0x507   : > { %v1413_v11 = vmul.f32 %v7153_v12, %v1412_v45  ;;  %v1357_v43 = vpop.xlane.xlu1 %1356  ;;  %v1165_v54 = vpop.xlane.xlu0 %1164 }
 0x508   : > { %v1386_v63 = vadd.f32 1e-05, %v1378_v22  ;;  %v1227_v28 = vadd.f32 %v1213_v8, %v1165_v54 }
 0x509   : > { %v1414_v62 = vmul.f32 0.5, %v1413_v11 }
 0x50a   : > { %7154 = vrsqrt.f32 %v1386_v63  ;;  %v1275_v18 = vadd.f32 %v1261_v34, %v1227_v28  ;;  %vm1427_vm15 = vweird.f32 %v1386_v63 }
 0x50b   : > { %v1415_v21 = vsub.f32 1.5, %v1414_v62 }
 0x50d   : > { %v1416_v56 = vmul.f32 %v7153_v12, %v1415_v21 }
 0x50e   : > { %v1168_v10 = vpop.xlane.xlu2 %1167 }
 0x50f   : > { %v1309_v55 = vpop.xlane.xlu0 %1308  ;;  %v8671_v24 = vsel %vm1419_vm11, %v7153_v12, %v1416_v56  ;;  %v1264_v36 = vpop.xlane.xlu1 %1263 }
 0x510   : > { %v7155_v37 = vpop.eup %7154  ;;  %v1323_v30 = vadd.f32 %v1309_v55, %v1275_v18  ;;  %v1473_v15 = vmul.f32 %v8671_v24, %v8391_v44  ;;  %v1559_v5 = vmul.f32 %v8671_v24, %v8419_v40  ;;  %v1640_v8 = vmul.f32 %v8671_v24, %v8394_v31 }
 0x511   : > { %v1422_v52 = vmul.f32 %v7155_v37, %v1386_v63  ;;  %v1724_v16 = vmul.f32 %v8671_v24, %v8409_v60  ;;  %vm1428_vm12 = vweird.f32 %v7155_v37 }
 0x512   : > { %v1371_v26 = vadd.f32 %v1357_v43, %v1323_v30  ;;  %6740 = vmatmul.msk.f32.gmra.mxu2 %vm958_vm14, %v1473_v15  ;;  %6748 = vmatmul.msk.f32.gmra.mxu3 %vm639_vm5, %v1559_v5  ;;  %vm1429_vm2 = vmor %vm1427_vm15, %vm1428_vm12 }
 0x513   : > { %v1423_v39 = vmul.f32 %v7155_v37, %v1422_v52  ;;  %6757 = vmatmul.msk.f32.gmra.mxu0 %vm1023_vm13, %v1640_v8  ;;  %6766 = vmatmul.msk.f32.gmra.mxu1 %vm958_vm14, %v1724_v16 }
 0x514   : > { %v1379_v44 = vmul.f32 %v1371_v26, %v8325_v7 }
 0x515   : > { %v1424_v40 = vmul.f32 0.5, %v1423_v39 }
 0x516   : > { %v1387_v47 = vadd.f32 1e-05, %v1379_v44  ;;  %v1312_v41 = vpop.xlane.xlu2 %1311 }
 0x517   : > { %v1425_v31 = vsub.f32 1.5, %v1424_v40  ;;  %v1216_v12 = vpop.xlane.xlu0 %1215  ;;  %v1171_v22 = vpop.xlane.xlu1 %1170 }
 0x518   : > { %7156 = vrsqrt.f32 %v1387_v47  ;;  %v1228_v60 = vadd.f32 %v1216_v12, %v1168_v10  ;;  %vm1437_vm4 = vweird.f32 %v1387_v47 }
 0x519   : > { %v1426_v51 = vmul.f32 %v7155_v37, %v1425_v31 }
 0x51a   : > { %v1276_v45 = vadd.f32 %v1264_v36, %v1228_v60 }
 0x51b   : > { %v8686_v34 = vsel %vm1429_vm2, %v7155_v37, %v1426_v51 }
 0x51c   : > { %v1474_v11 = vmul.f32 %v8686_v34, %v8415_v1  ;;  %v1560_v43 = vmul.f32 %v8686_v34, %v8431_v61  ;;  %v1641_v54 = vmul.f32 %v8686_v34, %v8458_v17  ;;  %v1725_v62 = vmul.f32 %v8686_v34, %v8434_v50 }
 0x51d   : > { %v1324_v63 = vadd.f32 %v1312_v41, %v1276_v45 }
 0x51e   : > { %v7157_v28 = vpop.eup %7156  ;;  %6741 = vmatmul.msk.f32.gmra.mxu2 %vm958_vm14, %v1474_v11  ;;  %6749 = vmatmul.msk.f32.gmra.mxu3 %vm639_vm5, %v1560_v43  ;;  %v1219_v10 = vpop.xlane.xlu2 %1218  ;;  %v741_v43 = vld [vmem:[%s11015_s0 + $0xb0] sm:$0xff] }
 0x51f   : > { %v1432_v21 = vmul.f32 %v7157_v28, %v1387_v47  ;;  %6758 = vmatmul.msk.f32.gmra.mxu0 %vm1023_vm13, %v1641_v54  ;;  %6767 = vmatmul.msk.f32.gmra.mxu1 %vm958_vm14, %v1725_v62  ;;  %v1360_v1 = vpop.xlane.xlu0 %1359  ;;  %vm1438_vm3 = vweird.f32 %v7157_v28  ;;  %v1315_v37 = vpop.xlane.xlu1 %1314  ;;  %v1229_v30 = vadd.f32 %v1219_v10, %v1171_v22  ;;  %v740_v54 = vld [vmem:[%s11015_s0 + $0xa8] sm:$0xff] }
 0x520   : > { %v1372_v56 = vadd.f32 %v1360_v1, %v1324_v63  ;;  %vm1439_vm6 = vmor %vm1437_vm4, %vm1438_vm3  ;;  %1850 = vmatpush.msrb.mxu2 %v741_v43 }
 0x521   : > { %v1433_v61 = vmul.f32 %v7157_v28, %v1432_v21 }
 0x522   : > { %v1380_v17 = vmul.f32 %v1372_v56, %v8325_v7  ;;  %1851 = vmatpush.msrb.mxu2 %v740_v54 }
 0x523   : > { %v1434_v18 = vmul.f32 0.5, %v1433_v61 }
 0x524   : > { %v1388_v55 = vadd.f32 1e-05, %v1380_v17 }
 0x525   : > { %v1435_v50 = vsub.f32 1.5, %v1434_v18 }
 0x526   : > { %7158 = vrsqrt.f32 %v1388_v55  ;;  %v1363_v44 = vpop.xlane.xlu2 %1362  ;;  %vm1447_vm8 = vweird.f32 %v1388_v55 }
 0x527   : > { %v1267_v15 = vpop.xlane.xlu0 %1266  ;;  %v1436_v5 = vmul.f32 %v7157_v28, %v1435_v50  ;;  %v1222_v12 = vpop.xlane.xlu1 %1221  ;;  %v739_v50 = vld [vmem:[%s11015_s0 + $0xa0] sm:$0xff] }
 0x528   : > { %v1277_v8 = vadd.f32 %v1267_v15, %v1229_v30  ;;  %1852 = vmatpush.msrb.mxu2 %v739_v50 }
 0x529   : > { %v8701_v52 = vsel %vm1439_vm6, %v7157_v28, %v1436_v5 }
 0x52a   : > { %v1325_v36 = vadd.f32 %v1315_v37, %v1277_v8  ;;  %v1475_v16 = vmul.f32 %v8701_v52, %v8479_v6  ;;  %v1561_v26 = vmul.f32 %v8701_v52, %v8454_v9  ;;  %v1642_v39 = vmul.f32 %v8701_v52, %v8470_v4 }
 0x52b   : > { %v1726_v40 = vmul.f32 %v8701_v52, %v8500_v23 }
 0x52c   : > { %v7159_v47 = vpop.eup %7158  ;;  %v1373_v31 = vadd.f32 %v1363_v44, %v1325_v36  ;;  %6742 = vmatmul.msk.f32.gmra.mxu2 %vm958_vm14, %v1475_v16  ;;  %6750 = vmatmul.msk.f32.gmra.mxu3 %vm639_vm5, %v1561_v26 }
 0x52d   : > { %v1442_v41 = vmul.f32 %v7159_v47, %v1388_v55  ;;  %6759 = vmatmul.msk.f32.gmra.mxu0 %vm1023_vm13, %v1642_v39  ;;  %6768 = vmatmul.msk.f32.gmra.mxu1 %vm958_vm14, %v1726_v40  ;;  %vm1448_vm7 = vweird.f32 %v7159_v47 }
 0x52e   : > { %v1381_v9 = vmul.f32 %v1373_v31, %v8325_v7  ;;  %v1270_v11 = vpop.xlane.xlu2 %1269  ;;  %vm1449_vm9 = vmor %vm1447_vm8, %vm1448_vm7 }
 0x52f   : > { %v1443_v6 = vmul.f32 %v7159_v47, %v1442_v41  ;;  %v1174_v4 = vpop.xlane.xlu0 %1173  ;;  %v1366_v18 = vpop.xlane.xlu1 %1365 }
 0x530   : > { %v1389_v60 = vadd.f32 1e-05, %v1381_v9  ;;  %v1230_v23 = vadd.f32 %v1222_v12, %v1174_v4 }
 0x531   : > { %v1444_v51 = vmul.f32 0.5, %v1443_v6  ;;  %v1806_v6 = vmul.f32 %v8641_v32, %v8330_v13  ;;  %v1810_v13 = vmul.f32 %v8701_v52, %v8475_v59 }
 0x532   : > { %7160 = vrsqrt.f32 %v1389_v60  ;;  %v1278_v62 = vadd.f32 %v1270_v11, %v1230_v23  ;;  %vm1457_vm11 = vweird.f32 %v1389_v60 }
 0x533   : > { %v1445_v45 = vsub.f32 1.5, %v1444_v51 }
 0x535   : > { %v1446_v22 = vmul.f32 %v7159_v47, %v1445_v45 }
 0x537   : > { %v1318_v28 = vpop.xlane.xlu0 %1317  ;;  %v8722_v63 = vsel %vm1449_vm9, %v7159_v47, %v1446_v22 }
 0x538   : > { %v7161_v21 = vpop.eup %7160  ;;  %v1326_v1 = vadd.f32 %v1318_v28, %v1278_v62  ;;  %v1476_v56 = vmul.f32 %v8722_v63, %v8493_v46  ;;  %v1562_v61 = vmul.f32 %v8722_v63, %v8520_v0  ;;  %v1643_v10 = vmul.f32 %v8722_v63, %v8496_v42  ;;  %v738_v42 = vld [vmem:[%s11015_s0 + $0x98] sm:$0xff] }
 0x539   : > { %v1452_v17 = vmul.f32 %v7161_v21, %v1389_v60  ;;  %v1727_v55 = vmul.f32 %v8722_v63, %v8511_v33  ;;  %1853 = vmatpush.msrb.mxu2 %v738_v42  ;;  %vm1458_vm10 = vweird.f32 %v7161_v21 }
 0x53a   : > { %v1374_v37 = vadd.f32 %v1366_v18, %v1326_v1  ;;  %6743 = vmatmul.msk.f32.gmra.mxu2 %vm958_vm14, %v1476_v56  ;;  %6751 = vmatmul.msk.f32.gmra.mxu3 %vm639_vm5, %v1562_v61  ;;  %vm1459_vm12 = vmor %vm1457_vm11, %vm1458_vm10 }
 0x53b   : > { %v1453_v46 = vmul.f32 %v7161_v21, %v1452_v17  ;;  %6760 = vmatmul.msk.f32.gmra.mxu0 %vm1023_vm13, %v1643_v10  ;;  %6769 = vmatmul.msk.f32.gmra.mxu1 %vm958_vm14, %v1727_v55 }
 0x53c   : > { %v1382_v33 = vmul.f32 %v1374_v37, %v8325_v7 }
 0x53d   : > { %v1454_v0 = vmul.f32 0.5, %v1453_v46 }
 0x53e   : > { %v1390_v30 = vadd.f32 1e-05, %v1382_v33 }
 0x53f   : > { %v1455_v15 = vsub.f32 1.5, %v1454_v0 }
 0x540   : > { %7162 = vrsqrt.f32 %v1390_v30  ;;  %vm1467_vm2 = vweird.f32 %v1390_v30 }
 0x541   : > { %v1456_v5 = vmul.f32 %v7161_v21, %v1455_v15 }
 0x543   : > { %v1460_v8 = vsel %vm1459_vm12, %v7161_v21, %v1456_v5  ;;  %vm1982_vm12 = vcmask 523264  }
 0x544   : > { %v1477_v36 = vmul.f32 %v1460_v8, %v8516_v2  ;;  %v1563_v16 = vmul.f32 %v1460_v8, %v8533_v27  ;;  %v1644_v26 = vmul.f32 %v1460_v8, %v8559_v57  ;;  %v1728_v39 = vmul.f32 %v1460_v8, %v8536_v58 }
 0x546   : > { %v7163_v7 = vpop.eup %7162  ;;  %6744 = vmatmul.msk.f32.gmra.mxu2 %vm958_vm14, %v1477_v36  ;;  %6752 = vmatmul.msk.f32.gmra.mxu3 %vm639_vm5, %v1563_v16 }
 0x547   : > { %v1462_v44 = vmul.f32 %v7163_v7, %v1390_v30  ;;  %6761 = vmatmul.msk.f32.gmra.mxu0 %vm1023_vm13, %v1644_v26  ;;  %6770 = vmatmul.msk.f32.gmra.mxu1 %vm958_vm14, %v1728_v39  ;;  %vm1468_vm15 = vweird.f32 %v7163_v7 }
 0x548   : > { %vm1469_vm3 = vmor %vm1467_vm2, %vm1468_vm15 }
 0x549   : > { %v1463_v40 = vmul.f32 %v7163_v7, %v1462_v44 }
 0x54b   : > { %v1464_v47 = vmul.f32 0.5, %v1463_v40 }
 0x54d   : > { %v1465_v31 = vsub.f32 1.5, %v1464_v47 }
 0x54f   : > { %v1466_v2 = vmul.f32 %v7163_v7, %v1465_v31 }
 0x551   : > { %v1470_v27 = vsel %vm1469_vm3, %v7163_v7, %v1466_v2 }
 0x552   : > { %v1478_v58 = vmul.f32 %v1470_v27, %v8577_v49  ;;  %v1564_v57 = vmul.f32 %v1470_v27, %v8555_v35  ;;  %v1645_v41 = vmul.f32 %v1470_v27, %v8570_v25  ;;  %v1729_v9 = vmul.f32 %v1470_v27, %v8589_v3 }
 0x553   : > { %v1807_v35 = vmul.f32 %v8656_v38, %v8372_v19  ;;  %v1808_v25 = vmul.f32 %v8671_v24, %v8438_v20  ;;  %v1809_v49 = vmul.f32 %v8686_v34, %v8451_v48  ;;  %v1811_v19 = vmul.f32 %v8722_v63, %v8540_v14  ;;  %v8786_v14 = vld [vmem:[%s11015_s0 + $0xb8] ss:$0 sm:$0xff]  ;;  %v8797_v63 = vld [vmem:[%s11015_s0 + $0xc0] ss:$0 sm:$0xff] }
 0x554   : > { %6745 = vmatmul.msk.f32.gmra.mxu2 %vm958_vm14, %v1478_v58  ;;  %6753 = vmatmul.msk.f32.gmra.mxu3 %vm639_vm5, %v1564_v57  ;;  %v1812_v3 = vmul.f32 %v1460_v8, %v8552_v29  ;;  %v1813_v20 = vmul.f32 %v1470_v27, %v8573_v53 }
 0x555   : > { %6762 = vmatmul.msk.f32.gmra.mxu0 %vm1023_vm13, %v1645_v41  ;;  %6771 = vmatmul.msk.f32.gmra.mxu1 %vm958_vm14, %v1729_v9 }
 0x55c   : > { %6772 = vmatmul.msk.f32.vlgmr.msrb.gmra.mxu2 %vm639_vm5, %v1806_v6 }
 0x564   : > { %6773 = vmatmul.msk.f32.gmra.mxu2 %vm639_vm5, %v1807_v35 }
 0x56c   : > { %6774 = vmatmul.msk.f32.gmra.mxu2 %vm639_vm5, %v1808_v25 }
 0x574   : > { %6775 = vmatmul.msk.f32.gmra.mxu2 %vm639_vm5, %v1809_v49  ;;  %v1690_v60 = vpop.f32.mrf.mxu0  ;;  %v1774_v45 = vpop.f32.mrf.mxu1 }
 0x579   : > { %v1524_v48 = vpop.f32.mrf.mxu2  ;;  %v1606_v12 = vpop.f32.mrf.mxu3 }
 0x57a   : > { %v1549_v29 = vadd.f32 %v8786_v14, %v1524_v48 }
 0x57c   : > { %6776 = vmatmul.msk.f32.gmra.mxu2 %vm639_vm5, %v1810_v13  ;;  %v1630_v53 = vadd.f32 %v1606_v12, %v1549_v29 }
 0x57e   : > { %v1714_v51 = vadd.f32 %v1690_v60, %v1630_v53 }
 0x580   : > { %v1798_v43 = vadd.f32 %v1774_v45, %v1714_v51 }
 0x582   : > { %v1693_v28 = vpop.f32.mrf.mxu0  ;;  %v1777_v10 = vpop.f32.mrf.mxu1 }
 0x584   : > { %6777 = vmatmul.msk.f32.gmra.mxu2 %vm639_vm5, %v1811_v19 }
 0x587   : > { %v1527_v32 = vpop.f32.mrf.mxu2  ;;  %v1609_v22 = vpop.f32.mrf.mxu3 }
 0x588   : > { %v1550_v23 = vadd.f32 %v8786_v14, %v1527_v32 }
 0x58a   : > { %v1631_v11 = vadd.f32 %v1609_v22, %v1550_v23 }
 0x58c   : > { %6778 = vmatmul.msk.f32.gmra.mxu2 %vm639_vm5, %v1812_v3  ;;  %v1715_v21 = vadd.f32 %v1693_v28, %v1631_v11 }
 0x58e   : > { %v1799_v50 = vadd.f32 %v1777_v10, %v1715_v21 }
 0x590   : > { %v1696_v33 = vpop.f32.mrf.mxu0  ;;  %v1780_v8 = vpop.f32.mrf.mxu1 }
 0x594   : > { %6779 = vmatmul.msk.f32.gmra.mxu2 %vm639_vm5, %v1813_v20 }
 0x595   : > { %v1530_v38 = vpop.f32.mrf.mxu2  ;;  %v1612_v17 = vpop.f32.mrf.mxu3 }
 0x596   : > { %v1551_v1 = vadd.f32 %v8786_v14, %v1530_v38 }
 0x598   : > { %v1632_v55 = vadd.f32 %v1612_v17, %v1551_v1 }
 0x59a   : > { %v1716_v0 = vadd.f32 %v1696_v33, %v1632_v55 }
 0x59c   : > { %v1800_v39 = vadd.f32 %v1780_v8, %v1716_v0  ;;  %v1699_v47 = vpop.f32.mrf.mxu0  ;;  %v1783_v57 = vpop.f32.mrf.mxu1 }
 0x5a1   : > { %v1533_v24 = vpop.f32.mrf.mxu2  ;;  %v1615_v36 = vpop.f32.mrf.mxu3 }
 0x5a2   : > { %v1552_v30 = vadd.f32 %v8786_v14, %v1533_v24 }
 0x5a4   : > { %v1633_v26 = vadd.f32 %v1615_v36, %v1552_v30 }
 0x5a6   : > { %v1717_v31 = vadd.f32 %v1699_v47, %v1633_v26 }
 0x5a8   : > { %v1801_v35 = vadd.f32 %v1783_v57, %v1717_v31 }
 0x5aa   : > { %v1702_v19 = vpop.f32.mrf.mxu0  ;;  %v1786_v38 = vpop.f32.mrf.mxu1 }
 0x5af   : > { %v1536_v59 = vpop.f32.mrf.mxu2  ;;  %v1618_v41 = vpop.f32.mrf.mxu3 }
 0x5b0   : > { %v1553_v2 = vadd.f32 %v8786_v14, %v1536_v59 }
 0x5b2   : > { %v1634_v6 = vadd.f32 %v1618_v41, %v1553_v2  ;;  %v8849_v41 = vld [vmem:[%s7952_s18] sm:$0xff] }
 0x5b4   : > { %v1718_v3 = vadd.f32 %v1702_v19, %v1634_v6  ;;  %v11092_v6 = vld [vmem:[#allocation6_spill] sm:$0xff] }
 0x5b6   : > { %v1802_v12 = vadd.f32 %v1786_v38, %v1718_v3 }
 0x5b8   : > { %v1705_v23 = vpop.f32.mrf.mxu0 }
 0x5bd   : > { %v8781_v34 = vpop.f32.mrf.mxu2  ;;  %v1621_v24 = vpop.f32.mrf.mxu3 }
 0x5be   : > { %v1554_v20 = vadd.f32 %v8786_v14, %v8781_v34 }
 0x5c0   : > { %v1635_v29 = vadd.f32 %v1621_v24, %v1554_v20 }
 0x5c2   : > { %v1719_v45 = vadd.f32 %v1705_v23, %v1635_v29 }
 0x5c4   : > { %v1708_v17 = vpop.f32.mrf.mxu0 }
 0x5c9   : > { %v8788_v52 = vpop.f32.mrf.mxu2 }
 0x5ca   : > { %v1555_v34 = vadd.f32 %v8786_v14, %v8788_v52 }
 0x5d2   : > { %v1711_v36 = vpop.f32.mrf.mxu0 }
 0x5d7   : > { %v8791_v4 = vpop.f32.mrf.mxu2 }
 0x5d8   : > { %v1556_v52 = vadd.f32 %v8786_v14, %v8791_v4 }
 0x5df   : > { %v1855_v54 = vpop.f32.mrf.mxu2 }
 0x5e0   : > { %v1879_v62 = vadd.f32 %v1855_v54, %v1798_v43  ;;  %v1789_v43 = vpop.f32.mrf.mxu1  ;;  %v1624_v54 = vpop.f32.mrf.mxu3 }
 0x5e1   : > { %v1636_v28 = vadd.f32 %v1624_v54, %v1555_v34  ;;  %v1803_v21 = vadd.f32 %v1789_v43, %v1719_v45 }
 0x5e2   : > { %vm1887_vm13 = vcmp.gt.f32.partialorder %v1879_v62, 0.0  ;;  %v1895_v56 = vmul.f32 0.01, %v1879_v62 }
 0x5e4   : > { %v8800_v61 = vsel %vm1887_vm13, %v1879_v62, %v1895_v56 }
 0x5e5   : > { %v1913_v18 = vmul.f32 %v8797_v63, %v8800_v61 }
 0x5e7   : > { %v1858_v37 = vpop.f32.mrf.mxu2  ;;  %v1921_v46 = vsel %vm639_vm5, %v1913_v18, 0.0  ;;  %v1720_v18 = vadd.f32 %v1708_v17, %v1636_v28 }
 0x5e8   : > { %v1880_v42 = vadd.f32 %v1858_v37, %v1799_v50  ;;  %1922 = vadd.xlane.f32.xlu2 %v1921_v46  ;;  %v1792_v37 = vpop.f32.mrf.mxu1  ;;  %v1627_v46 = vpop.f32.mrf.mxu3 }
 0x5e9   : > { %v1637_v33 = vadd.f32 %v1627_v46, %v1556_v52  ;;  %v1804_v0 = vadd.f32 %v1792_v37, %v1720_v18 }
 0x5ea   : > { %vm1888_vm4 = vcmp.gt.f32.partialorder %v1880_v42, 0.0  ;;  %v1896_v15 = vmul.f32 0.01, %v1880_v42 }
 0x5ec   : > { %v8806_v5 = vsel %vm1888_vm4, %v1880_v42, %v1896_v15 }
 0x5ed   : > { %v1914_v16 = vmul.f32 %v8797_v63, %v8806_v5 }
 0x5ef   : > { %v1861_v7 = vpop.f32.mrf.mxu2  ;;  %v1924_v44 = vsel %vm639_vm5, %v1914_v16, 0.0  ;;  %v1721_v16 = vadd.f32 %v1711_v36, %v1637_v33 }
 0x5f0   : > { %v1881_v40 = vadd.f32 %v1861_v7, %v1800_v39  ;;  %1925 = vadd.xlane.f32.xlu0 %v1924_v44  ;;  %v1795_v26 = vpop.f32.mrf.mxu1 }
 0x5f1   : > { %v1805_v7 = vadd.f32 %v1795_v26, %v1721_v16 }
 0x5f2   : > { %vm1889_vm6 = vcmp.gt.f32.partialorder %v1881_v40, 0.0  ;;  %v1897_v27 = vmul.f32 0.01, %v1881_v40 }
 0x5f4   : > { %v8812_v58 = vsel %vm1889_vm6, %v1881_v40, %v1897_v27 }
 0x5f5   : > { %v1915_v9 = vmul.f32 %v8797_v63, %v8812_v58 }
 0x5f7   : > { %v1864_v25 = vpop.f32.mrf.mxu2  ;;  %v1927_v49 = vsel %vm639_vm5, %v1915_v9, 0.0  ;;  %v2096_v9 = vsel %vm958_vm14, %v8849_v41, 0.0 }
 0x5f8   : > { %v1882_v13 = vadd.f32 %v1864_v25, %v1801_v35  ;;  %1928 = vadd.xlane.f32.xlu1 %v1927_v49  ;;  %v2104_v35 = vsel %vm639_vm5, %v11092_v6, 0.0 }
 0x5fa   : > { %vm1890_vm7 = vcmp.gt.f32.partialorder %v1882_v13, 0.0  ;;  %v1898_v48 = vmul.f32 0.01, %v1882_v13 }
 0x5fc   : > { %v8819_v32 = vsel %vm1890_vm7, %v1882_v13, %v1898_v48 }
 0x5fd   : > { %v1916_v59 = vmul.f32 %v8797_v63, %v8819_v32 }
 0x5ff   : > { %v1867_v53 = vpop.f32.mrf.mxu2  ;;  %v1930_v60 = vsel %vm639_vm5, %v1916_v59, 0.0 }
 0x600   : > { %v1883_v51 = vadd.f32 %v1867_v53, %v1802_v12  ;;  %1931 = vadd.xlane.f32.xlu2 %v1930_v60 }
 0x602   : > { %vm1891_vm8 = vcmp.gt.f32.partialorder %v1883_v51, 0.0  ;;  %v1899_v22 = vmul.f32 0.01, %v1883_v51 }
 0x604   : > { %v8826_v11 = vsel %vm1891_vm8, %v1883_v51, %v1899_v22 }
 0x605   : > { %v1917_v62 = vmul.f32 %v8797_v63, %v8826_v11 }
 0x607   : > { %v1870_v1 = vpop.f32.mrf.mxu2  ;;  %v1933_v56 = vsel %vm639_vm5, %v1917_v62, 0.0 }
 0x608   : > { %v1884_v10 = vadd.f32 %v1870_v1, %v1803_v21  ;;  %1934 = vadd.xlane.f32.xlu0 %v1933_v56 }
 0x60a   : > { %vm1892_vm9 = vcmp.gt.f32.partialorder %v1884_v10, 0.0  ;;  %v1900_v55 = vmul.f32 0.01, %v1884_v10 }
 0x60c   : > { %v8833_v50 = vsel %vm1892_vm9, %v1884_v10, %v1900_v55  ;;  %v7571_v55 = vmov 0  }
 0x60d   : > { %v1918_v42 = vmul.f32 %v8797_v63, %v8833_v50  ;;  %7059 = vset.pattern.permute.xlu1 %v7571_v55  ;;  %7060 = vset.pattern.permute.xlu2 %v7571_v55 }
 0x60e   : > { %7081 = vset.pattern.permute.xlu0 %v7571_v55 }
 0x60f   : > { %v1873_v30 = vpop.f32.mrf.mxu2  ;;  %v1936_v15 = vsel %vm639_vm5, %v1918_v42, 0.0 }
 0x610   : > { %v1885_v8 = vadd.f32 %v1873_v30, %v1804_v0  ;;  %1937 = vadd.xlane.f32.xlu1 %v1936_v15 }
 0x612   : > { %vm1893_vm10 = vcmp.gt.f32.partialorder %v1885_v8, 0.0  ;;  %v1901_v14 = vmul.f32 0.01, %v1885_v8 }
 0x614   : > { %v8838_v4 = vsel %vm1893_vm10, %v1885_v8, %v1901_v14 }
 0x615   : > { %v1919_v39 = vmul.f32 %v8797_v63, %v8838_v4 }
 0x617   : > { %v1876_v44 = vpop.f32.mrf.mxu2  ;;  %v1939_v40 = vsel %vm639_vm5, %v1919_v39, 0.0 }
 0x618   : > { %v1886_v47 = vadd.f32 %v1876_v44, %v1805_v7  ;;  %1940 = vadd.xlane.f32.xlu2 %v1939_v40 }
 0x61a   : > { %vm1894_vm11 = vcmp.gt.f32.partialorder %v1886_v47, 0.0  ;;  %v1902_v31 = vmul.f32 0.01, %v1886_v47 }
 0x61c   : > { %v8843_v2 = vsel %vm1894_vm11, %v1886_v47, %v1902_v31 }
 0x61d   : > { %v1920_v27 = vmul.f32 %v8797_v63, %v8843_v2 }
 0x61f   : > { %v1942_v57 = vsel %vm639_vm5, %v1920_v27, 0.0 }
 0x620   : > { %1943 = vadd.xlane.f32.xlu0 %v1942_v57 }
 0x628   : > { %2097 = vadd.xlane.f32.xlu0 %v2096_v9 }
 0x630   : > { %2105 = vadd.xlane.f32.xlu0 %v2104_v35  ;;  %v333_v35 = vld [vmem:[%s11018_s3] sm:$0xff] }
 0x65b   : > { %v1923_v25 = vpop.xlane.xlu2 %1922 }
 0x663   : > { %v1926_v49 = vpop.xlane.xlu0 %1925 }
 0x66b   : > { %v1929_v13 = vpop.xlane.xlu1 %1928 }
 0x673   : > { %v1932_v19 = vpop.xlane.xlu2 %1931 }
 0x67b   : > { %v1935_v3 = vpop.xlane.xlu0 %1934 }
 0x67c   : > { %v1945_v24 = vmax.f32 %v1923_v25, %v1935_v3 }
 0x683   : > { %v1938_v20 = vpop.xlane.xlu1 %1937 }
 0x684   : > { %v1946_v48 = vmax.f32 %v1926_v49, %v1938_v20 }
 0x686   : > { %v1949_v12 = vmax.f32 %v1945_v24, %v1946_v48 }
 0x68b   : > { %v1941_v63 = vpop.xlane.xlu2 %1940 }
 0x68c   : > { %v1947_v59 = vmax.f32 %v1929_v13, %v1941_v63 }
 0x693   : > { %v1944_v38 = vpop.xlane.xlu0 %1943 }
 0x694   : > { %v1948_v29 = vmax.f32 %v1932_v19, %v1944_v38 }
 0x696   : > { %v1950_v53 = vmax.f32 %v1947_v59, %v1948_v29 }
 0x698   : > { %v1951_v60 = vmax.f32 %v1949_v12, %v1950_v53 }
 0x69a   : > { %v1952_v51 = vrot.slane %v1951_v60, 4 }
 0x69c   : > { %v1953_v23 = vmax.f32 %v1951_v60, %v1952_v51 }
 0x69e   : > { %v1954_v45 = vrot.slane %v1953_v23, 2 }
 0x6a0   : > { %v1955_v34 = vmax.f32 %v1953_v23, %v1954_v45 }
 0x6a2   : > { %v1956_v22 = vrot.slane %v1955_v34, 1 }
 0x6a4   : > { %v1957_v43 = vmax.f32 %v1955_v34, %v1956_v22 }
 0x6a6   : > { %v1965_v54 = vsub.f32 %v1944_v38, %v1957_v43  ;;  %v1964_v62 = vsub.f32 %v1941_v63, %v1957_v43  ;;  %v1963_v28 = vsub.f32 %v1938_v20, %v1957_v43  ;;  %v1962_v21 = vsub.f32 %v1935_v3, %v1957_v43  ;;  %v11093_v3 = vld [vmem:[#allocation5_spill] sm:$0xff]  ;;  %v8876_v63 = vld [vmem:[%s7952_s18 + $0x8] sm:$0xff]  ;;  %s7576_s18 = smov 96  }
 0x6a7   : > { %v1961_v17 = vsub.f32 %v1932_v19, %v1957_v43  ;;  %v1960_v52 = vsub.f32 %v1929_v13, %v1957_v43  ;;  %v1959_v46 = vsub.f32 %v1926_v49, %v1957_v43  ;;  %v1958_v33 = vsub.f32 %v1923_v25, %v1957_v43  ;;  %v334_v49 = vld [vmem:[%s11018_s3 + $0x8] sm:$0xff] }
 0x6a8   : > { %v1980_v1 = vmul.f32 1.442695, %v1965_v54  ;;  %v1978_v56 = vmul.f32 1.442695, %v1964_v62  ;;  %v1976_v10 = vmul.f32 1.442695, %v1963_v28 }
 0x6a9   : > { %v1974_v18 = vmul.f32 1.442695, %v1962_v21  ;;  %v1972_v37 = vmul.f32 1.442695, %v1961_v17  ;;  %v1970_v42 = vmul.f32 1.442695, %v1960_v52 }
 0x6aa   : > { %7164 = vpow2.f32 %v1980_v1  ;;  %v1968_v30 = vmul.f32 1.442695, %v1959_v46  ;;  %v1966_v16 = vmul.f32 1.442695, %v1958_v33  ;;  %v2107_v20 = vsel %vm639_vm5, %v11093_v3, 0.0 }
 0x6ab   : > { %7166 = vpow2.f32 %v1978_v56  ;;  %v2099_v48 = vsel %vm958_vm14, %v8876_v63, 0.0 }
 0x6ac   : > { %7168 = vpow2.f32 %v1976_v10 }
 0x6ad   : > { %7170 = vpow2.f32 %v1974_v18 }
 0x6ae   : > { %7172 = vpow2.f32 %v1972_v37 }
 0x6af   : > { %7174 = vpow2.f32 %v1970_v42 }
 0x6b0   : > { %v7165_v0 = vpop.eup %7164  ;;  %7176 = vpow2.f32 %v1968_v30 }
 0x6b1   : > { %v7167_v15 = vpop.eup %7166  ;;  %1997 = vmatpush.msrb.mxu3 %v7165_v0  ;;  %v2019_v8 = vmul.f32 %v7165_v0, %v8843_v2  ;;  %7178 = vpow2.f32 %v1966_v16  ;;  %v7572_v0 = vmov 92.0  }
 0x6b2   : > { %v7169_v36 = vpop.eup %7168  ;;  %v2018_v14 = vmul.f32 %v7167_v15, %v8838_v4 }
 0x6b3   : > { %1998 = vmatpush.msrb.mxu3 %v7167_v15  ;;  %2028 = vmatpush.msrb.mxu0 %v2019_v8  ;;  %v7171_v26 = vpop.eup %7170  ;;  %v2017_v39 = vmul.f32 %v7169_v36, %v8833_v50  ;;  %v2098_v15 = vpop.xlane.xlu0 %2097 }
 0x6b4   : > { %v7173_v7 = vpop.eup %7172  ;;  %v2016_v44 = vmul.f32 %v7171_v26, %v8826_v11 }
 0x6b5   : > { %1999 = vmatpush.msrb.mxu3 %v7169_v36  ;;  %2029 = vmatpush.msrb.mxu0 %v2018_v14  ;;  %v7175_v40 = vpop.eup %7174  ;;  %v2015_v47 = vmul.f32 %v7173_v7, %v8819_v32 }
 0x6b6   : > { %v7177_v31 = vpop.eup %7176  ;;  %v2014_v27 = vmul.f32 %v7175_v40, %v8812_v58 }
 0x6b7   : > { %2000 = vmatpush.msrb.mxu3 %v7171_v26  ;;  %2030 = vmatpush.msrb.mxu0 %v2017_v39  ;;  %v7179_v57 = vpop.eup %7178  ;;  %v2013_v9 = vmul.f32 %v7177_v31, %v8806_v5 }
 0x6b8   : > { %v2012_v25 = vmul.f32 %v7179_v57, %v8800_v61 }
 0x6b9   : > { %2001 = vmatpush.msrb.mxu3 %v7173_v7  ;;  %2031 = vmatpush.msrb.mxu0 %v2016_v44 }
 0x6bb   : > { %2002 = vmatpush.msrb.mxu3 %v7175_v40  ;;  %2032 = vmatpush.msrb.mxu0 %v2015_v47  ;;  %v2106_v16 = vpop.xlane.xlu0 %2105 }
 0x6bc   : > { %v2110_v39 = vadd.f32 %v2106_v16, %v2098_v15 }
 0x6bd   : > { %2003 = vmatpush.msrb.mxu3 %v7177_v31  ;;  %2033 = vmatpush.msrb.mxu0 %v2014_v27 }
 0x6bf   : > { %2004 = vmatpush.msrb.mxu3 %v7179_v57  ;;  %2034 = vmatpush.msrb.mxu0 %v2013_v9 }
 0x6c0   : > { %6780 = vmatmul.msk.f32.vlgmr.msrb.gmra.mxu3 %vm1982_vm12, %v333_v35 }
 0x6c1   : > { %2035 = vmatpush.msrb.mxu0 %v2012_v25 }
 0x6c2   : > { %6782 = vmatmul.msk.f32.vlgmr.msrb.gmra.mxu0 %vm1982_vm12, %v333_v35 }
 0x6c8   : > { %6781 = vmatmul.msk.f32.gmra.mxu3 %vm1982_vm12, %v334_v49 }
 0x6ca   : > { %6783 = vmatmul.msk.f32.gmra.mxu0 %vm1982_vm12, %v334_v49 }
 0x73f   : > { %v2037_v23 = vpop.f32.mrf.mxu0 }
 0x743   : > { %v2006_v13 = vpop.f32.mrf.mxu3 }
 0x744   : > { %2045 = vperm.xlu1 %7059, %v2006_v13  }
 0x747   : > { %v2040_v55 = vpop.f32.mrf.mxu0 }
 0x74b   : > { %v2009_v19 = vpop.f32.mrf.mxu3 }
 0x74c   : > { %2050 = vperm.xlu2 %7060, %v2009_v19  }
 0x76e   : > { %2108 = vadd.xlane.f32.xlu1 %v2107_v20 }
 0x775   : > { %2100 = vadd.xlane.f32.xlu2 %v2099_v48 }
 0x7a6   : > { %v2051_v38 = vpop.permute.xlu2 %2050 }
 0x7a7   : > { %7180 = vrcp.f32 %v2051_v38  ;;  %vm2073_vm15 = vweird.f32 %v2051_v38  ;;  %v2077_v22 = vand.u32 2147483647, %v2051_v38  ;;  %v2079_v43 = vand.u32 2147483648, %v2051_v38 }
 0x7a9   : > { %v2080_v56 = vor.u32 1.1754944e-38, %v2079_v43  ;;  %vm2078_vm8 = vcmp.eq.f32.partialorder %v2077_v22, 8.507059e+37  ;;  %v2424_v22 = vsel %vm639_vm5, %v8806_v5, 0.0  ;;  %v2427_v43 = vsel %vm639_vm5, %v8812_v58, 0.0 }
 0x7ad   : > { %v7181_v24 = vpop.eup %7180 }
 0x7ae   : > { %v2069_v29 = vmul.f32 %v7181_v24, %v2051_v38  ;;  %vm2074_vm2 = vweird.f32 %v7181_v24 }
 0x7af   : > { %vm2075_vm13 = vmor %vm2073_vm15, %vm2074_vm2 }
 0x7b0   : > { %v2070_v12 = vsub.f32 1.0, %v2069_v29 }
 0x7b2   : > { %v2071_v51 = vmul.f32 %v7181_v24, %v2070_v12 }
 0x7b4   : > { %v2072_v28 = vadd.f32 %v7181_v24, %v2071_v51 }
 0x7b6   : > { %v2046_v59 = vpop.permute.xlu1 %2045  ;;  %v2076_v17 = vsel %vm2075_vm13, %v7181_v24, %v2072_v28  ;;  %v2439_v28 = vsel %vm639_vm5, %v8838_v4, 0.0 }
 0x7b7   : > { %7182 = vrcp.f32 %v2046_v59  ;;  %v2064_v34 = vand.u32 2147483648, %v2046_v59  ;;  %v2062_v62 = vand.u32 2147483647, %v2046_v59  ;;  %vm2058_vm4 = vweird.f32 %v2046_v59 }
 0x7b8   : > { %v2081_v37 = vsel %vm2078_vm8, %v2080_v56, %v2076_v17  ;;  %7184 = vrcp.f32 %v7572_v0  ;;  %v2090_v17 = vld [vmem:[%s11015_s0 + $0x100] sm:$0xff]  ;;  %v2083_v0 = vld [vmem:[%s11015_s0 + $0xc8] sm:$0xff] }
 0x7b9   : > { %v2065_v1 = vor.u32 1.1754944e-38, %v2064_v34  ;;  %vm2063_vm7 = vcmp.eq.f32.partialorder %v2062_v62, 8.507059e+37  ;;  %v2082_v42 = vmul.f32 %v2081_v37, %v2040_v55  ;;  %v2436_v62 = vsel %vm639_vm5, %v8833_v50, 0.0  ;;  %2246 = vmatpush.msrb.mxu1 %v2090_v17  ;;  %v2089_v55 = vld [vmem:[%s11015_s0 + $0xf8] sm:$0xff] }
 0x7ba   : > { %v2093_v37 = vld [vmem:[%s11015_s0 + $0x118] sm:$0xff] }
 0x7bb   : > { %v2115_v33 = vsel %vm639_vm5, %v2082_v42, 0.0  ;;  %2247 = vmatpush.msrb.mxu1 %v2089_v55  ;;  %v7453_v55 = vld [vmem:[%s11017_s2 + $0x40] sm:$0xff] }
 0x7bd   : > { %v7183_v53 = vpop.eup %7182 }
 0x7be   : > { %v2054_v60 = vmul.f32 %v7183_v53, %v2046_v59  ;;  %vm2059_vm3 = vweird.f32 %v7183_v53  ;;  %v7185_v30 = vpop.eup %7184 }
 0x7bf   : > { %vm2060_vm6 = vmor %vm2058_vm4, %vm2059_vm3  ;;  %v2121_v8 = vmul.f32 92.0, %v7185_v30  ;;  %vm2125_vm9 = vweird.f32 %v7185_v30 }
 0x7c0   : > { %v2055_v45 = vsub.f32 1.0, %v2054_v60 }
 0x7c1   : > { %v2122_v36 = vsub.f32 1.0, %v2121_v8  ;;  %v2091_v8 = vld [vmem:[%s11015_s0 + $0x108] sm:$0xff] }
 0x7c2   : > { %v2056_v54 = vmul.f32 %v7183_v53, %v2055_v45 }
 0x7c3   : > { %v2123_v14 = vmul.f32 %v7185_v30, %v2122_v36 }
 0x7c4   : > { %v2057_v21 = vadd.f32 %v7183_v53, %v2056_v54  ;;  %v2433_v54 = vsel %vm639_vm5, %v8826_v11, 0.0 }
 0x7c5   : > { %v2124_v26 = vadd.f32 %v7185_v30, %v2123_v14 }
 0x7c6   : > { %v2061_v10 = vsel %vm2060_vm6, %v7183_v53, %v2057_v21  ;;  %v2442_v21 = vsel %vm639_vm5, %v8843_v2, 0.0 }
 0x7c7   : > { %v2066_v18 = vsel %vm2063_vm7, %v2065_v1, %v2061_v10  ;;  %v8882_v7 = vsel %vm2125_vm9, %v7185_v30, %v2124_v26  ;;  %v2086_v10 = vld [vmem:[%s11015_s0 + $0xe0] sm:$0xf]  ;;  %v2087_v30 = vld [vmem:[%s11015_s0 + $0xe8] sm:$0xff] }
 0x7c8   : > { %v2067_v52 = vmul.f32 %v2066_v18, %v2037_v23  ;;  %v2421_v23 = vsel %vm639_vm5, %v8800_v61, 0.0  ;;  %v2094_v18 = vld [vmem:[%s11015_s0 + $0x120] sm:$0xff]  ;;  %6784 = vmatpush.msk.msra.mxu3 %vm1503_vm1, %v2086_v10 }
 0x7c9   : > { %2279 = vmatpush.msra.mxu0 %v2094_v18 }
 0x7ca   : > { %v2112_v46 = vsel %vm639_vm5, %v2067_v52, 0.0 }
 0x7cb   : > { %2113 = vadd.xlane.f32.xlu0 %v2112_v46  ;;  %v2084_v46 = vld [vmem:[%s11015_s0 + $0xd0] sm:$0xff]  ;;  %2280 = vmatpush.msra.mxu0 %v2093_v37  ;;  %v7454_v37 = vld [vmem:[%s11017_s2 + $0x8] sm:$0xff] }
 0x7d3   : > { %2116 = vadd.xlane.f32.xlu0 %v2115_v33  ;;  %v2092_v33 = vld [vmem:[%s11015_s0 + $0x110] sm:$0xff] }
 0x7d4   : > { %2281 = vmatpush.msra.mxu0 %v2092_v33  ;;  %v7457_v33 = vld [vmem:[%s11017_s2 + $0x50] sm:$0xff] }
 0x7d6   : > { %2282 = vmatpush.msra.mxu0 %v2091_v8  ;;  %v3014_v8 = vld [vmem:[%s11016_s1 + $0x30] sm:$0xff] }
 0x7e1   : > { %v2109_v57 = vpop.xlane.xlu1 %2108 }
 0x7e8   : > { %v2101_v31 = vpop.xlane.xlu2 %2100 }
 0x7e9   : > { %v2111_v9 = vadd.f32 %v2109_v57, %v2101_v31 }
 0x83e   : > { %v2114_v44 = vpop.xlane.xlu0 %2113 }
 0x83f   : > { %v2118_v40 = vadd.f32 %v2114_v44, %v2110_v39 }
 0x841   : > { %v2127_v47 = vmul.f32 %v8882_v7, %v2118_v40 }
 0x843   : > { %v8886_v27 = vsub.f32 %v8849_v41, %v2127_v47  ;;  %v8892_v19 = vsub.f32 %v11092_v6, %v2127_v47  ;;  %v8909_v53 = vsub.f32 %v2067_v52, %v2127_v47  ;;  %v2085_v52 = vld [vmem:[%s11015_s0 + $0xd8] sm:$0xff] }
 0x844   : > { %2213 = vmatpush.msra.mxu3 %v2085_v52  ;;  %v7452_v52 = vld [vmem:[%s11017_s2] sm:$0xff] }
 0x845   : > { %v2131_v35 = vmul.f32 %v8886_v27, %v8886_v27  ;;  %v2143_v48 = vmul.f32 %v8892_v19, %v8892_v19 }
 0x846   : > { %v2117_v25 = vpop.xlane.xlu0 %2116  ;;  %2214 = vmatpush.msra.mxu3 %v2084_v46  ;;  %v7455_v46 = vld [vmem:[%s11017_s2 + $0x48] sm:$0xff] }
 0x847   : > { %v2119_v49 = vadd.f32 %v2117_v25, %v2111_v9  ;;  %v2133_v13 = vsel %vm958_vm14, %v2131_v35, 0.0  ;;  %v2145_v6 = vsel %vm639_vm5, %v2143_v48, 0.0 }
 0x848   : > { %2134 = vadd.xlane.f32.xlu0 %v2133_v13  ;;  %2215 = vmatpush.msra.mxu3 %v2083_v0  ;;  %v7458_v0 = vld [vmem:[%s11017_s2 + $0x18] sm:$0xff] }
 0x849   : > { %v2128_v20 = vmul.f32 %v8882_v7, %v2119_v49 }
 0x84b   : > { %v8897_v41 = vsub.f32 %v2082_v42, %v2128_v20  ;;  %v8900_v38 = vsub.f32 %v11093_v3, %v2128_v20  ;;  %v2155_v3 = vmul.f32 %v8909_v53, %v8909_v53  ;;  %v8915_v51 = vsub.f32 %v8876_v63, %v2128_v20  ;;  %v2088_v42 = vld [vmem:[%s11015_s0 + $0xf0] sm:$0xff] }
 0x84c   : > { %v2430_v63 = vsel %vm639_vm5, %v8819_v32, 0.0  ;;  %2248 = vmatpush.msrb.mxu1 %v2088_v42  ;;  %v7456_v42 = vld [vmem:[%s11017_s2 + $0x10] sm:$0xff] }
 0x84d   : > { %v2156_v24 = vmul.f32 %v8897_v41, %v8897_v41  ;;  %v2144_v59 = vmul.f32 %v8900_v38, %v8900_v38  ;;  %v2157_v60 = vsel %vm639_vm5, %v2155_v3, 0.0  ;;  %v2132_v45 = vmul.f32 %v8915_v51, %v8915_v51 }
 0x84e   : > { %2249 = vmatpush.msrb.mxu1 %v2087_v30  ;;  %v7459_v30 = vld [vmem:[%s11017_s2 + $0x58] sm:$0xff] }
 0x84f   : > { %v2160_v29 = vsel %vm639_vm5, %v2156_v24, 0.0  ;;  %v2148_v12 = vsel %vm639_vm5, %v2144_v59, 0.0  ;;  %v2136_v34 = vsel %vm958_vm14, %v2132_v45, 0.0 }
 0x850   : > { %2146 = vadd.xlane.f32.xlu0 %v2145_v6  ;;  %2161 = vadd.xlane.f32.xlu1 %v2160_v29 }
 0x851   : > { %2149 = vadd.xlane.f32.xlu2 %v2148_v12 }
 0x858   : > { %2158 = vadd.xlane.f32.xlu0 %v2157_v60 }
 0x859   : > { %2422 = vadd.xlane.f32.xlu2 %v2421_v23 }
 0x860   : > { %2137 = vadd.xlane.f32.xlu0 %v2136_v34 }
 0x861   : > { %2425 = vadd.xlane.f32.xlu2 %v2424_v22 }
 0x869   : > { %2428 = vadd.xlane.f32.xlu2 %v2427_v43  ;;  %v7109_v43 = vld [vmem:[%s11015_s0 + $0x128] ss:$0 sm:$0xff] }
 0x871   : > { %2431 = vadd.xlane.f32.xlu2 %v2430_v63 }
 0x879   : > { %2434 = vadd.xlane.f32.xlu2 %v2433_v54 }
 0x881   : > { %2437 = vadd.xlane.f32.xlu2 %v2436_v62 }
 0x889   : > { %2440 = vadd.xlane.f32.xlu2 %v2439_v28 }
 0x891   : > { %2443 = vadd.xlane.f32.xlu2 %v2442_v21 }
 0x8bb   : > { %v2135_v1 = vpop.xlane.xlu0 %2134 }
 0x8c3   : > { %v2147_v56 = vpop.xlane.xlu0 %2146  ;;  %v2162_v47 = vpop.xlane.xlu1 %2161 }
 0x8c4   : > { %v2151_v15 = vadd.f32 %v2147_v56, %v2135_v1  ;;  %v2150_v39 = vpop.xlane.xlu2 %2149 }
 0x8cb   : > { %v2159_v36 = vpop.xlane.xlu0 %2158 }
 0x8cc   : > { %v2163_v16 = vadd.f32 %v2159_v36, %v2151_v15  ;;  %v3015_v15 = vld [vmem:[%s11016_s1 + $0x38] sm:$0xff]  ;;  %v3013_v36 = vld [vmem:[%s11016_s1 + $0x28] sm:$0xff] }
 0x8ce   : > { %v2165_v14 = vmul.f32 %v2163_v16, %v8882_v7  ;;  %v3012_v16 = vld [vmem:[%s11016_s1 + $0x20] sm:$0xff] }
 0x8d0   : > { %v2167_v26 = vadd.f32 1e-05, %v2165_v14  ;;  %v7460_v14 = vld [vmem:[%s11017_s2 + $0x20] sm:$0xff] }
 0x8d2   : > { %7186 = vrsqrt.f32 %v2167_v26  ;;  %vm2175_vm10 = vweird.f32 %v2167_v26 }
 0x8d3   : > { %v2138_v44 = vpop.xlane.xlu0 %2137 }
 0x8d4   : > { %v2152_v40 = vadd.f32 %v2150_v39, %v2138_v44  ;;  %v7462_v39 = vld [vmem:[%s11017_s2 + $0x28] sm:$0xff] }
 0x8d5   : > { %v7463_v44 = vld [vmem:[%s11017_s2 + $0x68] sm:$0xff] }
 0x8d6   : > { %v2164_v31 = vadd.f32 %v2162_v47, %v2152_v40  ;;  %v7464_v40 = vld [vmem:[%s11017_s2 + $0x30] sm:$0xff] }
 0x8d7   : > { %v7465_v47 = vld [vmem:[%s11017_s2 + $0x70] sm:$0xff] }
 0x8d8   : > { %v7187_v57 = vpop.eup %7186  ;;  %v2166_v9 = vmul.f32 %v2164_v31, %v8882_v7  ;;  %v7466_v31 = vld [vmem:[%s11017_s2 + $0x38] sm:$0xff] }
 0x8d9   : > { %v2170_v35 = vmul.f32 %v7187_v57, %v2167_v26  ;;  %vm2176_vm1 = vweird.f32 %v7187_v57  ;;  %v7461_v26 = vld [vmem:[%s11017_s2 + $0x60] sm:$0xff] }
 0x8da   : > { %v2168_v25 = vadd.f32 1e-05, %v2166_v9  ;;  %vm2177_vm11 = vmor %vm2175_vm10, %vm2176_vm1  ;;  %v3833_v9 = vld [vmem:[%s11016_s1 + $0x78] sm:$0xff] }
 0x8db   : > { %v2171_v49 = vmul.f32 %v7187_v57, %v2170_v35  ;;  %v3832_v35 = vld [vmem:[%s11016_s1 + $0x70] sm:$0xff] }
 0x8dc   : > { %7188 = vrsqrt.f32 %v2168_v25  ;;  %vm2185_vm2 = vweird.f32 %v2168_v25 }
 0x8dd   : > { %v2172_v13 = vmul.f32 0.5, %v2171_v49  ;;  %v3830_v49 = vld [vmem:[%s11016_s1 + $0x60] sm:$0xff] }
 0x8df   : > { %v2173_v20 = vsub.f32 1.5, %v2172_v13 }
 0x8e1   : > { %v2174_v48 = vmul.f32 %v7187_v57, %v2173_v20 }
 0x8e2   : > { %v7189_v24 = vpop.eup %7188 }
 0x8e3   : > { %v2178_v59 = vsel %vm2177_vm11, %v7187_v57, %v2174_v48  ;;  %v2180_v6 = vmul.f32 %v7189_v24, %v2168_v25  ;;  %vm2186_vm15 = vweird.f32 %v7189_v24  ;;  %v7467_v57 = vld [vmem:[%s11017_s2 + $0x78] sm:$0xff]  ;;  %v3831_v25 = vld [vmem:[%s11016_s1 + $0x68] sm:$0xff] }
 0x8e4   : > { %v2189_v29 = vmul.f32 %v2178_v59, %v8886_v27  ;;  %v2226_v12 = vmul.f32 %v2178_v59, %v8892_v19  ;;  %v2259_v3 = vmul.f32 %v2178_v59, %v8909_v53  ;;  %vm2187_vm3 = vmor %vm2185_vm2, %vm2186_vm15 }
 0x8e5   : > { %v2181_v7 = vmul.f32 %v7189_v24, %v2180_v6 }
 0x8e6   : > { %6785 = vmatmul.msk.f32.vlgmr.msra.gmra.mxu3 %vm958_vm14, %v2189_v29  ;;  %6787 = vmatmul.msk.f32.vlgmr.msrb.gmra.mxu1 %vm639_vm5, %v2226_v12 }
 0x8e7   : > { %6789 = vmatmul.msk.f32.vlgmr.msra.gmra.mxu0 %vm639_vm5, %v2259_v3  ;;  %v2182_v60 = vmul.f32 0.5, %v2181_v7 }
 0x8e9   : > { %v2183_v23 = vsub.f32 1.5, %v2182_v60 }
 0x8eb   : > { %v2184_v45 = vmul.f32 %v7189_v24, %v2183_v23 }
 0x8ed   : > { %v2188_v34 = vsel %vm2187_vm3, %v7189_v24, %v2184_v45 }
 0x8ee   : > { %v2190_v27 = vmul.f32 %v2188_v34, %v8915_v51  ;;  %v2227_v19 = vmul.f32 %v2188_v34, %v8900_v38  ;;  %v2260_v53 = vmul.f32 %v2188_v34, %v8897_v41 }
 0x8f0   : > { %6786 = vmatmul.msk.f32.gmra.mxu3 %vm958_vm14, %v2190_v27  ;;  %6788 = vmatmul.msk.f32.gmra.mxu1 %vm639_vm5, %v2227_v19 }
 0x8f1   : > { %6790 = vmatmul.msk.f32.gmra.mxu0 %vm639_vm5, %v2260_v53 }
 0x963   : > { %v2251_v63 = vpop.f32.mrf.mxu1 }
 0x964   : > { %v2284_v54 = vpop.f32.mrf.mxu0 }
 0x969   : > { %v2217_v22 = vpop.f32.mrf.mxu3 }
 0x96a   : > { %v2224_v62 = vadd.f32 %v7109_v43, %v2217_v22 }
 0x96c   : > { %v2257_v51 = vadd.f32 %v2251_v63, %v2224_v62 }
 0x96d   : > { %v2254_v38 = vpop.f32.mrf.mxu1 }
 0x96e   : > { %v2287_v41 = vpop.f32.mrf.mxu0  ;;  %v2290_v56 = vadd.f32 %v2284_v54, %v2257_v51 }
 0x970   : > { %v8992_v18 = vmax.f32 %v2290_v56, 0.0 }
 0x973   : > { %v2220_v28 = vpop.f32.mrf.mxu3 }
 0x974   : > { %v2225_v21 = vadd.f32 %v7109_v43, %v2220_v28 }
 0x976   : > { %v2258_v1 = vadd.f32 %v2254_v38, %v2225_v21 }
 0x978   : > { %v2291_v10 = vadd.f32 %v2287_v41, %v2258_v1 }
 0x97a   : > { %v8990_v17 = vmax.f32 %v2291_v10, 0.0 }
 0x97c   : > { %2316 = vmatpush.msrb.mxu3 %v8990_v17  ;;  %2357 = vmatpush.msra.mxu1 %v8990_v17 }
 0x97e   : > { %2317 = vmatpush.msrb.mxu3 %v8992_v18  ;;  %2358 = vmatpush.msra.mxu1 %v8992_v18 }
 0x97f   : > { %6791 = vmatmul.msk.f32.vlgmr.msrb.gmra.mxu3 %vm742_vm0, %v7452_v52  ;;  %6799 = vmatmul.msk.f32.vlgmr.msra.gmra.mxu1 %vm742_vm0, %v7453_v55 }
 0x980   : > { %3052 = vmatpush.msrb.mxu1 %v3015_v15 }
 0x982   : > { %3053 = vmatpush.msrb.mxu1 %v3014_v8 }
 0x984   : > { %3054 = vmatpush.msrb.mxu1 %v3013_v36 }
 0x986   : > { %3055 = vmatpush.msrb.mxu1 %v3012_v16 }
 0x987   : > { %6792 = vmatmul.msk.f32.gmra.mxu3 %vm742_vm0, %v7454_v37  ;;  %6800 = vmatmul.msk.f32.gmra.mxu1 %vm742_vm0, %v7455_v46  ;;  %v7573_v37 = vmov 96.0  }
 0x988   : > { %3852 = vmatpush.msra.mxu1 %v3833_v9  ;;  %7190 = vrcp.f32 %v7573_v37 }
 0x98a   : > { %3853 = vmatpush.msra.mxu1 %v3832_v35 }
 0x98c   : > { %3854 = vmatpush.msra.mxu1 %v3831_v25 }
 0x98e   : > { %3855 = vmatpush.msra.mxu1 %v3830_v49  ;;  %v7191_v46 = vpop.eup %7190 }
 0x98f   : > { %6793 = vmatmul.msk.f32.gmra.mxu3 %vm742_vm0, %v7456_v42  ;;  %6801 = vmatmul.msk.f32.gmra.mxu1 %vm742_vm0, %v7457_v33  ;;  %v2423_v42 = vpop.xlane.xlu2 %2422  ;;  %v2486_v33 = vmul.f32 96.0, %v7191_v46  ;;  %vm2490_vm14 = vweird.f32 %v7191_v46 }
 0x997   : > { %6794 = vmatmul.msk.f32.gmra.mxu3 %vm742_vm0, %v7458_v0  ;;  %6802 = vmatmul.msk.f32.gmra.mxu1 %vm742_vm0, %v7459_v30  ;;  %v2487_v0 = vsub.f32 1.0, %v2486_v33  ;;  %v2426_v8 = vpop.xlane.xlu2 %2425 }
 0x999   : > { %v2488_v30 = vmul.f32 %v7191_v46, %v2487_v0 }
 0x99b   : > { %v2489_v36 = vadd.f32 %v7191_v46, %v2488_v30 }
 0x99f   : > { %6795 = vmatmul.msk.f32.gmra.mxu3 %vm742_vm0, %v7460_v14  ;;  %6803 = vmatmul.msk.f32.gmra.mxu1 %vm742_vm0, %v7461_v26  ;;  %v9170_v26 = vsel %vm2490_vm14, %v7191_v46, %v2489_v36 }
 0x9a7   : > { %6796 = vmatmul.msk.f32.gmra.mxu3 %vm742_vm0, %v7462_v39  ;;  %6804 = vmatmul.msk.f32.gmra.mxu1 %vm742_vm0, %v7463_v44 }
 0x9af   : > { %6797 = vmatmul.msk.f32.gmra.mxu3 %vm742_vm0, %v7464_v40  ;;  %6805 = vmatmul.msk.f32.gmra.mxu1 %vm742_vm0, %v7465_v47  ;;  %v2429_v40 = vpop.xlane.xlu2 %2428 }
 0x9b7   : > { %6798 = vmatmul.msk.f32.gmra.mxu3 %vm742_vm0, %v7466_v31  ;;  %6806 = vmatmul.msk.f32.gmra.mxu1 %vm742_vm0, %v7467_v57 }
 0x9bf   : > { %6831 = vmatmul.msk.f32.vlgmr.msrb.gmra.mxu1 %vm639_vm5, %v8800_v61 }
 0x9c7   : > { %6832 = vmatmul.msk.f32.gmra.mxu1 %vm639_vm5, %v8806_v5 }
 0x9cf   : > { %6833 = vmatmul.msk.f32.gmra.mxu1 %vm639_vm5, %v8812_v58 }
 0x9d7   : > { %6834 = vmatmul.msk.f32.gmra.mxu1 %vm639_vm5, %v8819_v32 }
 0x9df   : > { %6835 = vmatmul.msk.f32.gmra.mxu1 %vm639_vm5, %v8826_v11 }
 0x9e7   : > { %6836 = vmatmul.msk.f32.gmra.mxu1 %vm639_vm5, %v8833_v50 }
 0x9ef   : > { %6837 = vmatmul.msk.f32.gmra.mxu1 %vm639_vm5, %v8838_v4 }
 0x9f7   : > { %6838 = vmatmul.msk.f32.gmra.mxu1 %vm639_vm5, %v8843_v2 }
 0x9fc   : > { %v9102_v13 = vpop.f32.mrf.mxu1 }
 0x9fd   : > { %v2453_v20 = vsel %vm639_vm5, %v9102_v13, 0.0 }
 0x9fe   : > { %2454 = vadd.xlane.f32.xlu1 %v2453_v20 }
 0x9ff   : > { %6863 = vmatmul.msk.f32.vlgmr.msra.gmra.mxu1 %vm639_vm5, %v8992_v18 }
 0xa02   : > { %v9108_v48 = vpop.f32.mrf.mxu3 }
 0xa03   : > { %v2389_v24 = vsel %vm639_vm5, %v9108_v48, 0.0 }
 0xa04   : > { %v9112_v59 = vpop.f32.mrf.mxu1  ;;  %2390 = vadd.xlane.f32.xlu0 %v2389_v24 }
 0xa05   : > { %v2456_v6 = vsel %vm639_vm5, %v9112_v59, 0.0 }
 0xa06   : > { %2457 = vadd.xlane.f32.xlu1 %v2456_v6 }
 0xa07   : > { %6864 = vmatmul.msk.f32.gmra.mxu1 %vm639_vm5, %v8990_v17 }
 0xa0a   : > { %v9118_v29 = vpop.f32.mrf.mxu3 }
 0xa0b   : > { %v2392_v12 = vsel %vm639_vm5, %v9118_v29, 0.0 }
 0xa0c   : > { %v9122_v3 = vpop.f32.mrf.mxu1  ;;  %2393 = vadd.xlane.f32.xlu0 %v2392_v12 }
 0xa0d   : > { %v2459_v7 = vsel %vm639_vm5, %v9122_v3, 0.0 }
 0xa0e   : > { %2460 = vadd.xlane.f32.xlu1 %v2459_v7 }
 0xa12   : > { %v9126_v60 = vpop.f32.mrf.mxu3 }
 0xa13   : > { %v2395_v23 = vsel %vm639_vm5, %v9126_v60, 0.0 }
 0xa14   : > { %v9130_v45 = vpop.f32.mrf.mxu1  ;;  %2396 = vadd.xlane.f32.xlu0 %v2395_v23  ;;  %v2432_v23 = vpop.xlane.xlu2 %2431 }
 0xa15   : > { %v2462_v34 = vsel %vm639_vm5, %v9130_v45, 0.0 }
 0xa16   : > { %2463 = vadd.xlane.f32.xlu1 %v2462_v34 }
 0xa1a   : > { %v9134_v27 = vpop.f32.mrf.mxu3 }
 0xa1b   : > { %v2398_v19 = vsel %vm639_vm5, %v9134_v27, 0.0 }
 0xa1c   : > { %v9138_v53 = vpop.f32.mrf.mxu1  ;;  %2399 = vadd.xlane.f32.xlu0 %v2398_v19  ;;  %v2435_v30 = vpop.xlane.xlu2 %2434 }
 0xa1d   : > { %v2465_v22 = vsel %vm639_vm5, %v9138_v53, 0.0 }
 0xa1e   : > { %2466 = vadd.xlane.f32.xlu1 %v2465_v22 }
 0xa22   : > { %v9142_v43 = vpop.f32.mrf.mxu3 }
 0xa23   : > { %v2401_v63 = vsel %vm639_vm5, %v9142_v43, 0.0 }
 0xa24   : > { %v9146_v54 = vpop.f32.mrf.mxu1  ;;  %2402 = vadd.xlane.f32.xlu0 %v2401_v63 }
 0xa25   : > { %v2468_v62 = vsel %vm639_vm5, %v9146_v54, 0.0 }
 0xa26   : > { %2469 = vadd.xlane.f32.xlu1 %v2468_v62 }
 0xa2a   : > { %v9150_v28 = vpop.f32.mrf.mxu3 }
 0xa2b   : > { %v2404_v51 = vsel %vm639_vm5, %v9150_v28, 0.0 }
 0xa2c   : > { %v9154_v21 = vpop.f32.mrf.mxu1  ;;  %2405 = vadd.xlane.f32.xlu0 %v2404_v51 }
 0xa2d   : > { %v2471_v38 = vsel %vm639_vm5, %v9154_v21, 0.0 }
 0xa2e   : > { %2472 = vadd.xlane.f32.xlu1 %v2471_v38 }
 0xa32   : > { %v9158_v1 = vpop.f32.mrf.mxu3 }
 0xa33   : > { %v2407_v41 = vsel %vm639_vm5, %v9158_v1, 0.0 }
 0xa34   : > { %v9162_v56 = vpop.f32.mrf.mxu1  ;;  %2408 = vadd.xlane.f32.xlu0 %v2407_v41 }
 0xa35   : > { %v2474_v10 = vsel %vm639_vm5, %v9162_v56, 0.0 }
 0xa36   : > { %2475 = vadd.xlane.f32.xlu1 %v2474_v10 }
 0xa3a   : > { %v9166_v52 = vpop.f32.mrf.mxu3 }
 0xa3b   : > { %v2410_v55 = vsel %vm639_vm5, %v9166_v52, 0.0 }
 0xa3c   : > { %2411 = vadd.xlane.f32.xlu0 %v2410_v55 }
 0xa71   : > { %v2455_v15 = vpop.xlane.xlu1 %2454 }
 0xa77   : > { %v2391_v16 = vpop.xlane.xlu0 %2390 }
 0xa78   : > { %v2445_v14 = vadd.f32 %v2423_v42, %v2391_v16 }
 0xa79   : > { %v2458_v39 = vpop.xlane.xlu1 %2457 }
 0xa7a   : > { %v2477_v44 = vadd.f32 %v2455_v15, %v2445_v14 }
 0xa7c   : > { %v2492_v47 = vmul.f32 %v9170_v26, %v2477_v44 }
 0xa7e   : > { %v9174_v31 = vsub.f32 %v9102_v13, %v2492_v47  ;;  %v9177_v57 = vsub.f32 %v8800_v61, %v2492_v47  ;;  %v9180_v9 = vsub.f32 %v9108_v48, %v2492_v47 }
 0xa7f   : > { %v2394_v35 = vpop.xlane.xlu0 %2393 }
 0xa80   : > { %v2446_v25 = vadd.f32 %v2426_v8, %v2394_v35  ;;  %v2604_v49 = vmul.f32 %v9174_v31, %v9174_v31  ;;  %v2556_v20 = vmul.f32 %v9177_v57, %v9177_v57  ;;  %v2508_v24 = vmul.f32 %v9180_v9, %v9180_v9 }
 0xa81   : > { %v2461_v6 = vpop.xlane.xlu1 %2460 }
 0xa82   : > { %v2478_v13 = vadd.f32 %v2458_v39, %v2446_v25  ;;  %v2612_v12 = vsel %vm639_vm5, %v2604_v49, 0.0  ;;  %v2564_v61 = vsel %vm639_vm5, %v2556_v20, 0.0  ;;  %v2516_v48 = vsel %vm639_vm5, %v2508_v24, 0.0 }
 0xa83   : > { %2613 = vadd.xlane.f32.xlu1 %v2612_v12  ;;  %2565 = vadd.xlane.f32.xlu2 %v2564_v61 }
 0xa84   : > { %v2493_v7 = vmul.f32 %v9170_v26, %v2478_v13  ;;  %2517 = vadd.xlane.f32.xlu0 %v2516_v48  ;;  %v2438_v13 = vpop.xlane.xlu2 %2437 }
 0xa86   : > { %v9193_v34 = vsub.f32 %v9112_v59, %v2493_v7  ;;  %v9196_v19 = vsub.f32 %v8806_v5, %v2493_v7  ;;  %v9199_v22 = vsub.f32 %v9118_v29, %v2493_v7 }
 0xa87   : > { %v2397_v63 = vpop.xlane.xlu0 %2396 }
 0xa88   : > { %v2447_v62 = vadd.f32 %v2429_v40, %v2397_v63  ;;  %v2605_v51 = vmul.f32 %v9193_v34, %v9193_v34  ;;  %v2557_v38 = vmul.f32 %v9196_v19, %v9196_v19  ;;  %v2509_v41 = vmul.f32 %v9199_v22, %v9199_v22 }
 0xa89   : > { %v2464_v10 = vpop.xlane.xlu1 %2463 }
 0xa8a   : > { %v2479_v59 = vadd.f32 %v2461_v6, %v2447_v62  ;;  %v2615_v55 = vsel %vm639_vm5, %v2605_v51, 0.0  ;;  %v2567_v5 = vsel %vm639_vm5, %v2557_v38, 0.0  ;;  %v2519_v29 = vsel %vm639_vm5, %v2509_v41, 0.0 }
 0xa8b   : > { %2616 = vadd.xlane.f32.xlu1 %v2615_v55  ;;  %2568 = vadd.xlane.f32.xlu2 %v2567_v5 }
 0xa8c   : > { %v2494_v37 = vmul.f32 %v9170_v26, %v2479_v59  ;;  %2520 = vadd.xlane.f32.xlu0 %v2519_v29 }
 0xa8e   : > { %v9212_v46 = vsub.f32 %v9122_v3, %v2494_v37  ;;  %v9215_v42 = vsub.f32 %v8812_v58, %v2494_v37  ;;  %v9218_v33 = vsub.f32 %v9126_v60, %v2494_v37 }
 0xa8f   : > { %v2400_v0 = vpop.xlane.xlu0 %2399 }
 0xa90   : > { %v2448_v15 = vadd.f32 %v2432_v23, %v2400_v0  ;;  %v2606_v8 = vmul.f32 %v9212_v46, %v9212_v46  ;;  %v2558_v36 = vmul.f32 %v9215_v42, %v9215_v42  ;;  %v2510_v16 = vmul.f32 %v9218_v33, %v9218_v33 }
 0xa91   : > { %v2467_v3 = vpop.xlane.xlu1 %2466 }
 0xa92   : > { %v2480_v14 = vadd.f32 %v2464_v10, %v2448_v15  ;;  %v2618_v58 = vsel %vm639_vm5, %v2606_v8, 0.0  ;;  %v2570_v39 = vsel %vm639_vm5, %v2558_v36, 0.0  ;;  %v2522_v60 = vsel %vm639_vm5, %v2510_v16, 0.0 }
 0xa93   : > { %2619 = vadd.xlane.f32.xlu1 %v2618_v58  ;;  %2571 = vadd.xlane.f32.xlu2 %v2570_v39 }
 0xa94   : > { %v2495_v44 = vmul.f32 %v9170_v26, %v2480_v14  ;;  %2523 = vadd.xlane.f32.xlu0 %v2522_v60 }
 0xa96   : > { %v9231_v40 = vsub.f32 %v9130_v45, %v2495_v44  ;;  %v9234_v47 = vsub.f32 %v8819_v32, %v2495_v44  ;;  %v9237_v35 = vsub.f32 %v9134_v27, %v2495_v44 }
 0xa97   : > { %v2403_v25 = vpop.xlane.xlu0 %2402 }
 0xa98   : > { %v2449_v49 = vadd.f32 %v2435_v30, %v2403_v25  ;;  %v2607_v20 = vmul.f32 %v9231_v40, %v9231_v40  ;;  %v2559_v24 = vmul.f32 %v9234_v47, %v9234_v47  ;;  %v2511_v6 = vmul.f32 %v9237_v35, %v9237_v35 }
 0xa99   : > { %v2470_v61 = vpop.xlane.xlu1 %2469 }
 0xa9a   : > { %v2481_v45 = vadd.f32 %v2467_v3, %v2449_v49  ;;  %v2621_v12 = vsel %vm639_vm5, %v2607_v20, 0.0  ;;  %v2573_v32 = vsel %vm639_vm5, %v2559_v24, 0.0  ;;  %v2525_v27 = vsel %vm639_vm5, %v2511_v6, 0.0 }
 0xa9b   : > { %2622 = vadd.xlane.f32.xlu1 %v2621_v12  ;;  %2574 = vadd.xlane.f32.xlu2 %v2573_v32 }
 0xa9c   : > { %v2496_v48 = vmul.f32 %v9170_v26, %v2481_v45  ;;  %2526 = vadd.xlane.f32.xlu0 %v2525_v27 }
 0xa9e   : > { %v9250_v7 = vsub.f32 %v9138_v53, %v2496_v48  ;;  %v9253_v23 = vsub.f32 %v8826_v11, %v2496_v48  ;;  %v9256_v63 = vsub.f32 %v9142_v43, %v2496_v48  ;;  %v2441_v43 = vpop.xlane.xlu2 %2440 }
 0xa9f   : > { %v2406_v62 = vpop.xlane.xlu0 %2405 }
 0xaa0   : > { %v2450_v51 = vadd.f32 %v2438_v13, %v2406_v62  ;;  %v2608_v38 = vmul.f32 %v9250_v7, %v9250_v7  ;;  %v2560_v41 = vmul.f32 %v9253_v23, %v9253_v23  ;;  %v2512_v10 = vmul.f32 %v9256_v63, %v9256_v63 }
 0xaa1   : > { %v2473_v29 = vpop.xlane.xlu1 %2472 }
 0xaa2   : > { %v2482_v59 = vadd.f32 %v2470_v61, %v2450_v51  ;;  %v2624_v53 = vsel %vm639_vm5, %v2608_v38, 0.0  ;;  %v2576_v11 = vsel %vm639_vm5, %v2560_v41, 0.0  ;;  %v2528_v55 = vsel %vm639_vm5, %v2512_v10, 0.0 }
 0xaa3   : > { %2625 = vadd.xlane.f32.xlu1 %v2624_v53  ;;  %2577 = vadd.xlane.f32.xlu2 %v2576_v11  ;;  %v2296_v53 = vld [vmem:[%s11015_s0 + $0x140] sm:$0xff] }
 0xaa4   : > { %v2497_v5 = vmul.f32 %v9170_v26, %v2482_v59  ;;  %2529 = vadd.xlane.f32.xlu0 %v2528_v55  ;;  %v2301_v59 = vld [vmem:[%s11015_s0 + $0x188] sm:$0xff]  ;;  %v2386_v11 = vld [vmem:[%s11015_s0 + $0x160] sm:$0xff] }
 0xaa5   : > { %2947 = vmatpush.msra.mxu3 %v2301_v59  ;;  %v2300_v55 = vld [vmem:[%s11015_s0 + $0x180] sm:$0xff] }
 0xaa6   : > { %v9269_v37 = vsub.f32 %v9146_v54, %v2497_v5  ;;  %v9272_v0 = vsub.f32 %v8833_v50, %v2497_v5  ;;  %v9275_v30 = vsub.f32 %v9150_v28, %v2497_v5  ;;  %v2444_v39 = vpop.xlane.xlu2 %2443 }
 0xaa7   : > { %v2409_v15 = vpop.xlane.xlu0 %2408  ;;  %2948 = vmatpush.msra.mxu3 %v2300_v55 }
 0xaa8   : > { %v2451_v8 = vadd.f32 %v2441_v43, %v2409_v15  ;;  %v2609_v36 = vmul.f32 %v9269_v37, %v9269_v37  ;;  %v2561_v16 = vmul.f32 %v9272_v0, %v9272_v0  ;;  %v2513_v3 = vmul.f32 %v9275_v30, %v9275_v30  ;;  %v2385_v15 = vld [vmem:[%s11015_s0 + $0x158] sm:$0xff] }
 0xaa9   : > { %v2476_v20 = vpop.xlane.xlu1 %2475 }
 0xaaa   : > { %v2483_v14 = vadd.f32 %v2473_v29, %v2451_v8  ;;  %v2627_v54 = vsel %vm639_vm5, %v2609_v36, 0.0  ;;  %v2579_v50 = vsel %vm639_vm5, %v2561_v16, 0.0  ;;  %v2531_v58 = vsel %vm639_vm5, %v2513_v3, 0.0  ;;  %v2295_v29 = vld [vmem:[%s11015_s0 + $0x138] sm:$0xff]  ;;  %v2294_v3 = vld [vmem:[%s11015_s0 + $0x130] sm:$0xff] }
 0xaab   : > { %2628 = vadd.xlane.f32.xlu1 %v2627_v54  ;;  %2580 = vadd.xlane.f32.xlu2 %v2579_v50  ;;  %v2299_v8 = vld [vmem:[%s11015_s0 + $0x178] sm:$0xff]  ;;  %v2298_v54 = vld [vmem:[%s11015_s0 + $0x170] sm:$0xff] }
 0xaac   : > { %v2498_v28 = vmul.f32 %v9170_v26, %v2483_v14  ;;  %2532 = vadd.xlane.f32.xlu0 %v2531_v58  ;;  %2949 = vmatpush.msra.mxu3 %v2299_v8  ;;  %v2384_v14 = vld [vmem:[%s11015_s0 + $0x150] sm:$0xff] }
 0xaae   : > { %v9288_v60 = vsub.f32 %v9154_v21, %v2498_v28  ;;  %v9291_v44 = vsub.f32 %v8838_v4, %v2498_v28  ;;  %v9294_v25 = vsub.f32 %v9158_v1, %v2498_v28  ;;  %2950 = vmatpush.msra.mxu3 %v2298_v54 }
 0xaaf   : > { %v2412_v49 = vpop.xlane.xlu0 %2411 }
 0xab0   : > { %v2452_v24 = vadd.f32 %v2444_v39, %v2412_v49  ;;  %v2610_v6 = vmul.f32 %v9288_v60, %v9288_v60  ;;  %v2562_v13 = vmul.f32 %v9291_v44, %v9291_v44  ;;  %v2514_v45 = vmul.f32 %v9294_v25, %v9294_v25 }
 0xab2   : > { %v2484_v21 = vadd.f32 %v2476_v20, %v2452_v24  ;;  %v2630_v12 = vsel %vm639_vm5, %v2610_v6, 0.0  ;;  %v2582_v4 = vsel %vm639_vm5, %v2562_v13, 0.0  ;;  %v2534_v1 = vsel %vm639_vm5, %v2514_v45, 0.0 }
 0xab3   : > { %2631 = vadd.xlane.f32.xlu1 %v2630_v12  ;;  %2583 = vadd.xlane.f32.xlu2 %v2582_v4 }
 0xab4   : > { %v2499_v32 = vmul.f32 %v9170_v26, %v2484_v21  ;;  %2535 = vadd.xlane.f32.xlu0 %v2534_v1 }
 0xab6   : > { %v9307_v27 = vsub.f32 %v9162_v56, %v2499_v32  ;;  %v9310_v61 = vsub.f32 %v8843_v2, %v2499_v32  ;;  %v9313_v48 = vsub.f32 %v9166_v52, %v2499_v32  ;;  %v2297_v2 = vld [vmem:[%s11015_s0 + $0x148] sm:$0xff] }
 0xab7   : > { %v2387_v52 = vld [vmem:[%s11015_s0 + $0x168] sm:$0xff]  ;;  %2784 = vmatpush.msrb.mxu0 %v2297_v2 }
 0xab8   : > { %v2611_v62 = vmul.f32 %v9307_v27, %v9307_v27  ;;  %v2563_v51 = vmul.f32 %v9310_v61, %v9310_v61  ;;  %v2515_v38 = vmul.f32 %v9313_v48, %v9313_v48  ;;  %2866 = vmatpush.msra.mxu2 %v2387_v52 }
 0xab9   : > { %2785 = vmatpush.msrb.mxu0 %v2296_v53 }
 0xaba   : > { %v2633_v41 = vsel %vm639_vm5, %v2611_v62, 0.0  ;;  %v2585_v56 = vsel %vm639_vm5, %v2563_v51, 0.0  ;;  %v2537_v10 = vsel %vm639_vm5, %v2515_v38, 0.0  ;;  %2867 = vmatpush.msra.mxu2 %v2386_v11 }
 0xabb   : > { %2634 = vadd.xlane.f32.xlu1 %v2633_v41  ;;  %2586 = vadd.xlane.f32.xlu2 %v2585_v56 }
 0xabc   : > { %2538 = vadd.xlane.f32.xlu0 %v2537_v10  ;;  %2786 = vmatpush.msrb.mxu0 %v2295_v29 }
 0xabd   : > { %2868 = vmatpush.msra.mxu2 %v2385_v15 }
 0xabe   : > { %2787 = vmatpush.msrb.mxu0 %v2294_v3 }
 0xabf   : > { %2869 = vmatpush.msra.mxu2 %v2384_v14 }
 0xaf6   : > { %v2614_v43 = vpop.xlane.xlu1 %2613  ;;  %v2566_v5 = vpop.xlane.xlu2 %2565 }
 0xaf7   : > { %v2518_v36 = vpop.xlane.xlu0 %2517 }
 0xaf8   : > { %v2588_v16 = vadd.f32 %v2566_v5, %v2518_v36 }
 0xafa   : > { %v2636_v50 = vadd.f32 %v2614_v43, %v2588_v16 }
 0xafc   : > { %v2644_v58 = vmul.f32 %v2636_v50, %v9170_v26 }
 0xafe   : > { %v2652_v28 = vadd.f32 1e-05, %v2644_v58  ;;  %v2617_v39 = vpop.xlane.xlu1 %2616  ;;  %v2569_v49 = vpop.xlane.xlu2 %2568 }
 0xaff   : > { %v2521_v20 = vpop.xlane.xlu0 %2520 }
 0xb00   : > { %7192 = vrsqrt.f32 %v2652_v28  ;;  %v2589_v24 = vadd.f32 %v2569_v49, %v2521_v20  ;;  %vm2666_vm4 = vweird.f32 %v2652_v28 }
 0xb02   : > { %v2637_v6 = vadd.f32 %v2617_v39, %v2589_v24 }
 0xb04   : > { %v2645_v13 = vmul.f32 %v2637_v6, %v9170_v26 }
 0xb06   : > { %v7193_v45 = vpop.eup %7192  ;;  %v2653_v21 = vadd.f32 1e-05, %v2645_v13  ;;  %v2620_v12 = vpop.xlane.xlu1 %2619 }
 0xb07   : > { %v2572_v4 = vpop.xlane.xlu2 %2571  ;;  %v2661_v1 = vmul.f32 %v7193_v45, %v2652_v28  ;;  %v2524_v32 = vpop.xlane.xlu0 %2523  ;;  %vm2667_vm13 = vweird.f32 %v7193_v45 }
 0xb08   : > { %7194 = vrsqrt.f32 %v2653_v21  ;;  %v2590_v62 = vadd.f32 %v2572_v4, %v2524_v32  ;;  %vm2668_vm6 = vmor %vm2666_vm4, %vm2667_vm13  ;;  %vm2676_vm8 = vweird.f32 %v2653_v21 }
 0xb09   : > { %v2662_v51 = vmul.f32 %v7193_v45, %v2661_v1 }
 0xb0a   : > { %v2638_v38 = vadd.f32 %v2620_v12, %v2590_v62 }
 0xb0b   : > { %v2663_v41 = vmul.f32 0.5, %v2662_v51 }
 0xb0c   : > { %v2646_v56 = vmul.f32 %v2638_v38, %v9170_v26 }
 0xb0d   : > { %v2664_v10 = vsub.f32 1.5, %v2663_v41 }
 0xb0e   : > { %v7195_v2 = vpop.eup %7194  ;;  %v2654_v52 = vadd.f32 1e-05, %v2646_v56  ;;  %v2623_v59 = vpop.xlane.xlu1 %2622 }
 0xb0f   : > { %v2575_v53 = vpop.xlane.xlu2 %2574  ;;  %v2665_v11 = vmul.f32 %v7193_v45, %v2664_v10  ;;  %v2671_v55 = vmul.f32 %v7195_v2, %v2653_v21  ;;  %v2527_v43 = vpop.xlane.xlu0 %2526  ;;  %vm2677_vm7 = vweird.f32 %v7195_v2 }
 0xb10   : > { %7196 = vrsqrt.f32 %v2654_v52  ;;  %v2591_v5 = vadd.f32 %v2575_v53, %v2527_v43  ;;  %vm2678_vm9 = vmor %vm2676_vm8, %vm2677_vm7  ;;  %vm2686_vm10 = vweird.f32 %v2654_v52 }
 0xb11   : > { %v2669_v29 = vsel %vm2668_vm6, %v7193_v45, %v2665_v11  ;;  %v2672_v15 = vmul.f32 %v7195_v2, %v2671_v55 }
 0xb12   : > { %v2822_v8 = vmul.f32 %v2669_v29, %v9177_v57  ;;  %v2903_v36 = vmul.f32 %v2669_v29, %v9174_v31  ;;  %v2639_v16 = vadd.f32 %v2623_v59, %v2591_v5  ;;  %v2740_v3 = vmul.f32 %v2669_v29, %v9180_v9 }
 0xb13   : > { %v2673_v14 = vmul.f32 0.5, %v2672_v15 }
 0xb14   : > { %v2647_v54 = vmul.f32 %v2639_v16, %v9170_v26  ;;  %6807 = vmatmul.msk.f32.vlgmr.msrb.gmra.mxu0 %vm639_vm5, %v2740_v3  ;;  %6815 = vmatmul.msk.f32.vlgmr.msra.gmra.mxu2 %vm639_vm5, %v2822_v8 }
 0xb15   : > { %6823 = vmatmul.msk.f32.vlgmr.msra.gmra.mxu3 %vm639_vm5, %v2903_v36  ;;  %v2674_v50 = vsub.f32 1.5, %v2673_v14 }
 0xb16   : > { %v7197_v58 = vpop.eup %7196  ;;  %v2655_v28 = vadd.f32 1e-05, %v2647_v54  ;;  %v2626_v39 = vpop.xlane.xlu1 %2625 }
 0xb17   : > { %v2578_v57 = vpop.xlane.xlu2 %2577  ;;  %v2681_v49 = vmul.f32 %v7197_v58, %v2654_v52  ;;  %v2530_v31 = vpop.xlane.xlu0 %2529  ;;  %v2675_v20 = vmul.f32 %v7195_v2, %v2674_v50  ;;  %vm2687_vm1 = vweird.f32 %v7197_v58 }
 0xb18   : > { %7198 = vrsqrt.f32 %v2655_v28  ;;  %v2592_v9 = vadd.f32 %v2578_v57, %v2530_v31  ;;  %vm2688_vm11 = vmor %vm2686_vm10, %vm2687_vm1  ;;  %vm2696_vm2 = vweird.f32 %v2655_v28 }
 0xb19   : > { %v2682_v24 = vmul.f32 %v7197_v58, %v2681_v49  ;;  %v2679_v6 = vsel %vm2678_vm9, %v7195_v2, %v2675_v20 }
 0xb1a   : > { %v2640_v13 = vadd.f32 %v2626_v39, %v2592_v9  ;;  %v2741_v45 = vmul.f32 %v2679_v6, %v9199_v22  ;;  %v2823_v12 = vmul.f32 %v2679_v6, %v9196_v19  ;;  %v2904_v4 = vmul.f32 %v2679_v6, %v9193_v34 }
 0xb1b   : > { %v2683_v1 = vmul.f32 0.5, %v2682_v24 }
 0xb1c   : > { %v2648_v32 = vmul.f32 %v2640_v13, %v9170_v26  ;;  %6808 = vmatmul.msk.f32.gmra.mxu0 %vm639_vm5, %v2741_v45  ;;  %6816 = vmatmul.msk.f32.gmra.mxu2 %vm639_vm5, %v2823_v12 }
 0xb1d   : > { %6824 = vmatmul.msk.f32.gmra.mxu3 %vm639_vm5, %v2904_v4  ;;  %v2684_v21 = vsub.f32 1.5, %v2683_v1 }
 0xb1e   : > { %v7199_v62 = vpop.eup %7198  ;;  %v2656_v51 = vadd.f32 1e-05, %v2648_v32  ;;  %v2629_v38 = vpop.xlane.xlu1 %2628 }
 0xb1f   : > { %v2581_v41 = vpop.xlane.xlu2 %2580  ;;  %v2691_v22 = vmul.f32 %v7199_v62, %v2655_v28  ;;  %v2533_v56 = vpop.xlane.xlu0 %2532  ;;  %v2685_v19 = vmul.f32 %v7197_v58, %v2684_v21  ;;  %vm2697_vm15 = vweird.f32 %v7199_v62 }
 0xb20   : > { %7200 = vrsqrt.f32 %v2656_v51  ;;  %v2593_v34 = vadd.f32 %v2581_v41, %v2533_v56  ;;  %vm2698_vm3 = vmor %vm2696_vm2, %vm2697_vm15  ;;  %vm2706_vm13 = vweird.f32 %v2656_v51 }
 0xb21   : > { %v2692_v10 = vmul.f32 %v7199_v62, %v2691_v22  ;;  %v2689_v2 = vsel %vm2688_vm11, %v7197_v58, %v2685_v19 }
 0xb22   : > { %v2641_v59 = vadd.f32 %v2629_v38, %v2593_v34  ;;  %v2742_v53 = vmul.f32 %v2689_v2, %v9218_v33  ;;  %v2824_v11 = vmul.f32 %v2689_v2, %v9215_v42  ;;  %v2905_v55 = vmul.f32 %v2689_v2, %v9212_v46 }
 0xb23   : > { %v2693_v43 = vmul.f32 0.5, %v2692_v10 }
 0xb24   : > { %v2649_v5 = vmul.f32 %v2641_v59, %v9170_v26  ;;  %6809 = vmatmul.msk.f32.gmra.mxu0 %vm639_vm5, %v2742_v53  ;;  %6817 = vmatmul.msk.f32.gmra.mxu2 %vm639_vm5, %v2824_v11 }
 0xb25   : > { %6825 = vmatmul.msk.f32.gmra.mxu3 %vm639_vm5, %v2905_v55  ;;  %v2694_v52 = vsub.f32 1.5, %v2693_v43 }
 0xb26   : > { %v7201_v29 = vpop.eup %7200  ;;  %v2657_v15 = vadd.f32 1e-05, %v2649_v5  ;;  %v2632_v33 = vpop.xlane.xlu1 %2631 }
 0xb27   : > { %v2584_v8 = vpop.xlane.xlu2 %2583  ;;  %v2701_v36 = vmul.f32 %v7201_v29, %v2656_v51  ;;  %v2536_v16 = vpop.xlane.xlu0 %2535  ;;  %v2695_v42 = vmul.f32 %v7199_v62, %v2694_v52  ;;  %vm2707_vm14 = vweird.f32 %v7201_v29 }
 0xb28   : > { %7202 = vrsqrt.f32 %v2657_v15  ;;  %v2594_v46 = vadd.f32 %v2584_v8, %v2536_v16  ;;  %vm2708_vm4 = vmor %vm2706_vm13, %vm2707_vm14  ;;  %vm2716_vm7 = vweird.f32 %v2657_v15 }
 0xb29   : > { %v2702_v3 = vmul.f32 %v7201_v29, %v2701_v36  ;;  %v2699_v14 = vsel %vm2698_vm3, %v7199_v62, %v2695_v42  ;;  %v3010_v36 = vld [vmem:[%s11016_s1 + $0x10] sm:$0xff] }
 0xb2a   : > { %v2642_v54 = vadd.f32 %v2632_v33, %v2594_v46  ;;  %v2743_v50 = vmul.f32 %v2699_v14, %v9237_v35  ;;  %v2825_v58 = vmul.f32 %v2699_v14, %v9234_v47  ;;  %v2906_v39 = vmul.f32 %v2699_v14, %v9231_v40  ;;  %v9431_v33 = vld [vmem:[%s11015_s0 + $0x190] ss:$0 sm:$0xff] }
 0xb2b   : > { %v2703_v57 = vmul.f32 0.5, %v2702_v3 }
 0xb2c   : > { %v2650_v49 = vmul.f32 %v2642_v54, %v9170_v26  ;;  %6810 = vmatmul.msk.f32.gmra.mxu0 %vm639_vm5, %v2743_v50  ;;  %6818 = vmatmul.msk.f32.gmra.mxu2 %vm639_vm5, %v2825_v58 }
 0xb2d   : > { %6826 = vmatmul.msk.f32.gmra.mxu3 %vm639_vm5, %v2906_v39  ;;  %v2704_v28 = vsub.f32 1.5, %v2703_v57 }
 0xb2e   : > { %v7203_v31 = vpop.eup %7202  ;;  %v2658_v20 = vadd.f32 1e-05, %v2650_v49  ;;  %v2635_v13 = vpop.xlane.xlu1 %2634 }
 0xb2f   : > { %v2587_v9 = vpop.xlane.xlu2 %2586  ;;  %v2711_v24 = vmul.f32 %v7203_v31, %v2657_v15  ;;  %v2539_v35 = vpop.xlane.xlu0 %2538  ;;  %v2705_v6 = vmul.f32 %v7201_v29, %v2704_v28  ;;  %vm2717_vm6 = vweird.f32 %v7203_v31 }
 0xb30   : > { %7204 = vrsqrt.f32 %v2658_v20  ;;  %v2595_v40 = vadd.f32 %v2587_v9, %v2539_v35  ;;  %vm2718_vm8 = vmor %vm2716_vm7, %vm2717_vm6  ;;  %vm2726_vm1 = vweird.f32 %v2658_v20 }
 0xb31   : > { %v2712_v47 = vmul.f32 %v7203_v31, %v2711_v24  ;;  %v2709_v45 = vsel %vm2708_vm4, %v7201_v29, %v2705_v6 }
 0xb32   : > { %v2643_v12 = vadd.f32 %v2635_v13, %v2595_v40  ;;  %v2744_v4 = vmul.f32 %v2709_v45, %v9256_v63  ;;  %v2826_v1 = vmul.f32 %v2709_v45, %v9253_v23  ;;  %v2907_v32 = vmul.f32 %v2709_v45, %v9250_v7 }
 0xb33   : > { %v2713_v21 = vmul.f32 0.5, %v2712_v47 }
 0xb34   : > { %v2651_v62 = vmul.f32 %v2643_v12, %v9170_v26  ;;  %6811 = vmatmul.msk.f32.gmra.mxu0 %vm639_vm5, %v2744_v4  ;;  %6819 = vmatmul.msk.f32.gmra.mxu2 %vm639_vm5, %v2826_v1 }
 0xb35   : > { %6827 = vmatmul.msk.f32.gmra.mxu3 %vm639_vm5, %v2907_v32  ;;  %v2714_v51 = vsub.f32 1.5, %v2713_v21 }
 0xb36   : > { %v7205_v38 = vpop.eup %7204  ;;  %v2659_v41 = vadd.f32 1e-05, %v2651_v62 }
 0xb37   : > { %v2721_v22 = vmul.f32 %v7205_v38, %v2658_v20  ;;  %v2715_v56 = vmul.f32 %v7203_v31, %v2714_v51  ;;  %vm2727_vm9 = vweird.f32 %v7205_v38 }
 0xb38   : > { %7206 = vrsqrt.f32 %v2659_v41  ;;  %vm2728_vm10 = vmor %vm2726_vm1, %vm2727_vm9  ;;  %vm2736_vm15 = vweird.f32 %v2659_v41 }
 0xb39   : > { %v2722_v23 = vmul.f32 %v7205_v38, %v2721_v22  ;;  %v2719_v7 = vsel %vm2718_vm8, %v7203_v31, %v2715_v56 }
 0xb3a   : > { %v2745_v63 = vmul.f32 %v2719_v7, %v9275_v30  ;;  %v2827_v19 = vmul.f32 %v2719_v7, %v9272_v0  ;;  %v2908_v34 = vmul.f32 %v2719_v7, %v9269_v37 }
 0xb3b   : > { %v2723_v10 = vmul.f32 0.5, %v2722_v23 }
 0xb3c   : > { %6812 = vmatmul.msk.f32.gmra.mxu0 %vm639_vm5, %v2745_v63  ;;  %6820 = vmatmul.msk.f32.gmra.mxu2 %vm639_vm5, %v2827_v19 }
 0xb3d   : > { %v2724_v2 = vsub.f32 1.5, %v2723_v10  ;;  %6828 = vmatmul.msk.f32.gmra.mxu3 %vm639_vm5, %v2908_v34 }
 0xb3e   : > { %v7207_v59 = vpop.eup %7206 }
 0xb3f   : > { %v2731_v53 = vmul.f32 %v7207_v59, %v2659_v41  ;;  %v2725_v11 = vmul.f32 %v7205_v38, %v2724_v2  ;;  %vm2737_vm11 = vweird.f32 %v7207_v59 }
 0xb40   : > { %vm2738_vm2 = vmor %vm2736_vm15, %vm2737_vm11 }
 0xb41   : > { %v2732_v55 = vmul.f32 %v7207_v59, %v2731_v53  ;;  %v2729_v30 = vsel %vm2728_vm10, %v7205_v38, %v2725_v11 }
 0xb42   : > { %v2746_v0 = vmul.f32 %v2729_v30, %v9294_v25  ;;  %v2828_v37 = vmul.f32 %v2729_v30, %v9291_v44  ;;  %v2909_v43 = vmul.f32 %v2729_v30, %v9288_v60  ;;  %v3011_v60 = vld [vmem:[%s11016_s1 + $0x18] sm:$0xff] }
 0xb43   : > { %v2733_v5 = vmul.f32 0.5, %v2732_v55  ;;  %3117 = vmatpush.msra.mxu0 %v3011_v60 }
 0xb44   : > { %6813 = vmatmul.msk.f32.gmra.mxu0 %vm639_vm5, %v2746_v0  ;;  %6821 = vmatmul.msk.f32.gmra.mxu2 %vm639_vm5, %v2828_v37 }
 0xb45   : > { %v2734_v52 = vsub.f32 1.5, %v2733_v5  ;;  %6829 = vmatmul.msk.f32.gmra.mxu3 %vm639_vm5, %v2909_v43  ;;  %3118 = vmatpush.msra.mxu0 %v3010_v36 }
 0xb47   : > { %v2735_v29 = vmul.f32 %v7207_v59, %v2734_v52 }
 0xb49   : > { %v2739_v15 = vsel %vm2738_vm2, %v7207_v59, %v2735_v29 }
 0xb4a   : > { %v2747_v8 = vmul.f32 %v2739_v15, %v9313_v48  ;;  %v2829_v25 = vmul.f32 %v2739_v15, %v9310_v61  ;;  %v2910_v44 = vmul.f32 %v2739_v15, %v9307_v27  ;;  %v3009_v61 = vld [vmem:[%s11016_s1 + $0x8] sm:$0xff]  ;;  %v3008_v27 = vld [vmem:[%s11016_s1] sm:$0xff] }
 0xb4b   : > { %3119 = vmatpush.msra.mxu0 %v3009_v61 }
 0xb4c   : > { %6814 = vmatmul.msk.f32.gmra.mxu0 %vm639_vm5, %v2747_v8  ;;  %6822 = vmatmul.msk.f32.gmra.mxu2 %vm639_vm5, %v2829_v25 }
 0xb4d   : > { %6830 = vmatmul.msk.f32.gmra.mxu3 %vm639_vm5, %v2910_v44  ;;  %3120 = vmatpush.msra.mxu0 %v3008_v27 }
 0xb91   : > { %v2789_v48 = vpop.f32.mrf.mxu0 }
 0xb92   : > { %v2814_v16 = vadd.f32 %v9431_v33, %v2789_v48 }
 0xb97   : > { %v2871_v42 = vpop.f32.mrf.mxu2 }
 0xb98   : > { %v2895_v46 = vadd.f32 %v2871_v42, %v2814_v16  ;;  %v2952_v3 = vpop.f32.mrf.mxu3 }
 0xb99   : > { %v2792_v14 = vpop.f32.mrf.mxu0 }
 0xb9a   : > { %v2976_v54 = vadd.f32 %v2952_v3, %v2895_v46  ;;  %v2815_v39 = vadd.f32 %v9431_v33, %v2792_v14  ;;  %v3057_v3 = vpop.f32.mrf.mxu1 }
 0xb9c   : > { %vm2984_vm3 = vcmp.gt.f32.partialorder %v2976_v54, 0.0  ;;  %v2992_v50 = vmul.f32 0.01, %v2976_v54 }
 0xb9e   : > { %v3000_v58 = vsel %vm2984_vm3, %v2976_v54, %v2992_v50 }
 0xb9f   : > { %v2874_v57 = vpop.f32.mrf.mxu2  ;;  %6839 = vmatmul.msk.f32.vlgmr.msra.gmra.mxu0 %vm639_vm5, %v3000_v58 }
 0xba0   : > { %v2896_v49 = vadd.f32 %v2874_v57, %v2815_v39  ;;  %v2955_v28 = vpop.f32.mrf.mxu3 }
 0xba1   : > { %v2795_v31 = vpop.f32.mrf.mxu0 }
 0xba2   : > { %v2977_v20 = vadd.f32 %v2955_v28, %v2896_v49  ;;  %v2816_v24 = vadd.f32 %v9431_v33, %v2795_v31  ;;  %v3060_v14 = vpop.f32.mrf.mxu1 }
 0xba4   : > { %v2993_v9 = vmul.f32 0.01, %v2977_v20  ;;  %vm2985_vm14 = vcmp.gt.f32.partialorder %v2977_v20, 0.0 }
 0xba6   : > { %v3001_v35 = vsel %vm2985_vm14, %v2977_v20, %v2993_v9 }
 0xba7   : > { %v2877_v6 = vpop.f32.mrf.mxu2  ;;  %6840 = vmatmul.msk.f32.gmra.mxu0 %vm639_vm5, %v3001_v35 }
 0xba8   : > { %v2897_v40 = vadd.f32 %v2877_v6, %v2816_v24  ;;  %v2958_v47 = vpop.f32.mrf.mxu3 }
 0xba9   : > { %v2798_v13 = vpop.f32.mrf.mxu0 }
 0xbaa   : > { %v2978_v45 = vadd.f32 %v2958_v47, %v2897_v40  ;;  %v2817_v4 = vadd.f32 %v9431_v33, %v2798_v13  ;;  %v3063_v58 = vpop.f32.mrf.mxu1 }
 0xbac   : > { %v2994_v12 = vmul.f32 0.01, %v2978_v45  ;;  %vm2986_vm13 = vcmp.gt.f32.partialorder %v2978_v45, 0.0 }
 0xbae   : > { %v3002_v1 = vsel %vm2986_vm13, %v2978_v45, %v2994_v12 }
 0xbaf   : > { %v2880_v32 = vpop.f32.mrf.mxu2  ;;  %6841 = vmatmul.msk.f32.gmra.mxu0 %vm639_vm5, %v3002_v1 }
 0xbb0   : > { %v2898_v21 = vadd.f32 %v2880_v32, %v2817_v4  ;;  %v2961_v62 = vpop.f32.mrf.mxu3 }
 0xbb1   : > { %v2801_v51 = vpop.f32.mrf.mxu0 }
 0xbb2   : > { %v2979_v38 = vadd.f32 %v2961_v62, %v2898_v21  ;;  %v2818_v22 = vadd.f32 %v9431_v33, %v2801_v51  ;;  %v3066_v49 = vpop.f32.mrf.mxu1 }
 0xbb4   : > { %v2995_v41 = vmul.f32 0.01, %v2979_v38  ;;  %vm2987_vm4 = vcmp.gt.f32.partialorder %v2979_v38, 0.0 }
 0xbb6   : > { %v3003_v56 = vsel %vm2987_vm4, %v2979_v38, %v2995_v41 }
 0xbb7   : > { %v2883_v23 = vpop.f32.mrf.mxu2  ;;  %6842 = vmatmul.msk.f32.gmra.mxu0 %vm639_vm5, %v3003_v56 }
 0xbb8   : > { %v2899_v7 = vadd.f32 %v2883_v23, %v2818_v22  ;;  %v2964_v63 = vpop.f32.mrf.mxu3 }
 0xbb9   : > { %v2804_v19 = vpop.f32.mrf.mxu0 }
 0xbba   : > { %v2980_v34 = vadd.f32 %v2964_v63, %v2899_v7  ;;  %v2819_v2 = vadd.f32 %v9431_v33, %v2804_v19  ;;  %v3069_v6 = vpop.f32.mrf.mxu1 }
 0xbbc   : > { %v2996_v10 = vmul.f32 0.01, %v2980_v34  ;;  %vm2988_vm6 = vcmp.gt.f32.partialorder %v2980_v34, 0.0 }
 0xbbe   : > { %v3004_v59 = vsel %vm2988_vm6, %v2980_v34, %v2996_v10 }
 0xbbf   : > { %v2886_v53 = vpop.f32.mrf.mxu2  ;;  %6843 = vmatmul.msk.f32.gmra.mxu0 %vm639_vm5, %v3004_v59 }
 0xbc0   : > { %v2900_v11 = vadd.f32 %v2886_v53, %v2819_v2  ;;  %v2967_v55 = vpop.f32.mrf.mxu3 }
 0xbc1   : > { %v2807_v30 = vpop.f32.mrf.mxu0 }
 0xbc2   : > { %v2981_v0 = vadd.f32 %v2967_v55, %v2900_v11  ;;  %v2820_v43 = vadd.f32 %v9431_v33, %v2807_v30  ;;  %v3072_v45 = vpop.f32.mrf.mxu1 }
 0xbc4   : > { %v2997_v37 = vmul.f32 0.01, %v2981_v0  ;;  %vm2989_vm7 = vcmp.gt.f32.partialorder %v2981_v0, 0.0 }
 0xbc6   : > { %v3005_v5 = vsel %vm2989_vm7, %v2981_v0, %v2997_v37 }
 0xbc7   : > { %v2889_v52 = vpop.f32.mrf.mxu2  ;;  %6844 = vmatmul.msk.f32.gmra.mxu0 %vm639_vm5, %v3005_v5 }
 0xbc8   : > { %v2901_v29 = vadd.f32 %v2889_v52, %v2820_v43  ;;  %v2970_v15 = vpop.f32.mrf.mxu3 }
 0xbc9   : > { %v2810_v25 = vpop.f32.mrf.mxu0 }
 0xbca   : > { %v2982_v8 = vadd.f32 %v2970_v15, %v2901_v29  ;;  %v2821_v60 = vadd.f32 %v9431_v33, %v2810_v25  ;;  %v3075_v32 = vpop.f32.mrf.mxu1 }
 0xbcc   : > { %v2998_v44 = vmul.f32 0.01, %v2982_v8  ;;  %vm2990_vm8 = vcmp.gt.f32.partialorder %v2982_v8, 0.0 }
 0xbce   : > { %v3006_v36 = vsel %vm2990_vm8, %v2982_v8, %v2998_v44 }
 0xbcf   : > { %v2892_v61 = vpop.f32.mrf.mxu2  ;;  %6845 = vmatmul.msk.f32.gmra.mxu0 %vm639_vm5, %v3006_v36 }
 0xbd0   : > { %v2902_v27 = vadd.f32 %v2892_v61, %v2821_v60  ;;  %v2973_v48 = vpop.f32.mrf.mxu3 }
 0xbd2   : > { %v2983_v16 = vadd.f32 %v2973_v48, %v2902_v27  ;;  %v3078_v38 = vpop.f32.mrf.mxu1 }
 0xbd4   : > { %v2999_v42 = vmul.f32 0.01, %v2983_v16  ;;  %vm2991_vm9 = vcmp.gt.f32.partialorder %v2983_v16, 0.0 }
 0xbd6   : > { %v3007_v46 = vsel %vm2991_vm9, %v2983_v16, %v2999_v42 }
 0xbd7   : > { %6846 = vmatmul.msk.f32.gmra.mxu0 %vm639_vm5, %v3007_v46 }
 0xc1c   : > { %v3122_v54 = vpop.f32.mrf.mxu0 }
 0xc1d   : > { %v3123_v50 = vadd.f32 %v3122_v54, %v3057_v3 }
 0xc1f   : > { %7208 = vtanh.f32 %v3123_v50  ;;  %v6847_v34 = vmul.f32 -1.442695, %v3123_v50 }
 0xc24   : > { %v3125_v39 = vpop.f32.mrf.mxu0 }
 0xc25   : > { %v7209_v33 = vpop.eup %7208  ;;  %v3126_v57 = vadd.f32 %v3125_v39, %v3060_v14 }
 0xc26   : > { %3322 = vrot.lane.b32.xlu0 %v7209_v33, %s7574_s19 }
 0xc27   : > { %7210 = vtanh.f32 %v3126_v57  ;;  %v6848_v23 = vmul.f32 -1.442695, %v3126_v57 }
 0xc2c   : > { %v3128_v28 = vpop.f32.mrf.mxu0 }
 0xc2d   : > { %v7211_v31 = vpop.eup %7210  ;;  %v3129_v20 = vadd.f32 %v3128_v28, %v3063_v58 }
 0xc2e   : > { %3324 = vrot.lane.b32.xlu2 %v7211_v31, %s7574_s19 }
 0xc2f   : > { %7212 = vtanh.f32 %v3129_v20  ;;  %v6849_v30 = vmul.f32 -1.442695, %v3129_v20 }
 0xc34   : > { %v3131_v9 = vpop.f32.mrf.mxu0 }
 0xc35   : > { %v7213_v24 = vpop.eup %7212  ;;  %v3132_v35 = vadd.f32 %v3131_v9, %v3066_v49 }
 0xc36   : > { %3326 = vrot.lane.b32.xlu1 %v7213_v24, %s7574_s19 }
 0xc37   : > { %7214 = vtanh.f32 %v3132_v35  ;;  %v6850_v15 = vmul.f32 -1.442695, %v3132_v35 }
 0xc3c   : > { %v3134_v40 = vpop.f32.mrf.mxu0 }
 0xc3d   : > { %v7215_v47 = vpop.eup %7214  ;;  %v3135_v13 = vadd.f32 %v3134_v40, %v3069_v6 }
 0xc3e   : > { %3328 = vrot.lane.b32.xlu0 %v7215_v47, %s7574_s19 }
 0xc3f   : > { %7216 = vtanh.f32 %v3135_v13  ;;  %v6851_v2 = vmul.f32 -1.442695, %v3135_v13 }
 0xc44   : > { %v3137_v12 = vpop.f32.mrf.mxu0 }
 0xc45   : > { %v7217_v4 = vpop.eup %7216  ;;  %v9453_v1 = vadd.f32 %v3137_v12, %v3072_v45 }
 0xc46   : > { %3330 = vrot.lane.b32.xlu2 %v7217_v4, %s7574_s19 }
 0xc47   : > { %7218 = vtanh.f32 %v9453_v1  ;;  %v6852_v28 = vmul.f32 -1.442695, %v9453_v1 }
 0xc4c   : > { %v3140_v21 = vpop.f32.mrf.mxu0 }
 0xc4d   : > { %v7219_v62 = vpop.eup %7218  ;;  %v9457_v51 = vadd.f32 %v3140_v21, %v3075_v32 }
 0xc4e   : > { %3332 = vrot.lane.b32.xlu0 %v7219_v62, %s7574_s19 }
 0xc4f   : > { %7220 = vtanh.f32 %v9457_v51  ;;  %v6853_v21 = vmul.f32 -1.442695, %v9457_v51 }
 0xc54   : > { %v3143_v41 = vpop.f32.mrf.mxu0 }
 0xc55   : > { %v7221_v22 = vpop.eup %7220  ;;  %v3144_v56 = vadd.f32 %v3143_v41, %v3078_v38 }
 0xc56   : > { %3334 = vrot.lane.b32.xlu1 %v7221_v22, %s7574_s19 }
 0xc57   : > { %7222 = vtanh.f32 %v3144_v56  ;;  %v6854_v3 = vmul.f32 -1.442695, %v3144_v56 }
 0xc58   : > { %7224 = vpow2.f32 %v6848_v23 }
 0xc5d   : > { %v7223_v7 = vpop.eup %7222 }
 0xc5e   : > { %3336 = vrot.lane.b32.xlu2 %v7223_v7, %s7574_s19  ;;  %v7225_v63 = vpop.eup %7224 }
 0xc5f   : > { %v3171_v19 = vadd.f32 1.0, %v7225_v63 }
 0xc61   : > { %7226 = vrcp.f32 %v3171_v19  ;;  %v3204_v29 = vand.u32 2147483648, %v3171_v19  ;;  %vm3198_vm10 = vweird.f32 %v3171_v19  ;;  %v3202_v8 = vand.u32 2147483647, %v3171_v19 }
 0xc62   : > { %7228 = vpow2.f32 %v6847_v34 }
 0xc63   : > { %7230 = vpow2.f32 %v6851_v2  ;;  %v3205_v36 = vor.u32 1.1754944e-38, %v3204_v29  ;;  %vm3203_vm15 = vcmp.eq.f32.partialorder %v3202_v8, 8.507059e+37 }
 0xc67   : > { %v7227_v10 = vpop.eup %7226 }
 0xc68   : > { %v7229_v59 = vpop.eup %7228  ;;  %v3194_v53 = vmul.f32 %v7227_v10, %v3171_v19  ;;  %vm3199_vm1 = vweird.f32 %v7227_v10 }
 0xc69   : > { %v3170_v11 = vadd.f32 1.0, %v7229_v59  ;;  %v7231_v0 = vpop.eup %7230  ;;  %vm3200_vm11 = vmor %vm3198_vm10, %vm3199_vm1 }
 0xc6a   : > { %v3195_v55 = vsub.f32 1.0, %v3194_v53  ;;  %v9463_v43 = vadd.f32 1.0, %v7231_v0 }
 0xc6b   : > { %7232 = vrcp.f32 %v3170_v11  ;;  %v3189_v49 = vand.u32 2147483648, %v3170_v11  ;;  %vm3183_vm3 = vweird.f32 %v3170_v11  ;;  %v3187_v31 = vand.u32 2147483647, %v3170_v11 }
 0xc6c   : > { %v3196_v37 = vmul.f32 %v7227_v10, %v3195_v55  ;;  %7234 = vpow2.f32 %v6849_v30  ;;  %v3249_v32 = vand.u32 2147483648, %v9463_v43  ;;  %vm3243_vm6 = vweird.f32 %v9463_v43 }
 0xc6d   : > { %7236 = vrcp.f32 %v9463_v43  ;;  %v3190_v6 = vor.u32 1.1754944e-38, %v3189_v49  ;;  %vm3188_vm13 = vcmp.eq.f32.partialorder %v3187_v31, 8.507059e+37  ;;  %v3247_v62 = vand.u32 2147483647, %v9463_v43 }
 0xc6e   : > { %v3197_v5 = vadd.f32 %v7227_v10, %v3196_v37  ;;  %7238 = vpow2.f32 %v6850_v15  ;;  %v3250_v23 = vor.u32 1.1754944e-38, %v3249_v32 }
 0xc6f   : > { %vm3248_vm8 = vcmp.eq.f32.partialorder %v3247_v62, 8.507059e+37 }
 0xc70   : > { %v3201_v44 = vsel %vm3200_vm11, %v7227_v10, %v3197_v5 }
 0xc71   : > { %v7233_v52 = vpop.eup %7232  ;;  %v9468_v48 = vsel %vm3203_vm15, %v3205_v36, %v3201_v44 }
 0xc72   : > { %v7235_v25 = vpop.eup %7234  ;;  %v3179_v60 = vmul.f32 %v7233_v52, %v3170_v11  ;;  %vm3184_vm2 = vweird.f32 %v7233_v52 }
 0xc73   : > { %v9466_v61 = vadd.f32 1.0, %v7235_v25  ;;  %v7237_v46 = vpop.eup %7236  ;;  %vm3185_vm14 = vmor %vm3183_vm3, %vm3184_vm2 }
 0xc74   : > { %v3180_v42 = vsub.f32 1.0, %v3179_v60  ;;  %v7239_v14 = vpop.eup %7238  ;;  %v3239_v50 = vmul.f32 %v7237_v46, %v9463_v43  ;;  %vm3244_vm4 = vweird.f32 %v7237_v46 }
 0xc75   : > { %7240 = vrcp.f32 %v9466_v61  ;;  %v9474_v58 = vadd.f32 1.0, %v7239_v14  ;;  %vm3245_vm7 = vmor %vm3243_vm6, %vm3244_vm4  ;;  %v3219_v59 = vand.u32 2147483648, %v9466_v61  ;;  %vm3213_vm1 = vweird.f32 %v9466_v61 }
 0xc76   : > { %v3181_v54 = vmul.f32 %v7233_v52, %v3180_v42  ;;  %7242 = vpow2.f32 %v6854_v3  ;;  %v3240_v33 = vsub.f32 1.0, %v3239_v50  ;;  %v3217_v53 = vand.u32 2147483647, %v9466_v61 }
 0xc77   : > { %7244 = vrcp.f32 %v9474_v58  ;;  %v3220_v37 = vor.u32 1.1754944e-38, %v3219_v59  ;;  %v3234_v44 = vand.u32 2147483648, %v9474_v58  ;;  %vm3228_vm2 = vweird.f32 %v9474_v58 }
 0xc78   : > { %v3182_v39 = vadd.f32 %v7233_v52, %v3181_v54  ;;  %v3241_v24 = vmul.f32 %v7237_v46, %v3240_v33  ;;  %7246 = vpow2.f32 %v6852_v28  ;;  %vm3218_vm11 = vcmp.eq.f32.partialorder %v3217_v53, 8.507059e+37 }
 0xc79   : > { %v3232_v60 = vand.u32 2147483647, %v9474_v58 }
 0xc7a   : > { %v3186_v9 = vsel %vm3185_vm14, %v7233_v52, %v3182_v39  ;;  %v3242_v12 = vadd.f32 %v7237_v46, %v3241_v24 }
 0xc7b   : > { %v7241_v57 = vpop.eup %7240  ;;  %v9481_v13 = vsel %vm3188_vm13, %v3190_v6, %v3186_v9  ;;  %vm3233_vm14 = vcmp.eq.f32.partialorder %v3232_v60, 8.507059e+37 }
 0xc7c   : > { %v7243_v20 = vpop.eup %7242  ;;  %v3209_v35 = vmul.f32 %v7241_v57, %v9466_v61  ;;  %v3246_v41 = vsel %vm3245_vm7, %v7237_v46, %v3242_v12  ;;  %vm3214_vm9 = vweird.f32 %v7241_v57 }
 0xc7d   : > { %v9479_v40 = vadd.f32 1.0, %v7243_v20  ;;  %v7245_v1 = vpop.eup %7244  ;;  %v9493_v51 = vsel %vm3248_vm8, %v3250_v23, %v3246_v41  ;;  %vm3215_vm10 = vmor %vm3213_vm1, %vm3214_vm9 }
 0xc7e   : > { %v3210_v4 = vsub.f32 1.0, %v3209_v35  ;;  %v7247_v38 = vpop.eup %7246  ;;  %v3224_v56 = vmul.f32 %v7245_v1, %v9474_v58  ;;  %vm3229_vm15 = vweird.f32 %v7245_v1 }
 0xc7f   : > { %7248 = vrcp.f32 %v9479_v40  ;;  %v9491_v7 = vadd.f32 1.0, %v7247_v38  ;;  %vm3230_vm3 = vmor %vm3228_vm2, %vm3229_vm15  ;;  %v3294_v58 = vand.u32 2147483648, %v9479_v40  ;;  %vm3288_vm4 = vweird.f32 %v9479_v40 }
 0xc80   : > { %v3211_v22 = vmul.f32 %v7241_v57, %v3210_v4  ;;  %7250 = vpow2.f32 %v6853_v21  ;;  %v3225_v10 = vsub.f32 1.0, %v3224_v56  ;;  %v3292_v39 = vand.u32 2147483647, %v9479_v40 }
 0xc81   : > { %7252 = vrcp.f32 %v9491_v7  ;;  %v3295_v28 = vor.u32 1.1754944e-38, %v3294_v58  ;;  %v3264_v6 = vand.u32 2147483648, %v9491_v7  ;;  %vm3258_vm9 = vweird.f32 %v9491_v7 }
 0xc82   : > { %v3212_v34 = vadd.f32 %v7241_v57, %v3211_v22  ;;  %v3226_v30 = vmul.f32 %v7245_v1, %v3225_v10  ;;  %vm3293_vm7 = vcmp.eq.f32.partialorder %v3292_v39, 8.507059e+37 }
 0xc83   : > { %v3265_v12 = vor.u32 1.1754944e-38, %v3264_v6 }
 0xc84   : > { %v3216_v55 = vsel %vm3215_vm10, %v7241_v57, %v3212_v34  ;;  %v3227_v15 = vadd.f32 %v7245_v1, %v3226_v30 }
 0xc85   : > { %v7249_v2 = vpop.eup %7248  ;;  %v9504_v52 = vsel %vm3218_vm11, %v3220_v37, %v3216_v55  ;;  %v3310_v37 = vmul.f32 0.0, %v9493_v51 }
 0xc86   : > { %v7251_v11 = vpop.eup %7250  ;;  %v3284_v0 = vmul.f32 %v7249_v2, %v9479_v40  ;;  %v3231_v36 = vsel %vm3230_vm3, %v7245_v1, %v3227_v15  ;;  %vm3289_vm13 = vweird.f32 %v7249_v2  ;;  %v3262_v40 = vand.u32 2147483647, %v9491_v7 }
 0xc87   : > { %v9502_v43 = vadd.f32 1.0, %v7251_v11  ;;  %v7253_v25 = vpop.eup %7252  ;;  %vm3290_vm6 = vmor %vm3288_vm4, %vm3289_vm13  ;;  %v3308_v10 = vmul.f32 0.0, %v9504_v52  ;;  %v3306_v11 = vmul.f32 0.0, %v9481_v13 }
 0xc88   : > { %v3325_v27 = vpop.permute.xlu2 %3324  ;;  %v3285_v8 = vsub.f32 1.0, %v3284_v0  ;;  %vm3259_vm8 = vweird.f32 %v7253_v25  ;;  %vm3263_vm10 = vcmp.eq.f32.partialorder %v3262_v40, 8.507059e+37 }
 0xc89   : > { %v3347_v16 = vmul.f32 %v3325_v27, %v9468_v48  ;;  %7254 = vrcp.f32 %v9502_v43  ;;  %v3254_v27 = vmul.f32 %v7253_v25, %v9491_v7  ;;  %vm3260_vm1 = vmor %vm3258_vm9, %vm3259_vm8  ;;  %v3279_v62 = vand.u32 2147483648, %v9502_v43 }
 0xc8a   : > { %v3286_v61 = vmul.f32 %v7249_v2, %v3285_v8  ;;  %vm3273_vm15 = vweird.f32 %v9502_v43  ;;  %v3277_v38 = vand.u32 2147483647, %v9502_v43 }
 0xc8b   : > { %3364 = vrot.lane.b32.xlu1 %v3347_v16, %s7575_s20  ;;  %v3235_v16 = vor.u32 1.1754944e-38, %v3234_v44  ;;  %v3255_v54 = vsub.f32 1.0, %v3254_v27  ;;  %v3280_v22 = vor.u32 1.1754944e-38, %v3279_v62 }
 0xc8c   : > { %v3287_v14 = vadd.f32 %v7249_v2, %v3286_v61  ;;  %vm3278_vm3 = vcmp.eq.f32.partialorder %v3277_v38, 8.507059e+37 }
 0xc8d   : > { %v9513_v42 = vsel %vm3233_vm14, %v3235_v16, %v3231_v36  ;;  %v3256_v57 = vmul.f32 %v7253_v25, %v3255_v54  ;;  %v7111_v16 = vld [vmem:[%s11015_s0 + $0x198] ss:$0 sm:$0xff] }
 0xc8e   : > { %v3291_v33 = vsel %vm3290_vm6, %v7249_v2, %v3287_v14  ;;  %v3309_v60 = vmul.f32 0.0, %v9513_v42 }
 0xc8f   : > { %v7255_v50 = vpop.eup %7254  ;;  %v9521_v20 = vsel %vm3293_vm7, %v3295_v28, %v3291_v33  ;;  %v3257_v24 = vadd.f32 %v7253_v25, %v3256_v57 }
 0xc90   : > { %v3269_v49 = vmul.f32 %v7255_v50, %v9502_v43  ;;  %vm3274_vm11 = vweird.f32 %v7255_v50 }
 0xc91   : > { %vm3275_vm2 = vmor %vm3273_vm15, %vm3274_vm11 }
 0xc92   : > { %v3270_v35 = vsub.f32 1.0, %v3269_v49 }
 0xc98   : > { %v3323_v47 = vpop.permute.xlu0 %3322 }
 0xc99   : > { %v3346_v45 = vmul.f32 %v3323_v47, %v9481_v13  ;;  %v3261_v47 = vsel %vm3260_vm1, %v7253_v25, %v3257_v24 }
 0xc9a   : > { %v9528_v4 = vsel %vm3263_vm10, %v3265_v12, %v3261_v47 }
 0xc9b   : > { %3362 = vrot.lane.b32.xlu0 %v3346_v45, %s7575_s20  ;;  %v3271_v45 = vmul.f32 %v7255_v50, %v3270_v35  ;;  %v3311_v15 = vmul.f32 0.0, %v9528_v4 }
 0xc9d   : > { %v3272_v21 = vadd.f32 %v7255_v50, %v3271_v45 }
 0xc9f   : > { %v3276_v41 = vsel %vm3275_vm2, %v7255_v50, %v3272_v21 }
 0xca0   : > { %v3331_v63 = vpop.permute.xlu2 %3330  ;;  %v9535_v56 = vsel %vm3278_vm3, %v3280_v22, %v3276_v41 }
 0xca1   : > { %v3350_v19 = vmul.f32 %v3331_v63, %v9493_v51  ;;  %v3307_v63 = vmul.f32 0.0, %v9468_v48  ;;  %v3312_v58 = vmul.f32 0.0, %v9535_v56 }
 0xca3   : > { %3370 = vrot.lane.b32.xlu1 %v3350_v19, %s7575_s20 }
 0xca8   : > { %v3327_v5 = vpop.permute.xlu1 %3326 }
 0xca9   : > { %v3348_v29 = vmul.f32 %v3327_v5, %v9504_v52 }
 0xcab   : > { %3366 = vrot.lane.b32.xlu2 %v3348_v29, %s7575_s20 }
 0xcb0   : > { %v3329_v46 = vpop.permute.xlu0 %3328 }
 0xcb1   : > { %v3349_v3 = vmul.f32 %v3329_v46, %v9513_v42  ;;  %v3313_v46 = vmul.f32 0.0, %v9521_v20 }
 0xcb3   : > { %3368 = vrot.lane.b32.xlu0 %v3349_v3, %s7575_s20 }
 0xcb8   : > { %v3337_v31 = vpop.permute.xlu2 %3336 }
 0xcb9   : > { %v3353_v9 = vmul.f32 %v3337_v31, %v9521_v20 }
 0xcbb   : > { %3376 = vrot.lane.b32.xlu1 %v3353_v9, %s7575_s20 }
 0xcc0   : > { %v3333_v1 = vpop.permute.xlu0 %3332 }
 0xcc1   : > { %v3351_v32 = vmul.f32 %v3333_v1, %v9528_v4 }
 0xcc3   : > { %3372 = vrot.lane.b32.xlu2 %v3351_v32, %s7575_s20 }
 0xcc8   : > { %v3335_v23 = vpop.permute.xlu1 %3334 }
 0xcc9   : > { %v3352_v7 = vmul.f32 %v3335_v23, %v9535_v56 }
 0xccb   : > { %3374 = vrot.lane.b32.xlu0 %v3352_v7, %s7575_s20 }
 0xcfd   : > { %v3365_v19 = vpop.permute.xlu1 %3364 }
 0xcfe   : > { %v9540_v34 = vadd.f32 %v3365_v19, %v3307_v63 }
 0xd00   : > { %7256 = vtanh.f32 %v9540_v34 }
 0xd05   : > { %v3367_v2 = vpop.permute.xlu2 %3366 }
 0xd06   : > { %v7257_v59 = vpop.eup %7256  ;;  %v9544_v53 = vadd.f32 %v3367_v2, %v3308_v10 }
 0xd07   : > { %3412 = vrot.lane.b32.xlu0 %v7257_v59, %s7574_s19 }
 0xd08   : > { %7258 = vtanh.f32 %v9544_v53 }
 0xd0d   : > { %v3363_v55 = vpop.permute.xlu0 %3362 }
 0xd0e   : > { %v7259_v30 = vpop.eup %7258  ;;  %v9549_v0 = vadd.f32 %v3363_v55, %v3306_v11 }
 0xd0f   : > { %3414 = vrot.lane.b32.xlu1 %v7259_v30, %s7574_s19 }
 0xd10   : > { %7260 = vtanh.f32 %v9549_v0 }
 0xd15   : > { %v3371_v43 = vpop.permute.xlu1 %3370 }
 0xd16   : > { %v7261_v5 = vpop.eup %7260  ;;  %v9554_v29 = vadd.f32 %v3371_v43, %v3310_v37 }
 0xd17   : > { %3410 = vrot.lane.b32.xlu2 %v7261_v5, %s7574_s19 }
 0xd18   : > { %7262 = vtanh.f32 %v9554_v29 }
 0xd1d   : > { %v3373_v8 = vpop.permute.xlu2 %3372 }
 0xd1e   : > { %v7263_v25 = vpop.eup %7262  ;;  %v9559_v44 = vadd.f32 %v3373_v8, %v3311_v15 }
 0xd1f   : > { %3418 = vrot.lane.b32.xlu0 %v7263_v25, %s7574_s19 }
 0xd20   : > { %7264 = vtanh.f32 %v9559_v44 }
 0xd25   : > { %v3369_v36 = vpop.permute.xlu0 %3368 }
 0xd26   : > { %v7265_v61 = vpop.eup %7264  ;;  %v9564_v27 = vadd.f32 %v3369_v36, %v3309_v60 }
 0xd27   : > { %3420 = vrot.lane.b32.xlu1 %v7265_v61, %s7574_s19 }
 0xd28   : > { %7266 = vtanh.f32 %v9564_v27 }
 0xd2d   : > { %v3377_v3 = vpop.permute.xlu1 %3376 }
 0xd2e   : > { %v7267_v14 = vpop.eup %7266  ;;  %v9572_v54 = vadd.f32 %v3377_v3, %v3313_v46 }
 0xd2f   : > { %3416 = vrot.lane.b32.xlu2 %v7267_v14, %s7574_s19  ;;  %3445 = vrot.lane.b32.xlu1 %v7111_v16, %s7576_s18 }
 0xd30   : > { %7268 = vtanh.f32 %v9572_v54 }
 0xd36   : > { %v7269_v50 = vpop.eup %7268 }
 0xd37   : > { %3424 = vrot.lane.b32.xlu0 %v7269_v50, %s7574_s19 }
 0xd3d   : > { %v3375_v39 = vpop.permute.xlu0 %3374 }
 0xd3e   : > { %v9579_v33 = vadd.f32 %v3375_v39, %v3312_v58 }
 0xd40   : > { %7270 = vtanh.f32 %v9579_v33 }
 0xd46   : > { %v7271_v57 = vpop.eup %7270 }
 0xd47   : > { %3422 = vrot.lane.b32.xlu2 %v7271_v57, %s7574_s19 }
 0xd71   : > { %v3411_v31 = vpop.permute.xlu2 %3410 }
 0xd72   : > { %v9584_v24 = vmul.f32 %v3411_v31, %v9481_v13 }
 0xd79   : > { %v3413_v9 = vpop.permute.xlu0 %3412 }
 0xd7a   : > { %v9587_v35 = vmul.f32 %v3413_v9, %v9468_v48 }
 0xd81   : > { %v3415_v49 = vpop.permute.xlu1 %3414 }
 0xd82   : > { %v9590_v6 = vmul.f32 %v3415_v49, %v9504_v52 }
 0xd89   : > { %v3417_v1 = vpop.permute.xlu2 %3416 }
 0xd8a   : > { %v9599_v48 = vmul.f32 %v3417_v1, %v9513_v42 }
 0xd91   : > { %v3419_v32 = vpop.permute.xlu0 %3418 }
 0xd92   : > { %v9605_v52 = vmul.f32 %v3419_v32, %v9493_v51 }
 0xd99   : > { %v3421_v28 = vpop.permute.xlu1 %3420 }
 0xd9a   : > { %v9602_v13 = vmul.f32 %v3421_v28, %v9528_v4 }
 0xda1   : > { %v3446_v40 = vpop.permute.xlu1 %3445  ;;  %v3423_v38 = vpop.permute.xlu2 %3422 }
 0xda2   : > { %v3450_v47 = vmul.f32 %v3446_v40, %v9590_v6  ;;  %v3448_v45 = vmul.f32 %v3446_v40, %v9584_v24  ;;  %v3449_v12 = vmul.f32 %v3446_v40, %v9587_v35  ;;  %v3453_v21 = vmul.f32 %v3446_v40, %v9602_v13 }
 0xda3   : > { %v3451_v62 = vmul.f32 %v3446_v40, %v9599_v48  ;;  %v3452_v41 = vmul.f32 %v3446_v40, %v9605_v52  ;;  %v9614_v42 = vmul.f32 %v3423_v38, %v9535_v56 }
 0xda4   : > { %3468 = vrot.lane.b32.xlu1 %v3450_v47, %s7575_s20  ;;  %3464 = vrot.lane.b32.xlu2 %v3448_v45, %s7575_s20 }
 0xda5   : > { %3466 = vrot.lane.b32.xlu0 %v3449_v12, %s7575_s20  ;;  %v3454_v4 = vmul.f32 %v3446_v40, %v9614_v42 }
 0xda9   : > { %v3425_v22 = vpop.permute.xlu0 %3424 }
 0xdaa   : > { %v9617_v51 = vmul.f32 %v3425_v22, %v9521_v20 }
 0xdac   : > { %3474 = vrot.lane.b32.xlu1 %v3453_v21, %s7575_s20  ;;  %3470 = vrot.lane.b32.xlu2 %v3451_v62, %s7575_s20  ;;  %v3455_v23 = vmul.f32 %v3446_v40, %v9617_v51 }
 0xdad   : > { %3472 = vrot.lane.b32.xlu0 %v3452_v41, %s7575_s20 }
 0xdb4   : > { %3476 = vrot.lane.b32.xlu2 %v3454_v4, %s7575_s20 }
 0xdb5   : > { %3478 = vrot.lane.b32.xlu0 %v3455_v23, %s7575_s20 }
 0xdfe   : > { %v3465_v7 = vpop.permute.xlu2 %3464 }
 0xdff   : > { %v3488_v63 = vsel %vm639_vm5, %v3465_v7, 0.0 }
 0xe00   : > { %3489 = vadd.xlane.f32.xlu1 %v3488_v63 }
 0xe06   : > { %v3471_v19 = vpop.permute.xlu2 %3470 }
 0xe07   : > { %v3497_v10 = vsel %vm639_vm5, %v3471_v19, 0.0 }
 0xe08   : > { %3498 = vadd.xlane.f32.xlu1 %v3497_v10 }
 0xe0e   : > { %v3477_v56 = vpop.permute.xlu2 %3476 }
 0xe0f   : > { %v3506_v20 = vsel %vm639_vm5, %v3477_v56, 0.0 }
 0xe10   : > { %3507 = vadd.xlane.f32.xlu1 %v3506_v20 }
 0xe16   : > { %v3469_v2 = vpop.permute.xlu1 %3468 }
 0xe17   : > { %v3467_v59 = vpop.permute.xlu0 %3466  ;;  %v3494_v11 = vsel %vm639_vm5, %v3469_v2, 0.0 }
 0xe18   : > { %3495 = vadd.xlane.f32.xlu0 %v3494_v11  ;;  %v3491_v55 = vsel %vm639_vm5, %v3467_v59, 0.0 }
 0xe19   : > { %3492 = vadd.xlane.f32.xlu2 %v3491_v55 }
 0xe1e   : > { %v3475_v30 = vpop.permute.xlu1 %3474 }
 0xe1f   : > { %v3473_v37 = vpop.permute.xlu0 %3472  ;;  %v3503_v43 = vsel %vm639_vm5, %v3475_v30, 0.0 }
 0xe20   : > { %3504 = vadd.xlane.f32.xlu0 %v3503_v43  ;;  %v3500_v5 = vsel %vm639_vm5, %v3473_v37, 0.0 }
 0xe21   : > { %3501 = vadd.xlane.f32.xlu2 %v3500_v5 }
 0xe27   : > { %v3479_v15 = vpop.permute.xlu0 %3478 }
 0xe28   : > { %v3509_v8 = vsel %vm639_vm5, %v3479_v15, 0.0 }
 0xe29   : > { %3510 = vadd.xlane.f32.xlu2 %v3509_v8 }
 0xe73   : > { %v3490_v25 = vpop.xlane.xlu1 %3489 }
 0xe7b   : > { %v3499_v61 = vpop.xlane.xlu1 %3498 }
 0xe83   : > { %v3508_v50 = vpop.xlane.xlu1 %3507 }
 0xe8b   : > { %v3496_v36 = vpop.xlane.xlu0 %3495 }
 0xe8c   : > { %v3493_v60 = vpop.xlane.xlu2 %3492  ;;  %v3514_v39 = vmax.f32 %v3496_v36, %v3508_v50 }
 0xe93   : > { %v3505_v46 = vpop.xlane.xlu0 %3504 }
 0xe94   : > { %v3502_v16 = vpop.xlane.xlu2 %3501  ;;  %v3513_v14 = vmax.f32 %v3493_v60, %v3505_v46 }
 0xe95   : > { %v3512_v3 = vmax.f32 %v3490_v25, %v3502_v16 }
 0xe97   : > { %v3516_v49 = vmax.f32 %v3512_v3, %v3513_v14 }
 0xe9c   : > { %v3511_v58 = vpop.xlane.xlu2 %3510 }
 0xe9d   : > { %v3515_v57 = vmax.f32 %v3499_v61, %v3511_v58 }
 0xe9f   : > { %v3517_v28 = vmax.f32 %v3514_v39, %v3515_v57 }
 0xea1   : > { %v3518_v31 = vmax.f32 %v3516_v49, %v3517_v28  ;;  %v7468_v49 = vld [vmem:[%s11018_s3] sm:$0xff]  ;;  %v7469_v28 = vld [vmem:[%s11018_s3 + $0x8] sm:$0xff] }
 0xea3   : > { %v3519_v9 = vrot.slane %v3518_v31, 4 }
 0xea5   : > { %v3520_v40 = vmax.f32 %v3518_v31, %v3519_v9  ;;  %v3684_v31 = vsel %vm639_vm5, %v8992_v18, 0.0 }
 0xea7   : > { %v3521_v47 = vrot.slane %v3520_v40, 2 }
 0xea9   : > { %v3522_v45 = vmax.f32 %v3520_v40, %v3521_v47 }
 0xeab   : > { %v3523_v12 = vrot.slane %v3522_v45, 1 }
 0xead   : > { %v3524_v1 = vmax.f32 %v3522_v45, %v3523_v12 }
 0xeaf   : > { %v3532_v32 = vsub.f32 %v3511_v58, %v3524_v1  ;;  %v3531_v21 = vsub.f32 %v3508_v50, %v3524_v1  ;;  %v3530_v62 = vsub.f32 %v3505_v46, %v3524_v1  ;;  %v3529_v38 = vsub.f32 %v3502_v16, %v3524_v1 }
 0xeb0   : > { %v3527_v41 = vsub.f32 %v3496_v36, %v3524_v1  ;;  %v3528_v22 = vsub.f32 %v3499_v61, %v3524_v1  ;;  %v3526_v63 = vsub.f32 %v3493_v60, %v3524_v1  ;;  %v3525_v10 = vsub.f32 %v3490_v25, %v3524_v1 }
 0xeb1   : > { %v3547_v4 = vmul.f32 1.442695, %v3532_v32  ;;  %v3545_v23 = vmul.f32 1.442695, %v3531_v21  ;;  %v3543_v7 = vmul.f32 1.442695, %v3530_v62 }
 0xeb2   : > { %v3541_v19 = vmul.f32 1.442695, %v3529_v38  ;;  %v3537_v56 = vmul.f32 1.442695, %v3527_v41  ;;  %v3539_v20 = vmul.f32 1.442695, %v3528_v22 }
 0xeb3   : > { %7272 = vpow2.f32 %v3547_v4  ;;  %v3535_v2 = vmul.f32 1.442695, %v3526_v63  ;;  %v3533_v59 = vmul.f32 1.442695, %v3525_v10 }
 0xeb4   : > { %7274 = vpow2.f32 %v3545_v23 }
 0xeb5   : > { %7276 = vpow2.f32 %v3543_v7  ;;  %v3687_v7 = vsel %vm639_vm5, %v8990_v17, 0.0 }
 0xeb6   : > { %7278 = vpow2.f32 %v3541_v19 }
 0xeb7   : > { %7280 = vpow2.f32 %v3537_v56 }
 0xeb8   : > { %7282 = vpow2.f32 %v3539_v20 }
 0xeb9   : > { %v7273_v11 = vpop.eup %7272  ;;  %7284 = vpow2.f32 %v3535_v2 }
 0xeba   : > { %v7275_v55 = vpop.eup %7274  ;;  %3557 = vmatpush.msrb.mxu2 %v7273_v11  ;;  %v3579_v30 = vmul.f32 %v7273_v11, %v9617_v51  ;;  %7286 = vpow2.f32 %v3533_v59 }
 0xebb   : > { %v7277_v37 = vpop.eup %7276  ;;  %v3578_v43 = vmul.f32 %v7275_v55, %v9614_v42 }
 0xebc   : > { %v7279_v5 = vpop.eup %7278  ;;  %3558 = vmatpush.msrb.mxu2 %v7275_v55  ;;  %v3577_v15 = vmul.f32 %v7277_v37, %v9602_v13 }
 0xebd   : > { %v7281_v8 = vpop.eup %7280  ;;  %v7061_v25 = vpack.i.bf16 %v3578_v43, %v3579_v30  ;;  %v3576_v60 = vmul.f32 %v7279_v5, %v9605_v52 }
 0xebe   : > { %v7283_v36 = vpop.eup %7282  ;;  %3559 = vmatpush.msrb.mxu2 %v7277_v37  ;;  %v3574_v61 = vmul.f32 %v7281_v8, %v9590_v6 }
 0xebf   : > { %v7285_v16 = vpop.eup %7284  ;;  %7062 = vrot.lane.b32.xlu0 %v7061_v25, %s7575_s20  ;;  %v7066_v46 = vpack.i.bf16 %v3576_v60, %v3577_v15  ;;  %v3575_v3 = vmul.f32 %v7283_v36, %v9599_v48 }
 0xec0   : > { %v7287_v14 = vpop.eup %7286  ;;  %3560 = vmatpush.msrb.mxu2 %v7279_v5  ;;  %v3573_v39 = vmul.f32 %v7285_v16, %v9587_v35 }
 0xec1   : > { %7067 = vrot.lane.b32.xlu1 %v7066_v46, %s7575_s20  ;;  %v7071_v50 = vpack.i.bf16 %v3574_v61, %v3575_v3  ;;  %v3572_v58 = vmul.f32 %v7287_v14, %v9584_v24 }
 0xec2   : > { %3561 = vmatpush.msrb.mxu2 %v7283_v36 }
 0xec3   : > { %7072 = vrot.lane.b32.xlu2 %v7071_v50, %s7575_s20  ;;  %v7076_v57 = vpack.i.bf16 %v3572_v58, %v3573_v39 }
 0xec4   : > { %3562 = vmatpush.msrb.mxu2 %v7281_v8 }
 0xec6   : > { %3563 = vmatpush.msrb.mxu2 %v7285_v16 }
 0xec7   : > { %7077 = vrot.lane.b32.xlu0 %v7076_v57, %s7575_s20 }
 0xec8   : > { %3564 = vmatpush.msrb.mxu2 %v7287_v14 }
 0xec9   : > { %6855 = vmatmul.msk.f32.vlgmr.msrb.gmra.mxu2 %vm1982_vm12, %v7468_v49 }
 0xed1   : > { %6856 = vmatmul.msk.f32.gmra.mxu2 %vm1982_vm12, %v7469_v28 }
 0xeec   : > { %3685 = vadd.xlane.f32.xlu2 %v3684_v31 }
 0xf1d   : > { %v7073_v1 = vpop.permute.xlu2 %7072 }
 0xf1e   : > { %v7074_v21 = vunpack.i.l.bf16 %v7073_v1  ;;  %v7075_v38 = vunpack.i.h.bf16 %v7073_v1 }
 0xf31   : > { %v7063_v9 = vpop.permute.xlu0 %7062 }
 0xf32   : > { %v7064_v40 = vunpack.i.l.bf16 %v7063_v9  ;;  %v7065_v45 = vunpack.i.h.bf16 %v7063_v9 }
 0xf33   : > { %v7068_v47 = vpop.permute.xlu1 %7067 }
 0xf34   : > { %3620 = vmatpush.msra.mxu2 %v7064_v40  ;;  %v7069_v12 = vunpack.i.l.bf16 %v7068_v47  ;;  %v7070_v32 = vunpack.i.h.bf16 %v7068_v47 }
 0xf36   : > { %3621 = vmatpush.msra.mxu2 %v7065_v45 }
 0xf38   : > { %3622 = vmatpush.msra.mxu2 %v7069_v12 }
 0xf39   : > { %v7078_v62 = vpop.permute.xlu0 %7077 }
 0xf3a   : > { %3623 = vmatpush.msra.mxu2 %v7070_v32  ;;  %v7079_v41 = vunpack.i.l.bf16 %v7078_v62  ;;  %v7080_v22 = vunpack.i.h.bf16 %v7078_v62 }
 0xf3c   : > { %3624 = vmatpush.msra.mxu2 %v7074_v21 }
 0xf3e   : > { %3625 = vmatpush.msra.mxu2 %v7075_v38 }
 0xf40   : > { %3626 = vmatpush.msra.mxu2 %v7079_v41 }
 0xf42   : > { %3627 = vmatpush.msra.mxu2 %v7080_v22 }
 0xf43   : > { %6857 = vmatmul.msk.f32.vlgmr.msra.gmra.mxu2 %vm1982_vm12, %v7468_v49 }
 0xf4b   : > { %6858 = vmatmul.msk.f32.gmra.mxu2 %vm1982_vm12, %v7469_v28  ;;  %v7577_v28 = vmov 64.0  }
 0xf4c   : > { %v3566_v4 = vpop.f32.mrf.mxu2 }
 0xf4d   : > { %3637 = vperm.xlu1 %7059, %v3566_v4  }
 0xf54   : > { %v3569_v23 = vpop.f32.mrf.mxu2 }
 0xf55   : > { %3642 = vperm.xlu0 %7081, %v3569_v23  }
 0xf5f   : > { %v3686_v12 = vpop.xlane.xlu2 %3685 }
 0xf7f   : > { %3688 = vadd.xlane.f32.xlu0 %v3687_v7 }
 0xfbf   : > { %v3638_v63 = vpop.permute.xlu1 %3637 }
 0xfc0   : > { %7288 = vrcp.f32 %v3638_v63  ;;  %v3656_v2 = vand.u32 2147483648, %v3638_v63  ;;  %v3654_v11 = vand.u32 2147483647, %v3638_v63  ;;  %vm3650_vm13 = vweird.f32 %v3638_v63 }
 0xfc2   : > { %v3657_v43 = vor.u32 1.1754944e-38, %v3656_v2  ;;  %vm3655_vm6 = vcmp.eq.f32.partialorder %v3654_v11, 8.507059e+37 }
 0xfc6   : > { %v7289_v19 = vpop.eup %7288  ;;  %v3629_v55 = vpop.f32.mrf.mxu2 }
 0xfc7   : > { %v3646_v10 = vmul.f32 %v7289_v19, %v3638_v63  ;;  %v3643_v56 = vpop.permute.xlu0 %3642  ;;  %vm3651_vm14 = vweird.f32 %v7289_v19 }
 0xfc8   : > { %7290 = vrcp.f32 %v3643_v56  ;;  %vm3652_vm4 = vmor %vm3650_vm13, %vm3651_vm14  ;;  %vm3665_vm7 = vweird.f32 %v3643_v56  ;;  %v3671_v25 = vand.u32 2147483648, %v3643_v56  ;;  %v3669_v61 = vand.u32 2147483647, %v3643_v56 }
 0xfc9   : > { %v3647_v20 = vsub.f32 1.0, %v3646_v10  ;;  %7292 = vrcp.f32 %v7577_v28 }
 0xfca   : > { %v3672_v3 = vor.u32 1.1754944e-38, %v3671_v25  ;;  %vm3670_vm1 = vcmp.eq.f32.partialorder %v3669_v61, 8.507059e+37  ;;  %v3679_v25 = vld [vmem:[%s11015_s0 + $0x1c0] sm:$0xff] }
 0xfcb   : > { %v3648_v59 = vmul.f32 %v7289_v19, %v3647_v20 }
 0xfcd   : > { %v3649_v30 = vadd.f32 %v7289_v19, %v3648_v59 }
 0xfce   : > { %v7291_v37 = vpop.eup %7290  ;;  %v3632_v50 = vpop.f32.mrf.mxu2 }
 0xfcf   : > { %v3661_v5 = vmul.f32 %v7291_v37, %v3643_v56  ;;  %v3653_v15 = vsel %vm3652_vm4, %v7289_v19, %v3649_v30  ;;  %vm3666_vm8 = vweird.f32 %v7291_v37  ;;  %v7293_v31 = vpop.eup %7292  ;;  %v3678_v30 = vld [vmem:[%s11015_s0 + $0x1b8] sm:$0xff] }
 0xfd0   : > { %v3658_v8 = vsel %vm3655_vm6, %v3657_v43, %v3653_v15  ;;  %vm3667_vm9 = vmor %vm3665_vm7, %vm3666_vm8  ;;  %v3701_v9 = vmul.f32 64.0, %v7293_v31  ;;  %vm3705_vm10 = vweird.f32 %v7293_v31  ;;  %3777 = vmatpush.msrb.mxu2 %v3678_v30  ;;  %v3681_v43 = vld [vmem:[%s11015_s0 + $0x1d0] sm:$0xff]  ;;  %v3680_v15 = vld [vmem:[%s11015_s0 + $0x1c8] sm:$0xff] }
 0xfd1   : > { %v3662_v60 = vsub.f32 1.0, %v3661_v5  ;;  %v3659_v36 = vmul.f32 %v3658_v8, %v3629_v55  ;;  %v3676_v5 = vld [vmem:[%s11015_s0 + $0x1a8] sm:$0xff]  ;;  %v3675_v8 = vld [vmem:[%s11015_s0 + $0x1a0] sm:$0xff] }
 0xfd2   : > { %v3702_v40 = vsub.f32 1.0, %v3701_v9 }
 0xfd3   : > { %v3692_v16 = vsel %vm639_vm5, %v3659_v36, 0.0  ;;  %v3663_v46 = vmul.f32 %v7291_v37, %v3662_v60 }
 0xfd4   : > { %3693 = vadd.xlane.f32.xlu1 %v3692_v16  ;;  %v3703_v47 = vmul.f32 %v7293_v31, %v3702_v40 }
 0xfd5   : > { %v3664_v14 = vadd.f32 %v7291_v37, %v3663_v46 }
 0xfd6   : > { %v3704_v45 = vadd.f32 %v7293_v31, %v3703_v47 }
 0xfd7   : > { %v3668_v58 = vsel %vm3667_vm9, %v7291_v37, %v3664_v14  ;;  %v3682_v37 = vld [vmem:[%s11015_s0 + $0x1d8] sm:$0xff] }
 0xfd8   : > { %v3673_v39 = vsel %vm3670_vm1, %v3672_v3, %v3668_v58  ;;  %v9659_v1 = vsel %vm3705_vm10, %v7293_v31, %v3704_v45  ;;  %3811 = vmatpush.msrb.mxu3 %v3682_v37 }
 0xfd9   : > { %v3674_v57 = vmul.f32 %v3673_v39, %v3632_v50 }
 0xfda   : > { %3812 = vmatpush.msrb.mxu3 %v3681_v43 }
 0xfdb   : > { %v3695_v49 = vsel %vm639_vm5, %v3674_v57, 0.0 }
 0xfdc   : > { %3696 = vadd.xlane.f32.xlu2 %v3695_v49  ;;  %3813 = vmatpush.msrb.mxu3 %v3680_v15  ;;  %v3857_v15 = vpop.f32.mrf.mxu1 }
 0xfde   : > { %3814 = vmatpush.msrb.mxu3 %v3679_v25 }
 0xff2   : > { %v3689_v23 = vpop.xlane.xlu0 %3688 }
0x1047   : > { %v3694_v32 = vpop.xlane.xlu1 %3693 }
0x1048   : > { %v3698_v21 = vadd.f32 %v3694_v32, %v3686_v12 }
0x104a   : > { %v3707_v62 = vmul.f32 %v9659_v1, %v3698_v21 }
0x104c   : > { %v3709_v38 = vsub.f32 %v8992_v18, %v3707_v62  ;;  %v3721_v41 = vsub.f32 %v3659_v36, %v3707_v62 }
0x104e   : > { %v3711_v22 = vmul.f32 %v3709_v38, %v3709_v38  ;;  %v3723_v4 = vmul.f32 %v3721_v41, %v3721_v41 }
0x104f   : > { %v3697_v7 = vpop.xlane.xlu2 %3696 }
0x1050   : > { %v3699_v63 = vadd.f32 %v3697_v7, %v3689_v23  ;;  %v3713_v19 = vsel %vm639_vm5, %v3711_v22, 0.0  ;;  %v3725_v10 = vsel %vm639_vm5, %v3723_v4, 0.0 }
0x1051   : > { %3714 = vadd.xlane.f32.xlu1 %v3713_v19  ;;  %3726 = vadd.xlane.f32.xlu2 %v3725_v10  ;;  %v3827_v10 = vld [vmem:[%s11016_s1 + $0x48] sm:$0xff] }
0x1052   : > { %v3708_v56 = vmul.f32 %v9659_v1, %v3699_v63 }
0x1054   : > { %v3722_v20 = vsub.f32 %v3674_v57, %v3708_v56  ;;  %v3710_v2 = vsub.f32 %v8990_v17, %v3708_v56  ;;  %v3677_v17 = vld [vmem:[%s11015_s0 + $0x1b0] sm:$0xff]  ;;  %v3826_v56 = vld [vmem:[%s11016_s1 + $0x40] sm:$0xff] }
0x1055   : > { %3778 = vmatpush.msrb.mxu2 %v3677_v17 }
0x1056   : > { %v3724_v59 = vmul.f32 %v3722_v20, %v3722_v20  ;;  %v3712_v11 = vmul.f32 %v3710_v2, %v3710_v2 }
0x1057   : > { %3779 = vmatpush.msrb.mxu2 %v3676_v5 }
0x1058   : > { %v3728_v18 = vsel %vm639_vm5, %v3724_v59, 0.0  ;;  %v3716_v55 = vsel %vm639_vm5, %v3712_v11, 0.0 }
0x1059   : > { %3729 = vadd.xlane.f32.xlu2 %v3728_v18  ;;  %3717 = vadd.xlane.f32.xlu1 %v3716_v55 }
0x105a   : > { %3780 = vmatpush.msrb.mxu2 %v3675_v8 }
0x10c4   : > { %v3715_v60 = vpop.xlane.xlu1 %3714  ;;  %v3727_v36 = vpop.xlane.xlu2 %3726 }
0x10c5   : > { %v3731_v61 = vadd.f32 %v3727_v36, %v3715_v60  ;;  %v3860_v60 = vpop.f32.mrf.mxu1 }
0x10c7   : > { %v3733_v16 = vmul.f32 %v3731_v61, %v9659_v1 }
0x10c9   : > { %v3735_v46 = vadd.f32 1e-05, %v3733_v16 }
0x10cb   : > { %7294 = vrsqrt.f32 %v3735_v46  ;;  %vm3743_vm15 = vweird.f32 %v3735_v46 }
0x10cc   : > { %v3718_v3 = vpop.xlane.xlu1 %3717  ;;  %v3730_v14 = vpop.xlane.xlu2 %3729 }
0x10cd   : > { %v3732_v50 = vadd.f32 %v3730_v14, %v3718_v3 }
0x10cf   : > { %v3734_v58 = vmul.f32 %v3732_v50, %v9659_v1 }
0x10d1   : > { %v7295_v39 = vpop.eup %7294  ;;  %v3736_v57 = vadd.f32 1e-05, %v3734_v58 }
0x10d2   : > { %v3738_v49 = vmul.f32 %v7295_v39, %v3735_v46  ;;  %vm3744_vm11 = vweird.f32 %v7295_v39 }
0x10d3   : > { %7296 = vrsqrt.f32 %v3736_v57  ;;  %vm3745_vm2 = vmor %vm3743_vm15, %vm3744_vm11  ;;  %vm3753_vm14 = vweird.f32 %v3736_v57 }
0x10d4   : > { %v3739_v28 = vmul.f32 %v7295_v39, %v3738_v49 }
0x10d6   : > { %v3740_v31 = vmul.f32 0.5, %v3739_v28 }
0x10d8   : > { %v3741_v9 = vsub.f32 1.5, %v3740_v31 }
0x10d9   : > { %v7297_v40 = vpop.eup %7296 }
0x10da   : > { %v3742_v47 = vmul.f32 %v7295_v39, %v3741_v9  ;;  %v3748_v45 = vmul.f32 %v7297_v40, %v3736_v57  ;;  %vm3754_vm3 = vweird.f32 %v7297_v40 }
0x10db   : > { %vm3755_vm13 = vmor %vm3753_vm14, %vm3754_vm3 }
0x10dc   : > { %v3746_v12 = vsel %vm3745_vm2, %v7295_v39, %v3742_v47  ;;  %v3749_v32 = vmul.f32 %v7297_v40, %v3748_v45 }
0x10dd   : > { %v3757_v21 = vmul.f32 %v3746_v12, %v3709_v38  ;;  %v3791_v62 = vmul.f32 %v3746_v12, %v3721_v41  ;;  %v3829_v38 = vld [vmem:[%s11016_s1 + $0x58] sm:$0xff]  ;;  %v3828_v41 = vld [vmem:[%s11016_s1 + $0x50] sm:$0xff] }
0x10de   : > { %v3750_v22 = vmul.f32 0.5, %v3749_v32  ;;  %3881 = vmatpush.msrb.mxu0 %v3829_v38 }
0x10df   : > { %6859 = vmatmul.msk.f32.vlgmr.msrb.gmra.mxu2 %vm639_vm5, %v3757_v21  ;;  %6861 = vmatmul.msk.f32.vlgmr.msrb.gmra.mxu3 %vm639_vm5, %v3791_v62 }
0x10e0   : > { %v3751_v4 = vsub.f32 1.5, %v3750_v22  ;;  %3882 = vmatpush.msrb.mxu0 %v3828_v41 }
0x10e2   : > { %v3752_v23 = vmul.f32 %v7297_v40, %v3751_v4  ;;  %3883 = vmatpush.msrb.mxu0 %v3827_v10 }
0x10e4   : > { %v3756_v7 = vsel %vm3755_vm13, %v7297_v40, %v3752_v23  ;;  %3884 = vmatpush.msrb.mxu0 %v3826_v56 }
0x10e5   : > { %v3758_v63 = vmul.f32 %v3756_v7, %v3710_v2  ;;  %v3792_v19 = vmul.f32 %v3756_v7, %v3722_v20  ;;  %v7112_v20 = vld [vmem:[%s11015_s0 + $0x1e0] ss:$0 sm:$0xff] }
0x10e7   : > { %6860 = vmatmul.msk.f32.gmra.mxu2 %vm639_vm5, %v3758_v63  ;;  %6862 = vmatmul.msk.f32.gmra.mxu3 %vm639_vm5, %v3792_v19 }
0x1162   : > { %v3782_v2 = vpop.f32.mrf.mxu2  ;;  %v3816_v59 = vpop.f32.mrf.mxu3 }
0x1163   : > { %v3789_v11 = vadd.f32 %v7112_v20, %v3782_v2 }
0x1165   : > { %v3822_v18 = vadd.f32 %v3816_v59, %v3789_v11 }
0x1167   : > { %v3824_v55 = vmax.f32 %v3822_v18, 0.0 }
0x1169   : > { %6865 = vmatmul.msk.f32.vlgmr.msrb.gmra.mxu0 %vm639_vm5, %v3824_v55 }
0x116a   : > { %v3785_v30 = vpop.f32.mrf.mxu2  ;;  %v3819_v17 = vpop.f32.mrf.mxu3 }
0x116b   : > { %v3790_v37 = vadd.f32 %v7112_v20, %v3785_v30 }
0x116d   : > { %v3823_v43 = vadd.f32 %v3819_v17, %v3790_v37 }
0x116f   : > { %v3825_v5 = vmax.f32 %v3823_v43, 0.0 }
0x1171   : > { %6866 = vmatmul.msk.f32.gmra.mxu0 %vm639_vm5, %v3825_v5 }
0x11e6   : > { %v3886_v8 = vpop.f32.mrf.mxu0 }
0x11e7   : > { %v3887_v25 = vadd.f32 %v3886_v8, %v3857_v15 }
0x11e9   : > { %7298 = vtanh.f32 %v3887_v25  ;;  %v6867_v3 = vmul.f32 -1.442695, %v3887_v25 }
0x11ee   : > { %v3889_v36 = vpop.f32.mrf.mxu0 }
0x11ef   : > { %v7299_v61 = vpop.eup %7298  ;;  %v3890_v16 = vadd.f32 %v3889_v36, %v3860_v60 }
0x11f0   : > { %3936 = vrot.lane.b32.xlu1 %v7299_v61, %s7574_s19 }
0x11f1   : > { %7300 = vtanh.f32 %v3890_v16  ;;  %v6868_v14 = vmul.f32 -1.442695, %v3890_v16 }
0x11f2   : > { %7302 = vpow2.f32 %v6867_v3 }
0x11f3   : > { %7304 = vpow2.f32 %v6868_v14 }
0x11f7   : > { %v7301_v46 = vpop.eup %7300 }
0x11f8   : > { %3938 = vrot.lane.b32.xlu0 %v7301_v46, %s7574_s19  ;;  %v7303_v50 = vpop.eup %7302 }
0x11f9   : > { %v3898_v58 = vadd.f32 1.0, %v7303_v50  ;;  %v7305_v39 = vpop.eup %7304 }
0x11fa   : > { %v3899_v57 = vadd.f32 1.0, %v7305_v39 }
0x11fb   : > { %7306 = vrcp.f32 %v3898_v58  ;;  %v3911_v32 = vand.u32 2147483648, %v3898_v58  ;;  %vm3905_vm6 = vweird.f32 %v3898_v58  ;;  %v3909_v21 = vand.u32 2147483647, %v3898_v58 }
0x11fc   : > { %7308 = vrcp.f32 %v3899_v57  ;;  %v3926_v38 = vand.u32 2147483648, %v3899_v57  ;;  %vm3920_vm1 = vweird.f32 %v3899_v57  ;;  %v3924_v41 = vand.u32 2147483647, %v3899_v57 }
0x11fd   : > { %v3912_v4 = vor.u32 1.1754944e-38, %v3911_v32  ;;  %vm3910_vm8 = vcmp.eq.f32.partialorder %v3909_v21, 8.507059e+37 }
0x11fe   : > { %v3927_v56 = vor.u32 1.1754944e-38, %v3926_v38  ;;  %vm3925_vm11 = vcmp.eq.f32.partialorder %v3924_v41, 8.507059e+37  ;;  %v7478_v38 = vld [vmem:[%s11017_s2 + $0x20] sm:$0xff] }
0x11ff   : > { %v7479_v41 = vld [vmem:[%s11017_s2 + $0x60] sm:$0xff] }
0x1201   : > { %v7307_v49 = vpop.eup %7306 }
0x1202   : > { %v3901_v28 = vmul.f32 %v7307_v49, %v3898_v58  ;;  %v7309_v9 = vpop.eup %7308  ;;  %vm3906_vm4 = vweird.f32 %v7307_v49 }
0x1203   : > { %v3916_v47 = vmul.f32 %v7309_v9, %v3899_v57  ;;  %vm3907_vm7 = vmor %vm3905_vm6, %vm3906_vm4  ;;  %vm3921_vm9 = vweird.f32 %v7309_v9 }
0x1204   : > { %v3902_v31 = vsub.f32 1.0, %v3901_v28  ;;  %vm3922_vm10 = vmor %vm3920_vm1, %vm3921_vm9  ;;  %v7471_v28 = vld [vmem:[%s11017_s2 + $0x40] sm:$0xff] }
0x1205   : > { %v3917_v12 = vsub.f32 1.0, %v3916_v47  ;;  %v7473_v47 = vld [vmem:[%s11017_s2 + $0x48] sm:$0xff] }
0x1206   : > { %v3903_v40 = vmul.f32 %v7307_v49, %v3902_v31 }
0x1207   : > { %v3918_v22 = vmul.f32 %v7309_v9, %v3917_v12  ;;  %v7475_v12 = vld [vmem:[%s11017_s2 + $0x50] sm:$0xff] }
0x1208   : > { %v3904_v45 = vadd.f32 %v7307_v49, %v3903_v40  ;;  %v7472_v40 = vld [vmem:[%s11017_s2 + $0x8] sm:$0xff] }
0x1209   : > { %v3919_v19 = vadd.f32 %v7309_v9, %v3918_v22  ;;  %v7477_v22 = vld [vmem:[%s11017_s2 + $0x58] sm:$0xff] }
0x120a   : > { %v3908_v62 = vsel %vm3907_vm7, %v7307_v49, %v3904_v45  ;;  %v7470_v49 = vld [vmem:[%s11017_s2] sm:$0xff]  ;;  %v7474_v45 = vld [vmem:[%s11017_s2 + $0x10] sm:$0xff] }
0x120b   : > { %v3913_v7 = vsel %vm3910_vm8, %v3912_v4, %v3908_v62  ;;  %v3923_v10 = vsel %vm3922_vm10, %v7309_v9, %v3919_v19  ;;  %v7476_v62 = vld [vmem:[%s11017_s2 + $0x18] sm:$0xff]  ;;  %v4765_v19 = vld [vmem:[%s11016_s1 + $0xa0] sm:$0xff] }
0x120c   : > { %v3928_v2 = vsel %vm3925_vm11, %v3927_v56, %v3923_v10  ;;  %v3932_v37 = vmul.f32 0.0, %v3913_v7 }
0x120d   : > { %v3933_v11 = vmul.f32 0.0, %v3928_v2 }
0x1262   : > { %v3937_v23 = vpop.permute.xlu1 %3936 }
0x1263   : > { %v3942_v63 = vmul.f32 %v3937_v23, %v3913_v7  ;;  %v4768_v23 = vld [vmem:[%s11016_s1 + $0xb8] sm:$0xff] }
0x1265   : > { %3946 = vrot.lane.b32.xlu0 %v3942_v63, %s7575_s20  ;;  %v4766_v63 = vld [vmem:[%s11016_s1 + $0xa8] sm:$0xff] }
0x126a   : > { %v3939_v20 = vpop.permute.xlu0 %3938 }
0x126b   : > { %v3943_v59 = vmul.f32 %v3939_v20, %v3928_v2  ;;  %v7480_v20 = vld [vmem:[%s11017_s2 + $0x28] sm:$0xff] }
0x126d   : > { %3948 = vrot.lane.b32.xlu2 %v3943_v59, %s7575_s20 }
0x12c7   : > { %v3949_v18 = vpop.permute.xlu2 %3948 }
0x12c8   : > { %v9720_v55 = vadd.f32 %v3949_v18, %v3933_v11  ;;  %v7482_v11 = vld [vmem:[%s11017_s2 + $0x30] sm:$0xff] }
0x12c9   : > { %v7483_v18 = vld [vmem:[%s11017_s2 + $0x70] sm:$0xff] }
0x12ca   : > { %7310 = vtanh.f32 %v9720_v55 }
0x12d0   : > { %v7311_v30 = vpop.eup %7310 }
0x12d1   : > { %3960 = vrot.lane.b32.xlu0 %v7311_v30, %s7574_s19 }
0x12d7   : > { %v3947_v17 = vpop.permute.xlu0 %3946 }
0x12d8   : > { %v9724_v43 = vadd.f32 %v3947_v17, %v3932_v37  ;;  %v7484_v37 = vld [vmem:[%s11017_s2 + $0x38] sm:$0xff] }
0x12d9   : > { %v7485_v17 = vld [vmem:[%s11017_s2 + $0x78] sm:$0xff] }
0x12da   : > { %7312 = vtanh.f32 %v9724_v43 }
0x12e0   : > { %v7313_v5 = vpop.eup %7312 }
0x12e1   : > { %3958 = vrot.lane.b32.xlu1 %v7313_v5, %s7574_s19 }
0x12e9   : > { %4109 = vrot.lane.b32.xlu1 %v9584_v24, %s7575_s20 }
0x12f1   : > { %4115 = vrot.lane.b32.xlu1 %v9599_v48, %s7575_s20 }
0x12f9   : > { %4119 = vrot.lane.b32.xlu1 %v9602_v13, %s7575_s20 }
0x1301   : > { %4123 = vrot.lane.b32.xlu1 %v9617_v51, %s7575_s20 }
0x1343   : > { %v3961_v15 = vpop.permute.xlu0 %3960 }
0x1344   : > { %v9736_v8 = vmul.f32 %v3961_v15, %v3928_v2  ;;  %v7481_v2 = vld [vmem:[%s11017_s2 + $0x68] sm:$0xff] }
0x1346   : > { %3978 = vrot.lane.b32.xlu2 %v9736_v8, %s7575_s20 }
0x134e   : > { %4111 = vrot.lane.b32.xlu2 %v9587_v35, %s7575_s20 }
0x1353   : > { %v3959_v25 = vpop.permute.xlu1 %3958 }
0x1354   : > { %v9742_v60 = vmul.f32 %v3959_v25, %v3913_v7  ;;  %v4767_v7 = vld [vmem:[%s11016_s1 + $0xb0] sm:$0xff] }
0x1356   : > { %3976 = vrot.lane.b32.xlu0 %v9742_v60, %s7575_s20  ;;  %4117 = vrot.lane.b32.xlu2 %v9605_v52, %s7575_s20 }
0x135b   : > { %v9748_v36 = vpop.permute.xlu1 %4109 }
0x135c   : > { %v4133_v14 = vsel %vm639_vm5, %v9748_v36, 0.0 }
0x135e   : > { %4113 = vrot.lane.b32.xlu0 %v9590_v6, %s7575_s20 }
0x1363   : > { %v9752_v61 = vpop.permute.xlu1 %4115 }
0x1364   : > { %v4142_v32 = vsel %vm639_vm5, %v9752_v61, 0.0 }
0x136b   : > { %v9754_v16 = vpop.permute.xlu1 %4119 }
0x136c   : > { %v4148_v10 = vsel %vm639_vm5, %v9754_v16, 0.0 }
0x1373   : > { %v9756_v46 = vpop.permute.xlu1 %4123 }
0x1374   : > { %v4154_v3 = vsel %vm639_vm5, %v9756_v46, 0.0 }
0x1375   : > { %4155 = vadd.xlane.f32.xlu1 %v4154_v3 }
0x137f   : > { %4134 = vadd.xlane.f32.xlu2 %v4133_v14 }
0x1397   : > { %4121 = vrot.lane.b32.xlu2 %v9614_v42, %s7575_s20 }
0x13a0   : > { %v9764_v50 = vpop.permute.xlu2 %3978 }
0x13a1   : > { %3996 = vmatpush.msra.mxu2 %v9764_v50  ;;  %4037 = vmatpush.msra.mxu3 %v9764_v50 }
0x13a8   : > { %v4112_v58 = vpop.permute.xlu2 %4111 }
0x13a9   : > { %v4136_v39 = vsel %vm639_vm5, %v4112_v58, 0.0 }
0x13aa   : > { %4137 = vadd.xlane.f32.xlu0 %v4136_v39 }
0x13b0   : > { %v4118_v21 = vpop.permute.xlu2 %4117 }
0x13b1   : > { %v4145_v4 = vsel %vm639_vm5, %v4118_v21, 0.0 }
0x13c8   : > { %v9769_v57 = vpop.permute.xlu0 %3976 }
0x13c9   : > { %3997 = vmatpush.msra.mxu2 %v9769_v57  ;;  %4038 = vmatpush.msra.mxu3 %v9769_v57 }
0x13ca   : > { %6869 = vmatmul.msk.f32.vlgmr.msra.gmra.mxu2 %vm742_vm0, %v7470_v49  ;;  %6877 = vmatmul.msk.f32.vlgmr.msra.gmra.mxu3 %vm742_vm0, %v7471_v28 }
0x13cb   : > { %4797 = vmatpush.msrb.mxu3 %v4768_v23 }
0x13cd   : > { %4798 = vmatpush.msrb.mxu3 %v4767_v7 }
0x13cf   : > { %4799 = vmatpush.msrb.mxu3 %v4766_v63 }
0x13d0   : > { %v4114_v31 = vpop.permute.xlu0 %4113 }
0x13d1   : > { %v4139_v9 = vsel %vm639_vm5, %v4114_v31, 0.0  ;;  %4800 = vmatpush.msrb.mxu3 %v4765_v19 }
0x13d2   : > { %6870 = vmatmul.msk.f32.gmra.mxu2 %vm742_vm0, %v7472_v40  ;;  %6878 = vmatmul.msk.f32.gmra.mxu3 %vm742_vm0, %v7473_v47 }
0x13d3   : > { %4140 = vadd.xlane.f32.xlu0 %v4139_v9 }
0x13da   : > { %6871 = vmatmul.msk.f32.gmra.mxu2 %vm742_vm0, %v7474_v45  ;;  %6879 = vmatmul.msk.f32.gmra.mxu3 %vm742_vm0, %v7475_v12 }
0x13db   : > { %4143 = vadd.xlane.f32.xlu0 %v4142_v32 }
0x13e2   : > { %6872 = vmatmul.msk.f32.gmra.mxu2 %vm742_vm0, %v7476_v62  ;;  %6880 = vmatmul.msk.f32.gmra.mxu3 %vm742_vm0, %v7477_v22 }
0x13e3   : > { %4146 = vadd.xlane.f32.xlu0 %v4145_v4 }
0x13ea   : > { %6873 = vmatmul.msk.f32.gmra.mxu2 %vm742_vm0, %v7478_v38  ;;  %6881 = vmatmul.msk.f32.gmra.mxu3 %vm742_vm0, %v7479_v41 }
0x13eb   : > { %4149 = vadd.xlane.f32.xlu0 %v4148_v10 }
0x13f2   : > { %v9831_v56 = vpop.xlane.xlu2 %4134  ;;  %6874 = vmatmul.msk.f32.gmra.mxu2 %vm742_vm0, %v7480_v20  ;;  %6882 = vmatmul.msk.f32.gmra.mxu3 %vm742_vm0, %v7481_v2 }
0x13fa   : > { %v4122_v59 = vpop.permute.xlu2 %4121  ;;  %6875 = vmatmul.msk.f32.gmra.mxu2 %vm742_vm0, %v7482_v11  ;;  %6883 = vmatmul.msk.f32.gmra.mxu3 %vm742_vm0, %v7483_v18 }
0x13fb   : > { %v4151_v30 = vsel %vm639_vm5, %v4122_v59, 0.0 }
0x13fc   : > { %4152 = vadd.xlane.f32.xlu2 %v4151_v30  ;;  %v9931_v30 = vpop.xlane.xlu1 %4155 }
0x1402   : > { %6876 = vmatmul.msk.f32.gmra.mxu2 %vm742_vm0, %v7484_v37  ;;  %6884 = vmatmul.msk.f32.gmra.mxu3 %vm742_vm0, %v7485_v17 }
0x140a   : > { %6909 = vmatmul.msk.f32.vlgmr.msrb.gmra.mxu3 %vm639_vm5, %v9748_v36 }
0x1412   : > { %6910 = vmatmul.msk.f32.gmra.mxu3 %vm639_vm5, %v4112_v58 }
0x141a   : > { %6911 = vmatmul.msk.f32.gmra.mxu3 %vm639_vm5, %v4114_v31 }
0x141d   : > { %v4138_v2 = vpop.xlane.xlu0 %4137 }
0x1422   : > { %6912 = vmatmul.msk.f32.gmra.mxu3 %vm639_vm5, %v9752_v61 }
0x142a   : > { %6913 = vmatmul.msk.f32.gmra.mxu3 %vm639_vm5, %v4118_v21 }
0x1432   : > { %6914 = vmatmul.msk.f32.gmra.mxu3 %vm639_vm5, %v9754_v16 }
0x143a   : > { %6915 = vmatmul.msk.f32.gmra.mxu3 %vm639_vm5, %v4122_v59 }
0x1442   : > { %6916 = vmatmul.msk.f32.gmra.mxu3 %vm639_vm5, %v9756_v46 }
0x1446   : > { %v4141_v59 = vpop.xlane.xlu0 %4140 }
0x144d   : > { %v9870_v5 = vpop.f32.mrf.mxu2  ;;  %v4040_v15 = vpop.f32.mrf.mxu3 }
0x144e   : > { %v4069_v25 = vsel %vm639_vm5, %v9870_v5, 0.0  ;;  %v4165_v36 = vsel %vm639_vm5, %v4040_v15, 0.0  ;;  %v4144_v11 = vpop.xlane.xlu0 %4143 }
0x144f   : > { %4070 = vadd.xlane.f32.xlu0 %v4069_v25  ;;  %4166 = vadd.xlane.f32.xlu1 %v4165_v36 }
0x1455   : > { %v9875_v61 = vpop.f32.mrf.mxu2  ;;  %v9877_v3 = vpop.f32.mrf.mxu3 }
0x1456   : > { %v4072_v16 = vsel %vm639_vm5, %v9875_v61, 0.0  ;;  %v4168_v46 = vsel %vm639_vm5, %v9877_v3, 0.0  ;;  %v4147_v18 = vpop.xlane.xlu0 %4146 }
0x1457   : > { %4073 = vadd.xlane.f32.xlu0 %v4072_v16  ;;  %4169 = vadd.xlane.f32.xlu1 %v4168_v46 }
0x145d   : > { %v9883_v14 = vpop.f32.mrf.mxu2  ;;  %v9885_v58 = vpop.f32.mrf.mxu3 }
0x145e   : > { %v4075_v39 = vsel %vm639_vm5, %v9883_v14, 0.0  ;;  %v4171_v49 = vsel %vm639_vm5, %v9885_v58, 0.0  ;;  %v4150_v37 = vpop.xlane.xlu0 %4149 }
0x145f   : > { %4076 = vadd.xlane.f32.xlu0 %v4075_v39  ;;  %4172 = vadd.xlane.f32.xlu2 %v4171_v49 }
0x1465   : > { %v9891_v28 = vpop.f32.mrf.mxu2  ;;  %v9893_v31 = vpop.f32.mrf.mxu3 }
0x1466   : > { %v4078_v9 = vsel %vm639_vm5, %v9891_v28, 0.0  ;;  %v4174_v40 = vsel %vm639_vm5, %v9893_v31, 0.0 }
0x1467   : > { %4079 = vadd.xlane.f32.xlu0 %v4078_v9  ;;  %4175 = vadd.xlane.f32.xlu1 %v4174_v40 }
0x146d   : > { %v9899_v47 = vpop.f32.mrf.mxu2  ;;  %v9901_v45 = vpop.f32.mrf.mxu3 }
0x146e   : > { %v4081_v12 = vsel %vm639_vm5, %v9899_v47, 0.0  ;;  %v4177_v32 = vsel %vm639_vm5, %v9901_v45, 0.0 }
0x146f   : > { %4082 = vadd.xlane.f32.xlu0 %v4081_v12  ;;  %v9940_v9 = vpop.xlane.xlu2 %4152 }
0x1475   : > { %v9907_v21 = vpop.f32.mrf.mxu2  ;;  %v9909_v62 = vpop.f32.mrf.mxu3 }
0x1476   : > { %v4084_v22 = vsel %vm639_vm5, %v9907_v21, 0.0  ;;  %v4180_v4 = vsel %vm639_vm5, %v9909_v62, 0.0 }
0x1477   : > { %4085 = vadd.xlane.f32.xlu2 %v4084_v22  ;;  %4178 = vadd.xlane.f32.xlu0 %v4177_v32 }
0x147d   : > { %v9915_v23 = vpop.f32.mrf.mxu2  ;;  %v9917_v7 = vpop.f32.mrf.mxu3 }
0x147e   : > { %v4087_v63 = vsel %vm639_vm5, %v9915_v23, 0.0  ;;  %v4183_v19 = vsel %vm639_vm5, %v9917_v7, 0.0 }
0x147f   : > { %4181 = vadd.xlane.f32.xlu2 %v4180_v4  ;;  %4088 = vadd.xlane.f32.xlu0 %v4087_v63 }
0x1480   : > { %4184 = vadd.xlane.f32.xlu1 %v4183_v19 }
0x1485   : > { %v9923_v38 = vpop.f32.mrf.mxu2  ;;  %v9927_v10 = vpop.f32.mrf.mxu3 }
0x1486   : > { %v4090_v41 = vsel %vm639_vm5, %v9923_v38, 0.0  ;;  %v4186_v20 = vsel %vm639_vm5, %v9927_v10, 0.0 }
0x1487   : > { %4091 = vadd.xlane.f32.xlu2 %v4090_v41 }
0x148f   : > { %4187 = vadd.xlane.f32.xlu2 %v4186_v20 }
0x14c2   : > { %v4071_v17 = vpop.xlane.xlu0 %4070  ;;  %v4167_v25 = vpop.xlane.xlu1 %4166 }
0x14c3   : > { %v4157_v36 = vadd.f32 %v9831_v56, %v4071_v17 }
0x14c5   : > { %v4189_v16 = vadd.f32 %v4167_v25, %v4157_v36 }
0x14c7   : > { %v4197_v46 = vmul.f32 %v4189_v16, %v9170_v26 }
0x14c9   : > { %v9936_v39 = vsub.f32 %v9584_v24, %v4197_v46  ;;  %v9938_v49 = vsub.f32 %v4040_v15, %v4197_v46 }
0x14ca   : > { %v4074_v40 = vpop.xlane.xlu0 %4073  ;;  %v4170_v19 = vpop.xlane.xlu1 %4169 }
0x14cb   : > { %v4261_v12 = vmul.f32 %v9936_v39, %v9936_v39  ;;  %v4341_v32 = vmul.f32 %v9938_v49, %v9938_v49  ;;  %v4158_v63 = vadd.f32 %v4138_v2, %v4074_v40  ;;  %v9966_v40 = vsub.f32 %v9870_v5, %v4197_v46 }
0x14cd   : > { %4277 = vrot.lane.b32.xlu0 %v4261_v12, %s7575_s20  ;;  %v4349_v56 = vsel %vm639_vm5, %v4341_v32, 0.0  ;;  %v4190_v20 = vadd.f32 %v4170_v19, %v4158_v63  ;;  %v4213_v32 = vmul.f32 %v9966_v40, %v9966_v40 }
0x14ce   : > { %4350 = vadd.xlane.f32.xlu1 %v4349_v56 }
0x14cf   : > { %v4198_v36 = vmul.f32 %v4190_v20, %v9170_v26 }
0x14d2   : > { %v4077_v22 = vpop.xlane.xlu0 %4076  ;;  %v4173_v4 = vpop.xlane.xlu2 %4172 }
0x14d3   : > { %v4159_v24 = vadd.f32 %v4141_v59, %v4077_v22  ;;  %v9960_v59 = vsub.f32 %v9587_v35, %v4198_v36 }
0x14d5   : > { %v4191_v15 = vadd.f32 %v4173_v4, %v4159_v24  ;;  %v4262_v2 = vmul.f32 %v9960_v59, %v9960_v59  ;;  %v4221_v4 = vsel %vm639_vm5, %v4213_v32, 0.0  ;;  %v9975_v24 = vsub.f32 %v9875_v61, %v4198_v36 }
0x14d7   : > { %v9949_v41 = vmul.f32 %v4191_v15, %v9170_v26 }
0x14d9   : > { %v9953_v17 = vsub.f32 %v9590_v6, %v9949_v41 }
0x14da   : > { %v4080_v35 = vpop.xlane.xlu0 %4079  ;;  %v4176_v61 = vpop.xlane.xlu1 %4175 }
0x14db   : > { %v4263_v25 = vmul.f32 %v9953_v17, %v9953_v17  ;;  %v4160_v19 = vadd.f32 %v4144_v11, %v4080_v35 }
0x14dd   : > { %4281 = vrot.lane.b32.xlu2 %v4263_v25, %s7575_s20  ;;  %v4192_v20 = vadd.f32 %v4176_v61, %v4160_v19 }
0x14df   : > { %v4200_v25 = vmul.f32 %v4192_v20, %v9170_v26 }
0x14e2   : > { %v4083_v15 = vpop.xlane.xlu0 %4082 }
0x14e7   : > { %4279 = vrot.lane.b32.xlu1 %v4262_v2, %s7575_s20  ;;  %v4161_v2 = vadd.f32 %v4147_v18, %v4083_v15  ;;  %v10002_v18 = vsub.f32 %v9877_v3, %v4198_v36  ;;  %v10019_v36 = vsub.f32 %v9883_v14, %v9949_v41 }
0x14e9   : > { %v4215_v20 = vmul.f32 %v10019_v36, %v10019_v36 }
0x14ea   : > { %v4086_v16 = vpop.xlane.xlu2 %4085 }
0x14eb   : > { %v4162_v6 = vadd.f32 %v4150_v37, %v4086_v16  ;;  %v4214_v37 = vmul.f32 %v9975_v24, %v9975_v24  ;;  %v9989_v16 = vsub.f32 %v9599_v48, %v4200_v25  ;;  %v4342_v48 = vmul.f32 %v10002_v18, %v10002_v18 }
0x14ed   : > { %v4224_v46 = vsel %vm639_vm5, %v4214_v37, 0.0  ;;  %v4264_v32 = vmul.f32 %v9989_v16, %v9989_v16 }
0x14f2   : > { %v4182_v12 = vpop.xlane.xlu2 %4181 }
0x14f3   : > { %v4194_v56 = vadd.f32 %v4182_v12, %v4162_v6 }
0x14f5   : > { %v9971_v22 = vmul.f32 %v4194_v56, %v9170_v26 }
0x14f7   : > { %v9979_v63 = vsub.f32 %v9602_v13, %v9971_v22  ;;  %4222 = vadd.xlane.f32.xlu0 %v4221_v4  ;;  %v4179_v13 = vpop.xlane.xlu0 %4178  ;;  %v4352_v4 = vsel %vm639_vm5, %v4342_v48, 0.0 }
0x14f8   : > { %v4193_v6 = vadd.f32 %v4179_v13, %v4161_v2  ;;  %v4227_v13 = vsel %vm639_vm5, %v4215_v20, 0.0 }
0x14f9   : > { %v4266_v5 = vmul.f32 %v9979_v63, %v9979_v63 }
0x14fa   : > { %v4201_v12 = vmul.f32 %v4193_v6, %v9170_v26  ;;  %v4092_v35 = vpop.xlane.xlu2 %4091  ;;  %v4185_v6 = vpop.xlane.xlu1 %4184 }
0x14fb   : > { %4287 = vrot.lane.b32.xlu1 %v4266_v5, %s7575_s20  ;;  %v4164_v37 = vadd.f32 %v9931_v30, %v4092_v35 }
0x14fc   : > { %v9996_v56 = vsub.f32 %v9605_v52, %v4201_v12  ;;  %v10034_v48 = vsub.f32 %v9899_v47, %v4201_v12 }
0x14fe   : > { %v4265_v11 = vmul.f32 %v9996_v56, %v9996_v56 }
0x14ff   : > { %4225 = vadd.xlane.f32.xlu0 %v4224_v46  ;;  %v4089_v15 = vpop.xlane.xlu0 %4088 }
0x1500   : > { %v4163_v2 = vadd.f32 %v9940_v9, %v4089_v15 }
0x1502   : > { %v4188_v5 = vpop.xlane.xlu2 %4187 }
0x1503   : > { %v4196_v52 = vadd.f32 %v4188_v5, %v4164_v37  ;;  %v10044_v5 = vsub.f32 %v9901_v45, %v4201_v12 }
0x1505   : > { %v10009_v46 = vmul.f32 %v4196_v52, %v9170_v26  ;;  %v4345_v47 = vmul.f32 %v10044_v5, %v10044_v5 }
0x1507   : > { %v10013_v19 = vsub.f32 %v9617_v51, %v10009_v46  ;;  %v10027_v51 = vsub.f32 %v9891_v28, %v4200_v25  ;;  %v4217_v28 = vmul.f32 %v10034_v48, %v10034_v48  ;;  %v4361_v52 = vsel %vm639_vm5, %v4345_v47, 0.0 }
0x1509   : > { %v4268_v3 = vmul.f32 %v10013_v19, %v10013_v19  ;;  %v4216_v14 = vmul.f32 %v10027_v51, %v10027_v51  ;;  %v4233_v9 = vsel %vm639_vm5, %v4217_v28, 0.0 }
0x1513   : > { %4283 = vrot.lane.b32.xlu0 %v4264_v32, %s7575_s20  ;;  %v4195_v32 = vadd.f32 %v4185_v6, %v4163_v2 }
0x1515   : > { %v4203_v35 = vmul.f32 %v4195_v32, %v9170_v26 }
0x1517   : > { %v10053_v15 = vsub.f32 %v9915_v23, %v4203_v35 }
0x1519   : > { %v4219_v45 = vmul.f32 %v10053_v15, %v10053_v15 }
0x151b   : > { %4285 = vrot.lane.b32.xlu0 %v4265_v11, %s7575_s20  ;;  %v4230_v11 = vsel %vm639_vm5, %v4216_v14, 0.0 }
0x1525   : > { %4353 = vadd.xlane.f32.xlu1 %v4352_v4  ;;  %v10040_v4 = vsub.f32 %v9614_v42, %v4203_v35  ;;  %v10056_v42 = vsub.f32 %v9893_v31, %v4200_v25 }
0x1527   : > { %v4267_v37 = vmul.f32 %v10040_v4, %v10040_v4  ;;  %v4344_v12 = vmul.f32 %v10056_v42, %v10056_v42 }
0x1529   : > { %v4358_v23 = vsel %vm639_vm5, %v4344_v12, 0.0 }
0x1537   : > { %v4282_v6 = vpop.permute.xlu2 %4281 }
0x1538   : > { %v4307_v14 = vsel %vm639_vm5, %v4282_v6, 0.0  ;;  %v3973_v6 = vld [vmem:[%s11015_s0 + $0x240] sm:$0xff] }
0x1539   : > { %4700 = vmatpush.msrb.mxu2 %v3973_v6 }
0x153e   : > { %4291 = vrot.lane.b32.xlu1 %v4268_v3, %s7575_s20  ;;  %v4239_v3 = vsel %vm639_vm5, %v4219_v45, 0.0 }
0x153f   : > { %v4278_v61 = vpop.permute.xlu0 %4277 }
0x1540   : > { %v4301_v30 = vsel %vm639_vm5, %v4278_v61, 0.0  ;;  %v10065_v61 = vsub.f32 %v9923_v38, %v10009_v46  ;;  %v10074_v38 = vsub.f32 %v9885_v58, %v9949_v41 }
0x1541   : > { %4302 = vadd.xlane.f32.xlu2 %v4301_v30  ;;  %v4351_v25 = vpop.xlane.xlu1 %4350 }
0x1542   : > { %v4220_v31 = vmul.f32 %v10065_v61, %v10065_v61 }
0x1544   : > { %v4242_v30 = vsel %vm639_vm5, %v4220_v31, 0.0 }
0x1545   : > { %4228 = vadd.xlane.f32.xlu0 %v4227_v13 }
0x154d   : > { %4231 = vadd.xlane.f32.xlu0 %v4230_v11  ;;  %v4343_v11 = vmul.f32 %v10074_v38, %v10074_v38 }
0x154f   : > { %v4355_v28 = vsel %vm639_vm5, %v4343_v11, 0.0  ;;  %v3971_v11 = vld [vmem:[%s11015_s0 + $0x230] sm:$0xff] }
0x1555   : > { %4234 = vadd.xlane.f32.xlu0 %v4233_v9  ;;  %v10084_v9 = vsub.f32 %v9907_v21, %v9971_v22 }
0x1557   : > { %v4218_v58 = vmul.f32 %v10084_v9, %v10084_v9 }
0x1559   : > { %4289 = vrot.lane.b32.xlu2 %v4267_v37, %s7575_s20  ;;  %v4280_v20 = vpop.permute.xlu1 %4279  ;;  %v4236_v47 = vsel %vm639_vm5, %v4218_v58, 0.0 }
0x155a   : > { %v4304_v2 = vsel %vm639_vm5, %v4280_v20, 0.0  ;;  %v10107_v20 = vsub.f32 %v9927_v10, %v10009_v46  ;;  %v3968_v10 = vld [vmem:[%s11015_s0 + $0x1f8] sm:$0xff] }
0x155b   : > { %v3972_v46 = vld [vmem:[%s11015_s0 + $0x238] sm:$0xff] }
0x155c   : > { %4701 = vmatpush.msrb.mxu2 %v3972_v46 }
0x155d   : > { %4362 = vadd.xlane.f32.xlu0 %v4361_v52  ;;  %v10092_v52 = vsub.f32 %v9909_v62, %v9971_v22 }
0x155e   : > { %4702 = vmatpush.msrb.mxu2 %v3971_v11 }
0x155f   : > { %v4346_v21 = vmul.f32 %v10092_v52, %v10092_v52 }
0x1565   : > { %4240 = vadd.xlane.f32.xlu0 %v4239_v3  ;;  %v4364_v3 = vsel %vm639_vm5, %v4346_v21, 0.0 }
0x1568   : > { %4359 = vadd.xlane.f32.xlu1 %v4358_v23  ;;  %v10099_v23 = vsub.f32 %v9917_v7, %v4203_v35  ;;  %v3969_v35 = vld [vmem:[%s11015_s0 + $0x200] sm:$0xff] }
0x1569   : > { %4521 = vmatpush.msrb.mxu1 %v3969_v35 }
0x156a   : > { %v4223_v13 = vpop.xlane.xlu0 %4222 }
0x156b   : > { %4522 = vmatpush.msrb.mxu1 %v3968_v10 }
0x156d   : > { %4243 = vadd.xlane.f32.xlu0 %v4242_v30  ;;  %v4288_v31 = vpop.permute.xlu1 %4287  ;;  %v4347_v30 = vmul.f32 %v10099_v23, %v10099_v23 }
0x156e   : > { %v4316_v62 = vsel %vm639_vm5, %v4288_v31, 0.0 }
0x156f   : > { %v4367_v22 = vsel %vm639_vm5, %v4347_v30, 0.0 }
0x1572   : > { %v10077_v32 = vpop.xlane.xlu0 %4225 }
0x1575   : > { %4305 = vadd.xlane.f32.xlu0 %v4304_v2  ;;  %v4348_v2 = vmul.f32 %v10107_v20, %v10107_v20 }
0x1577   : > { %v4370_v7 = vsel %vm639_vm5, %v4348_v2, 0.0 }
0x157d   : > { %4308 = vadd.xlane.f32.xlu0 %v4307_v14  ;;  %v3967_v14 = vld [vmem:[%s11015_s0 + $0x1f0] sm:$0xff] }
0x157e   : > { %4523 = vmatpush.msrb.mxu1 %v3967_v14 }
0x1582   : > { %4356 = vadd.xlane.f32.xlu2 %v4355_v28  ;;  %v3966_v28 = vld [vmem:[%s11015_s0 + $0x1e8] sm:$0xff] }
0x1583   : > { %4524 = vmatpush.msrb.mxu1 %v3966_v28 }
0x1585   : > { %v4284_v37 = vpop.permute.xlu0 %4283 }
0x1586   : > { %v4310_v41 = vsel %vm639_vm5, %v4284_v37, 0.0  ;;  %v3970_v37 = vld [vmem:[%s11015_s0 + $0x228] sm:$0xff] }
0x1587   : > { %4311 = vadd.xlane.f32.xlu0 %v4310_v41  ;;  %4703 = vmatpush.msrb.mxu2 %v3970_v37 }
0x158a   : > { %4237 = vadd.xlane.f32.xlu2 %v4236_v47 }
0x158d   : > { %v4286_v45 = vpop.permute.xlu0 %4285 }
0x158e   : > { %v4313_v12 = vsel %vm639_vm5, %v4286_v45, 0.0 }
0x158f   : > { %4314 = vadd.xlane.f32.xlu0 %v4313_v12 }
0x1592   : > { %4365 = vadd.xlane.f32.xlu2 %v4364_v3 }
0x1597   : > { %4317 = vadd.xlane.f32.xlu0 %v4316_v62 }
0x1598   : > { %v4354_v12 = vpop.xlane.xlu1 %4353 }
0x159a   : > { %4368 = vadd.xlane.f32.xlu2 %v4367_v22 }
0x15a2   : > { %4371 = vadd.xlane.f32.xlu2 %v4370_v7 }
0x15b0   : > { %v4292_v22 = vpop.permute.xlu1 %4291 }
0x15b1   : > { %v4322_v35 = vsel %vm639_vm5, %v4292_v22, 0.0 }
0x15b4   : > { %v4303_v58 = vpop.xlane.xlu2 %4302 }
0x15b5   : > { %v4325_v41 = vadd.f32 %v4303_v58, %v4223_v13 }
0x15b7   : > { %v4373_v47 = vadd.f32 %v4351_v25, %v4325_v41 }
0x15b8   : > { %v4229_v45 = vpop.xlane.xlu0 %4228 }
0x15b9   : > { %v4381_v21 = vmul.f32 %v4373_v47, %v9170_v26 }
0x15bb   : > { %v4389_v3 = vadd.f32 1e-05, %v4381_v21 }
0x15bc   : > { %v4290_v31 = vpop.permute.xlu2 %4289 }
0x15bd   : > { %7314 = vrsqrt.f32 %v4389_v3  ;;  %v4319_v30 = vsel %vm639_vm5, %v4290_v31, 0.0  ;;  %vm4403_vm2 = vweird.f32 %v4389_v3 }
0x15be   : > { %4320 = vadd.xlane.f32.xlu1 %v4319_v30 }
0x15c0   : > { %v4232_v62 = vpop.xlane.xlu0 %4231 }
0x15c3   : > { %v7315_v2 = vpop.eup %7314 }
0x15c4   : > { %v4398_v7 = vmul.f32 %v7315_v2, %v4389_v3  ;;  %vm4404_vm15 = vweird.f32 %v7315_v2 }
0x15c5   : > { %vm4405_vm3 = vmor %vm4403_vm2, %vm4404_vm15 }
0x15c6   : > { %v4399_v13 = vmul.f32 %v7315_v2, %v4398_v7  ;;  %4323 = vadd.xlane.f32.xlu1 %v4322_v35 }
0x15c8   : > { %v4400_v6 = vmul.f32 0.5, %v4399_v13  ;;  %v4235_v25 = vpop.xlane.xlu0 %4234 }
0x15ca   : > { %v4401_v10 = vsub.f32 1.5, %v4400_v6 }
0x15cc   : > { %v4402_v46 = vmul.f32 %v7315_v2, %v4401_v10 }
0x15ce   : > { %v4406_v14 = vsel %vm4405_vm3, %v7315_v2, %v4402_v46 }
0x15cf   : > { %v4477_v11 = vmul.f32 %v4406_v14, %v9966_v40  ;;  %v4656_v28 = vmul.f32 %v4406_v14, %v9938_v49  ;;  %v4559_v37 = vmul.f32 %v4406_v14, %v9936_v39 }
0x15d0   : > { %v4363_v58 = vpop.xlane.xlu0 %4362 }
0x15d1   : > { %6885 = vmatmul.msk.f32.vlgmr.msrb.gmra.mxu1 %vm639_vm5, %v4477_v11  ;;  %6901 = vmatmul.msk.f32.vlgmr.msrb.gmra.mxu2 %vm639_vm5, %v4656_v28 }
0x15d2   : > { %4575 = vrot.lane.b32.xlu0 %v4559_v37, %s7575_s20 }
0x15d8   : > { %v10145_v41 = vpop.xlane.xlu0 %4240 }
0x15db   : > { %v4360_v11 = vpop.xlane.xlu1 %4359 }
0x15e0   : > { %v10147_v47 = vpop.xlane.xlu0 %4243 }
0x15e8   : > { %v4306_v21 = vpop.xlane.xlu0 %4305 }
0x15e9   : > { %v4326_v3 = vadd.f32 %v4306_v21, %v10077_v32 }
0x15eb   : > { %v4374_v31 = vadd.f32 %v4354_v12, %v4326_v3 }
0x15ed   : > { %v4382_v40 = vmul.f32 %v4374_v31, %v9170_v26 }
0x15ef   : > { %v4390_v49 = vadd.f32 1e-05, %v4382_v40 }
0x15f0   : > { %v4309_v39 = vpop.xlane.xlu0 %4308 }
0x15f1   : > { %7316 = vrsqrt.f32 %v4390_v49  ;;  %v4327_v30 = vadd.f32 %v4309_v39, %v4229_v45  ;;  %vm4413_vm13 = vweird.f32 %v4390_v49 }
0x15f5   : > { %v4357_v22 = vpop.xlane.xlu2 %4356 }
0x15f6   : > { %v4375_v2 = vadd.f32 %v4357_v22, %v4327_v30 }
0x15f7   : > { %v7317_v7 = vpop.eup %7316 }
0x15f8   : > { %v4408_v35 = vmul.f32 %v7317_v7, %v4390_v49  ;;  %v4383_v13 = vmul.f32 %v4375_v2, %v9170_v26  ;;  %vm4414_vm14 = vweird.f32 %v7317_v7 }
0x15f9   : > { %vm4415_vm4 = vmor %vm4413_vm13, %vm4414_vm14 }
0x15fa   : > { %v4409_v6 = vmul.f32 %v7317_v7, %v4408_v35  ;;  %v4391_v10 = vadd.f32 1e-05, %v4383_v13  ;;  %v4312_v46 = vpop.xlane.xlu0 %4311 }
0x15fb   : > { %v4328_v14 = vadd.f32 %v4312_v46, %v4232_v62 }
0x15fc   : > { %v4410_v28 = vmul.f32 0.5, %v4409_v6  ;;  %7318 = vrsqrt.f32 %v4391_v10  ;;  %vm4423_vm7 = vweird.f32 %v4391_v10 }
0x15fd   : > { %v4376_v32 = vadd.f32 %v4360_v11, %v4328_v14  ;;  %v4238_v31 = vpop.xlane.xlu2 %4237 }
0x15fe   : > { %v4411_v12 = vsub.f32 1.5, %v4410_v28 }
0x15ff   : > { %v4384_v37 = vmul.f32 %v4376_v32, %v9170_v26 }
0x1600   : > { %v4412_v45 = vmul.f32 %v7317_v7, %v4411_v12 }
0x1601   : > { %v4392_v21 = vadd.f32 1e-05, %v4384_v37 }
0x1602   : > { %v7319_v3 = vpop.eup %7318  ;;  %v4315_v40 = vpop.xlane.xlu0 %4314  ;;  %v4416_v39 = vsel %vm4415_vm4, %v7317_v7, %v4412_v45 }
0x1603   : > { %v4418_v30 = vmul.f32 %v7319_v3, %v4391_v10  ;;  %7320 = vrsqrt.f32 %v4392_v21  ;;  %v4329_v22 = vadd.f32 %v4315_v40, %v4235_v25  ;;  %v4657_v62 = vmul.f32 %v4416_v39, %v10002_v18 }
0x1604   : > { %v4560_v2 = vmul.f32 %v4416_v39, %v9960_v59  ;;  %v4478_v35 = vmul.f32 %v4416_v39, %v9975_v24  ;;  %vm4424_vm6 = vweird.f32 %v7319_v3  ;;  %vm4433_vm1 = vweird.f32 %v4392_v21 }
0x1605   : > { %v4419_v13 = vmul.f32 %v7319_v3, %v4418_v30  ;;  %v4377_v6 = vadd.f32 %v4363_v58, %v4329_v22  ;;  %6902 = vmatmul.msk.f32.gmra.mxu2 %vm639_vm5, %v4657_v62  ;;  %vm4425_vm8 = vmor %vm4423_vm7, %vm4424_vm6  ;;  %v4366_v28 = vpop.xlane.xlu2 %4365 }
0x1606   : > { %4577 = vrot.lane.b32.xlu1 %v4560_v2, %s7575_s20  ;;  %6886 = vmatmul.msk.f32.gmra.mxu1 %vm639_vm5, %v4478_v35 }
0x1607   : > { %v4420_v49 = vmul.f32 0.5, %v4419_v13  ;;  %v4385_v7 = vmul.f32 %v4377_v6, %v9170_v26 }
0x1609   : > { %v7321_v46 = vpop.eup %7320  ;;  %v4421_v14 = vsub.f32 1.5, %v4420_v49  ;;  %v4393_v18 = vadd.f32 1e-05, %v4385_v7 }
0x160a   : > { %v4428_v25 = vmul.f32 %v7321_v46, %v4392_v21  ;;  %v4318_v11 = vpop.xlane.xlu0 %4317  ;;  %vm4434_vm9 = vweird.f32 %v7321_v46 }
0x160b   : > { %v4422_v59 = vmul.f32 %v7319_v3, %v4421_v14  ;;  %v4330_v24 = vadd.f32 %v4318_v11, %v4238_v31  ;;  %7322 = vrsqrt.f32 %v4393_v18  ;;  %vm4435_vm10 = vmor %vm4433_vm1, %vm4434_vm9  ;;  %vm4443_vm15 = vweird.f32 %v4393_v18 }
0x160c   : > { %v4429_v58 = vmul.f32 %v7321_v46, %v4428_v25 }
0x160d   : > { %v4378_v32 = vadd.f32 %v4366_v28, %v4330_v24  ;;  %v4426_v12 = vsel %vm4425_vm8, %v7319_v3, %v4422_v59  ;;  %v4067_v59 = vld [vmem:[%s11015_s0 + $0x220] sm:$0xff]  ;;  %v4065_v28 = vld [vmem:[%s11015_s0 + $0x210] sm:$0xff] }
0x160e   : > { %v4430_v37 = vmul.f32 0.5, %v4429_v58  ;;  %v4658_v45 = vmul.f32 %v4426_v12, %v10074_v38  ;;  %v4561_v40 = vmul.f32 %v4426_v12, %v9953_v17  ;;  %v4479_v39 = vmul.f32 %v4426_v12, %v10019_v36  ;;  %4619 = vmatpush.msra.mxu0 %v4067_v59  ;;  %v4066_v58 = vld [vmem:[%s11015_s0 + $0x218] sm:$0xff] }
0x160f   : > { %v4386_v30 = vmul.f32 %v4378_v32, %v9170_v26 }
0x1610   : > { %v4431_v22 = vsub.f32 1.5, %v4430_v37  ;;  %6903 = vmatmul.msk.f32.gmra.mxu2 %vm639_vm5, %v4658_v45  ;;  %4579 = vrot.lane.b32.xlu2 %v4561_v40, %s7575_s20  ;;  %v5583_v45 = vld [vmem:[%s11016_s1 + $0xf8] sm:$0xff]  ;;  %v5582_v40 = vld [vmem:[%s11016_s1 + $0xf0] sm:$0xff] }
0x1611   : > { %v4394_v10 = vadd.f32 1e-05, %v4386_v30  ;;  %6887 = vmatmul.msk.f32.gmra.mxu1 %vm639_vm5, %v4479_v39  ;;  %v7323_v31 = vpop.eup %7322  ;;  %4620 = vmatpush.msra.mxu0 %v4066_v58  ;;  %v4762_v58 = vld [vmem:[%s11016_s1 + $0x88] sm:$0xff] }
0x1612   : > { %v4432_v3 = vmul.f32 %v7321_v46, %v4431_v22  ;;  %v4438_v38 = vmul.f32 %v7323_v31, %v4393_v18  ;;  %vm4444_vm11 = vweird.f32 %v7323_v31  ;;  %5600 = vmatpush.msra.mxu2 %v5583_v45  ;;  %v5581_v22 = vld [vmem:[%s11016_s1 + $0xe8] sm:$0xff] }
0x1613   : > { %7324 = vrsqrt.f32 %v4394_v10  ;;  %vm4445_vm2 = vmor %vm4443_vm15, %vm4444_vm11  ;;  %vm4453_vm14 = vweird.f32 %v4394_v10  ;;  %4621 = vmatpush.msra.mxu0 %v4065_v28  ;;  %v4761_v28 = vld [vmem:[%s11016_s1 + $0x80] sm:$0xff] }
0x1614   : > { %v4436_v17 = vsel %vm4435_vm10, %v7321_v46, %v4432_v3  ;;  %v4439_v62 = vmul.f32 %v7323_v31, %v4438_v38  ;;  %5601 = vmatpush.msra.mxu2 %v5582_v40 }
0x1615   : > { %v4562_v36 = vmul.f32 %v4436_v17, %v9989_v16  ;;  %v4480_v2 = vmul.f32 %v4436_v17, %v10027_v51  ;;  %v4659_v35 = vmul.f32 %v4436_v17, %v10056_v42 }
0x1616   : > { %v4440_v13 = vmul.f32 0.5, %v4439_v62  ;;  %5602 = vmatpush.msra.mxu2 %v5581_v22 }
0x1617   : > { %4581 = vrot.lane.b32.xlu0 %v4562_v36, %s7575_s20 }
0x1618   : > { %6904 = vmatmul.msk.f32.gmra.mxu2 %vm639_vm5, %v4659_v35  ;;  %v4441_v49 = vsub.f32 1.5, %v4440_v13 }
0x1619   : > { %v7325_v6 = vpop.eup %7324  ;;  %6888 = vmatmul.msk.f32.gmra.mxu1 %vm639_vm5, %v4480_v2 }
0x161a   : > { %v4448_v21 = vmul.f32 %v7325_v6, %v4394_v10  ;;  %v4442_v7 = vmul.f32 %v7323_v31, %v4441_v49  ;;  %vm4454_vm3 = vweird.f32 %v7325_v6 }
0x161b   : > { %vm4455_vm13 = vmor %vm4453_vm14, %vm4454_vm3 }
0x161c   : > { %v4449_v46 = vmul.f32 %v7325_v6, %v4448_v21  ;;  %v4446_v16 = vsel %vm4445_vm2, %v7323_v31, %v4442_v7  ;;  %v5580_v31 = vld [vmem:[%s11016_s1 + $0xe0] sm:$0xff] }
0x161d   : > { %v4563_v51 = vmul.f32 %v4446_v16, %v9996_v56  ;;  %v4481_v42 = vmul.f32 %v4446_v16, %v10034_v48  ;;  %v4660_v25 = vmul.f32 %v4446_v16, %v10044_v5  ;;  %5603 = vmatpush.msra.mxu2 %v5580_v31 }
0x161e   : > { %v4450_v14 = vmul.f32 0.5, %v4449_v46 }
0x161f   : > { %4583 = vrot.lane.b32.xlu0 %v4563_v51, %s7575_s20 }
0x1620   : > { %v4451_v11 = vsub.f32 1.5, %v4450_v14  ;;  %6905 = vmatmul.msk.f32.gmra.mxu2 %vm639_vm5, %v4660_v25 }
0x1621   : > { %6889 = vmatmul.msk.f32.gmra.mxu1 %vm639_vm5, %v4481_v42 }
0x1622   : > { %v4452_v18 = vmul.f32 %v7325_v6, %v4451_v11 }
0x1624   : > { %v4456_v56 = vsel %vm4455_vm13, %v7325_v6, %v4452_v18 }
0x1625   : > { %v4564_v48 = vmul.f32 %v4456_v56, %v9979_v63  ;;  %v4482_v5 = vmul.f32 %v4456_v56, %v10084_v9  ;;  %v4661_v24 = vmul.f32 %v4456_v56, %v10092_v52  ;;  %v4064_v63 = vld [vmem:[%s11015_s0 + $0x208] sm:$0xff]  ;;  %v4369_v9 = vpop.xlane.xlu2 %4368 }
0x1626   : > { %4622 = vmatpush.msra.mxu0 %v4064_v63  ;;  %v10251_v63 = vld [vmem:[%s11015_s0 + $0x248] ss:$0 sm:$0xff] }
0x1627   : > { %4585 = vrot.lane.b32.xlu1 %v4564_v48, %s7575_s20 }
0x1628   : > { %6906 = vmatmul.msk.f32.gmra.mxu2 %vm639_vm5, %v4661_v24  ;;  %v4763_v24 = vld [vmem:[%s11016_s1 + $0x90] sm:$0xff] }
0x1629   : > { %6890 = vmatmul.msk.f32.gmra.mxu1 %vm639_vm5, %v4482_v5  ;;  %v4764_v5 = vld [vmem:[%s11016_s1 + $0x98] sm:$0xff] }
0x162a   : > { %4862 = vmatpush.msra.mxu1 %v4764_v5 }
0x162c   : > { %4863 = vmatpush.msra.mxu1 %v4763_v24 }
0x162d   : > { %v4372_v10 = vpop.xlane.xlu2 %4371 }
0x162e   : > { %4864 = vmatpush.msra.mxu1 %v4762_v58 }
0x1630   : > { %4865 = vmatpush.msra.mxu1 %v4761_v28 }
0x1631   : > { %v4321_v52 = vpop.xlane.xlu1 %4320 }
0x1632   : > { %v4331_v32 = vadd.f32 %v4321_v52, %v10145_v41 }
0x1634   : > { %v4379_v12 = vadd.f32 %v4369_v9, %v4331_v32 }
0x1636   : > { %v4387_v37 = vmul.f32 %v4379_v12, %v9170_v26 }
0x1638   : > { %v4395_v39 = vadd.f32 1e-05, %v4387_v37 }
0x1639   : > { %v4324_v30 = vpop.xlane.xlu1 %4323 }
0x163a   : > { %7326 = vrsqrt.f32 %v4395_v39  ;;  %v4332_v41 = vadd.f32 %v4324_v30, %v10147_v47  ;;  %vm4463_vm6 = vweird.f32 %v4395_v39 }
0x163c   : > { %v4380_v3 = vadd.f32 %v4372_v10, %v4332_v41 }
0x163e   : > { %v4388_v38 = vmul.f32 %v4380_v3, %v9170_v26 }
0x1640   : > { %v7327_v17 = vpop.eup %7326  ;;  %v4396_v62 = vadd.f32 1e-05, %v4388_v38 }
0x1641   : > { %v4458_v36 = vmul.f32 %v7327_v17, %v4395_v39  ;;  %vm4464_vm4 = vweird.f32 %v7327_v17 }
0x1642   : > { %7328 = vrsqrt.f32 %v4396_v62  ;;  %vm4465_vm7 = vmor %vm4463_vm6, %vm4464_vm4  ;;  %vm4473_vm9 = vweird.f32 %v4396_v62 }
0x1643   : > { %v4459_v2 = vmul.f32 %v7327_v17, %v4458_v36 }
0x1644   : > { %v4576_v35 = vpop.permute.xlu0 %4575 }
0x1645   : > { %v4460_v13 = vmul.f32 0.5, %v4459_v2  ;;  %6893 = vmatmul.msk.f32.vlgmr.msra.gmra.mxu0 %vm639_vm5, %v4576_v35 }
0x1647   : > { %v4461_v47 = vsub.f32 1.5, %v4460_v13 }
0x1648   : > { %v7329_v6 = vpop.eup %7328 }
0x1649   : > { %v4468_v49 = vmul.f32 %v7329_v6, %v4396_v62  ;;  %v4462_v21 = vmul.f32 %v7327_v17, %v4461_v47  ;;  %vm4474_vm8 = vweird.f32 %v7329_v6 }
0x164a   : > { %vm4475_vm1 = vmor %vm4473_vm9, %vm4474_vm8 }
0x164b   : > { %v4469_v7 = vmul.f32 %v7329_v6, %v4468_v49  ;;  %v4466_v46 = vsel %vm4465_vm7, %v7327_v17, %v4462_v21 }
0x164c   : > { %v4565_v16 = vmul.f32 %v4466_v46, %v10040_v4  ;;  %v4483_v14 = vmul.f32 %v4466_v46, %v10053_v15  ;;  %v4662_v51 = vmul.f32 %v4466_v46, %v10099_v23 }
0x164d   : > { %v4470_v42 = vmul.f32 0.5, %v4469_v7 }
0x164e   : > { %4587 = vrot.lane.b32.xlu2 %v4565_v16, %s7575_s20  ;;  %6891 = vmatmul.msk.f32.gmra.mxu1 %vm639_vm5, %v4483_v14  ;;  %v4526_v9 = vpop.f32.mrf.mxu1 }
0x164f   : > { %v4471_v25 = vsub.f32 1.5, %v4470_v42  ;;  %6907 = vmatmul.msk.f32.gmra.mxu2 %vm639_vm5, %v4662_v51  ;;  %v4551_v52 = vadd.f32 %v10251_v63, %v4526_v9 }
0x1651   : > { %v4472_v11 = vmul.f32 %v7329_v6, %v4471_v25 }
0x1653   : > { %v4476_v18 = vsel %vm4475_vm1, %v7329_v6, %v4472_v11 }
0x1654   : > { %v4566_v59 = vmul.f32 %v4476_v18, %v10013_v19  ;;  %v4484_v4 = vmul.f32 %v4476_v18, %v10065_v61  ;;  %v4663_v15 = vmul.f32 %v4476_v18, %v10107_v20  ;;  %v4705_v37 = vpop.f32.mrf.mxu2 }
0x1656   : > { %4589 = vrot.lane.b32.xlu0 %v4566_v59, %s7575_s20  ;;  %6892 = vmatmul.msk.f32.gmra.mxu1 %vm639_vm5, %v4484_v4 }
0x1657   : > { %6908 = vmatmul.msk.f32.gmra.mxu2 %vm639_vm5, %v4663_v15 }
0x165f   : > { %6941 = vmatmul.msk.f32.vlgmr.msra.gmra.mxu2 %vm639_vm5, %v9769_v57 }
0x1667   : > { %6942 = vmatmul.msk.f32.gmra.mxu2 %vm639_vm5, %v9764_v50 }
0x166a   : > { %v4580_v19 = vpop.permute.xlu2 %4579 }
0x1678   : > { %v4578_v23 = vpop.permute.xlu1 %4577 }
0x1679   : > { %6894 = vmatmul.msk.f32.gmra.mxu0 %vm639_vm5, %v4578_v23 }
0x1681   : > { %6895 = vmatmul.msk.f32.gmra.mxu0 %vm639_vm5, %v4580_v19 }
0x1683   : > { %v4529_v22 = vpop.f32.mrf.mxu1 }
0x1684   : > { %v4552_v10 = vadd.f32 %v10251_v63, %v4529_v22 }
0x1688   : > { %v4708_v41 = vpop.f32.mrf.mxu2 }
0x1689   : > { %v4582_v61 = vpop.permute.xlu0 %4581 }
0x168a   : > { %6896 = vmatmul.msk.f32.gmra.mxu0 %vm639_vm5, %v4582_v61 }
0x168e   : > { %v4532_v31 = vpop.f32.mrf.mxu1 }
0x168f   : > { %v4553_v2 = vadd.f32 %v10251_v63, %v4532_v31 }
0x1691   : > { %v4584_v20 = vpop.permute.xlu0 %4583 }
0x1692   : > { %6897 = vmatmul.msk.f32.gmra.mxu0 %vm639_vm5, %v4584_v20 }
0x1693   : > { %v4711_v36 = vpop.f32.mrf.mxu2 }
0x1696   : > { %v4535_v6 = vpop.f32.mrf.mxu1 }
0x1697   : > { %v4554_v46 = vadd.f32 %v10251_v63, %v4535_v6 }
0x1699   : > { %v4586_v56 = vpop.permute.xlu1 %4585 }
0x169a   : > { %6898 = vmatmul.msk.f32.gmra.mxu0 %vm639_vm5, %v4586_v56 }
0x169b   : > { %v4714_v16 = vpop.f32.mrf.mxu2 }
0x169e   : > { %v4538_v42 = vpop.f32.mrf.mxu1 }
0x169f   : > { %v4555_v59 = vadd.f32 %v10251_v63, %v4538_v42 }
0x16a3   : > { %v4717_v4 = vpop.f32.mrf.mxu2 }
0x16a6   : > { %v4541_v61 = vpop.f32.mrf.mxu1 }
0x16a7   : > { %v4556_v56 = vadd.f32 %v10251_v63, %v4541_v61 }
0x16a8   : > { %v4588_v48 = vpop.permute.xlu2 %4587 }
0x16a9   : > { %6899 = vmatmul.msk.f32.gmra.mxu0 %vm639_vm5, %v4588_v48 }
0x16ab   : > { %v4720_v58 = vpop.f32.mrf.mxu2 }
0x16c2   : > { %v4624_v32 = vpop.f32.mrf.mxu0 }
0x16c3   : > { %v4648_v12 = vadd.f32 %v4624_v32, %v4551_v52 }
0x16c5   : > { %v4729_v45 = vadd.f32 %v4705_v37, %v4648_v12 }
0x16c7   : > { %vm4737_vm10 = vcmp.gt.f32.partialorder %v4729_v45, 0.0  ;;  %v4745_v40 = vmul.f32 0.01, %v4729_v45 }
0x16c8   : > { %v4590_v39 = vpop.permute.xlu0 %4589 }
0x16c9   : > { %v4753_v30 = vsel %vm4737_vm10, %v4729_v45, %v4745_v40  ;;  %6900 = vmatmul.msk.f32.gmra.mxu0 %vm639_vm5, %v4590_v39 }
0x16ca   : > { %6917 = vmatmul.msk.f32.vlgmr.msra.gmra.mxu1 %vm639_vm5, %v4753_v30 }
0x16cb   : > { %v4544_v32 = vpop.f32.mrf.mxu1 }
0x16cc   : > { %v4557_v12 = vadd.f32 %v10251_v63, %v4544_v32 }
0x16d2   : > { %v4723_v40 = vpop.f32.mrf.mxu2 }
0x16f6   : > { %v4627_v3 = vpop.f32.mrf.mxu0 }
0x16f7   : > { %v4649_v38 = vadd.f32 %v4627_v3, %v4552_v10  ;;  %v4802_v3 = vpop.f32.mrf.mxu3 }
0x16f9   : > { %v4730_v17 = vadd.f32 %v4708_v41, %v4649_v38  ;;  %v4547_v41 = vpop.f32.mrf.mxu1 }
0x16fa   : > { %v4558_v10 = vadd.f32 %v10251_v63, %v4547_v41 }
0x16fb   : > { %vm4738_vm11 = vcmp.gt.f32.partialorder %v4730_v17, 0.0  ;;  %v4746_v62 = vmul.f32 0.01, %v4730_v17 }
0x16fd   : > { %v4754_v35 = vsel %vm4738_vm11, %v4730_v17, %v4746_v62  ;;  %v4726_v62 = vpop.f32.mrf.mxu2 }
0x16fe   : > { %v4630_v13 = vpop.f32.mrf.mxu0  ;;  %6918 = vmatmul.msk.f32.gmra.mxu1 %vm639_vm5, %v4754_v35 }
0x16ff   : > { %v4650_v47 = vadd.f32 %v4630_v13, %v4553_v2  ;;  %v4805_v6 = vpop.f32.mrf.mxu3 }
0x1701   : > { %v4731_v49 = vadd.f32 %v4711_v36, %v4650_v47 }
0x1703   : > { %vm4739_vm15 = vcmp.gt.f32.partialorder %v4731_v49, 0.0  ;;  %v4747_v21 = vmul.f32 0.01, %v4731_v49 }
0x1705   : > { %v4755_v7 = vsel %vm4739_vm15, %v4731_v49, %v4747_v21 }
0x1706   : > { %6919 = vmatmul.msk.f32.gmra.mxu1 %vm639_vm5, %v4755_v7 }
0x1707   : > { %v4633_v14 = vpop.f32.mrf.mxu0  ;;  %v4808_v63 = vpop.f32.mrf.mxu3 }
0x1708   : > { %v4651_v51 = vadd.f32 %v4633_v14, %v4554_v46 }
0x170a   : > { %v4732_v25 = vadd.f32 %v4714_v16, %v4651_v51 }
0x170c   : > { %vm4740_vm2 = vcmp.gt.f32.partialorder %v4732_v25, 0.0  ;;  %v4748_v11 = vmul.f32 0.01, %v4732_v25 }
0x170e   : > { %v4756_v18 = vsel %vm4740_vm2, %v4732_v25, %v4748_v11 }
0x170f   : > { %6920 = vmatmul.msk.f32.gmra.mxu1 %vm639_vm5, %v4756_v18  ;;  %v4636_v15 = vpop.f32.mrf.mxu0  ;;  %v4811_v14 = vpop.f32.mrf.mxu3 }
0x1710   : > { %v4652_v23 = vadd.f32 %v4636_v15, %v4555_v59 }
0x1712   : > { %v4733_v19 = vadd.f32 %v4717_v4, %v4652_v23 }
0x1714   : > { %vm4741_vm3 = vcmp.gt.f32.partialorder %v4733_v19, 0.0  ;;  %v4749_v20 = vmul.f32 0.01, %v4733_v19 }
0x1716   : > { %v4757_v48 = vsel %vm4741_vm3, %v4733_v19, %v4749_v20 }
0x1717   : > { %v4639_v5 = vpop.f32.mrf.mxu0  ;;  %6921 = vmatmul.msk.f32.gmra.mxu1 %vm639_vm5, %v4757_v48  ;;  %v4814_v11 = vpop.f32.mrf.mxu3 }
0x1718   : > { %v4653_v24 = vadd.f32 %v4639_v5, %v4556_v56 }
0x171a   : > { %v4734_v28 = vadd.f32 %v4720_v58, %v4653_v24 }
0x171c   : > { %vm4742_vm14 = vcmp.gt.f32.partialorder %v4734_v28, 0.0  ;;  %v4750_v9 = vmul.f32 0.01, %v4734_v28 }
0x171e   : > { %v4758_v52 = vsel %vm4742_vm14, %v4734_v28, %v4750_v9 }
0x171f   : > { %6922 = vmatmul.msk.f32.gmra.mxu1 %vm639_vm5, %v4758_v52  ;;  %v4817_v23 = vpop.f32.mrf.mxu3 }
0x1726   : > { %v4642_v37 = vpop.f32.mrf.mxu0 }
0x1727   : > { %v4654_v45 = vadd.f32 %v4642_v37, %v4557_v12  ;;  %v4820_v24 = vpop.f32.mrf.mxu3 }
0x1729   : > { %v4735_v39 = vadd.f32 %v4723_v40, %v4654_v45 }
0x172b   : > { %vm4743_vm13 = vcmp.gt.f32.partialorder %v4735_v39, 0.0  ;;  %v4751_v30 = vmul.f32 0.01, %v4735_v39 }
0x172d   : > { %v4759_v22 = vsel %vm4743_vm13, %v4735_v39, %v4751_v30 }
0x172e   : > { %6923 = vmatmul.msk.f32.gmra.mxu1 %vm639_vm5, %v4759_v22 }
0x1746   : > { %v4645_v31 = vpop.f32.mrf.mxu0 }
0x1747   : > { %v4655_v38 = vadd.f32 %v4645_v31, %v4558_v10  ;;  %v4867_v17 = vpop.f32.mrf.mxu1 }
0x1748   : > { %v4868_v36 = vadd.f32 %v4867_v17, %v4802_v3 }
0x1749   : > { %v4736_v2 = vadd.f32 %v4726_v62, %v4655_v38 }
0x174a   : > { %7330 = vtanh.f32 %v4868_v36  ;;  %v6925_v4 = vmul.f32 -1.442695, %v4868_v36  ;;  %v4823_v36 = vpop.f32.mrf.mxu3 }
0x174b   : > { %vm4744_vm4 = vcmp.gt.f32.partialorder %v4736_v2, 0.0  ;;  %v4752_v35 = vmul.f32 0.01, %v4736_v2 }
0x174d   : > { %v4760_v13 = vsel %vm4744_vm4, %v4736_v2, %v4752_v35 }
0x174e   : > { %6924 = vmatmul.msk.f32.gmra.mxu1 %vm639_vm5, %v4760_v13 }
0x1750   : > { %v7331_v47 = vpop.eup %7330 }
0x1751   : > { %5067 = vrot.lane.b32.xlu1 %v7331_v47, %s7574_s19 }
0x177b   : > { %v4870_v49 = vpop.f32.mrf.mxu1 }
0x177c   : > { %v4871_v21 = vadd.f32 %v4870_v49, %v4805_v6 }
0x177e   : > { %7332 = vtanh.f32 %v4871_v21  ;;  %v6926_v32 = vmul.f32 -1.442695, %v4871_v21 }
0x1783   : > { %v4873_v7 = vpop.f32.mrf.mxu1 }
0x1784   : > { %v7333_v46 = vpop.eup %7332  ;;  %v10271_v16 = vadd.f32 %v4873_v7, %v4808_v63 }
0x1785   : > { %5069 = vrot.lane.b32.xlu2 %v7333_v46, %s7574_s19 }
0x1786   : > { %7334 = vtanh.f32 %v10271_v16  ;;  %v6927_v49 = vmul.f32 -1.442695, %v10271_v16 }
0x178c   : > { %v7335_v51 = vpop.eup %7334  ;;  %v4876_v42 = vpop.f32.mrf.mxu1 }
0x178d   : > { %5071 = vrot.lane.b32.xlu0 %v7335_v51, %s7574_s19  ;;  %v10276_v25 = vadd.f32 %v4876_v42, %v4811_v14 }
0x178f   : > { %7336 = vtanh.f32 %v10276_v25 }
0x1794   : > { %v4879_v59 = vpop.f32.mrf.mxu1 }
0x1795   : > { %v7337_v18 = vpop.eup %7336  ;;  %v4880_v15 = vadd.f32 %v4879_v59, %v4814_v11  ;;  %v6928_v11 = vmul.f32 -1.442695, %v10276_v25 }
0x1796   : > { %5073 = vrot.lane.b32.xlu1 %v7337_v18, %s7574_s19 }
0x1797   : > { %7338 = vtanh.f32 %v4880_v15  ;;  %v6929_v35 = vmul.f32 -1.442695, %v4880_v15 }
0x1798   : > { %7340 = vpow2.f32 %v6925_v4 }
0x179c   : > { %v4882_v19 = vpop.f32.mrf.mxu1 }
0x179d   : > { %v7339_v61 = vpop.eup %7338  ;;  %v10280_v20 = vadd.f32 %v4882_v19, %v4817_v23 }
0x179e   : > { %5075 = vrot.lane.b32.xlu2 %v7339_v61, %s7574_s19  ;;  %v7341_v56 = vpop.eup %7340 }
0x179f   : > { %7342 = vtanh.f32 %v10280_v20  ;;  %v4915_v48 = vadd.f32 1.0, %v7341_v56 }
0x17a1   : > { %7344 = vrcp.f32 %v4915_v48  ;;  %v4934_v30 = vand.u32 2147483648, %v4915_v48  ;;  %vm4928_vm7 = vweird.f32 %v4915_v48  ;;  %v4932_v22 = vand.u32 2147483647, %v4915_v48 }
0x17a3   : > { %v4935_v31 = vor.u32 1.1754944e-38, %v4934_v30  ;;  %vm4933_vm9 = vcmp.eq.f32.partialorder %v4932_v22, 8.507059e+37 }
0x17a5   : > { %v7343_v5 = vpop.eup %7342 }
0x17a6   : > { %5077 = vrot.lane.b32.xlu0 %v7343_v5, %s7574_s19 }
0x17a7   : > { %v7345_v9 = vpop.eup %7344 }
0x17a8   : > { %v4924_v52 = vmul.f32 %v7345_v9, %v4915_v48  ;;  %vm4929_vm6 = vweird.f32 %v7345_v9 }
0x17a9   : > { %vm4930_vm8 = vmor %vm4928_vm7, %vm4929_vm6 }
0x17aa   : > { %v4925_v37 = vsub.f32 1.0, %v4924_v52 }
0x17ab   : > { %v4885_v58 = vpop.f32.mrf.mxu1 }
0x17ac   : > { %v10285_v28 = vadd.f32 %v4885_v58, %v4820_v24  ;;  %v4926_v45 = vmul.f32 %v7345_v9, %v4925_v37  ;;  %v6930_v58 = vmul.f32 -1.442695, %v10280_v20 }
0x17ae   : > { %7346 = vtanh.f32 %v10285_v28  ;;  %v4927_v39 = vadd.f32 %v7345_v9, %v4926_v45 }
0x17af   : > { %7348 = vpow2.f32 %v6926_v32 }
0x17b0   : > { %v4931_v10 = vsel %vm4930_vm8, %v7345_v9, %v4927_v39 }
0x17b1   : > { %v10289_v38 = vsel %vm4933_vm9, %v4935_v31, %v4931_v10 }
0x17b4   : > { %v7347_v12 = vpop.eup %7346 }
0x17b5   : > { %5079 = vrot.lane.b32.xlu1 %v7347_v12, %s7574_s19  ;;  %v7349_v40 = vpop.eup %7348 }
0x17b6   : > { %v4916_v41 = vadd.f32 1.0, %v7349_v40 }
0x17b8   : > { %7350 = vrcp.f32 %v4916_v41  ;;  %v4949_v51 = vand.u32 2147483648, %v4916_v41  ;;  %vm4943_vm10 = vweird.f32 %v4916_v41  ;;  %v4947_v42 = vand.u32 2147483647, %v4916_v41 }
0x17ba   : > { %v4950_v4 = vor.u32 1.1754944e-38, %v4949_v51  ;;  %vm4948_vm15 = vcmp.eq.f32.partialorder %v4947_v42, 8.507059e+37 }
0x17be   : > { %v7351_v62 = vpop.eup %7350 }
0x17bf   : > { %v4939_v47 = vmul.f32 %v7351_v62, %v4916_v41  ;;  %vm4944_vm1 = vweird.f32 %v7351_v62 }
0x17c0   : > { %vm4945_vm11 = vmor %vm4943_vm10, %vm4944_vm1 }
0x17c1   : > { %v4940_v6 = vsub.f32 1.0, %v4939_v47 }
0x17c3   : > { %v5068_v3 = vpop.permute.xlu1 %5067  ;;  %v4941_v63 = vmul.f32 %v7351_v62, %v4940_v6 }
0x17c4   : > { %v5091_v17 = vmul.f32 %v5068_v3, %v10289_v38 }
0x17c5   : > { %v4942_v46 = vadd.f32 %v7351_v62, %v4941_v63 }
0x17c6   : > { %5107 = vrot.lane.b32.xlu0 %v5091_v17, %s7575_s20 }
0x17c7   : > { %v4946_v59 = vsel %vm4945_vm11, %v7351_v62, %v4942_v46 }
0x17c8   : > { %v10299_v23 = vsel %vm4948_vm15, %v4950_v4, %v4946_v59 }
0x17cb   : > { %v4888_v2 = vpop.f32.mrf.mxu1 }
0x17cc   : > { %v10293_v13 = vadd.f32 %v4888_v2, %v4823_v36  ;;  %v6931_v2 = vmul.f32 -1.442695, %v10285_v28 }
0x17ce   : > { %7352 = vtanh.f32 %v10293_v13  ;;  %v6932_v28 = vmul.f32 -1.442695, %v10293_v13 }
0x17cf   : > { %7354 = vpow2.f32 %v6929_v35 }
0x17d0   : > { %7356 = vpow2.f32 %v6927_v49 }
0x17d4   : > { %v7353_v21 = vpop.eup %7352 }
0x17d5   : > { %5081 = vrot.lane.b32.xlu2 %v7353_v21, %s7574_s19  ;;  %v7355_v7 = vpop.eup %7354 }
0x17d6   : > { %v4919_v14 = vadd.f32 1.0, %v7355_v7  ;;  %v7357_v18 = vpop.eup %7356 }
0x17d7   : > { %v4917_v16 = vadd.f32 1.0, %v7357_v18 }
0x17d8   : > { %7358 = vrcp.f32 %v4919_v14  ;;  %v4994_v45 = vand.u32 2147483648, %v4919_v14  ;;  %vm4988_vm3 = vweird.f32 %v4919_v14  ;;  %v4992_v40 = vand.u32 2147483647, %v4919_v14 }
0x17d9   : > { %7360 = vpow2.f32 %v6928_v11  ;;  %v4964_v62 = vand.u32 2147483648, %v4917_v16  ;;  %vm4958_vm6 = vweird.f32 %v4917_v16  ;;  %v4962_v47 = vand.u32 2147483647, %v4917_v16 }
0x17da   : > { %7362 = vrcp.f32 %v4917_v16  ;;  %v4995_v10 = vor.u32 1.1754944e-38, %v4994_v45  ;;  %vm4993_vm13 = vcmp.eq.f32.partialorder %v4992_v40, 8.507059e+37 }
0x17db   : > { %v4965_v49 = vor.u32 1.1754944e-38, %v4964_v62  ;;  %vm4963_vm8 = vcmp.eq.f32.partialorder %v4962_v47, 8.507059e+37 }
0x17de   : > { %v7359_v61 = vpop.eup %7358 }
0x17df   : > { %v5070_v15 = vpop.permute.xlu2 %5069  ;;  %v7361_v56 = vpop.eup %7360  ;;  %v4984_v48 = vmul.f32 %v7359_v61, %v4919_v14  ;;  %vm4989_vm2 = vweird.f32 %v7359_v61 }
0x17e0   : > { %v5092_v19 = vmul.f32 %v5070_v15, %v10299_v23  ;;  %v4918_v25 = vadd.f32 1.0, %v7361_v56  ;;  %v7363_v5 = vpop.eup %7362  ;;  %vm4990_vm14 = vmor %vm4988_vm3, %vm4989_vm2 }
0x17e1   : > { %v4985_v24 = vsub.f32 1.0, %v4984_v48  ;;  %v4954_v9 = vmul.f32 %v7363_v5, %v4917_v16  ;;  %vm4959_vm4 = vweird.f32 %v7363_v5 }
0x17e2   : > { %5109 = vrot.lane.b32.xlu1 %v5092_v19, %s7575_s20  ;;  %7364 = vrcp.f32 %v4918_v25  ;;  %vm4960_vm7 = vmor %vm4958_vm6, %vm4959_vm4  ;;  %v4979_v51 = vand.u32 2147483648, %v4918_v25  ;;  %vm4973_vm1 = vweird.f32 %v4918_v25  ;;  %v4977_v11 = vand.u32 2147483647, %v4918_v25 }
0x17e3   : > { %v4986_v52 = vmul.f32 %v7359_v61, %v4985_v24  ;;  %7366 = vpow2.f32 %v6930_v58  ;;  %v4955_v32 = vsub.f32 1.0, %v4954_v9 }
0x17e4   : > { %v4980_v4 = vor.u32 1.1754944e-38, %v4979_v51  ;;  %vm4978_vm11 = vcmp.eq.f32.partialorder %v4977_v11, 8.507059e+37 }
0x17e5   : > { %v4987_v37 = vadd.f32 %v7359_v61, %v4986_v52  ;;  %v4956_v39 = vmul.f32 %v7363_v5, %v4955_v32 }
0x17e7   : > { %v4991_v41 = vsel %vm4990_vm14, %v7359_v61, %v4987_v37  ;;  %v4957_v31 = vadd.f32 %v7363_v5, %v4956_v39 }
0x17e8   : > { %v7365_v12 = vpop.eup %7364  ;;  %v10304_v17 = vsel %vm4993_vm13, %v4995_v10, %v4991_v41 }
0x17e9   : > { %v4969_v30 = vmul.f32 %v7365_v12, %v4918_v25  ;;  %v7367_v22 = vpop.eup %7366  ;;  %v4961_v6 = vsel %vm4960_vm7, %v7363_v5, %v4957_v31  ;;  %vm4974_vm9 = vweird.f32 %v7365_v12 }
0x17ea   : > { %v4920_v20 = vadd.f32 1.0, %v7367_v22  ;;  %v10309_v63 = vsel %vm4963_vm8, %v4965_v49, %v4961_v6  ;;  %vm4975_vm10 = vmor %vm4973_vm1, %vm4974_vm9 }
0x17eb   : > { %v4970_v36 = vsub.f32 1.0, %v4969_v30 }
0x17ec   : > { %7368 = vrcp.f32 %v4920_v20  ;;  %v5009_v9 = vand.u32 2147483648, %v4920_v20  ;;  %vm5003_vm2 = vweird.f32 %v4920_v20  ;;  %v5007_v52 = vand.u32 2147483647, %v4920_v20 }
0x17ed   : > { %v4971_v21 = vmul.f32 %v7365_v12, %v4970_v36  ;;  %7370 = vpow2.f32 %v6931_v2 }
0x17ee   : > { %7372 = vpow2.f32 %v6932_v28  ;;  %v5010_v37 = vor.u32 1.1754944e-38, %v5009_v9  ;;  %vm5008_vm14 = vcmp.eq.f32.partialorder %v5007_v52, 8.507059e+37 }
0x17ef   : > { %v4972_v14 = vadd.f32 %v7365_v12, %v4971_v21 }
0x17f1   : > { %v4976_v59 = vsel %vm4975_vm10, %v7365_v12, %v4972_v14 }
0x17f2   : > { %v7369_v42 = vpop.eup %7368  ;;  %v10314_v61 = vsel %vm4978_vm11, %v4980_v4, %v4976_v59 }
0x17f3   : > { %v7371_v18 = vpop.eup %7370  ;;  %v4999_v16 = vmul.f32 %v7369_v42, %v4920_v20  ;;  %vm5004_vm15 = vweird.f32 %v7369_v42 }
0x17f4   : > { %v4921_v15 = vadd.f32 1.0, %v7371_v18  ;;  %v7373_v48 = vpop.eup %7372  ;;  %vm5005_vm3 = vmor %vm5003_vm2, %vm5004_vm15  ;;  %v5051_v18 = vmul.f32 %v10289_v38, %v9549_v0 }
0x17f5   : > { %v5000_v13 = vsub.f32 1.0, %v4999_v16  ;;  %v4922_v25 = vadd.f32 1.0, %v7373_v48 }
0x17f6   : > { %7374 = vrcp.f32 %v4921_v15  ;;  %v5024_v20 = vand.u32 2147483648, %v4921_v15  ;;  %vm5018_vm4 = vweird.f32 %v4921_v15  ;;  %v5022_v62 = vand.u32 2147483647, %v4921_v15 }
0x17f7   : > { %v5001_v5 = vmul.f32 %v7369_v42, %v5000_v13  ;;  %7376 = vrcp.f32 %v4922_v25  ;;  %vm5033_vm9 = vweird.f32 %v4922_v25  ;;  %v5053_v13 = vmul.f32 %v10309_v63, %v9544_v53 }
0x17f8   : > { %v5076_v3 = vpop.permute.xlu2 %5075  ;;  %vm5023_vm7 = vcmp.eq.f32.partialorder %v5022_v62, 8.507059e+37 }
0x17f9   : > { %v5095_v35 = vmul.f32 %v5076_v3, %v10304_v17  ;;  %v5002_v58 = vadd.f32 %v7369_v42, %v5001_v5 }
0x17fb   : > { %5115 = vrot.lane.b32.xlu1 %v5095_v35, %s7575_s20  ;;  %v5006_v12 = vsel %vm5005_vm3, %v7369_v42, %v5002_v58  ;;  %v5025_v35 = vor.u32 1.1754944e-38, %v5024_v20 }
0x17fc   : > { %v7375_v24 = vpop.eup %7374  ;;  %v10318_v39 = vsel %vm5008_vm14, %v5010_v37, %v5006_v12  ;;  %v5054_v12 = vmul.f32 %v10314_v61, %v9564_v27 }
0x17fd   : > { %v5014_v32 = vmul.f32 %v7375_v24, %v4921_v15  ;;  %v7377_v40 = vpop.eup %7376  ;;  %vm5019_vm13 = vweird.f32 %v7375_v24  ;;  %v5052_v15 = vmul.f32 %v10299_v23, %v9540_v34  ;;  %v5056_v9 = vmul.f32 %v10318_v39, %v9559_v44 }
0x17fe   : > { %v5029_v10 = vmul.f32 %v7377_v40, %v4922_v25  ;;  %vm5020_vm6 = vmor %vm5018_vm4, %vm5019_vm13  ;;  %vm5034_vm8 = vweird.f32 %v7377_v40 }
0x17ff   : > { %v5072_v7 = vpop.permute.xlu0 %5071  ;;  %v5015_v45 = vsub.f32 1.0, %v5014_v32  ;;  %vm5035_vm1 = vmor %vm5033_vm9, %vm5034_vm8 }
0x1800   : > { %v5093_v46 = vmul.f32 %v5072_v7, %v10309_v63  ;;  %v5030_v3 = vsub.f32 1.0, %v5029_v10  ;;  %v5039_v7 = vand.u32 2147483648, %v4922_v25 }
0x1801   : > { %v5016_v41 = vmul.f32 %v7375_v24, %v5015_v45 }
0x1802   : > { %5111 = vrot.lane.b32.xlu2 %v5093_v46, %s7575_s20  ;;  %v5031_v2 = vmul.f32 %v7377_v40, %v5030_v3  ;;  %v5037_v46 = vand.u32 2147483647, %v4922_v25  ;;  %v5040_v28 = vor.u32 1.1754944e-38, %v5039_v7 }
0x1803   : > { %v5017_v31 = vadd.f32 %v7375_v24, %v5016_v41 }
0x1804   : > { %v5032_v21 = vadd.f32 %v7377_v40, %v5031_v2  ;;  %vm5038_vm10 = vcmp.eq.f32.partialorder %v5037_v46, 8.507059e+37 }
0x1805   : > { %v5021_v36 = vsel %vm5020_vm6, %v7375_v24, %v5017_v31  ;;  %v5055_v24 = vmul.f32 %v10304_v17, %v9554_v29  ;;  %v7114_v29 = vld [vmem:[%s11015_s0 + $0x250] ss:$0 sm:$0xff] }
0x1806   : > { %v10322_v6 = vsel %vm5023_vm7, %v5025_v35, %v5021_v36  ;;  %v5036_v14 = vsel %vm5035_vm1, %v7377_v40, %v5032_v21 }
0x1807   : > { %v10326_v42 = vsel %vm5038_vm10, %v5040_v28, %v5036_v14 }
0x1808   : > { %v5074_v19 = vpop.permute.xlu1 %5073  ;;  %v5058_v41 = vmul.f32 %v10326_v42, %v9572_v54 }
0x1809   : > { %v5094_v56 = vmul.f32 %v5074_v19, %v10314_v61 }
0x180b   : > { %5113 = vrot.lane.b32.xlu0 %v5094_v56, %s7575_s20 }
0x1818   : > { %v5078_v30 = vpop.permute.xlu0 %5077 }
0x1819   : > { %v5096_v22 = vmul.f32 %v5078_v30, %v10318_v39  ;;  %v5057_v30 = vmul.f32 %v10322_v6, %v9579_v33 }
0x181b   : > { %5117 = vrot.lane.b32.xlu2 %v5096_v22, %s7575_s20 }
0x1827   : > { %v5080_v47 = vpop.permute.xlu1 %5079 }
0x1828   : > { %v5097_v49 = vmul.f32 %v5080_v47, %v10322_v6 }
0x182a   : > { %5119 = vrot.lane.b32.xlu0 %v5097_v49, %s7575_s20 }
0x182f   : > { %v5082_v51 = vpop.permute.xlu2 %5081 }
0x1830   : > { %v5098_v11 = vmul.f32 %v5082_v51, %v10326_v42 }
0x1832   : > { %5121 = vrot.lane.b32.xlu1 %v5098_v11, %s7575_s20 }
0x1838   : > { %v5108_v59 = vpop.permute.xlu0 %5107 }
0x1839   : > { %v5131_v4 = vadd.f32 %v5108_v59, %v5051_v18 }
0x183b   : > { %7378 = vtanh.f32 %v5131_v4 }
0x1841   : > { %v7379_v16 = vpop.eup %7378 }
0x1842   : > { %5155 = vrot.lane.b32.xlu2 %v7379_v16, %s7574_s19 }
0x1854   : > { %v5110_v19 = vpop.permute.xlu1 %5109 }
0x1855   : > { %v5132_v56 = vadd.f32 %v5110_v19, %v5052_v15 }
0x1857   : > { %7380 = vtanh.f32 %v5132_v56 }
0x185c   : > { %v5112_v48 = vpop.permute.xlu2 %5111 }
0x185d   : > { %v7381_v5 = vpop.eup %7380  ;;  %v5133_v25 = vadd.f32 %v5112_v48, %v5053_v13 }
0x185e   : > { %5157 = vrot.lane.b32.xlu0 %v7381_v5, %s7574_s19 }
0x185f   : > { %7382 = vtanh.f32 %v5133_v25 }
0x1865   : > { %v7383_v0 = vpop.eup %7382 }
0x1866   : > { %5159 = vrot.lane.b32.xlu1 %v7383_v0, %s7574_s19 }
0x186d   : > { %v5116_v58 = vpop.permute.xlu1 %5115 }
0x186e   : > { %v5135_v34 = vadd.f32 %v5116_v58, %v5055_v24 }
0x1870   : > { %7384 = vtanh.f32 %v5135_v34 }
0x1875   : > { %v5118_v52 = vpop.permute.xlu2 %5117 }
0x1876   : > { %v7385_v53 = vpop.eup %7384  ;;  %v5136_v32 = vadd.f32 %v5118_v52, %v5056_v9 }
0x1877   : > { %5163 = vrot.lane.b32.xlu0 %v7385_v53, %s7574_s19 }
0x1878   : > { %7386 = vtanh.f32 %v5136_v32 }
0x187d   : > { %v5114_v37 = vpop.permute.xlu0 %5113 }
0x187e   : > { %v5134_v45 = vadd.f32 %v5114_v37, %v5054_v12  ;;  %v7387_v40 = vpop.eup %7386 }
0x187f   : > { %5165 = vrot.lane.b32.xlu1 %v7387_v40, %s7574_s19 }
0x1880   : > { %7388 = vtanh.f32 %v5134_v45 }
0x1886   : > { %v7389_v44 = vpop.eup %7388 }
0x1887   : > { %5161 = vrot.lane.b32.xlu2 %v7389_v44, %s7574_s19  ;;  %5190 = vrot.lane.b32.xlu1 %v7114_v29, %s7576_s18  ;;  %s6600_s18 = scalar_lea.hbm %s11022_s7, %s7002_s29 }
0x1888   : > { %s6603_s15 = sshll.u32 %s6600_s18, 4  ;;  %s6604_s15 = int_to_ptr.hbm [resolvable:$true] %s6603_s15 }
0x1889   : > { %s7518_s17 = sshra.s32 %s6604_s15, 4  ;;  %s7519_s17 = int_to_ptr.hbm [resolvable:$true] %s7518_s17 }
0x188a   : > { %s7520_s13 = scalar_lea.hbm %s7519_s17, 64  ;;  %p7525_p0 = scmp.lt.s32.totalorder %s7519_s17, %s11022_s7 }
0x188b   : > { %p7521_p11 = scmp.ne.s32.totalorder %s7519_s17, %s7520_s13  ;;  %p7526_p1 = scmp.lt.s32.totalorder %s7524_s22, %s7520_s13 }
0x188d   : > { %p7522_p12 = pnand %p7521_p11, %p7658_p5  ;;  %p7527_p2 = por %p7526_p1, %p7525_p0 }
0x188f   : > { %p7523_p13 = pneg %p7522_p12 }
0x1891   : > { %p7528_p3 = pnand %p7527_p2, %p7523_p13 }
0x189c   : > { %v5120_v22 = vpop.permute.xlu0 %5119  ;;  %v5156_v2 = vpop.permute.xlu2 %5155 }
0x189d   : > { %v5137_v27 = vadd.f32 %v5120_v22, %v5057_v30  ;;  %v10359_v33 = vmul.f32 %v5156_v2, %v10289_v38 }
0x189f   : > { %7390 = vtanh.f32 %v5137_v27 }
0x18a4   : > { %v5122_v10 = vpop.permute.xlu1 %5121 }
0x18a5   : > { %v7391_v31 = vpop.eup %7390  ;;  %v5138_v3 = vadd.f32 %v5122_v10, %v5058_v41 }
0x18a6   : > { %5167 = vrot.lane.b32.xlu2 %v7391_v31, %s7574_s19 }
0x18a7   : > { %7392 = vtanh.f32 %v5138_v3 }
0x18ad   : > { %v7393_v20 = vpop.eup %7392 }
0x18ae   : > { %5169 = vrot.lane.b32.xlu0 %v7393_v20, %s7574_s19 }
0x18d0   : > { %v5158_v35 = vpop.permute.xlu0 %5157 }
0x18d1   : > { %v10362_v47 = vmul.f32 %v5158_v35, %v10299_v23 }
0x18d8   : > { %v5160_v62 = vpop.permute.xlu1 %5159 }
0x18d9   : > { %v10365_v54 = vmul.f32 %v5160_v62, %v10309_v63 }
0x18e1   : > { %v5162_v14 = vpop.permute.xlu2 %5161 }
0x18e2   : > { %v10374_v23 = vmul.f32 %v5162_v14, %v10314_v61 }
0x18e9   : > { %v5164_v38 = vpop.permute.xlu0 %5163 }
0x18ea   : > { %v10380_v28 = vmul.f32 %v5164_v38, %v10304_v17 }
0x18f1   : > { %v5166_v36 = vpop.permute.xlu1 %5165 }
0x18f2   : > { %v10377_v63 = vmul.f32 %v5166_v36, %v10318_v39 }
0x18f9   : > { %v5191_v49 = vpop.permute.xlu1 %5190 }
0x18fa   : > { %v5195_v21 = vmul.f32 %v5191_v49, %v10365_v54  ;;  %v5193_v7 = vmul.f32 %v5191_v49, %v10359_v33  ;;  %v5194_v46 = vmul.f32 %v5191_v49, %v10362_v47  ;;  %v5198_v51 = vmul.f32 %v5191_v49, %v10377_v63 }
0x18fb   : > { %v5196_v11 = vmul.f32 %v5191_v49, %v10374_v23  ;;  %v5197_v59 = vmul.f32 %v5191_v49, %v10380_v28 }
0x18fc   : > { %5213 = vrot.lane.b32.xlu1 %v5195_v21, %s7575_s20  ;;  %5209 = vrot.lane.b32.xlu2 %v5193_v7, %s7575_s20 }
0x18fd   : > { %5211 = vrot.lane.b32.xlu0 %v5194_v46, %s7575_s20 }
0x1900   : > { %v5168_v18 = vpop.permute.xlu2 %5167 }
0x1901   : > { %v10389_v61 = vmul.f32 %v5168_v18, %v10322_v6 }
0x1903   : > { %v5199_v39 = vmul.f32 %v5191_v49, %v10389_v61 }
0x1904   : > { %5219 = vrot.lane.b32.xlu1 %v5198_v51, %s7575_s20  ;;  %5215 = vrot.lane.b32.xlu2 %v5196_v11, %s7575_s20 }
0x1905   : > { %5217 = vrot.lane.b32.xlu0 %v5197_v59, %s7575_s20 }
0x190c   : > { %5221 = vrot.lane.b32.xlu2 %v5199_v39, %s7575_s20 }
0x1920   : > { %v5170_v17 = vpop.permute.xlu0 %5169 }
0x1921   : > { %v10394_v4 = vmul.f32 %v5170_v17, %v10326_v42 }
0x1923   : > { %v5200_v16 = vmul.f32 %v5191_v49, %v10394_v4 }
0x1925   : > { %5223 = vrot.lane.b32.xlu0 %v5200_v16, %s7575_s20 }
0x1956   : > { %v5210_v15 = vpop.permute.xlu2 %5209 }
0x1957   : > { %v5233_v19 = vsel %vm639_vm5, %v5210_v15, 0.0 }
0x1958   : > { %5234 = vadd.xlane.f32.xlu1 %v5233_v19 }
0x195e   : > { %v5216_v56 = vpop.permute.xlu2 %5215 }
0x195f   : > { %v5242_v6 = vsel %vm639_vm5, %v5216_v56, 0.0 }
0x1960   : > { %5243 = vadd.xlane.f32.xlu1 %v5242_v6 }
0x1966   : > { %v5222_v13 = vpop.permute.xlu2 %5221 }
0x1967   : > { %v5251_v48 = vsel %vm639_vm5, %v5222_v13, 0.0 }
0x1968   : > { %5252 = vadd.xlane.f32.xlu1 %v5251_v48 }
0x196e   : > { %v5214_v5 = vpop.permute.xlu1 %5213 }
0x196f   : > { %v5239_v42 = vsel %vm639_vm5, %v5214_v5, 0.0  ;;  %v5212_v25 = vpop.permute.xlu0 %5211 }
0x1970   : > { %v5236_v0 = vsel %vm639_vm5, %v5212_v25, 0.0  ;;  %5240 = vadd.xlane.f32.xlu0 %v5239_v42 }
0x1971   : > { %5237 = vadd.xlane.f32.xlu2 %v5236_v0 }
0x1976   : > { %v5220_v24 = vpop.permute.xlu1 %5219 }
0x1977   : > { %v5248_v58 = vsel %vm639_vm5, %v5220_v24, 0.0  ;;  %v5218_v34 = vpop.permute.xlu0 %5217 }
0x1978   : > { %v5245_v9 = vsel %vm639_vm5, %v5218_v34, 0.0  ;;  %5249 = vadd.xlane.f32.xlu0 %v5248_v58 }
0x1979   : > { %5246 = vadd.xlane.f32.xlu2 %v5245_v9 }
0x1997   : > { %v5224_v52 = vpop.permute.xlu0 %5223 }
0x1998   : > { %v5254_v53 = vsel %vm639_vm5, %v5224_v52, 0.0 }
0x1999   : > { %5255 = vadd.xlane.f32.xlu2 %v5254_v53 }
0x19cb   : > { %v5235_v32 = vpop.xlane.xlu1 %5234 }
0x19d3   : > { %v5244_v45 = vpop.xlane.xlu1 %5243 }
0x19db   : > { %v5253_v22 = vpop.xlane.xlu1 %5252 }
0x19e3   : > { %v5241_v37 = vpop.xlane.xlu0 %5240 }
0x19e4   : > { %v5238_v12 = vpop.xlane.xlu2 %5237  ;;  %v5259_v41 = vmax.f32 %v5241_v37, %v5253_v22 }
0x19eb   : > { %v5250_v29 = vpop.xlane.xlu0 %5249 }
0x19ec   : > { %v5247_v40 = vpop.xlane.xlu2 %5246  ;;  %v5258_v30 = vmax.f32 %v5238_v12, %v5250_v29 }
0x19ed   : > { %v5257_v44 = vmax.f32 %v5235_v32, %v5247_v40 }
0x19ef   : > { %v5261_v31 = vmax.f32 %v5257_v44, %v5258_v30 }
0x1a0c   : > { %v5256_v27 = vpop.xlane.xlu2 %5255 }
0x1a0d   : > { %v5260_v10 = vmax.f32 %v5244_v45, %v5256_v27 }
0x1a0f   : > { %v5262_v3 = vmax.f32 %v5259_v41, %v5260_v10  ;;  %v7487_v41 = vld [vmem:[%s11018_s3 + $0x8] sm:$0xff]  ;;  %v5429_v10 = vsel %vm639_vm5, %v9769_v57, 0.0 }
0x1a11   : > { %v5263_v20 = vmax.f32 %v5261_v31, %v5262_v3 }
0x1a13   : > { %v5264_v62 = vrot.slane %v5263_v20, 4 }
0x1a15   : > { %v5265_v36 = vmax.f32 %v5263_v20, %v5264_v62 }
0x1a17   : > { %v5266_v2 = vrot.slane %v5265_v36, 2 }
0x1a19   : > { %v5267_v35 = vmax.f32 %v5265_v36, %v5266_v2 }
0x1a1b   : > { %v5268_v49 = vrot.slane %v5267_v35, 1 }
0x1a1d   : > { %v5269_v21 = vmax.f32 %v5267_v35, %v5268_v49 }
0x1a1f   : > { %v5277_v7 = vsub.f32 %v5256_v27, %v5269_v21  ;;  %v5276_v46 = vsub.f32 %v5253_v22, %v5269_v21  ;;  %v5275_v14 = vsub.f32 %v5250_v29, %v5269_v21  ;;  %v5274_v38 = vsub.f32 %v5247_v40, %v5269_v21  ;;  %v7486_v27 = vld [vmem:[%s11018_s3] sm:$0xff] }
0x1a20   : > { %v5272_v51 = vsub.f32 %v5241_v37, %v5269_v21  ;;  %v5273_v11 = vsub.f32 %v5244_v45, %v5269_v21  ;;  %v5271_v17 = vsub.f32 %v5238_v12, %v5269_v21  ;;  %v5270_v15 = vsub.f32 %v5235_v32, %v5269_v21 }
0x1a21   : > { %v5292_v18 = vmul.f32 1.442695, %v5277_v7  ;;  %v5290_v59 = vmul.f32 1.442695, %v5276_v46  ;;  %v5288_v39 = vmul.f32 1.442695, %v5275_v14 }
0x1a22   : > { %v5286_v16 = vmul.f32 1.442695, %v5274_v38  ;;  %v5282_v19 = vmul.f32 1.442695, %v5272_v51  ;;  %v5284_v56 = vmul.f32 1.442695, %v5273_v11 }
0x1a23   : > { %7394 = vpow2.f32 %v5292_v18  ;;  %v5280_v6 = vmul.f32 1.442695, %v5271_v17  ;;  %v5278_v13 = vmul.f32 1.442695, %v5270_v15  ;;  %v5432_v51 = vsel %vm639_vm5, %v9764_v50, 0.0 }
0x1a24   : > { %7396 = vpow2.f32 %v5290_v59 }
0x1a25   : > { %7398 = vpow2.f32 %v5288_v39 }
0x1a26   : > { %7400 = vpow2.f32 %v5286_v16 }
0x1a27   : > { %7402 = vpow2.f32 %v5282_v19 }
0x1a28   : > { %7404 = vpow2.f32 %v5284_v56 }
0x1a29   : > { %v7395_v48 = vpop.eup %7394  ;;  %7406 = vpow2.f32 %v5280_v6 }
0x1a2a   : > { %v7397_v5 = vpop.eup %7396  ;;  %5302 = vmatpush.msrb.mxu0 %v7395_v48  ;;  %v5324_v42 = vmul.f32 %v7395_v48, %v10394_v4  ;;  %7408 = vpow2.f32 %v5278_v13 }
0x1a2b   : > { %v7399_v25 = vpop.eup %7398  ;;  %v5323_v0 = vmul.f32 %v7397_v5, %v10389_v61 }
0x1a2c   : > { %v7401_v24 = vpop.eup %7400  ;;  %5303 = vmatpush.msrb.mxu0 %v7397_v5  ;;  %v5322_v58 = vmul.f32 %v7399_v25, %v10377_v63 }
0x1a2d   : > { %v7403_v34 = vpop.eup %7402  ;;  %v7082_v9 = vpack.i.bf16 %v5323_v0, %v5324_v42  ;;  %v5321_v52 = vmul.f32 %v7401_v24, %v10380_v28 }
0x1a2e   : > { %v7405_v53 = vpop.eup %7404  ;;  %5304 = vmatpush.msrb.mxu0 %v7399_v25  ;;  %v5319_v32 = vmul.f32 %v7403_v34, %v10365_v54 }
0x1a2f   : > { %v7407_v12 = vpop.eup %7406  ;;  %7083 = vrot.lane.b32.xlu0 %v7082_v9, %s7575_s20  ;;  %v7087_v37 = vpack.i.bf16 %v5321_v52, %v5322_v58  ;;  %v5320_v45 = vmul.f32 %v7405_v53, %v10374_v23 }
0x1a30   : > { %v7409_v40 = vpop.eup %7408  ;;  %5305 = vmatpush.msrb.mxu0 %v7401_v24  ;;  %v5318_v30 = vmul.f32 %v7407_v12, %v10362_v47 }
0x1a31   : > { %7088 = vrot.lane.b32.xlu1 %v7087_v37, %s7575_s20  ;;  %v7092_v29 = vpack.i.bf16 %v5319_v32, %v5320_v45  ;;  %v5317_v44 = vmul.f32 %v7409_v40, %v10359_v33 }
0x1a32   : > { %5306 = vmatpush.msrb.mxu0 %v7405_v53 }
0x1a33   : > { %7093 = vrot.lane.b32.xlu2 %v7092_v29, %s7575_s20  ;;  %v7097_v22 = vpack.i.bf16 %v5317_v44, %v5318_v30 }
0x1a34   : > { %5307 = vmatpush.msrb.mxu0 %v7403_v34 }
0x1a36   : > { %5308 = vmatpush.msrb.mxu0 %v7407_v12 }
0x1a37   : > { %7098 = vrot.lane.b32.xlu0 %v7097_v22, %s7575_s20 }
0x1a38   : > { %5309 = vmatpush.msrb.mxu0 %v7409_v40 }
0x1a39   : > { %6933 = vmatmul.msk.f32.vlgmr.msrb.gmra.mxu0 %vm1982_vm12, %v7486_v27 }
0x1a41   : > { %6934 = vmatmul.msk.f32.gmra.mxu0 %vm1982_vm12, %v7487_v41 }
0x1a61   : > { %5430 = vadd.xlane.f32.xlu0 %v5429_v10 }
0x1a8d   : > { %v7094_v2 = vpop.permute.xlu2 %7093 }
0x1a8e   : > { %v7095_v49 = vunpack.i.l.bf16 %v7094_v2  ;;  %v7096_v7 = vunpack.i.h.bf16 %v7094_v2 }
0x1aa1   : > { %v7084_v31 = vpop.permute.xlu0 %7083 }
0x1aa2   : > { %v7085_v3 = vunpack.i.l.bf16 %v7084_v31  ;;  %v7086_v62 = vunpack.i.h.bf16 %v7084_v31 }
0x1aa3   : > { %v7089_v20 = vpop.permute.xlu1 %7088 }
0x1aa4   : > { %5365 = vmatpush.msra.mxu0 %v7085_v3  ;;  %v7090_v36 = vunpack.i.l.bf16 %v7089_v20  ;;  %v7091_v35 = vunpack.i.h.bf16 %v7089_v20 }
0x1aa6   : > { %5366 = vmatpush.msra.mxu0 %v7086_v62 }
0x1aa8   : > { %5367 = vmatpush.msra.mxu0 %v7090_v36 }
0x1aa9   : > { %v7099_v21 = vpop.permute.xlu0 %7098 }
0x1aaa   : > { %5368 = vmatpush.msra.mxu0 %v7091_v35  ;;  %v7100_v46 = vunpack.i.l.bf16 %v7099_v21  ;;  %v7101_v14 = vunpack.i.h.bf16 %v7099_v21 }
0x1aac   : > { %5369 = vmatpush.msra.mxu0 %v7095_v49 }
0x1aae   : > { %5370 = vmatpush.msra.mxu0 %v7096_v7 }
0x1ab0   : > { %5371 = vmatpush.msra.mxu0 %v7100_v46 }
0x1ab2   : > { %5372 = vmatpush.msra.mxu0 %v7101_v14 }
0x1ab3   : > { %6935 = vmatmul.msk.f32.vlgmr.msra.gmra.mxu0 %vm1982_vm12, %v7486_v27 }
0x1ab6   : > { %v5311_v57 = vpop.f32.mrf.mxu0 }
0x1ab7   : > { %5382 = vperm.xlu2 %7060, %v5311_v57  }
0x1abb   : > { %6936 = vmatmul.msk.f32.gmra.mxu0 %vm1982_vm12, %v7487_v41 }
0x1abe   : > { %v5314_v38 = vpop.f32.mrf.mxu0 }
0x1abf   : > { %5387 = vperm.xlu1 %7059, %v5314_v38  }
0x1ad4   : > { %v5431_v29 = vpop.xlane.xlu0 %5430 }
0x1ae9   : > { %5433 = vadd.xlane.f32.xlu1 %v5432_v51 }
0x1b11   : > { %v5383_v11 = vpop.permute.xlu2 %5382 }
0x1b12   : > { %7410 = vrcp.f32 %v5383_v11  ;;  %v5401_v15 = vand.u32 2147483648, %v5383_v11  ;;  %vm5395_vm15 = vweird.f32 %v5383_v11  ;;  %v5399_v19 = vand.u32 2147483647, %v5383_v11 }
0x1b14   : > { %v5402_v6 = vor.u32 1.1754944e-38, %v5401_v15  ;;  %vm5400_vm12 = vcmp.eq.f32.partialorder %v5399_v19, 8.507059e+37 }
0x1b18   : > { %v7411_v18 = vpop.eup %7410 }
0x1b19   : > { %v5391_v59 = vmul.f32 %v7411_v18, %v5383_v11  ;;  %vm5396_vm11 = vweird.f32 %v7411_v18 }
0x1b1a   : > { %vm5397_vm2 = vmor %vm5395_vm15, %vm5396_vm11 }
0x1b1b   : > { %v5392_v39 = vsub.f32 1.0, %v5391_v59 }
0x1b1d   : > { %v5393_v17 = vmul.f32 %v7411_v18, %v5392_v39 }
0x1b1f   : > { %v5394_v16 = vadd.f32 %v7411_v18, %v5393_v17 }
0x1b21   : > { %v5398_v56 = vsel %vm5397_vm2, %v7411_v18, %v5394_v16 }
0x1b22   : > { %v5403_v48 = vsel %vm5400_vm12, %v5402_v6, %v5398_v56 }
0x1b30   : > { %v5374_v13 = vpop.f32.mrf.mxu0 }
0x1b31   : > { %v5404_v5 = vmul.f32 %v5403_v48, %v5374_v13  ;;  %v5388_v50 = vpop.permute.xlu1 %5387 }
0x1b32   : > { %7412 = vrcp.f32 %v5388_v50  ;;  %v5416_v58 = vand.u32 2147483648, %v5388_v50  ;;  %v5414_v9 = vand.u32 2147483647, %v5388_v50  ;;  %vm5410_vm14 = vweird.f32 %v5388_v50 }
0x1b33   : > { %v5437_v42 = vsel %vm639_vm5, %v5404_v5, 0.0 }
0x1b34   : > { %5438 = vadd.xlane.f32.xlu2 %v5437_v42  ;;  %v5417_v32 = vor.u32 1.1754944e-38, %v5416_v58  ;;  %vm5415_vm4 = vcmp.eq.f32.partialorder %v5414_v9, 8.507059e+37  ;;  %v5423_v58 = vld [vmem:[%s11015_s0 + $0x270] sm:$0xff]  ;;  %v5421_v9 = vld [vmem:[%s11015_s0 + $0x260] sm:$0xff] }
0x1b35   : > { %5527 = vmatpush.msrb.mxu0 %v5423_v58 }
0x1b38   : > { %v7413_v25 = vpop.eup %7412  ;;  %v5377_v53 = vpop.f32.mrf.mxu0 }
0x1b39   : > { %v5406_v0 = vmul.f32 %v7413_v25, %v5388_v50  ;;  %vm5411_vm3 = vweird.f32 %v7413_v25 }
0x1b3a   : > { %vm5412_vm13 = vmor %vm5410_vm14, %vm5411_vm3 }
0x1b3b   : > { %v5407_v24 = vsub.f32 1.0, %v5406_v0 }
0x1b3d   : > { %v5408_v34 = vmul.f32 %v7413_v25, %v5407_v24 }
0x1b3f   : > { %v5409_v52 = vadd.f32 %v7413_v25, %v5408_v34  ;;  %v5422_v34 = vld [vmem:[%s11015_s0 + $0x268] sm:$0xff] }
0x1b40   : > { %5528 = vmatpush.msrb.mxu0 %v5422_v34 }
0x1b41   : > { %v5413_v12 = vsel %vm5412_vm13, %v7413_v25, %v5409_v52 }
0x1b42   : > { %v5418_v37 = vsel %vm5415_vm4, %v5417_v32, %v5413_v12  ;;  %5529 = vmatpush.msrb.mxu0 %v5421_v9 }
0x1b43   : > { %v5419_v45 = vmul.f32 %v5418_v37, %v5377_v53 }
0x1b45   : > { %v5440_v40 = vsel %vm639_vm5, %v5419_v45, 0.0 }
0x1b46   : > { %5441 = vadd.xlane.f32.xlu0 %v5440_v40 }
0x1b5c   : > { %v5434_v20 = vpop.xlane.xlu1 %5433 }
0x1ba7   : > { %v5439_v44 = vpop.xlane.xlu2 %5438 }
0x1ba8   : > { %v5443_v30 = vadd.f32 %v5439_v44, %v5431_v29 }
0x1baa   : > { %v5445_v22 = vmul.f32 %v5443_v30, %v9659_v1  ;;  %v5427_v30 = vld [vmem:[%s11015_s0 + $0x290] sm:$0xff] }
0x1bac   : > { %v5447_v27 = vsub.f32 %v9742_v60, %v5445_v22  ;;  %v10436_v41 = vsub.f32 %v5404_v5, %v5445_v22  ;;  %v5426_v22 = vld [vmem:[%s11015_s0 + $0x288] sm:$0xff] }
0x1bae   : > { %v5449_v10 = vmul.f32 %v5447_v27, %v5447_v27  ;;  %v5469_v31 = vmul.f32 %v10436_v41, %v10436_v41 }
0x1bb0   : > { %5453 = vrot.lane.b32.xlu2 %v5449_v10, %s7575_s20  ;;  %v5471_v3 = vsel %vm639_vm5, %v5469_v31, 0.0  ;;  %v5424_v10 = vld [vmem:[%s11015_s0 + $0x278] sm:$0xff] }
0x1bb1   : > { %5472 = vadd.xlane.f32.xlu0 %v5471_v3 }
0x1bb9   : > { %v5442_v62 = vpop.xlane.xlu0 %5441 }
0x1bba   : > { %v5444_v36 = vadd.f32 %v5442_v62, %v5434_v20  ;;  %v5579_v62 = vld [vmem:[%s11016_s1 + $0xd8] sm:$0xff] }
0x1bbb   : > { %5629 = vmatpush.msra.mxu3 %v5579_v62 }
0x1bbc   : > { %v5446_v2 = vmul.f32 %v5444_v36, %v9659_v1  ;;  %v5578_v36 = vld [vmem:[%s11016_s1 + $0xd0] sm:$0xff] }
0x1bbd   : > { %5630 = vmatpush.msra.mxu3 %v5578_v36 }
0x1bbe   : > { %v5448_v35 = vsub.f32 %v9736_v8, %v5446_v2  ;;  %v10445_v60 = vsub.f32 %v5419_v45, %v5446_v2  ;;  %v5577_v2 = vld [vmem:[%s11016_s1 + $0xc8] sm:$0xff] }
0x1bbf   : > { %5631 = vmatpush.msra.mxu3 %v5577_v2 }
0x1bc0   : > { %v5450_v49 = vmul.f32 %v5448_v35, %v5448_v35  ;;  %v5470_v21 = vmul.f32 %v10445_v60, %v10445_v60 }
0x1bc2   : > { %5455 = vrot.lane.b32.xlu1 %v5450_v49, %s7575_s20  ;;  %v5474_v7 = vsel %vm639_vm5, %v5470_v21, 0.0 }
0x1bd9   : > { %5475 = vadd.xlane.f32.xlu2 %v5474_v7 }
0x1bf1   : > { %5857 = vrot.lane.b32.xlu2 %v10359_v33, %s7575_s20 }
0x1c0a   : > { %v5454_v46 = vpop.permute.xlu2 %5453 }
0x1c0b   : > { %v5459_v14 = vsel %vm639_vm5, %v5454_v46, 0.0 }
0x1c0c   : > { %5460 = vadd.xlane.f32.xlu0 %v5459_v14 }
0x1c24   : > { %v5473_v18 = vpop.xlane.xlu0 %5472 }
0x1c34   : > { %v5456_v57 = vpop.permute.xlu1 %5455 }
0x1c35   : > { %v5462_v8 = vsel %vm639_vm5, %v5456_v57, 0.0 }
0x1c36   : > { %5463 = vadd.xlane.f32.xlu0 %v5462_v8 }
0x1c4c   : > { %v5476_v38 = vpop.xlane.xlu2 %5475 }
0x1c54   : > { %v5858_v51 = vpop.permute.xlu2 %5857 }
0x1c55   : > { %v5881_v11 = vsel %vm639_vm5, %v5858_v51, 0.0 }
0x1c56   : > { %5882 = vadd.xlane.f32.xlu2 %v5881_v11  ;;  %v5605_v11 = vpop.f32.mrf.mxu2 }
0x1c6e   : > { %5869 = vrot.lane.b32.xlu2 %v10389_v61, %s7575_s20 }
0x1c7f   : > { %v5461_v59 = vpop.xlane.xlu0 %5460 }
0x1c80   : > { %v5477_v39 = vadd.f32 %v5473_v18, %v5461_v59  ;;  %v5608_v59 = vpop.f32.mrf.mxu2 }
0x1c82   : > { %v5479_v17 = vmul.f32 %v5477_v39, %v9659_v1 }
0x1c84   : > { %v5481_v16 = vadd.f32 1e-05, %v5479_v17 }
0x1c86   : > { %7414 = vrsqrt.f32 %v5481_v16  ;;  %vm5489_vm7 = vweird.f32 %v5481_v16 }
0x1c8c   : > { %v7415_v15 = vpop.eup %7414 }
0x1c8d   : > { %v5484_v19 = vmul.f32 %v7415_v15, %v5481_v16  ;;  %vm5490_vm6 = vweird.f32 %v7415_v15 }
0x1c8e   : > { %vm5491_vm8 = vmor %vm5489_vm7, %vm5490_vm6 }
0x1c8f   : > { %v5485_v56 = vmul.f32 %v7415_v15, %v5484_v19 }
0x1c91   : > { %v5486_v6 = vmul.f32 0.5, %v5485_v56 }
0x1c93   : > { %v5487_v13 = vsub.f32 1.5, %v5486_v6 }
0x1c95   : > { %v5488_v48 = vmul.f32 %v7415_v15, %v5487_v13 }
0x1c97   : > { %v5492_v5 = vsel %vm5491_vm8, %v7415_v15, %v5488_v48 }
0x1c98   : > { %v5503_v50 = vmul.f32 %v5492_v5, %v5447_v27  ;;  %v5425_v27 = vld [vmem:[%s11015_s0 + $0x280] sm:$0xff]  ;;  %v5541_v3 = vmul.f32 %v5492_v5, %v10436_v41 }
0x1c99   : > { %v5576_v41 = vld [vmem:[%s11016_s1 + $0xc0] sm:$0xff] }
0x1c9a   : > { %5507 = vrot.lane.b32.xlu0 %v5503_v50, %s7575_s20  ;;  %5632 = vmatpush.msra.mxu3 %v5576_v41 }
0x1ca9   : > { %v5464_v42 = vpop.xlane.xlu0 %5463 }
0x1caa   : > { %v5478_v25 = vadd.f32 %v5476_v38, %v5464_v42 }
0x1cac   : > { %v5480_v0 = vmul.f32 %v5478_v25, %v9659_v1  ;;  %v5420_v1 = vld [vmem:[%s11015_s0 + $0x258] sm:$0xff] }
0x1cad   : > { %5530 = vmatpush.msrb.mxu0 %v5420_v1 }
0x1cae   : > { %v5482_v24 = vadd.f32 1e-05, %v5480_v0 }
0x1caf   : > { %5561 = vmatpush.msra.mxu0 %v5427_v30 }
0x1cb0   : > { %7416 = vrsqrt.f32 %v5482_v24  ;;  %vm5499_vm1 = vweird.f32 %v5482_v24 }
0x1cb1   : > { %5562 = vmatpush.msra.mxu0 %v5426_v22 }
0x1cb3   : > { %5563 = vmatpush.msra.mxu0 %v5425_v27 }
0x1cb5   : > { %5564 = vmatpush.msra.mxu0 %v5424_v10 }
0x1cb6   : > { %v7417_v52 = vpop.eup %7416 }
0x1cb7   : > { %v5494_v53 = vmul.f32 %v7417_v52, %v5482_v24  ;;  %vm5500_vm9 = vweird.f32 %v7417_v52 }
0x1cb8   : > { %vm5501_vm10 = vmor %vm5499_vm1, %vm5500_vm9 }
0x1cb9   : > { %v5495_v32 = vmul.f32 %v7417_v52, %v5494_v53 }
0x1cbb   : > { %v5496_v12 = vmul.f32 0.5, %v5495_v32 }
0x1cbd   : > { %v5497_v37 = vsub.f32 1.5, %v5496_v12 }
0x1cbf   : > { %v5498_v45 = vmul.f32 %v7417_v52, %v5497_v37 }
0x1cc1   : > { %v5502_v40 = vsel %vm5501_vm10, %v7417_v52, %v5498_v45 }
0x1cc2   : > { %v5504_v29 = vmul.f32 %v5502_v40, %v5448_v35  ;;  %v5542_v20 = vmul.f32 %v5502_v40, %v10445_v60  ;;  %v7115_v60 = vld [vmem:[%s11015_s0 + $0x298] ss:$0 sm:$0xff] }
0x1cc4   : > { %5509 = vrot.lane.b32.xlu1 %v5504_v29, %s7575_s20 }
0x1d0c   : > { %v5508_v44 = vpop.permute.xlu0 %5507 }
0x1d0d   : > { %6937 = vmatmul.msk.f32.vlgmr.msrb.gmra.mxu0 %vm639_vm5, %v5508_v44 }
0x1d36   : > { %v5510_v31 = vpop.permute.xlu1 %5509 }
0x1d37   : > { %6938 = vmatmul.msk.f32.gmra.mxu0 %vm639_vm5, %v5510_v31 }
0x1d3f   : > { %6939 = vmatmul.msk.f32.vlgmr.msra.gmra.mxu0 %vm639_vm5, %v5541_v3 }
0x1d47   : > { %6940 = vmatmul.msk.f32.gmra.mxu0 %vm639_vm5, %v5542_v20 }
0x1d8a   : > { %v5532_v35 = vpop.f32.mrf.mxu0 }
0x1d8b   : > { %v5539_v21 = vadd.f32 %v7115_v60, %v5532_v35 }
0x1db4   : > { %v5535_v49 = vpop.f32.mrf.mxu0 }
0x1db5   : > { %v5540_v57 = vadd.f32 %v7115_v60, %v5535_v49 }
0x1dbc   : > { %v5566_v7 = vpop.f32.mrf.mxu0 }
0x1dbd   : > { %v5572_v46 = vadd.f32 %v5566_v7, %v5539_v21 }
0x1dbf   : > { %v5574_v14 = vmax.f32 %v5572_v46, 0.0 }
0x1dc1   : > { %6943 = vmatmul.msk.f32.vlgmr.msra.gmra.mxu3 %vm639_vm5, %v5574_v14 }
0x1dc4   : > { %v5569_v8 = vpop.f32.mrf.mxu0 }
0x1dc5   : > { %v5573_v38 = vadd.f32 %v5569_v8, %v5540_v57 }
0x1dc7   : > { %v5575_v51 = vmax.f32 %v5573_v38, 0.0  ;;  %v10530_v38 = vpop.xlane.xlu2 %5882 }
0x1dc9   : > { %6944 = vmatmul.msk.f32.gmra.mxu3 %vm639_vm5, %v5575_v51 }
0x1e44   : > { %v5634_v18 = vpop.f32.mrf.mxu3 }
0x1e45   : > { %v5635_v16 = vadd.f32 %v5634_v18, %v5605_v11  ;;  %v5870_v18 = vpop.permute.xlu2 %5869 }
0x1e47   : > { %v6945_v6 = vmul.f32 -1.442695, %v5635_v16 }
0x1e4c   : > { %v5637_v39 = vpop.f32.mrf.mxu3 }
0x1e4d   : > { %v5638_v17 = vadd.f32 %v5637_v39, %v5608_v59  ;;  %v5899_v59 = vsel %vm639_vm5, %v5870_v18, 0.0 }
0x1e4f   : > { %7418 = vtanh.f32 %v5638_v17  ;;  %v6946_v56 = vmul.f32 -1.442695, %v5638_v17 }
0x1e50   : > { %7420 = vtanh.f32 %v5635_v16 }
0x1e51   : > { %7422 = vpow2.f32 %v6946_v56 }
0x1e52   : > { %7424 = vpow2.f32 %v6945_v6 }
0x1e55   : > { %v7419_v15 = vpop.eup %7418 }
0x1e56   : > { %5686 = vrot.lane.b32.xlu1 %v7419_v15, %s7574_s19  ;;  %v7421_v19 = vpop.eup %7420  ;;  %v7488_v15 = vld [vmem:[%s11017_s2] sm:$0xff] }
0x1e57   : > { %v7423_v13 = vpop.eup %7422 }
0x1e58   : > { %v5647_v48 = vadd.f32 1.0, %v7423_v13  ;;  %v7425_v5 = vpop.eup %7424  ;;  %v7490_v13 = vld [vmem:[%s11017_s2 + $0x8] sm:$0xff] }
0x1e59   : > { %v5646_v50 = vadd.f32 1.0, %v7425_v5 }
0x1e5a   : > { %7426 = vrcp.f32 %v5647_v48  ;;  %v5674_v1 = vand.u32 2147483648, %v5647_v48  ;;  %vm5668_vm15 = vweird.f32 %v5647_v48  ;;  %v5672_v53 = vand.u32 2147483647, %v5647_v48 }
0x1e5b   : > { %7428 = vrcp.f32 %v5646_v50  ;;  %v5659_v30 = vand.u32 2147483648, %v5646_v50  ;;  %vm5653_vm14 = vweird.f32 %v5646_v50  ;;  %v5657_v22 = vand.u32 2147483647, %v5646_v50 }
0x1e5c   : > { %v5675_v37 = vor.u32 1.1754944e-38, %v5674_v1  ;;  %vm5673_vm12 = vcmp.eq.f32.partialorder %v5672_v53, 8.507059e+37  ;;  %v7496_v1 = vld [vmem:[%s11017_s2 + $0x20] sm:$0xff] }
0x1e5d   : > { %v5660_v10 = vor.u32 1.1754944e-38, %v5659_v30  ;;  %vm5658_vm4 = vcmp.eq.f32.partialorder %v5657_v22, 8.507059e+37  ;;  %v7497_v53 = vld [vmem:[%s11017_s2 + $0x60] sm:$0xff] }
0x1e5e   : > { %5684 = vrot.lane.b32.xlu1 %v7421_v19, %s7574_s19  ;;  %v7489_v19 = vld [vmem:[%s11017_s2 + $0x40] sm:$0xff] }
0x1e60   : > { %v7427_v42 = vpop.eup %7426 }
0x1e61   : > { %v5664_v25 = vmul.f32 %v7427_v42, %v5647_v48  ;;  %v7429_v24 = vpop.eup %7428  ;;  %vm5669_vm11 = vweird.f32 %v7427_v42  ;;  %v7491_v48 = vld [vmem:[%s11017_s2 + $0x48] sm:$0xff] }
0x1e62   : > { %v5649_v34 = vmul.f32 %v7429_v24, %v5646_v50  ;;  %vm5670_vm2 = vmor %vm5668_vm15, %vm5669_vm11  ;;  %vm5654_vm3 = vweird.f32 %v7429_v24 }
0x1e63   : > { %v5665_v0 = vsub.f32 1.0, %v5664_v25  ;;  %vm5655_vm13 = vmor %vm5653_vm14, %vm5654_vm3  ;;  %v7493_v25 = vld [vmem:[%s11017_s2 + $0x50] sm:$0xff] }
0x1e64   : > { %v5650_v52 = vsub.f32 1.0, %v5649_v34  ;;  %v7495_v34 = vld [vmem:[%s11017_s2 + $0x58] sm:$0xff] }
0x1e65   : > { %v5666_v58 = vmul.f32 %v7427_v42, %v5665_v0 }
0x1e66   : > { %v5651_v12 = vmul.f32 %v7429_v24, %v5650_v52 }
0x1e67   : > { %v5667_v9 = vadd.f32 %v7427_v42, %v5666_v58  ;;  %v7494_v58 = vld [vmem:[%s11017_s2 + $0x18] sm:$0xff] }
0x1e68   : > { %v5652_v44 = vadd.f32 %v7429_v24, %v5651_v12  ;;  %v7499_v12 = vld [vmem:[%s11017_s2 + $0x68] sm:$0xff] }
0x1e69   : > { %v5671_v32 = vsel %vm5670_vm2, %v7427_v42, %v5667_v9  ;;  %v7492_v42 = vld [vmem:[%s11017_s2 + $0x10] sm:$0xff] }
0x1e6a   : > { %v5676_v40 = vsel %vm5673_vm12, %v5675_v37, %v5671_v32  ;;  %v5656_v27 = vsel %vm5655_vm13, %v7429_v24, %v5652_v44  ;;  %v7498_v32 = vld [vmem:[%s11017_s2 + $0x28] sm:$0xff]  ;;  %v7500_v37 = vld [vmem:[%s11017_s2 + $0x30] sm:$0xff] }
0x1e6b   : > { %v5661_v31 = vsel %vm5658_vm4, %v5660_v10, %v5656_v27  ;;  %v5681_v62 = vmul.f32 %v5676_v40, %v9720_v55 }
0x1e6c   : > { %v5680_v41 = vmul.f32 %v5661_v31, %v9724_v43 }
0x1ec8   : > { %v5687_v45 = vpop.permute.xlu1 %5686 }
0x1ec9   : > { %v5691_v29 = vmul.f32 %v5687_v45, %v5676_v40  ;;  %v7501_v45 = vld [vmem:[%s11017_s2 + $0x70] sm:$0xff] }
0x1ecb   : > { %5696 = vrot.lane.b32.xlu0 %v5691_v29, %s7575_s20  ;;  %v7503_v29 = vld [vmem:[%s11017_s2 + $0x78] sm:$0xff] }
0x1ed0   : > { %v5685_v3 = vpop.permute.xlu1 %5684 }
0x1ed1   : > { %v5690_v20 = vmul.f32 %v5685_v3, %v5661_v31 }
0x1ed3   : > { %5694 = vrot.lane.b32.xlu1 %v5690_v20, %s7575_s20 }
0x1f3d   : > { %v5697_v36 = vpop.permute.xlu0 %5696 }
0x1f3e   : > { %v5701_v2 = vadd.f32 %v5697_v36, %v5681_v62 }
0x1f40   : > { %7430 = vtanh.f32 %v5701_v2 }
0x1f45   : > { %v5695_v35 = vpop.permute.xlu1 %5694 }
0x1f46   : > { %v7431_v49 = vpop.eup %7430  ;;  %v5700_v60 = vadd.f32 %v5695_v35, %v5680_v41 }
0x1f47   : > { %5708 = vrot.lane.b32.xlu0 %v7431_v49, %s7574_s19 }
0x1f48   : > { %7432 = vtanh.f32 %v5700_v60 }
0x1f4e   : > { %v7433_v21 = vpop.eup %7432 }
0x1f4f   : > { %5706 = vrot.lane.b32.xlu1 %v7433_v21, %s7574_s19  ;;  %s299_s19 = sand.u32 1, %s7558_s25  }
0x1f50   : > { %s6694_s21 = sshll.u32 %s299_s19, 6  ;;  %s6589_s16 = scalar_lea.sflag [#allocation3], %s299_s19 }
0x1f57   : > { %5859 = vrot.lane.b32.xlu1 %v10362_v47, %s7575_s20 }
0x1f5f   : > { %5863 = vrot.lane.b32.xlu1 %v10374_v23, %s7575_s20 }
0x1fb9   : > { %v5709_v55 = vpop.permute.xlu0 %5708 }
0x1fba   : > { %v5713_v46 = vmul.f32 %v5709_v55, %v5676_v40  ;;  %v7502_v40 = vld [vmem:[%s11017_s2 + $0x38] sm:$0xff] }
0x1fc1   : > { %v5707_v7 = vpop.permute.xlu1 %5706 }
0x1fc2   : > { %v5712_v14 = vmul.f32 %v5707_v7, %v5661_v31 }
0x1fc4   : > { %v7102_v43 = vpack.i.bf16 %v5712_v14, %v5713_v46 }
0x1fc6   : > { %7103 = vrot.lane.b32.xlu0 %v7102_v43, %s7575_s20 }
0x1fc9   : > { %v5860_v57 = vpop.permute.xlu1 %5859 }
0x1fca   : > { %v5884_v8 = vsel %vm639_vm5, %v5860_v57, 0.0 }
0x1fcb   : > { %5885 = vadd.xlane.f32.xlu1 %v5884_v8 }
0x1fce   : > { %5861 = vrot.lane.b32.xlu0 %v10365_v54, %s7575_s20 }
0x1fd1   : > { %v5864_v51 = vpop.permute.xlu1 %5863 }
0x1fd2   : > { %v5890_v11 = vsel %vm639_vm5, %v5864_v51, 0.0 }
0x1fd6   : > { %5865 = vrot.lane.b32.xlu0 %v10380_v28, %s7575_s20 }
0x1fde   : > { %5867 = vrot.lane.b32.xlu0 %v10377_v63, %s7575_s20 }
0x1fe6   : > { %5871 = vrot.lane.b32.xlu0 %v10394_v4, %s7575_s20 }
0x2010   : > { %5891 = vadd.xlane.f32.xlu0 %v5890_v11 }
0x2018   : > { %5900 = vadd.xlane.f32.xlu0 %v5899_v59 }
0x2038   : > { %v7104_v39 = vpop.permute.xlu0 %7103 }
0x2039   : > { %v7105_v17 = vunpack.i.l.bf16 %v7104_v39  ;;  %v7106_v16 = vunpack.i.h.bf16 %v7104_v39 }
0x203b   : > { %5744 = vmatpush.msrb.mxu1 %v7105_v17  ;;  %5785 = vmatpush.msrb.mxu0 %v7105_v17 }
0x203d   : > { %5745 = vmatpush.msrb.mxu1 %v7106_v16  ;;  %5786 = vmatpush.msrb.mxu0 %v7106_v16 }
0x203e   : > { %6947 = vmatmul.msk.f32.vlgmr.msrb.gmra.mxu1 %vm742_vm0, %v7488_v15  ;;  %6955 = vmatmul.msk.f32.vlgmr.msrb.gmra.mxu0 %vm742_vm0, %v7489_v19 }
0x2040   : > { %v5862_v56 = vpop.permute.xlu0 %5861 }
0x2041   : > { %v5887_v6 = vsel %vm639_vm5, %v5862_v56, 0.0  ;;  %v5886_v56 = vpop.xlane.xlu1 %5885 }
0x2042   : > { %5888 = vadd.xlane.f32.xlu1 %v5887_v6 }
0x2046   : > { %6948 = vmatmul.msk.f32.gmra.mxu1 %vm742_vm0, %v7490_v13  ;;  %6956 = vmatmul.msk.f32.gmra.mxu0 %vm742_vm0, %v7491_v48 }
0x2048   : > { %v5866_v5 = vpop.permute.xlu0 %5865 }
0x2049   : > { %v5893_v50 = vsel %vm639_vm5, %v5866_v5, 0.0 }
0x204a   : > { %5894 = vadd.xlane.f32.xlu1 %v5893_v50 }
0x204e   : > { %6949 = vmatmul.msk.f32.gmra.mxu1 %vm742_vm0, %v7492_v42  ;;  %6957 = vmatmul.msk.f32.gmra.mxu0 %vm742_vm0, %v7493_v25 }
0x2050   : > { %v5868_v0 = vpop.permute.xlu0 %5867 }
0x2051   : > { %v5896_v24 = vsel %vm639_vm5, %v5868_v0, 0.0 }
0x2052   : > { %5897 = vadd.xlane.f32.xlu1 %v5896_v24 }
0x2056   : > { %6950 = vmatmul.msk.f32.gmra.mxu1 %vm742_vm0, %v7494_v58  ;;  %6958 = vmatmul.msk.f32.gmra.mxu0 %vm742_vm0, %v7495_v34 }
0x2058   : > { %v5872_v9 = vpop.permute.xlu0 %5871 }
0x2059   : > { %v5902_v52 = vsel %vm639_vm5, %v5872_v9, 0.0 }
0x205a   : > { %5903 = vadd.xlane.f32.xlu2 %v5902_v52 }
0x205e   : > { %6951 = vmatmul.msk.f32.gmra.mxu1 %vm742_vm0, %v7496_v1  ;;  %6959 = vmatmul.msk.f32.gmra.mxu0 %vm742_vm0, %v7497_v53 }
0x2066   : > { %6952 = vmatmul.msk.f32.gmra.mxu1 %vm742_vm0, %v7498_v32  ;;  %6960 = vmatmul.msk.f32.gmra.mxu0 %vm742_vm0, %v7499_v12 }
0x206e   : > { %6953 = vmatmul.msk.f32.gmra.mxu1 %vm742_vm0, %v7500_v37  ;;  %6961 = vmatmul.msk.f32.gmra.mxu0 %vm742_vm0, %v7501_v45 }
0x2076   : > { %6954 = vmatmul.msk.f32.gmra.mxu1 %vm742_vm0, %v7502_v40  ;;  %6962 = vmatmul.msk.f32.gmra.mxu0 %vm742_vm0, %v7503_v29 }
0x2083   : > { %v5892_v13 = vpop.xlane.xlu0 %5891 }
0x208b   : > { %v5901_v5 = vpop.xlane.xlu0 %5900 }
0x20b5   : > { %v5889_v6 = vpop.xlane.xlu1 %5888 }
0x20bb   : > { %v5747_v44 = vpop.f32.mrf.mxu1  ;;  %v5788_v30 = vpop.f32.mrf.mxu0 }
0x20bc   : > { %v5817_v22 = vsel %vm639_vm5, %v5747_v44, 0.0  ;;  %v5913_v27 = vsel %vm639_vm5, %v5788_v30, 0.0 }
0x20bd   : > { %5818 = vadd.xlane.f32.xlu1 %v5817_v22  ;;  %5914 = vadd.xlane.f32.xlu0 %v5913_v27  ;;  %v5895_v48 = vpop.xlane.xlu1 %5894 }
0x20c3   : > { %v10604_v10 = vpop.f32.mrf.mxu1  ;;  %v10606_v31 = vpop.f32.mrf.mxu0 }
0x20c4   : > { %v5820_v3 = vsel %vm639_vm5, %v10604_v10, 0.0  ;;  %v5916_v20 = vsel %vm639_vm5, %v10606_v31, 0.0 }
0x20c5   : > { %5821 = vadd.xlane.f32.xlu1 %v5820_v3  ;;  %5917 = vadd.xlane.f32.xlu0 %v5916_v20  ;;  %v10660_v50 = vpop.xlane.xlu1 %5897 }
0x20cb   : > { %v10612_v62 = vpop.f32.mrf.mxu1  ;;  %v10614_v36 = vpop.f32.mrf.mxu0 }
0x20cc   : > { %v5823_v2 = vsel %vm639_vm5, %v10612_v62, 0.0  ;;  %v5919_v41 = vsel %vm639_vm5, %v10614_v36, 0.0 }
0x20cd   : > { %5824 = vadd.xlane.f32.xlu1 %v5823_v2  ;;  %5920 = vadd.xlane.f32.xlu2 %v5919_v41 }
0x20d3   : > { %v10620_v35 = vpop.f32.mrf.mxu1  ;;  %v10622_v49 = vpop.f32.mrf.mxu0 }
0x20d4   : > { %v5826_v60 = vsel %vm639_vm5, %v10620_v35, 0.0  ;;  %v5922_v21 = vsel %vm639_vm5, %v10622_v49, 0.0 }
0x20d5   : > { %5827 = vadd.xlane.f32.xlu1 %v5826_v60 }
0x20db   : > { %v10628_v55 = vpop.f32.mrf.mxu1  ;;  %v10630_v7 = vpop.f32.mrf.mxu0 }
0x20dc   : > { %v5829_v46 = vsel %vm639_vm5, %v10628_v55, 0.0  ;;  %v5925_v8 = vsel %vm639_vm5, %v10630_v7, 0.0 }
0x20dd   : > { %5923 = vadd.xlane.f32.xlu1 %v5922_v21 }
0x20e3   : > { %v10634_v14 = vpop.f32.mrf.mxu1  ;;  %v10636_v43 = vpop.f32.mrf.mxu0 }
0x20e4   : > { %v5832_v57 = vsel %vm639_vm5, %v10634_v14, 0.0  ;;  %v5928_v51 = vsel %vm639_vm5, %v10636_v43, 0.0 }
0x20e5   : > { %5830 = vadd.xlane.f32.xlu1 %v5829_v46  ;;  %5833 = vadd.xlane.f32.xlu2 %v5832_v57 }
0x20eb   : > { %v10644_v11 = vpop.f32.mrf.mxu1  ;;  %v10646_v18 = vpop.f32.mrf.mxu0 }
0x20ec   : > { %v5835_v59 = vsel %vm639_vm5, %v10644_v11, 0.0  ;;  %v5931_v17 = vsel %vm639_vm5, %v10646_v18, 0.0 }
0x20ed   : > { %5926 = vadd.xlane.f32.xlu1 %v5925_v8  ;;  %5929 = vadd.xlane.f32.xlu2 %v5928_v51 }
0x20f3   : > { %v10650_v39 = vpop.f32.mrf.mxu1  ;;  %v10656_v15 = vpop.f32.mrf.mxu0 }
0x20f4   : > { %v5838_v16 = vsel %vm639_vm5, %v10650_v39, 0.0  ;;  %v5934_v19 = vsel %vm639_vm5, %v10656_v15, 0.0 }
0x20f5   : > { %5836 = vadd.xlane.f32.xlu1 %v5835_v59  ;;  %5839 = vadd.xlane.f32.xlu0 %v5838_v16 }
0x20f6   : > { %5932 = vadd.xlane.f32.xlu2 %v5931_v17 }
0x20fd   : > { %5935 = vadd.xlane.f32.xlu0 %v5934_v19 }
0x2130   : > { %v5819_v42 = vpop.xlane.xlu1 %5818  ;;  %v5915_v25 = vpop.xlane.xlu0 %5914 }
0x2131   : > { %v5905_v0 = vadd.f32 %v10530_v38, %v5819_v42 }
0x2133   : > { %v5937_v24 = vadd.f32 %v5915_v25, %v5905_v0 }
0x2135   : > { %v5945_v58 = vmul.f32 %v5937_v24, %v9170_v26 }
0x2137   : > { %v10665_v34 = vsub.f32 %v10359_v33, %v5945_v58  ;;  %v10667_v9 = vsub.f32 %v5788_v30, %v5945_v58  ;;  %v10669_v52 = vsub.f32 %v5747_v44, %v5945_v58  ;;  %v5904_v44 = vpop.xlane.xlu2 %5903 }
0x2138   : > { %v5822_v1 = vpop.xlane.xlu1 %5821  ;;  %v5918_v53 = vpop.xlane.xlu0 %5917 }
0x2139   : > { %v5906_v32 = vadd.f32 %v5886_v56, %v5822_v1  ;;  %v6009_v12 = vmul.f32 %v10665_v34, %v10665_v34  ;;  %v6089_v37 = vmul.f32 %v10667_v9, %v10667_v9  ;;  %v5961_v38 = vmul.f32 %v10669_v52, %v10669_v52 }
0x213b   : > { %v5938_v45 = vadd.f32 %v5918_v53, %v5906_v32  ;;  %6025 = vrot.lane.b32.xlu1 %v6009_v12, %s7575_s20  ;;  %v6097_v33 = vsel %vm639_vm5, %v6089_v37, 0.0  ;;  %v5969_v40 = vsel %vm639_vm5, %v5961_v38, 0.0 }
0x213c   : > { %6098 = vadd.xlane.f32.xlu2 %v6097_v33  ;;  %5970 = vadd.xlane.f32.xlu0 %v5969_v40 }
0x213d   : > { %v5946_v29 = vmul.f32 %v5938_v45, %v9170_v26 }
0x213f   : > { %v10682_v30 = vsub.f32 %v10604_v10, %v5946_v29  ;;  %v10688_v21 = vsub.f32 %v10362_v47, %v5946_v29  ;;  %v10733_v38 = vsub.f32 %v10606_v31, %v5946_v29 }
0x2140   : > { %v5825_v22 = vpop.xlane.xlu1 %5824  ;;  %v5921_v2 = vpop.xlane.xlu2 %5920 }
0x2141   : > { %v5962_v27 = vmul.f32 %v10682_v30, %v10682_v30  ;;  %v5907_v20 = vadd.f32 %v5889_v6, %v5825_v22  ;;  %v6010_v59 = vmul.f32 %v10688_v21, %v10688_v21 }
0x2143   : > { %v5972_v3 = vsel %vm639_vm5, %v5962_v27, 0.0  ;;  %v5939_v60 = vadd.f32 %v5921_v2, %v5907_v20 }
0x2144   : > { %5973 = vadd.xlane.f32.xlu0 %v5972_v3 }
0x2145   : > { %v5947_v46 = vmul.f32 %v5939_v60, %v9170_v26 }
0x2147   : > { %v10692_v51 = vsub.f32 %v10365_v54, %v5947_v46  ;;  %v10728_v37 = vsub.f32 %v10612_v62, %v5947_v46 }
0x2148   : > { %v5828_v41 = vpop.xlane.xlu1 %5827 }
0x2149   : > { %v5908_v57 = vadd.f32 %v5892_v13, %v5828_v41  ;;  %v6011_v47 = vmul.f32 %v10692_v51, %v10692_v51 }
0x2150   : > { %v5924_v8 = vpop.xlane.xlu1 %5923 }
0x2151   : > { %v5940_v10 = vadd.f32 %v5924_v8, %v5908_v57  ;;  %v10756_v8 = vsub.f32 %v10614_v36, %v5947_v46 }
0x2153   : > { %v5948_v17 = vmul.f32 %v5940_v10, %v9170_v26 }
0x2154   : > { %6027 = vrot.lane.b32.xlu2 %v6010_v59, %s7575_s20 }
0x2155   : > { %v10699_v16 = vsub.f32 %v10374_v23, %v5948_v17 }
0x2157   : > { %v6012_v19 = vmul.f32 %v10699_v16, %v10699_v16 }
0x2158   : > { %v5831_v56 = vpop.xlane.xlu1 %5830  ;;  %v5834_v6 = vpop.xlane.xlu2 %5833  ;;  %6029 = vrot.lane.b32.xlu0 %v6011_v47, %s7575_s20 }
0x2159   : > { %6031 = vrot.lane.b32.xlu1 %v6012_v19, %s7575_s20  ;;  %v5909_v54 = vadd.f32 %v5895_v48, %v5831_v56  ;;  %v5910_v22 = vadd.f32 %v10660_v50, %v5834_v6  ;;  %v10773_v19 = vsub.f32 %v10622_v49, %v5948_v17 }
0x2160   : > { %v5927_v13 = vpop.xlane.xlu1 %5926  ;;  %v5930_v25 = vpop.xlane.xlu2 %5929 }
0x2161   : > { %v5941_v42 = vadd.f32 %v5927_v13, %v5909_v54  ;;  %v5942_v3 = vadd.f32 %v5930_v25, %v5910_v22 }
0x2163   : > { %v10708_v0 = vmul.f32 %v5941_v42, %v9170_v26  ;;  %v5950_v2 = vmul.f32 %v5942_v3, %v9170_v26 }
0x2165   : > { %v10712_v23 = vsub.f32 %v10380_v28, %v10708_v0  ;;  %v10743_v29 = vsub.f32 %v10377_v63, %v5950_v2  ;;  %v6091_v63 = vmul.f32 %v10756_v8, %v10756_v8  ;;  %v10765_v59 = vsub.f32 %v10634_v14, %v5950_v2 }
0x2166   : > { %v6092_v14 = vmul.f32 %v10773_v19, %v10773_v19  ;;  %v10787_v49 = vsub.f32 %v10628_v55, %v10708_v0 }
0x2167   : > { %v6013_v24 = vmul.f32 %v10712_v23, %v10712_v23  ;;  %v6014_v60 = vmul.f32 %v10743_v29, %v10743_v29  ;;  %v6103_v10 = vsel %vm639_vm5, %v6091_v63, 0.0  ;;  %v5966_v36 = vmul.f32 %v10765_v59, %v10765_v59 }
0x2168   : > { %v5837_v58 = vpop.xlane.xlu1 %5836  ;;  %v5840_v45 = vpop.xlane.xlu0 %5839  ;;  %v6106_v54 = vsel %vm639_vm5, %v6092_v14, 0.0  ;;  %v5715_v14 = vld [vmem:[%s11015_s0 + $0x2a8] sm:$0xff] }
0x2169   : > { %v5911_v1 = vadd.f32 %v5901_v5, %v5837_v58  ;;  %6033 = vrot.lane.b32.xlu1 %v6013_v24, %s7575_s20  ;;  %v5933_v53 = vpop.xlane.xlu2 %5932  ;;  %v5963_v5 = vmul.f32 %v10728_v37, %v10728_v37  ;;  %v5912_v27 = vadd.f32 %v5904_v44, %v5840_v45  ;;  %v10799_v58 = vsub.f32 %v10636_v43, %v5950_v2 }
0x216b   : > { %v5943_v32 = vadd.f32 %v5933_v53, %v5911_v1  ;;  %v5975_v33 = vsel %vm639_vm5, %v5963_v5, 0.0 }
0x216d   : > { %v10718_v48 = vmul.f32 %v5943_v32, %v9170_v26 }
0x216f   : > { %v10722_v12 = vsub.f32 %v10389_v61, %v10718_v48  ;;  %v6090_v61 = vmul.f32 %v10733_v38, %v10733_v38  ;;  %v10778_v56 = vsub.f32 %v10644_v11, %v10718_v48  ;;  %v5965_v11 = vmul.f32 %v10787_v49, %v10787_v49 }
0x2170   : > { %v5936_v62 = vpop.xlane.xlu0 %5935  ;;  %v10814_v45 = vsub.f32 %v10646_v18, %v10718_v48 }
0x2171   : > { %v6015_v28 = vmul.f32 %v10722_v12, %v10722_v12  ;;  %v6100_v40 = vsel %vm639_vm5, %v6090_v61, 0.0  ;;  %v5944_v20 = vadd.f32 %v5936_v62, %v5912_v27  ;;  %v5967_v6 = vmul.f32 %v10778_v56, %v10778_v56 }
0x2172   : > { %v5981_v55 = vsel %vm639_vm5, %v5965_v11, 0.0 }
0x2173   : > { %6037 = vrot.lane.b32.xlu1 %v6015_v28, %s7575_s20  ;;  %v5952_v31 = vmul.f32 %v5944_v20, %v9170_v26  ;;  %v6094_v28 = vmul.f32 %v10799_v58, %v10799_v58 }
0x2175   : > { %v10746_v41 = vsub.f32 %v10394_v4, %v5952_v31  ;;  %v10761_v4 = vsub.f32 %v10620_v35, %v5948_v17  ;;  %v5984_v35 = vsel %vm639_vm5, %v5966_v36, 0.0  ;;  %v5987_v17 = vsel %vm639_vm5, %v5967_v6, 0.0  ;;  %v5721_v36 = vld [vmem:[%s11015_s0 + $0x2f8] sm:$0xff]  ;;  %v5719_v6 = vld [vmem:[%s11015_s0 + $0x2e8] sm:$0xff] }
0x2176   : > { %v10791_v13 = vsub.f32 %v10650_v39, %v5952_v31  ;;  %v10804_v39 = vsub.f32 %v10630_v7, %v10708_v0  ;;  %v6112_v5 = vsel %vm639_vm5, %v6094_v28, 0.0  ;;  %v6095_v0 = vmul.f32 %v10814_v45, %v10814_v45  ;;  %6448 = vmatpush.msra.mxu1 %v5721_v36 }
0x2177   : > { %v6016_v50 = vmul.f32 %v10746_v41, %v10746_v41  ;;  %v5964_v47 = vmul.f32 %v10761_v4, %v10761_v4  ;;  %v10823_v22 = vsub.f32 %v10656_v15, %v5952_v31 }
0x2178   : > { %v5968_v42 = vmul.f32 %v10791_v13, %v10791_v13  ;;  %v6093_v43 = vmul.f32 %v10804_v39, %v10804_v39 }
0x2179   : > { %v5978_v46 = vsel %vm639_vm5, %v5964_v47, 0.0  ;;  %v6096_v18 = vmul.f32 %v10823_v22, %v10823_v22  ;;  %v5717_v47 = vld [vmem:[%s11015_s0 + $0x2b8] sm:$0xff] }
0x217a   : > { %v5990_v1 = vsel %vm639_vm5, %v5968_v42, 0.0  ;;  %v6109_v7 = vsel %vm639_vm5, %v6093_v43, 0.0  ;;  %6269 = vmatpush.msrb.mxu2 %v5717_v47 }
0x217b   : > { %v6118_v27 = vsel %vm639_vm5, %v6096_v18, 0.0 }
0x217d   : > { %5976 = vadd.xlane.f32.xlu2 %v5975_v33 }
0x2182   : > { %6101 = vadd.xlane.f32.xlu0 %v6100_v40  ;;  %v6115_v40 = vsel %vm639_vm5, %v6095_v0, 0.0 }
0x2195   : > { %6035 = vrot.lane.b32.xlu2 %v6014_v60, %s7575_s20 }
0x2196   : > { %6039 = vrot.lane.b32.xlu0 %v6016_v50, %s7575_s20 }
0x21ad   : > { %v6026_v44 = vpop.permute.xlu1 %6025 }
0x21ae   : > { %v6049_v57 = vsel %vm639_vm5, %v6026_v44, 0.0 }
0x21af   : > { %6050 = vadd.xlane.f32.xlu1 %v6049_v57  ;;  %v6099_v53 = vpop.xlane.xlu2 %6098  ;;  %v5971_v32 = vpop.xlane.xlu0 %5970 }
0x21b7   : > { %6104 = vadd.xlane.f32.xlu1 %v6103_v10  ;;  %v6028_v33 = vpop.permute.xlu2 %6027  ;;  %v10819_v61 = vpop.xlane.xlu0 %5973 }
0x21b8   : > { %v6052_v62 = vsel %vm639_vm5, %v6028_v33, 0.0 }
0x21be   : > { %5979 = vadd.xlane.f32.xlu2 %v5978_v46  ;;  %v5716_v46 = vld [vmem:[%s11015_s0 + $0x2b0] sm:$0xff] }
0x21bf   : > { %5985 = vadd.xlane.f32.xlu1 %v5984_v35  ;;  %v5720_v35 = vld [vmem:[%s11015_s0 + $0x2f0] sm:$0xff]  ;;  %6270 = vmatpush.msrb.mxu2 %v5716_v46 }
0x21c0   : > { %6449 = vmatpush.msra.mxu1 %v5720_v35 }
0x21c1   : > { %6271 = vmatpush.msrb.mxu2 %v5715_v14 }
0x21c2   : > { %6450 = vmatpush.msra.mxu1 %v5719_v6 }
0x21c6   : > { %6107 = vadd.xlane.f32.xlu2 %v6106_v54  ;;  %v5714_v54 = vld [vmem:[%s11015_s0 + $0x2a0] sm:$0xff] }
0x21c7   : > { %5988 = vadd.xlane.f32.xlu1 %v5987_v17  ;;  %v5718_v17 = vld [vmem:[%s11015_s0 + $0x2e0] sm:$0xff]  ;;  %6272 = vmatpush.msrb.mxu2 %v5714_v54 }
0x21c8   : > { %6451 = vmatpush.msra.mxu1 %v5718_v17 }
0x21ca   : > { %v6030_v48 = vpop.permute.xlu0 %6029 }
0x21cb   : > { %v6032_v25 = vpop.permute.xlu1 %6031  ;;  %v6055_v3 = vsel %vm639_vm5, %v6030_v48, 0.0 }
0x21cc   : > { %v6058_v24 = vsel %vm639_vm5, %v6032_v25, 0.0 }
0x21cd   : > { %6059 = vadd.xlane.f32.xlu0 %v6058_v24 }
0x21ce   : > { %5982 = vadd.xlane.f32.xlu2 %v5981_v55 }
0x21cf   : > { %5991 = vadd.xlane.f32.xlu1 %v5990_v1 }
0x21d5   : > { %6113 = vadd.xlane.f32.xlu0 %v6112_v5 }
0x21d6   : > { %6110 = vadd.xlane.f32.xlu2 %v6109_v7 }
0x21db   : > { %v6034_v20 = vpop.permute.xlu1 %6033 }
0x21dc   : > { %v6061_v2 = vsel %vm639_vm5, %v6034_v20, 0.0 }
0x21dd   : > { %6116 = vadd.xlane.f32.xlu0 %v6115_v40 }
0x21de   : > { %6053 = vadd.xlane.f32.xlu2 %v6052_v62 }
0x21e5   : > { %6119 = vadd.xlane.f32.xlu0 %v6118_v27  ;;  %v6038_v50 = vpop.permute.xlu1 %6037 }
0x21e6   : > { %6056 = vadd.xlane.f32.xlu2 %v6055_v3  ;;  %v6067_v57 = vsel %vm639_vm5, %v6038_v50, 0.0 }
0x21ee   : > { %6062 = vadd.xlane.f32.xlu2 %v6061_v2 }
0x21f0   : > { %v10831_v15 = vpop.xlane.xlu2 %5976 }
0x21f5   : > { %v6102_v44 = vpop.xlane.xlu0 %6101 }
0x21f8   : > { %v6036_v31 = vpop.permute.xlu2 %6035 }
0x21f9   : > { %v6064_v60 = vsel %vm639_vm5, %v6036_v31, 0.0 }
0x21fa   : > { %6065 = vadd.xlane.f32.xlu2 %v6064_v60 }
0x2202   : > { %6068 = vadd.xlane.f32.xlu2 %v6067_v57 }
0x2208   : > { %v6040_v63 = vpop.permute.xlu0 %6039 }
0x2209   : > { %v6070_v10 = vsel %vm639_vm5, %v6040_v63, 0.0 }
0x220a   : > { %6071 = vadd.xlane.f32.xlu2 %v6070_v10 }
0x2222   : > { %v6051_v11 = vpop.xlane.xlu1 %6050 }
0x2223   : > { %v6073_v42 = vadd.f32 %v6051_v11, %v5971_v32 }
0x2225   : > { %v6121_v25 = vadd.f32 %v6099_v53, %v6073_v42 }
0x2227   : > { %v6129_v24 = vmul.f32 %v6121_v25, %v9170_v26 }
0x2229   : > { %v6137_v55 = vadd.f32 1e-05, %v6129_v24 }
0x222a   : > { %v6105_v17 = vpop.xlane.xlu1 %6104 }
0x222b   : > { %7434 = vrsqrt.f32 %v6137_v55  ;;  %vm6151_vm6 = vweird.f32 %v6137_v55 }
0x2231   : > { %v7435_v1 = vpop.eup %7434  ;;  %v5980_v28 = vpop.xlane.xlu2 %5979 }
0x2232   : > { %v6146_v43 = vmul.f32 %v7435_v1, %v6137_v55  ;;  %vm6152_vm0 = vweird.f32 %v7435_v1 }
0x2233   : > { %vm6153_vm7 = vmor %vm6151_vm6, %vm6152_vm0 }
0x2234   : > { %v6147_v5 = vmul.f32 %v7435_v1, %v6146_v43 }
0x2236   : > { %v6148_v7 = vmul.f32 0.5, %v6147_v5 }
0x2238   : > { %v6149_v0 = vsub.f32 1.5, %v6148_v7 }
0x2239   : > { %v6108_v33 = vpop.xlane.xlu2 %6107 }
0x223a   : > { %v6150_v40 = vmul.f32 %v7435_v1, %v6149_v0 }
0x223c   : > { %v6154_v62 = vsel %vm6153_vm7, %v7435_v1, %v6150_v40 }
0x223d   : > { %v6225_v32 = vmul.f32 %v6154_v62, %v10669_v52  ;;  %v6404_v53 = vmul.f32 %v6154_v62, %v10667_v9  ;;  %v6307_v18 = vmul.f32 %v6154_v62, %v10665_v34 }
0x223f   : > { %6979 = vmatmul.msk.f32.vlgmr.msra.gmra.mxu1 %vm639_vm5, %v6404_v53  ;;  %6323 = vrot.lane.b32.xlu1 %v6307_v18, %s7575_s20 }
0x2240   : > { %6963 = vmatmul.msk.f32.vlgmr.msrb.gmra.mxu2 %vm639_vm5, %v6225_v32  ;;  %v6060_v48 = vpop.xlane.xlu0 %6059 }
0x2241   : > { %v6076_v27 = vadd.f32 %v6060_v48, %v5980_v28  ;;  %v5983_v3 = vpop.xlane.xlu2 %5982 }
0x2243   : > { %v6124_v20 = vadd.f32 %v6108_v33, %v6076_v27  ;;  %v5986_v33 = vpop.xlane.xlu1 %5985 }
0x2245   : > { %v6132_v2 = vmul.f32 %v6124_v20, %v9170_v26 }
0x2247   : > { %v6140_v31 = vadd.f32 1e-05, %v6132_v2 }
0x2248   : > { %v6114_v32 = vpop.xlane.xlu0 %6113 }
0x2249   : > { %7436 = vrsqrt.f32 %v6140_v31  ;;  %v6111_v60 = vpop.xlane.xlu2 %6110  ;;  %vm6181_vm9 = vweird.f32 %v6140_v31 }
0x224f   : > { %v7437_v52 = vpop.eup %7436 }
0x2250   : > { %v6176_v50 = vmul.f32 %v7437_v52, %v6140_v31  ;;  %vm6182_vm8 = vweird.f32 %v7437_v52 }
0x2251   : > { %v6054_v9 = vpop.xlane.xlu2 %6053  ;;  %vm6183_vm1 = vmor %vm6181_vm9, %vm6182_vm8 }
0x2252   : > { %v6177_v57 = vmul.f32 %v7437_v52, %v6176_v50  ;;  %v6074_v34 = vadd.f32 %v6054_v9, %v10819_v61 }
0x2254   : > { %v6178_v63 = vmul.f32 0.5, %v6177_v57  ;;  %v6122_v10 = vadd.f32 %v6102_v44, %v6074_v34 }
0x2256   : > { %v6179_v47 = vsub.f32 1.5, %v6178_v63  ;;  %v6130_v36 = vmul.f32 %v6122_v10, %v9170_v26 }
0x2258   : > { %v6138_v46 = vadd.f32 1e-05, %v6130_v36  ;;  %v6180_v35 = vmul.f32 %v7437_v52, %v6179_v47 }
0x2259   : > { %v6057_v14 = vpop.xlane.xlu2 %6056 }
0x225a   : > { %7438 = vrsqrt.f32 %v6138_v46  ;;  %v6075_v6 = vadd.f32 %v6057_v14, %v10831_v15  ;;  %v10871_v54 = vsel %vm6183_vm1, %v7437_v52, %v6180_v35  ;;  %vm6161_vm11 = vweird.f32 %v6138_v46 }
0x225b   : > { %v6310_v61 = vmul.f32 %v10871_v54, %v10699_v16 }
0x225c   : > { %v6123_v11 = vadd.f32 %v6105_v17, %v6075_v6 }
0x225d   : > { %6329 = vrot.lane.b32.xlu1 %v6310_v61, %s7575_s20 }
0x225e   : > { %v6131_v44 = vmul.f32 %v6123_v11, %v9170_v26 }
0x2260   : > { %v7439_v42 = vpop.eup %7438  ;;  %v6139_v25 = vadd.f32 1e-05, %v6131_v44 }
0x2261   : > { %v6156_v24 = vmul.f32 %v7439_v42, %v6138_v46  ;;  %v6063_v55 = vpop.xlane.xlu2 %6062  ;;  %vm6162_vm10 = vweird.f32 %v7439_v42  ;;  %v6117_v46 = vpop.xlane.xlu0 %6116 }
0x2262   : > { %7440 = vrsqrt.f32 %v6139_v25  ;;  %v6077_v1 = vadd.f32 %v6063_v55, %v5983_v3  ;;  %vm6163_vm15 = vmor %vm6161_vm11, %vm6162_vm10  ;;  %vm6171_vm12 = vweird.f32 %v6139_v25 }
0x2263   : > { %v6157_v28 = vmul.f32 %v7439_v42, %v6156_v24 }
0x2264   : > { %v6125_v43 = vadd.f32 %v6111_v60, %v6077_v1 }
0x2265   : > { %v6158_v15 = vmul.f32 0.5, %v6157_v28  ;;  %v6407_v28 = vmul.f32 %v10871_v54, %v10773_v19 }
0x2266   : > { %v6133_v5 = vmul.f32 %v6125_v43, %v9170_v26 }
0x2267   : > { %v6159_v7 = vsub.f32 1.5, %v6158_v15 }
0x2268   : > { %v7441_v0 = vpop.eup %7440  ;;  %v6141_v16 = vadd.f32 1e-05, %v6133_v5 }
0x2269   : > { %v6166_v40 = vmul.f32 %v7441_v0, %v6139_v25  ;;  %v6160_v62 = vmul.f32 %v7439_v42, %v6159_v7  ;;  %vm6172_vm2 = vweird.f32 %v7441_v0  ;;  %v6228_v25 = vmul.f32 %v10871_v54, %v10761_v4  ;;  %v6120_v15 = vpop.xlane.xlu0 %6119  ;;  %v5814_v4 = vld [vmem:[%s11015_s0 + $0x2d0] sm:$0xff]  ;;  %v5813_v54 = vld [vmem:[%s11015_s0 + $0x2c8] sm:$0xff] }
0x226a   : > { %7442 = vrsqrt.f32 %v6141_v16  ;;  %vm6173_vm3 = vmor %vm6171_vm12, %vm6172_vm2  ;;  %vm6191_vm13 = vweird.f32 %v6141_v16 }
0x226b   : > { %v6167_v53 = vmul.f32 %v7441_v0, %v6166_v40  ;;  %v6164_v18 = vsel %vm6163_vm15, %v7439_v42, %v6160_v62 }
0x226c   : > { %v6226_v48 = vmul.f32 %v6164_v18, %v10682_v30  ;;  %v6405_v27 = vmul.f32 %v6164_v18, %v10733_v38  ;;  %v6308_v3 = vmul.f32 %v6164_v18, %v10688_v21  ;;  %v5989_v21 = vpop.xlane.xlu1 %5988 }
0x226d   : > { %v6168_v20 = vmul.f32 0.5, %v6167_v53  ;;  %v6066_v2 = vpop.xlane.xlu2 %6065 }
0x226e   : > { %v6078_v31 = vadd.f32 %v6066_v2, %v5986_v33  ;;  %6964 = vmatmul.msk.f32.gmra.mxu2 %vm639_vm5, %v6226_v48  ;;  %6980 = vmatmul.msk.f32.gmra.mxu1 %vm639_vm5, %v6405_v27  ;;  %v5812_v33 = vld [vmem:[%s11015_s0 + $0x2c0] sm:$0xff] }
0x226f   : > { %v6169_v60 = vsub.f32 1.5, %v6168_v20  ;;  %6325 = vrot.lane.b32.xlu2 %v6308_v3, %s7575_s20 }
0x2270   : > { %v7443_v52 = vpop.eup %7442  ;;  %v6126_v50 = vadd.f32 %v6114_v32, %v6078_v31 }
0x2271   : > { %v6186_v9 = vmul.f32 %v7443_v52, %v6141_v16  ;;  %v6170_v30 = vmul.f32 %v7441_v0, %v6169_v60  ;;  %vm6192_vm14 = vweird.f32 %v7443_v52 }
0x2272   : > { %v6134_v38 = vmul.f32 %v6126_v50, %v9170_v26  ;;  %vm6193_vm4 = vmor %vm6191_vm13, %vm6192_vm14 }
0x2273   : > { %v6187_v57 = vmul.f32 %v7443_v52, %v6186_v9  ;;  %v6174_v34 = vsel %vm6173_vm3, %v7441_v0, %v6170_v30 }
0x2274   : > { %v6142_v63 = vadd.f32 1e-05, %v6134_v38  ;;  %v6309_v10 = vmul.f32 %v6174_v34, %v10692_v51  ;;  %v6227_v47 = vmul.f32 %v6174_v34, %v10728_v37  ;;  %v6406_v36 = vmul.f32 %v6174_v34, %v10756_v8  ;;  %v5992_v24 = vpop.xlane.xlu1 %5991 }
0x2275   : > { %v6188_v35 = vmul.f32 0.5, %v6187_v57  ;;  %v6069_v14 = vpop.xlane.xlu2 %6068 }
0x2276   : > { %7444 = vrsqrt.f32 %v6142_v63  ;;  %v6079_v6 = vadd.f32 %v6069_v14, %v5989_v21  ;;  %6327 = vrot.lane.b32.xlu0 %v6309_v10, %s7575_s20  ;;  %6965 = vmatmul.msk.f32.gmra.mxu2 %vm639_vm5, %v6227_v47  ;;  %vm6201_vm6 = vweird.f32 %v6142_v63  ;;  %v6510_v14 = vld [vmem:[%s11016_s1 + $0x108] sm:$0xff] }
0x2277   : > { %v6189_v17 = vsub.f32 1.5, %v6188_v35  ;;  %6981 = vmatmul.msk.f32.gmra.mxu1 %vm639_vm5, %v6406_v36  ;;  %v6511_v35 = vld [vmem:[%s11016_s1 + $0x110] sm:$0xff] }
0x2278   : > { %v6127_v61 = vadd.f32 %v6117_v46, %v6079_v6  ;;  %v6512_v46 = vld [vmem:[%s11016_s1 + $0x118] sm:$0xff]  ;;  %v6509_v6 = vld [vmem:[%s11016_s1 + $0x100] sm:$0xff] }
0x2279   : > { %v6190_v51 = vmul.f32 %v7443_v52, %v6189_v17  ;;  %6551 = vmatpush.msra.mxu0 %v6512_v46  ;;  %v10958_v17 = vld [vmem:[%s11015_s0 + $0x300] ss:$0 sm:$0xff] }
0x227a   : > { %v6135_v37 = vmul.f32 %v6127_v61, %v9170_v26 }
0x227b   : > { %v6194_v8 = vsel %vm6193_vm4, %v7443_v52, %v6190_v51  ;;  %6552 = vmatpush.msra.mxu0 %v6511_v35 }
0x227c   : > { %v7445_v11 = vpop.eup %7444  ;;  %v6143_v44 = vadd.f32 1e-05, %v6135_v37  ;;  %v6311_v42 = vmul.f32 %v6194_v8, %v10712_v23  ;;  %v5815_v23 = vld [vmem:[%s11015_s0 + $0x2d8] sm:$0xff]  ;;  %v6229_v32 = vmul.f32 %v6194_v8, %v10787_v49  ;;  %v6408_v18 = vmul.f32 %v6194_v8, %v10804_v39 }
0x227d   : > { %v6196_v55 = vmul.f32 %v7445_v11, %v6142_v63  ;;  %v6072_v1 = vpop.xlane.xlu2 %6071  ;;  %6367 = vmatpush.msrb.mxu3 %v5815_v23  ;;  %vm6202_vm0 = vweird.f32 %v7445_v11  ;;  %6553 = vmatpush.msra.mxu0 %v6510_v14 }
0x227e   : > { %7446 = vrsqrt.f32 %v6143_v44  ;;  %v6080_v43 = vadd.f32 %v6072_v1, %v5992_v24  ;;  %6331 = vrot.lane.b32.xlu2 %v6311_v42, %s7575_s20  ;;  %6966 = vmatmul.msk.f32.gmra.mxu2 %vm639_vm5, %v6228_v25  ;;  %vm6203_vm7 = vmor %vm6201_vm6, %vm6202_vm0  ;;  %vm6211_vm9 = vweird.f32 %v6143_v44 }
0x227f   : > { %v6197_v5 = vmul.f32 %v7445_v11, %v6196_v55  ;;  %6982 = vmatmul.msk.f32.gmra.mxu1 %vm639_vm5, %v6407_v28  ;;  %6368 = vmatpush.msrb.mxu3 %v5814_v4 }
0x2280   : > { %v6128_v7 = vadd.f32 %v6120_v15, %v6080_v43  ;;  %6554 = vmatpush.msra.mxu0 %v6509_v6 }
0x2281   : > { %v6198_v19 = vmul.f32 0.5, %v6197_v5  ;;  %6369 = vmatpush.msrb.mxu3 %v5813_v54 }
0x2282   : > { %v6136_v0 = vmul.f32 %v6128_v7, %v9170_v26 }
0x2283   : > { %v6199_v16 = vsub.f32 1.5, %v6198_v19  ;;  %6370 = vmatpush.msrb.mxu3 %v5812_v33 }
0x2284   : > { %v7447_v40 = vpop.eup %7446  ;;  %v6144_v62 = vadd.f32 1e-05, %v6136_v0 }
0x2285   : > { %v6206_v53 = vmul.f32 %v7447_v40, %v6143_v44  ;;  %v6200_v48 = vmul.f32 %v7445_v11, %v6199_v16  ;;  %vm6212_vm8 = vweird.f32 %v7447_v40 }
0x2286   : > { %7448 = vrsqrt.f32 %v6144_v62  ;;  %6967 = vmatmul.msk.f32.gmra.mxu2 %vm639_vm5, %v6229_v32  ;;  %vm6213_vm1 = vmor %vm6211_vm9, %vm6212_vm8  ;;  %vm6221_vm11 = vweird.f32 %v6144_v62 }
0x2287   : > { %v6207_v26 = vmul.f32 %v7447_v40, %v6206_v53  ;;  %6983 = vmatmul.msk.f32.gmra.mxu1 %vm639_vm5, %v6408_v18  ;;  %v6204_v27 = vsel %vm6203_vm7, %v7445_v11, %v6200_v48 }
0x2288   : > { %v6312_v3 = vmul.f32 %v6204_v27, %v10743_v29  ;;  %v6230_v39 = vmul.f32 %v6204_v27, %v10765_v59  ;;  %v6409_v60 = vmul.f32 %v6204_v27, %v10799_v58 }
0x2289   : > { %v6208_v20 = vmul.f32 0.5, %v6207_v26 }
0x228a   : > { %6333 = vrot.lane.b32.xlu0 %v6312_v3, %s7575_s20 }
0x228b   : > { %v6209_v49 = vsub.f32 1.5, %v6208_v20 }
0x228c   : > { %v7449_v2 = vpop.eup %7448 }
0x228d   : > { %v6216_v31 = vmul.f32 %v7449_v2, %v6144_v62  ;;  %v6210_v52 = vmul.f32 %v7447_v40, %v6209_v49  ;;  %vm6222_vm10 = vweird.f32 %v7449_v2 }
0x228e   : > { %6968 = vmatmul.msk.f32.gmra.mxu2 %vm639_vm5, %v6230_v39  ;;  %vm6223_vm15 = vmor %vm6221_vm11, %vm6222_vm10 }
0x228f   : > { %v6217_v50 = vmul.f32 %v7449_v2, %v6216_v31  ;;  %6984 = vmatmul.msk.f32.gmra.mxu1 %vm639_vm5, %v6409_v60  ;;  %v6214_v29 = vsel %vm6213_vm1, %v7447_v40, %v6210_v52 }
0x2290   : > { %v6313_v9 = vmul.f32 %v6214_v29, %v10722_v12  ;;  %v6231_v59 = vmul.f32 %v6214_v29, %v10778_v56  ;;  %v6410_v58 = vmul.f32 %v6214_v29, %v10814_v45 }
0x2291   : > { %v6218_v30 = vmul.f32 0.5, %v6217_v50 }
0x2292   : > { %6335 = vrot.lane.b32.xlu1 %v6313_v9, %s7575_s20 }
0x2293   : > { %v6219_v38 = vsub.f32 1.5, %v6218_v30 }
0x2295   : > { %v6220_v21 = vmul.f32 %v7449_v2, %v6219_v38 }
0x2296   : > { %6969 = vmatmul.msk.f32.gmra.mxu2 %vm639_vm5, %v6231_v59 }
0x2297   : > { %6985 = vmatmul.msk.f32.gmra.mxu1 %vm639_vm5, %v6410_v58  ;;  %v6224_v57 = vsel %vm6223_vm15, %v7449_v2, %v6220_v21 }
0x2298   : > { %v6314_v34 = vmul.f32 %v6224_v57, %v10746_v41  ;;  %v6232_v12 = vmul.f32 %v6224_v57, %v10791_v13  ;;  %v6411_v63 = vmul.f32 %v6224_v57, %v10823_v22 }
0x229a   : > { %6337 = vrot.lane.b32.xlu2 %v6314_v34, %s7575_s20  ;;  %s301_s20 = scalar_lea.vmem [#allocation2], %s6694_s21 }
0x229b   : > { %s6601_s14 = sshll.u32 %s301_s20, 4  ;;  %s6602_s14 = int_to_ptr.vmem [resolvable:$true] %s6601_s14 }
0x229e   : > { %6970 = vmatmul.msk.f32.gmra.mxu2 %vm639_vm5, %v6232_v12 }
0x229f   : > { %6986 = vmatmul.msk.f32.gmra.mxu1 %vm639_vm5, %v6411_v63 }
0x22b1   : > { %v6324_v56 = vpop.permute.xlu1 %6323 }
0x22b2   : > { %6971 = vmatmul.msk.f32.vlgmr.msrb.gmra.mxu3 %vm639_vm5, %v6324_v56 }
0x22bc   : > { %v6453_v11 = vpop.f32.mrf.mxu1 }
0x22c3   : > { %v6274_v61 = vpop.f32.mrf.mxu2 }
0x22c4   : > { %v6299_v51 = vadd.f32 %v10958_v17, %v6274_v61 }
0x22c9   : > { %v6326_v45 = vpop.permute.xlu2 %6325 }
0x22ca   : > { %6972 = vmatmul.msk.f32.gmra.mxu3 %vm639_vm5, %v6326_v45 }
0x22cf   : > { %v6330_v41 = vpop.permute.xlu1 %6329 }
0x22d8   : > { %v6332_v47 = vpop.permute.xlu2 %6331 }
0x22e8   : > { %v6328_v10 = vpop.permute.xlu0 %6327 }
0x22e9   : > { %6973 = vmatmul.msk.f32.gmra.mxu3 %vm639_vm5, %v6328_v10 }
0x22eb   : > { %v6456_v43 = vpop.f32.mrf.mxu1 }
0x22f1   : > { %6974 = vmatmul.msk.f32.gmra.mxu3 %vm639_vm5, %v6330_v41  ;;  %v6277_v24 = vpop.f32.mrf.mxu2 }
0x22f2   : > { %v6300_v55 = vadd.f32 %v10958_v17, %v6277_v24 }
0x22f4   : > { %v6338_v36 = vpop.permute.xlu2 %6337  ;;  %v6459_v7 = vpop.f32.mrf.mxu1 }
0x22f9   : > { %6975 = vmatmul.msk.f32.gmra.mxu3 %vm639_vm5, %v6332_v47  ;;  %v6280_v4 = vpop.f32.mrf.mxu2 }
0x22fa   : > { %v6301_v54 = vadd.f32 %v10958_v17, %v6280_v4 }
0x22fc   : > { %v6334_v13 = vpop.permute.xlu0 %6333  ;;  %v6462_v33 = vpop.f32.mrf.mxu1 }
0x2301   : > { %6976 = vmatmul.msk.f32.gmra.mxu3 %vm639_vm5, %v6334_v13  ;;  %v6283_v19 = vpop.f32.mrf.mxu2 }
0x2302   : > { %v6302_v53 = vadd.f32 %v10958_v17, %v6283_v19 }
0x2304   : > { %v6336_v22 = vpop.permute.xlu1 %6335  ;;  %v6465_v3 = vpop.f32.mrf.mxu1 }
0x2309   : > { %6977 = vmatmul.msk.f32.gmra.mxu3 %vm639_vm5, %v6336_v22  ;;  %v6286_v32 = vpop.f32.mrf.mxu2 }
0x230a   : > { %v6303_v49 = vadd.f32 %v10958_v17, %v6286_v32 }
0x230c   : > { %v6468_v29 = vpop.f32.mrf.mxu1 }
0x2311   : > { %6978 = vmatmul.msk.f32.gmra.mxu3 %vm639_vm5, %v6338_v36  ;;  %v6289_v39 = vpop.f32.mrf.mxu2 }
0x2312   : > { %v6304_v9 = vadd.f32 %v10958_v17, %v6289_v39 }
0x2314   : > { %v6471_v63 = vpop.f32.mrf.mxu1 }
0x2319   : > { %v6292_v58 = vpop.f32.mrf.mxu2 }
0x231a   : > { %v6305_v34 = vadd.f32 %v10958_v17, %v6292_v58 }
0x231c   : > { %v6474_v35 = vpop.f32.mrf.mxu1 }
0x2321   : > { %v6295_v41 = vpop.f32.mrf.mxu2 }
0x2322   : > { %v6306_v13 = vadd.f32 %v10958_v17, %v6295_v41 }
0x2335   : > { %v6372_v37 = vpop.f32.mrf.mxu3 }
0x2336   : > { %v6396_v8 = vadd.f32 %v6372_v37, %v6299_v51  ;;  %v7117_v51 = vld [vmem:[%s11016_s1 + $0x120] ss:$0 sm:$0xff] }
0x2338   : > { %v6477_v44 = vadd.f32 %v6453_v11, %v6396_v8 }
0x233a   : > { %vm6485_vm2 = vcmp.gt.f32.partialorder %v6477_v44, 0.0  ;;  %v6493_v42 = vmul.f32 0.01, %v6477_v44 }
0x233c   : > { %v6501_v25 = vsel %vm6485_vm2, %v6477_v44, %v6493_v42 }
0x233d   : > { %6987 = vmatmul.msk.f32.vlgmr.msra.gmra.mxu0 %vm639_vm5, %v6501_v25 }
0x234d   : > { %v6375_v1 = vpop.f32.mrf.mxu3 }
0x234e   : > { %v6397_v28 = vadd.f32 %v6375_v1, %v6300_v55 }
0x2350   : > { %v6478_v15 = vadd.f32 %v6456_v43, %v6397_v28 }
0x2352   : > { %v6494_v5 = vmul.f32 0.01, %v6478_v15  ;;  %vm6486_vm12 = vcmp.gt.f32.partialorder %v6478_v15, 0.0 }
0x2354   : > { %v6502_v23 = vsel %vm6486_vm12, %v6478_v15, %v6494_v5 }
0x2355   : > { %6988 = vmatmul.msk.f32.gmra.mxu0 %vm639_vm5, %v6502_v23 }
0x236c   : > { %v6378_v0 = vpop.f32.mrf.mxu3 }
0x236d   : > { %v6398_v16 = vadd.f32 %v6378_v0, %v6301_v54 }
0x236f   : > { %v6479_v40 = vadd.f32 %v6459_v7, %v6398_v16 }
0x2371   : > { %v6495_v62 = vmul.f32 0.01, %v6479_v40  ;;  %vm6487_vm3 = vcmp.gt.f32.partialorder %v6479_v40, 0.0 }
0x2373   : > { %v6503_v18 = vsel %vm6487_vm3, %v6479_v40, %v6495_v62 }
0x2374   : > { %v6381_v48 = vpop.f32.mrf.mxu3  ;;  %6989 = vmatmul.msk.f32.gmra.mxu0 %vm639_vm5, %v6503_v18 }
0x2375   : > { %v6399_v26 = vadd.f32 %v6381_v48, %v6302_v53 }
0x2377   : > { %v6480_v27 = vadd.f32 %v6462_v33, %v6399_v26 }
0x2379   : > { %v6496_v20 = vmul.f32 0.01, %v6480_v27  ;;  %vm6488_vm14 = vcmp.gt.f32.partialorder %v6480_v27, 0.0 }
0x237b   : > { %v6504_v2 = vsel %vm6488_vm14, %v6480_v27, %v6496_v20 }
0x237c   : > { %v6384_v31 = vpop.f32.mrf.mxu3  ;;  %6990 = vmatmul.msk.f32.gmra.mxu0 %vm639_vm5, %v6504_v2 }
0x237d   : > { %v6400_v60 = vadd.f32 %v6384_v31, %v6303_v49 }
0x237f   : > { %v6481_v52 = vadd.f32 %v6465_v3, %v6400_v60 }
0x2381   : > { %v6497_v50 = vmul.f32 0.01, %v6481_v52  ;;  %vm6489_vm13 = vcmp.gt.f32.partialorder %v6481_v52, 0.0 }
0x2383   : > { %v6505_v30 = vsel %vm6489_vm13, %v6481_v52, %v6497_v50 }
0x2384   : > { %v6387_v38 = vpop.f32.mrf.mxu3  ;;  %6991 = vmatmul.msk.f32.gmra.mxu0 %vm639_vm5, %v6505_v30 }
0x2385   : > { %v6401_v59 = vadd.f32 %v6387_v38, %v6304_v9 }
0x2387   : > { %v6482_v21 = vadd.f32 %v6468_v29, %v6401_v59 }
0x2389   : > { %v6498_v57 = vmul.f32 0.01, %v6482_v21  ;;  %vm6490_vm4 = vcmp.gt.f32.partialorder %v6482_v21, 0.0 }
0x238b   : > { %v6506_v12 = vsel %vm6490_vm4, %v6482_v21, %v6498_v57 }
0x238c   : > { %v6390_v56 = vpop.f32.mrf.mxu3  ;;  %6992 = vmatmul.msk.f32.gmra.mxu0 %vm639_vm5, %v6506_v12 }
0x238d   : > { %v6402_v45 = vadd.f32 %v6390_v56, %v6305_v34 }
0x238f   : > { %v6483_v10 = vadd.f32 %v6471_v63, %v6402_v45 }
0x2391   : > { %v6499_v47 = vmul.f32 0.01, %v6483_v10  ;;  %vm6491_vm0 = vcmp.gt.f32.partialorder %v6483_v10, 0.0 }
0x2393   : > { %v6507_v22 = vsel %vm6491_vm0, %v6483_v10, %v6499_v47 }
0x2394   : > { %v6393_v36 = vpop.f32.mrf.mxu3  ;;  %6993 = vmatmul.msk.f32.gmra.mxu0 %vm639_vm5, %v6507_v22 }
0x2395   : > { %v6403_v46 = vadd.f32 %v6393_v36, %v6306_v13 }
0x2397   : > { %v6484_v14 = vadd.f32 %v6474_v35, %v6403_v46 }
0x2399   : > { %v6500_v6 = vmul.f32 0.01, %v6484_v14  ;;  %vm6492_vm6 = vcmp.gt.f32.partialorder %v6484_v14, 0.0 }
0x239b   : > { %v6508_v61 = vsel %vm6492_vm6, %v6484_v14, %v6500_v6 }
0x239c   : > { %6994 = vmatmul.msk.f32.gmra.mxu0 %vm639_vm5, %v6508_v61 }
0x23ba   : > { %v6556_v17 = vpop.f32.mrf.mxu0 }
0x23bb   : > { %v6557_v37 = vadd.f32 %v7117_v51, %v6556_v17 }
0x23bd   : > { %6580 = vst [vmem:[%s301_s20] sm:$0xff] %v6557_v37 }
0x23d2   : > { %v6559_v8 = vpop.f32.mrf.mxu0 }
0x23d3   : > { %v6560_v11 = vadd.f32 %v7117_v51, %v6559_v8 }
0x23d5   : > { %6581 = vst [vmem:[%s301_s20 + $0x8] sm:$0xff] %v6560_v11 }
0x23f1   : > { %v6562_v44 = vpop.f32.mrf.mxu0 }
0x23f2   : > { %v6563_v42 = vadd.f32 %v7117_v51, %v6562_v44 }
0x23f4   : > { %6582 = vst [vmem:[%s301_s20 + $0x10] sm:$0xff] %v6563_v42 }
0x23f9   : > { %v6565_v25 = vpop.f32.mrf.mxu0 }
0x23fa   : > { %v6566_v24 = vadd.f32 %v7117_v51, %v6565_v25 }
0x23fc   : > { %6583 = vst [vmem:[%s301_s20 + $0x18] sm:$0xff] %v6566_v24 }
0x2401   : > { %v6568_v55 = vpop.f32.mrf.mxu0 }
0x2402   : > { %v6569_v1 = vadd.f32 %v7117_v51, %v6568_v55 }
0x2404   : > { %6584 = vst [vmem:[%s301_s20 + $0x20] sm:$0xff] %v6569_v1 }
0x2409   : > { %v6571_v28 = vpop.f32.mrf.mxu0 }
0x240a   : > { %v6572_v43 = vadd.f32 %v7117_v51, %v6571_v28 }
0x240c   : > { %6585 = vst [vmem:[%s301_s20 + $0x28] sm:$0xff] %v6572_v43 }
0x2411   : > { %v6574_v15 = vpop.f32.mrf.mxu0 }
0x2412   : > { %v6575_v5 = vadd.f32 %v7117_v51, %v6574_v15 }
0x2414   : > { %6586 = vst [vmem:[%s301_s20 + $0x30] sm:$0xff] %v6575_v5 }
0x2419   : > { %v6577_v23 = vpop.f32.mrf.mxu0 }
0x241a   : > { %v6578_v4 = vadd.f32 %v7117_v51, %v6577_v23 }
0x241c   : > { %6587 = vst [vmem:[%s301_s20 + $0x38] sm:$0xff] %v6578_v4 }
0x241d   : > { %7531 = shalt.err (!%p7528_p3)
}
0x241e   : > { %s7578_s19 = smov 128   ;;  %s7579_s20 = smov 8  }
0x241f   : > { %7008 = dma.vmem_to_hbm [thread:$0]  (%p7658_p5), %s6602_s14, 1024, %s6604_s15, %s6589_s16, %s7578_s19, %s7578_s19, %s7579_s20  }
0x2420 PF: > { %p7014_p4 = scmp.ge.s32.totalorder %s7566_s27, 2  ;;  %s6618_s8 = sand.u32 1, %s7554_s24  }
0x2421   : > { %s6619_s9 = scalar_lea.sflag [#allocation3], %s6618_s8 }
0x2422   : > { %p7011_p7 = pnand %p7014_p4, %p7662_p6 }
0x2424   : > { %p7012_p8 = pneg %p7011_p7 }
0x2426   : > { %7549 = dma.done.wait (%p7012_p8), %s6619_s9, 1024  }
0x2427   : > { %7551 = vsyncadd (%p7012_p8), %s6619_s9, 4294966272  ;;  %p17_p9 = scmp.ge.s32.totalorder %s7645_s30, 10   ;;  %s11094_s24 = smov %s7558_s25 }
0x2428   : > { %s11095_s25 = smov %s7562_s26  ;;  %s11096_s26 = smov %s7656_s10 }
0x2429   : > { %s11097_s27 = smov %s7645_s30  ;;  %19 = sbr.rel (!%p17_p9) target bundleno = 3 (0x3), region = 89 }
0x242e   :  { %6625 = vsyncpa [#allocation3], 1 }
0x242f   :  { %6627 = vsyncpa [#allocation3 + $0x1], 1 }

</bundles_post_ra>
